<compile_context>
chip_gen: v7x
topology: tpu7x:2x2x1
jax: 0.10.0
libtpu: 0.0.40
codegen_flags: <defaults>
</compile_context>

<pallas_src>
import functools

import jax
import jax.numpy as jnp
from jax import lax
from jax.experimental import pallas as pl
from jax.experimental.pallas import tpu as pltpu

DROPOUT_P = 0.2
N_EMBD = 384
N_HEAD = 6
BLOCK_SIZE = 256
LN_EPS = 1e-5


# ----------------------------------------------------------------------------
# Stateless in-kernel dropout: counter-based integer hash -> keep mask.
# Pure int32 ops (mul/xor/shift+mask), so it lowers on Mosaic and in interpret mode.
# ----------------------------------------------------------------------------
def _wrap_i32(x):
    """Represent a uint32 constant as a Python int with int32 two's-complement value."""
    x &= 0xFFFFFFFF
    return x - (1 << 32) if x >= (1 << 31) else x


_C1 = _wrap_i32(0x9E3779B9)
_C2 = _wrap_i32(0x85EBCA6B)
_C3 = _wrap_i32(0x7FEB352D)
_C4 = _wrap_i32(0x846CA68B)
_C5 = _wrap_i32(0x9E3779B1)
_C6 = _wrap_i32(0x85EBCA77)
_C7 = _wrap_i32(0x7F4A7C15)
_C8 = _wrap_i32(0x27D4EB2F)


def _lshr(x, n):
    """Logical right shift for int32 values (arithmetic shift + mask)."""
    return (x >> n) & ((1 << (32 - n)) - 1)


def _salt(seed_i32, *vals):
    """Mix a scalar seed with integer indices (batch / head / tile) into one int32 salt."""
    s = seed_i32.astype(jnp.int32) * _C5 + _C7
    for v in vals:
        v32 = jnp.int32(v) if isinstance(v, int) else v.astype(jnp.int32)
        s = (s ^ v32) * _C6 + _C8
    return s


def _keep_mask(shape, salt, dropout_p):
    """Boolean mask with P(keep) = 1 - dropout_p, unique per (salt, row, col)."""
    r = lax.broadcasted_iota(jnp.int32, shape, 0)
    c = lax.broadcasted_iota(jnp.int32, shape, 1)
    h = salt + r * _C1 + c * _C2
    # murmur3-style avalanche
    h = (h ^ _lshr(h, 16)) * _C3
    h = (h ^ _lshr(h, 15)) * _C4
    h = h ^ _lshr(h, 16)
    # single integer threshold compare on the top 24 bits
    thr = min(int(round(dropout_p * (1 << 24))), (1 << 24) - 1)
    return _lshr(h, 8) >= thr


# ----------------------------------------------------------------------------
# Kernel 1: LayerNorm1 + multi-head causal self-attention + proj + dropout + residual.
# ----------------------------------------------------------------------------
def _attn_block_kernel(seed_ref, x_ref, g1_ref, be1_ref, wq_ref, wk_ref, wv_ref,
                       wo_ref, bo_ref, o_ref, *, n_head, training, dropout_p):
    b = pl.program_id(0)
    x = x_ref[...]                                  # (T, C) f32
    T, C = x.shape
    hs = C // n_head
    use_dropout = bool(training) and dropout_p > 0.0
    inv_keep = 1.0 / (1.0 - dropout_p) if dropout_p > 0.0 else 1.0   # compile-time const
    seed = seed_ref[0]

    # --- LayerNorm 1 (f32) ---
    mu = jnp.mean(x, axis=-1, keepdims=True)
    xc = x - mu
    var = jnp.mean(xc * xc, axis=-1, keepdims=True)
    xln = xc * lax.rsqrt(var + LN_EPS) * g1_ref[...] + be1_ref[...]
    xln_b = xln.astype(jnp.bfloat16)

    # --- fused QKV projections for all heads (bf16 MXU, f32 accumulation) ---
    q = jnp.dot(xln_b, wq_ref[...], preferred_element_type=jnp.float32)   # (T, C)
    k = jnp.dot(xln_b, wk_ref[...], preferred_element_type=jnp.float32)
    v = jnp.dot(xln_b, wv_ref[...], preferred_element_type=jnp.float32)

    row = lax.broadcasted_iota(jnp.int32, (T, T), 0)
    col = lax.broadcasted_iota(jnp.int32, (T, T), 1)
    causal = row >= col
    scale = jnp.float32(1.0 / (hs ** 0.5))

    # Accumulate the output projection per head: concat(heads) @ Wo == sum_h out_h @ Wo[h]
    acc = jnp.zeros((T, C), jnp.float32)
    for h in range(n_head):
        sl = slice(h * hs, (h + 1) * hs)
        qh = q[:, sl].astype(jnp.bfloat16)
        kh = k[:, sl].astype(jnp.bfloat16)
        vh = v[:, sl].astype(jnp.bfloat16)

        s = lax.dot_general(qh, kh, (((1,), (1,)), ((), ())),
                            preferred_element_type=jnp.float32) * scale   # (T, T)
        s = jnp.where(causal, s, jnp.float32(-1e30))
        s = s - jnp.max(s, axis=-1, keepdims=True)
        p = jnp.exp(s)
        p = p / jnp.sum(p, axis=-1, keepdims=True)

        if use_dropout:
            keep = _keep_mask((T, T), _salt(seed, 0xA11, b, h), dropout_p)
            p = jnp.where(keep, p * inv_keep, 0.0)

        oh = jnp.dot(p.astype(jnp.bfloat16), vh,
                     preferred_element_type=jnp.float32)                  # (T, hs)
        acc = acc + jnp.dot(oh.astype(jnp.bfloat16), wo_ref[sl, :],
                            preferred_element_type=jnp.float32)           # (T, C)

    y = acc + bo_ref[...]
    if use_dropout:
        keep = _keep_mask((T, C), _salt(seed, 0xB22, b), dropout_p)
        y = jnp.where(keep, y * inv_keep, 0.0)

    o_ref[...] = (x + y).astype(o_ref.dtype)


# ----------------------------------------------------------------------------
# Kernel 2: LayerNorm2 + Linear(C->4C) + ReLU + Linear(4C->C) + dropout + residual.
# ----------------------------------------------------------------------------
def _ffn_block_kernel(seed_ref, x_ref, g2_ref, be2_ref, w1_ref, b1_ref, w2_ref, b2_ref,
                      o_ref, *, training, dropout_p):
    i = pl.program_id(0)
    x = x_ref[...]                                  # (tile_m, C) f32
    use_dropout = bool(training) and dropout_p > 0.0
    inv_keep = 1.0 / (1.0 - dropout_p) if dropout_p > 0.0 else 1.0

    # --- LayerNorm 2 (f32) ---
    mu = jnp.mean(x, axis=-1, keepdims=True)
    xc = x - mu
    var = jnp.mean(xc * xc, axis=-1, keepdims=True)
    xln = xc * lax.rsqrt(var + LN_EPS) * g2_ref[...] + be2_ref[...]

    # --- FFN (bf16 MXU operands, f32 accumulation; bias/ReLU/dropout in f32) ---
    h = jnp.dot(xln.astype(jnp.bfloat16), w1_ref[...],
                preferred_element_type=jnp.float32)
    h = jnp.maximum(h + b1_ref[...], 0.0)
    y = jnp.dot(h.astype(jnp.bfloat16), w2_ref[...],
                preferred_element_type=jnp.float32)
    y = y + b2_ref[...]

    if use_dropout:
        keep = _keep_mask(y.shape, _salt(seed_ref[0], 0xC33, i), dropout_p)
        y = jnp.where(keep, y * inv_keep, 0.0)

    o_ref[...] = (x + y).astype(o_ref.dtype)


# ----------------------------------------------------------------------------
# Wrappers.
# ----------------------------------------------------------------------------
def attention_block(x, p, *, seed, training, dropout_p):
    B, T, C = x.shape
    n_head = p["n_head"]
    assert C % n_head == 0 and C % 128 == 0
    bf = jnp.bfloat16
    seed_arr = jnp.array([seed], dtype=jnp.int32)
    kernel = functools.partial(_attn_block_kernel, n_head=n_head,
                               training=training, dropout_p=dropout_p)

    grid_spec = pltpu.PrefetchScalarGridSpec(
        num_scalar_prefetch=1,                  # seed lands in SMEM
        grid=(B,),
        in_specs=[
            pl.BlockSpec((None, T, C), lambda b, s: (b, 0, 0)),   # x (one batch / step)
            pl.BlockSpec((1, C), lambda b, s: (0, 0)),            # ln1 gamma
            pl.BlockSpec((1, C), lambda b, s: (0, 0)),            # ln1 beta
            pl.BlockSpec((C, C), lambda b, s: (0, 0)),            # Wq (resident, bf16)
            pl.BlockSpec((C, C), lambda b, s: (0, 0)),            # Wk
            pl.BlockSpec((C, C), lambda b, s: (0, 0)),            # Wv
            pl.BlockSpec((C, C), lambda b, s: (0, 0)),            # Wo (proj)
            pl.BlockSpec((1, C), lambda b, s: (0, 0)),            # bo
        ],
        out_specs=pl.BlockSpec((None, T, C), lambda b, s: (b, 0, 0)),
    )
    flops = int(B * (8 * T * C * C + 4 * T * T * C))
    transcendentals = int(B * n_head * T * T + B * T)
    bytes_accessed = int(2 * B * T * C * 4 + 4 * C * C * 2 + 6 * C * 4)

    return pl.pallas_call(
        kernel,
        out_shape=jax.ShapeDtypeStruct((B, T, C), x.dtype),
        grid_spec=grid_spec,
        compiler_params=pltpu.CompilerParams(
            dimension_semantics=("parallel",),        # steps independent (stateless RNG)
            vmem_limit_bytes=48 * 1024 * 1024),
        cost_estimate=pl.CostEstimate(flops=flops, transcendentals=transcendentals,
                                      bytes_accessed=bytes_accessed),
    )(seed_arr, x,
      p["ln1_g"].reshape(1, C), p["ln1_b"].reshape(1, C),
      p["wq"].astype(bf), p["wk"].astype(bf), p["wv"].astype(bf),
      p["wo"].astype(bf), p["bo"].reshape(1, C))


def ffn_block(x, p, *, seed, training, dropout_p, tile_m=128):
    B, T, C = x.shape
    H = p["w1"].shape[1]
    M = B * T
    tile_m = min(tile_m, M)
    assert M % tile_m == 0, "B*T must be divisible by tile_m"
    assert C % 128 == 0 and H % 128 == 0
    bf = jnp.bfloat16
    x2 = x.reshape(M, C)
    seed_arr = jnp.array([seed], dtype=jnp.int32)
    kernel = functools.partial(_ffn_block_kernel, training=training, dropout_p=dropout_p)

    grid_spec = pltpu.PrefetchScalarGridSpec(
        num_scalar_prefetch=1,
        grid=(M // tile_m,),
        in_specs=[
            pl.BlockSpec((tile_m, C), lambda i, s: (i, 0)),   # x tile
            pl.BlockSpec((1, C), lambda i, s: (0, 0)),        # ln2 gamma
            pl.BlockSpec((1, C), lambda i, s: (0, 0)),        # ln2 beta
            pl.BlockSpec((C, H), lambda i, s: (0, 0)),        # W1 (resident, bf16)
            pl.BlockSpec((1, H), lambda i, s: (0, 0)),        # b1
            pl.BlockSpec((H, C), lambda i, s: (0, 0)),        # W2 (resident, bf16)
            pl.BlockSpec((1, C), lambda i, s: (0, 0)),        # b2
        ],
        out_specs=pl.BlockSpec((tile_m, C), lambda i, s: (i, 0)),
    )
    flops = int(4 * M * C * H)
    bytes_accessed = int(2 * M * C * 4 + 2 * C * H * 2 + (H + 3 * C) * 4)

    out2 = pl.pallas_call(
        kernel,
        out_shape=jax.ShapeDtypeStruct((M, C), x.dtype),
        grid_spec=grid_spec,
        compiler_params=pltpu.CompilerParams(
            dimension_semantics=("parallel",),
            vmem_limit_bytes=48 * 1024 * 1024),
        cost_estimate=pl.CostEstimate(flops=flops, transcendentals=int(M),
                                      bytes_accessed=bytes_accessed),
    )(seed_arr, x2,
      p["ln2_g"].reshape(1, C), p["ln2_b"].reshape(1, C),
      p["w1"].astype(bf), p["b1"].reshape(1, H),
      p["w2"].astype(bf), p["b2"].reshape(1, C))
    return out2.reshape(B, T, C)


def block_forward(x, p, *, seed=0, training=True, dropout_p=DROPOUT_P, tile_m=128):
    """Full Block forward: x = x + sa(ln1(x)); x = x + ffwd(ln2(x))."""
    x1 = attention_block(x, p, seed=seed, training=training, dropout_p=dropout_p)
    return ffn_block(x1, p, seed=seed + 1, training=training,
                     dropout_p=dropout_p, tile_m=tile_m)


# ----------------------------------------------------------------------------
# Parameter init (PyTorch nn.Linear default: U(-1/sqrt(fan_in), 1/sqrt(fan_in)),
# weights stored transposed as (in, out)).  LayerNorm: gamma=1, beta=0.
# ----------------------------------------------------------------------------
def init_block_params(key, n_embd, n_head):
    H = 4 * n_embd
    ks = jax.random.split(key, 9)
    bC = 1.0 / (n_embd ** 0.5)
    bH = 1.0 / (H ** 0.5)
    u = lambda k, shp, b: jax.random.uniform(k, shp, jnp.float32, -b, b)
    return dict(
        n_head=n_head,
        ln1_g=jnp.ones((n_embd,), jnp.float32), ln1_b=jnp.zeros((n_embd,), jnp.float32),
        ln2_g=jnp.ones((n_embd,), jnp.float32), ln2_b=jnp.zeros((n_embd,), jnp.float32),
        wq=u(ks[0], (n_embd, n_embd), bC),
        wk=u(ks[1], (n_embd, n_embd), bC),
        wv=u(ks[2], (n_embd, n_embd), bC),
        wo=u(ks[3], (n_embd, n_embd), bC), bo=u(ks[4], (n_embd,), bC),
        w1=u(ks[5], (n_embd, H), bC), b1=u(ks[6], (H,), bC),
        w2=u(ks[7], (H, n_embd), bH), b2=u(ks[8], (n_embd,), bH),
    )


# ----------------------------------------------------------------------------
# Pure-JAX reference (eval mode, dropout = identity).  Matmul operands are rounded
# through bf16 to mirror the kernel's bf16-operand / f32-accumulation matmuls.
# ----------------------------------------------------------------------------
def _bf(a):
    return a.astype(jnp.bfloat16).astype(jnp.float32)


def block_reference(x, p):
    B, T, C = x.shape
    nh = int(p["n_head"])
    hs = C // nh

    def ln(z, g, b):
        m = z.mean(-1, keepdims=True)
        v = ((z - m) ** 2).mean(-1, keepdims=True)
        return (z - m) * lax.rsqrt(v + LN_EPS) * g + b

    h = ln(x, p["ln1_g"], p["ln1_b"])
    q = _bf(h) @ _bf(p["wq"])
    k = _bf(h) @ _bf(p["wk"])
    v = _bf(h) @ _bf(p["wv"])
    qh = q.reshape(B, T, nh, hs).transpose(0, 2, 1, 3)
    kh = k.reshape(B, T, nh, hs).transpose(0, 2, 1, 3)
    vh = v.reshape(B, T, nh, hs).transpose(0, 2, 1, 3)

    att = jnp.einsum("bhqd,bhkd->bhqk", _bf(qh), _bf(kh)) * (hs ** -0.5)
    mask = jnp.tril(jnp.ones((T, T), dtype=bool))
    att = jnp.where(mask[None, None], att, -1e30)
    att = att - att.max(-1, keepdims=True)
    att = jnp.exp(att)
    att = att / att.sum(-1, keepdims=True)

    o = jnp.einsum("bhqk,bhkd->bhqd", _bf(att), _bf(vh))
    o = o.transpose(0, 2, 1, 3).reshape(B, T, C)
    sa = _bf(o) @ _bf(p["wo"]) + p["bo"]
    x1 = x + sa

    h2 = ln(x1, p["ln2_g"], p["ln2_b"])
    y = jnp.maximum(_bf(h2) @ _bf(p["w1"]) + p["b1"], 0.0)
    y = _bf(y) @ _bf(p["w2"]) + p["b2"]
    return x1 + y


if __name__ == "__main__":
    # Small shapes consistent with the module: n_embd=384, n_head=6, T <= block_size=256.
    B, T = 2, 128
    key = jax.random.PRNGKey(0)
    kx, kp = jax.random.split(key)
    x = jax.random.normal(kx, (B, T, N_EMBD), dtype=jnp.float32)
    params = init_block_params(kp, N_EMBD, N_HEAD)

    # Eval-mode check against the pure-JAX reference (dropout is identity in eval).
    out_eval = block_forward(x, params, training=False)
    ref = block_reference(x, params)
    max_err = float(jnp.max(jnp.abs(out_eval - ref)))
    assert jnp.allclose(out_eval, ref, atol=2e-2, rtol=2e-2), f"eval mismatch: {max_err}"

    # Training-mode run exercises the in-kernel dropout paths.
    out_train = block_forward(x, params, seed=1234, training=True)
    assert out_train.shape == x.shape
    assert bool(jnp.all(jnp.isfinite(out_train)))

    jax.block_until_ready((out_eval, out_train))
    print("KERNEL_OK")
</pallas_src>

<mosaic_0001>
module attributes {stable_mosaic.version = 11 : i64} {
  func.func @_attn_block_kernel(%arg0: i32, %arg1: memref<1xi32, #tpu.memory_space<smem>>, %arg2: memref<1x128x384xf32, #tpu.memory_space<vmem>>, %arg3: memref<1x384xf32, #tpu.memory_space<vmem>>, %arg4: memref<1x384xf32, #tpu.memory_space<vmem>>, %arg5: memref<384x384xbf16, #tpu.memory_space<vmem>>, %arg6: memref<384x384xbf16, #tpu.memory_space<vmem>>, %arg7: memref<384x384xbf16, #tpu.memory_space<vmem>>, %arg8: memref<384x384xbf16, #tpu.memory_space<vmem>>, %arg9: memref<1x384xf32, #tpu.memory_space<vmem>>, %arg10: memref<1x128x384xf32, #tpu.memory_space<vmem>>) attributes {dimension_semantics = [#tpu.dimension_semantics<parallel>], iteration_bounds = array<i64: 2>, scalar_prefetch = 1 : i64, scratch_operands = 0 : i64, tpu.core_type = #tpu.core_type<tc>, window_params = [{transform_indices = @transform_0, window_bounds = array<i64: 1, 128, 384>}, {pipeline_mode = #tpu.pipeline_mode<synchronous>, transform_indices = @transform_1, window_bounds = array<i64: 1, 384>}, {pipeline_mode = #tpu.pipeline_mode<synchronous>, transform_indices = @transform_2, window_bounds = array<i64: 1, 384>}, {pipeline_mode = #tpu.pipeline_mode<synchronous>, transform_indices = @transform_3, window_bounds = array<i64: 384, 384>}, {pipeline_mode = #tpu.pipeline_mode<synchronous>, transform_indices = @transform_4, window_bounds = array<i64: 384, 384>}, {pipeline_mode = #tpu.pipeline_mode<synchronous>, transform_indices = @transform_5, window_bounds = array<i64: 384, 384>}, {pipeline_mode = #tpu.pipeline_mode<synchronous>, transform_indices = @transform_6, window_bounds = array<i64: 384, 384>}, {pipeline_mode = #tpu.pipeline_mode<synchronous>, transform_indices = @transform_7, window_bounds = array<i64: 1, 384>}, {transform_indices = @transform_8, window_bounds = array<i64: 1, 128, 384>}]} {
    %c0 = arith.constant 0 : index
    %c0_0 = arith.constant 0 : index
    %c0_1 = arith.constant 0 : index
    %0 = vector.load %arg2[%c0, %c0_0, %c0_1] : memref<1x128x384xf32, #tpu.memory_space<vmem>>, vector<1x128x384xf32>
    %1 = vector.shape_cast %0 : vector<1x128x384xf32> to vector<128x384xf32>
    %cst = arith.constant dense<0.000000e+00> : vector<128xf32>
    %2 = vector.multi_reduction <add>, %1, %cst [1] : vector<128x384xf32> to vector<128xf32>
    %3 = vector.shape_cast %2 : vector<128xf32> to vector<128x1xf32>
    %cst_2 = arith.constant 3.840000e+02 : f32
    %4 = vector.broadcast %cst_2 : f32 to vector<128x1xf32>
    %5 = arith.divf %3, %4 : vector<128x1xf32>
    %6 = vector.broadcast %5 : vector<128x1xf32> to vector<128x384xf32>
    %7 = arith.subf %1, %6 : vector<128x384xf32>
    %8 = arith.mulf %7, %7 : vector<128x384xf32>
    %cst_3 = arith.constant dense<0.000000e+00> : vector<128xf32>
    %9 = vector.multi_reduction <add>, %8, %cst_3 [1] : vector<128x384xf32> to vector<128xf32>
    %10 = vector.shape_cast %9 : vector<128xf32> to vector<128x1xf32>
    %cst_4 = arith.constant 3.840000e+02 : f32
    %11 = vector.broadcast %cst_4 : f32 to vector<128x1xf32>
    %12 = arith.divf %10, %11 : vector<128x1xf32>
    %cst_5 = arith.constant 9.99999974E-6 : f32
    %13 = vector.broadcast %cst_5 : f32 to vector<128x1xf32>
    %14 = arith.addf %12, %13 : vector<128x1xf32>
    %15 = math.rsqrt %14 : vector<128x1xf32>
    %16 = vector.broadcast %15 : vector<128x1xf32> to vector<128x384xf32>
    %17 = arith.mulf %7, %16 : vector<128x384xf32>
    %c0_6 = arith.constant 0 : index
    %c0_7 = arith.constant 0 : index
    %18 = vector.load %arg3[%c0_6, %c0_7] : memref<1x384xf32, #tpu.memory_space<vmem>>, vector<1x384xf32>
    %19 = vector.broadcast %18 : vector<1x384xf32> to vector<128x384xf32>
    %20 = arith.mulf %17, %19 : vector<128x384xf32>
    %c0_8 = arith.constant 0 : index
    %c0_9 = arith.constant 0 : index
    %21 = vector.load %arg4[%c0_8, %c0_9] : memref<1x384xf32, #tpu.memory_space<vmem>>, vector<1x384xf32>
    %22 = vector.broadcast %21 : vector<1x384xf32> to vector<128x384xf32>
    %23 = arith.addf %20, %22 : vector<128x384xf32>
    %24 = arith.truncf %23 : vector<128x384xf32> to vector<128x384xbf16>
    %c0_10 = arith.constant 0 : index
    %c0_11 = arith.constant 0 : index
    %25 = vector.load %arg5[%c0_10, %c0_11] : memref<384x384xbf16, #tpu.memory_space<vmem>>, vector<384x384xbf16>
    %cst_12 = arith.constant dense<0.000000e+00> : vector<128x384xf32>
    %26 = tpu.matmul %24, %25, %cst_12 {dimension_numbers = #tpu.dot_dimension_numbers<[1], [0], [0], [1], [0, 0, 1, 1], [], []>} : vector<128x384xbf16>, vector<384x384xbf16>, vector<128x384xf32> -> vector<128x384xf32>
    %c0_13 = arith.constant 0 : index
    %c0_14 = arith.constant 0 : index
    %27 = vector.load %arg6[%c0_13, %c0_14] : memref<384x384xbf16, #tpu.memory_space<vmem>>, vector<384x384xbf16>
    %cst_15 = arith.constant dense<0.000000e+00> : vector<128x384xf32>
    %28 = tpu.matmul %24, %27, %cst_15 {dimension_numbers = #tpu.dot_dimension_numbers<[1], [0], [0], [1], [0, 0, 1, 1], [], []>} : vector<128x384xbf16>, vector<384x384xbf16>, vector<128x384xf32> -> vector<128x384xf32>
    %c0_16 = arith.constant 0 : index
    %c0_17 = arith.constant 0 : index
    %29 = vector.load %arg7[%c0_16, %c0_17] : memref<384x384xbf16, #tpu.memory_space<vmem>>, vector<384x384xbf16>
    %cst_18 = arith.constant dense<0.000000e+00> : vector<128x384xf32>
    %30 = tpu.matmul %24, %29, %cst_18 {dimension_numbers = #tpu.dot_dimension_numbers<[1], [0], [0], [1], [0, 0, 1, 1], [], []>} : vector<128x384xbf16>, vector<384x384xbf16>, vector<128x384xf32> -> vector<128x384xf32>
    %31 = tpu.iota {dimensions = array<i32: 0>} : vector<128x128xi32>
    %32 = tpu.iota {dimensions = array<i32: 1>} : vector<128x128xi32>
    %33 = arith.cmpi sge, %31, %32 : vector<128x128xi32>
    %cst_19 = arith.constant 0.000000e+00 : f32
    %34 = vector.broadcast %cst_19 : f32 to vector<128x384xf32>
    %35 = vector.extract_strided_slice %26 {offsets = [0, 0], sizes = [128, 64], strides = [1, 1]} : vector<128x384xf32> to vector<128x64xf32>
    %36 = arith.truncf %35 : vector<128x64xf32> to vector<128x64xbf16>
    %37 = vector.extract_strided_slice %28 {offsets = [0, 0], sizes = [128, 64], strides = [1, 1]} : vector<128x384xf32> to vector<128x64xf32>
    %38 = arith.truncf %37 : vector<128x64xf32> to vector<128x64xbf16>
    %39 = vector.extract_strided_slice %30 {offsets = [0, 0], sizes = [128, 64], strides = [1, 1]} : vector<128x384xf32> to vector<128x64xf32>
    %40 = arith.truncf %39 : vector<128x64xf32> to vector<128x64xbf16>
    %cst_20 = arith.constant dense<0.000000e+00> : vector<128x128xf32>
    %41 = tpu.matmul %36, %38, %cst_20 {dimension_numbers = #tpu.dot_dimension_numbers<[1], [1], [0], [0], [0, 0, 1, 0], [], []>} : vector<128x64xbf16>, vector<128x64xbf16>, vector<128x128xf32> -> vector<128x128xf32>
    %cst_21 = arith.constant 1.250000e-01 : f32
    %42 = vector.broadcast %cst_21 : f32 to vector<128x128xf32>
    %43 = arith.mulf %41, %42 : vector<128x128xf32>
    %cst_22 = arith.constant -1.000000e+30 : f32
    %44 = vector.broadcast %cst_22 : f32 to vector<128x128xf32>
    %45 = arith.select %33, %43, %44 : vector<128x128xi1>, vector<128x128xf32>
    %cst_23 = arith.constant dense<0xFF800000> : vector<128xf32>
    %46 = vector.multi_reduction <maximumf>, %45, %cst_23 [1] : vector<128x128xf32> to vector<128xf32>
    %47 = vector.shape_cast %46 : vector<128xf32> to vector<128x1xf32>
    %48 = vector.broadcast %47 : vector<128x1xf32> to vector<128x128xf32>
    %49 = arith.subf %45, %48 : vector<128x128xf32>
    %50 = math.exp %49 : vector<128x128xf32>
    %cst_24 = arith.constant dense<0.000000e+00> : vector<128xf32>
    %51 = vector.multi_reduction <add>, %50, %cst_24 [1] : vector<128x128xf32> to vector<128xf32>
    %52 = vector.shape_cast %51 : vector<128xf32> to vector<128x1xf32>
    %53 = vector.broadcast %52 : vector<128x1xf32> to vector<128x128xf32>
    %54 = arith.divf %50, %53 : vector<128x128xf32>
    %55 = arith.truncf %54 : vector<128x128xf32> to vector<128x128xbf16>
    %cst_25 = arith.constant dense<0.000000e+00> : vector<128x64xf32>
    %56 = tpu.matmul %55, %40, %cst_25 {dimension_numbers = #tpu.dot_dimension_numbers<[1], [0], [0], [1], [0, 0, 1, 1], [], []>} : vector<128x128xbf16>, vector<128x64xbf16>, vector<128x64xf32> -> vector<128x64xf32>
    %57 = arith.truncf %56 : vector<128x64xf32> to vector<128x64xbf16>
    %c0_26 = arith.constant 0 : index
    %c0_27 = arith.constant 0 : index
    %58 = vector.load %arg8[%c0_26, %c0_27] : memref<384x384xbf16, #tpu.memory_space<vmem>>, vector<64x384xbf16>
    %cst_28 = arith.constant dense<0.000000e+00> : vector<128x384xf32>
    %59 = tpu.matmul %57, %58, %cst_28 {dimension_numbers = #tpu.dot_dimension_numbers<[1], [0], [0], [1], [0, 0, 1, 1], [], []>} : vector<128x64xbf16>, vector<64x384xbf16>, vector<128x384xf32> -> vector<128x384xf32>
    %60 = arith.addf %34, %59 : vector<128x384xf32>
    %61 = vector.extract_strided_slice %26 {offsets = [0, 64], sizes = [128, 64], strides = [1, 1]} : vector<128x384xf32> to vector<128x64xf32>
    %62 = arith.truncf %61 : vector<128x64xf32> to vector<128x64xbf16>
    %63 = vector.extract_strided_slice %28 {offsets = [0, 64], sizes = [128, 64], strides = [1, 1]} : vector<128x384xf32> to vector<128x64xf32>
    %64 = arith.truncf %63 : vector<128x64xf32> to vector<128x64xbf16>
    %65 = vector.extract_strided_slice %30 {offsets = [0, 64], sizes = [128, 64], strides = [1, 1]} : vector<128x384xf32> to vector<128x64xf32>
    %66 = arith.truncf %65 : vector<128x64xf32> to vector<128x64xbf16>
    %cst_29 = arith.constant dense<0.000000e+00> : vector<128x128xf32>
    %67 = tpu.matmul %62, %64, %cst_29 {dimension_numbers = #tpu.dot_dimension_numbers<[1], [1], [0], [0], [0, 0, 1, 0], [], []>} : vector<128x64xbf16>, vector<128x64xbf16>, vector<128x128xf32> -> vector<128x128xf32>
    %cst_30 = arith.constant 1.250000e-01 : f32
    %68 = vector.broadcast %cst_30 : f32 to vector<128x128xf32>
    %69 = arith.mulf %67, %68 : vector<128x128xf32>
    %cst_31 = arith.constant -1.000000e+30 : f32
    %70 = vector.broadcast %cst_31 : f32 to vector<128x128xf32>
    %71 = arith.select %33, %69, %70 : vector<128x128xi1>, vector<128x128xf32>
    %cst_32 = arith.constant dense<0xFF800000> : vector<128xf32>
    %72 = vector.multi_reduction <maximumf>, %71, %cst_32 [1] : vector<128x128xf32> to vector<128xf32>
    %73 = vector.shape_cast %72 : vector<128xf32> to vector<128x1xf32>
    %74 = vector.broadcast %73 : vector<128x1xf32> to vector<128x128xf32>
    %75 = arith.subf %71, %74 : vector<128x128xf32>
    %76 = math.exp %75 : vector<128x128xf32>
    %cst_33 = arith.constant dense<0.000000e+00> : vector<128xf32>
    %77 = vector.multi_reduction <add>, %76, %cst_33 [1] : vector<128x128xf32> to vector<128xf32>
    %78 = vector.shape_cast %77 : vector<128xf32> to vector<128x1xf32>
    %79 = vector.broadcast %78 : vector<128x1xf32> to vector<128x128xf32>
    %80 = arith.divf %76, %79 : vector<128x128xf32>
    %81 = arith.truncf %80 : vector<128x128xf32> to vector<128x128xbf16>
    %cst_34 = arith.constant dense<0.000000e+00> : vector<128x64xf32>
    %82 = tpu.matmul %81, %66, %cst_34 {dimension_numbers = #tpu.dot_dimension_numbers<[1], [0], [0], [1], [0, 0, 1, 1], [], []>} : vector<128x128xbf16>, vector<128x64xbf16>, vector<128x64xf32> -> vector<128x64xf32>
    %83 = arith.truncf %82 : vector<128x64xf32> to vector<128x64xbf16>
    %c64 = arith.constant 64 : index
    %c0_35 = arith.constant 0 : index
    %84 = vector.load %arg8[%c64, %c0_35] : memref<384x384xbf16, #tpu.memory_space<vmem>>, vector<64x384xbf16>
    %cst_36 = arith.constant dense<0.000000e+00> : vector<128x384xf32>
    %85 = tpu.matmul %83, %84, %cst_36 {dimension_numbers = #tpu.dot_dimension_numbers<[1], [0], [0], [1], [0, 0, 1, 1], [], []>} : vector<128x64xbf16>, vector<64x384xbf16>, vector<128x384xf32> -> vector<128x384xf32>
    %86 = arith.addf %60, %85 : vector<128x384xf32>
    %87 = vector.extract_strided_slice %26 {offsets = [0, 128], sizes = [128, 64], strides = [1, 1]} : vector<128x384xf32> to vector<128x64xf32>
    %88 = arith.truncf %87 : vector<128x64xf32> to vector<128x64xbf16>
    %89 = vector.extract_strided_slice %28 {offsets = [0, 128], sizes = [128, 64], strides = [1, 1]} : vector<128x384xf32> to vector<128x64xf32>
    %90 = arith.truncf %89 : vector<128x64xf32> to vector<128x64xbf16>
    %91 = vector.extract_strided_slice %30 {offsets = [0, 128], sizes = [128, 64], strides = [1, 1]} : vector<128x384xf32> to vector<128x64xf32>
    %92 = arith.truncf %91 : vector<128x64xf32> to vector<128x64xbf16>
    %cst_37 = arith.constant dense<0.000000e+00> : vector<128x128xf32>
    %93 = tpu.matmul %88, %90, %cst_37 {dimension_numbers = #tpu.dot_dimension_numbers<[1], [1], [0], [0], [0, 0, 1, 0], [], []>} : vector<128x64xbf16>, vector<128x64xbf16>, vector<128x128xf32> -> vector<128x128xf32>
    %cst_38 = arith.constant 1.250000e-01 : f32
    %94 = vector.broadcast %cst_38 : f32 to vector<128x128xf32>
    %95 = arith.mulf %93, %94 : vector<128x128xf32>
    %cst_39 = arith.constant -1.000000e+30 : f32
    %96 = vector.broadcast %cst_39 : f32 to vector<128x128xf32>
    %97 = arith.select %33, %95, %96 : vector<128x128xi1>, vector<128x128xf32>
    %cst_40 = arith.constant dense<0xFF800000> : vector<128xf32>
    %98 = vector.multi_reduction <maximumf>, %97, %cst_40 [1] : vector<128x128xf32> to vector<128xf32>
    %99 = vector.shape_cast %98 : vector<128xf32> to vector<128x1xf32>
    %100 = vector.broadcast %99 : vector<128x1xf32> to vector<128x128xf32>
    %101 = arith.subf %97, %100 : vector<128x128xf32>
    %102 = math.exp %101 : vector<128x128xf32>
    %cst_41 = arith.constant dense<0.000000e+00> : vector<128xf32>
    %103 = vector.multi_reduction <add>, %102, %cst_41 [1] : vector<128x128xf32> to vector<128xf32>
    %104 = vector.shape_cast %103 : vector<128xf32> to vector<128x1xf32>
    %105 = vector.broadcast %104 : vector<128x1xf32> to vector<128x128xf32>
    %106 = arith.divf %102, %105 : vector<128x128xf32>
    %107 = arith.truncf %106 : vector<128x128xf32> to vector<128x128xbf16>
    %cst_42 = arith.constant dense<0.000000e+00> : vector<128x64xf32>
    %108 = tpu.matmul %107, %92, %cst_42 {dimension_numbers = #tpu.dot_dimension_numbers<[1], [0], [0], [1], [0, 0, 1, 1], [], []>} : vector<128x128xbf16>, vector<128x64xbf16>, vector<128x64xf32> -> vector<128x64xf32>
    %109 = arith.truncf %108 : vector<128x64xf32> to vector<128x64xbf16>
    %c128 = arith.constant 128 : index
    %c0_43 = arith.constant 0 : index
    %110 = vector.load %arg8[%c128, %c0_43] : memref<384x384xbf16, #tpu.memory_space<vmem>>, vector<64x384xbf16>
    %cst_44 = arith.constant dense<0.000000e+00> : vector<128x384xf32>
    %111 = tpu.matmul %109, %110, %cst_44 {dimension_numbers = #tpu.dot_dimension_numbers<[1], [0], [0], [1], [0, 0, 1, 1], [], []>} : vector<128x64xbf16>, vector<64x384xbf16>, vector<128x384xf32> -> vector<128x384xf32>
    %112 = arith.addf %86, %111 : vector<128x384xf32>
    %113 = vector.extract_strided_slice %26 {offsets = [0, 192], sizes = [128, 64], strides = [1, 1]} : vector<128x384xf32> to vector<128x64xf32>
    %114 = arith.truncf %113 : vector<128x64xf32> to vector<128x64xbf16>
    %115 = vector.extract_strided_slice %28 {offsets = [0, 192], sizes = [128, 64], strides = [1, 1]} : vector<128x384xf32> to vector<128x64xf32>
    %116 = arith.truncf %115 : vector<128x64xf32> to vector<128x64xbf16>
    %117 = vector.extract_strided_slice %30 {offsets = [0, 192], sizes = [128, 64], strides = [1, 1]} : vector<128x384xf32> to vector<128x64xf32>
    %118 = arith.truncf %117 : vector<128x64xf32> to vector<128x64xbf16>
    %cst_45 = arith.constant dense<0.000000e+00> : vector<128x128xf32>
    %119 = tpu.matmul %114, %116, %cst_45 {dimension_numbers = #tpu.dot_dimension_numbers<[1], [1], [0], [0], [0, 0, 1, 0], [], []>} : vector<128x64xbf16>, vector<128x64xbf16>, vector<128x128xf32> -> vector<128x128xf32>
    %cst_46 = arith.constant 1.250000e-01 : f32
    %120 = vector.broadcast %cst_46 : f32 to vector<128x128xf32>
    %121 = arith.mulf %119, %120 : vector<128x128xf32>
    %cst_47 = arith.constant -1.000000e+30 : f32
    %122 = vector.broadcast %cst_47 : f32 to vector<128x128xf32>
    %123 = arith.select %33, %121, %122 : vector<128x128xi1>, vector<128x128xf32>
    %cst_48 = arith.constant dense<0xFF800000> : vector<128xf32>
    %124 = vector.multi_reduction <maximumf>, %123, %cst_48 [1] : vector<128x128xf32> to vector<128xf32>
    %125 = vector.shape_cast %124 : vector<128xf32> to vector<128x1xf32>
    %126 = vector.broadcast %125 : vector<128x1xf32> to vector<128x128xf32>
    %127 = arith.subf %123, %126 : vector<128x128xf32>
    %128 = math.exp %127 : vector<128x128xf32>
    %cst_49 = arith.constant dense<0.000000e+00> : vector<128xf32>
    %129 = vector.multi_reduction <add>, %128, %cst_49 [1] : vector<128x128xf32> to vector<128xf32>
    %130 = vector.shape_cast %129 : vector<128xf32> to vector<128x1xf32>
    %131 = vector.broadcast %130 : vector<128x1xf32> to vector<128x128xf32>
    %132 = arith.divf %128, %131 : vector<128x128xf32>
    %133 = arith.truncf %132 : vector<128x128xf32> to vector<128x128xbf16>
    %cst_50 = arith.constant dense<0.000000e+00> : vector<128x64xf32>
    %134 = tpu.matmul %133, %118, %cst_50 {dimension_numbers = #tpu.dot_dimension_numbers<[1], [0], [0], [1], [0, 0, 1, 1], [], []>} : vector<128x128xbf16>, vector<128x64xbf16>, vector<128x64xf32> -> vector<128x64xf32>
    %135 = arith.truncf %134 : vector<128x64xf32> to vector<128x64xbf16>
    %c192 = arith.constant 192 : index
    %c0_51 = arith.constant 0 : index
    %136 = vector.load %arg8[%c192, %c0_51] : memref<384x384xbf16, #tpu.memory_space<vmem>>, vector<64x384xbf16>
    %cst_52 = arith.constant dense<0.000000e+00> : vector<128x384xf32>
    %137 = tpu.matmul %135, %136, %cst_52 {dimension_numbers = #tpu.dot_dimension_numbers<[1], [0], [0], [1], [0, 0, 1, 1], [], []>} : vector<128x64xbf16>, vector<64x384xbf16>, vector<128x384xf32> -> vector<128x384xf32>
    %138 = arith.addf %112, %137 : vector<128x384xf32>
    %139 = vector.extract_strided_slice %26 {offsets = [0, 256], sizes = [128, 64], strides = [1, 1]} : vector<128x384xf32> to vector<128x64xf32>
    %140 = arith.truncf %139 : vector<128x64xf32> to vector<128x64xbf16>
    %141 = vector.extract_strided_slice %28 {offsets = [0, 256], sizes = [128, 64], strides = [1, 1]} : vector<128x384xf32> to vector<128x64xf32>
    %142 = arith.truncf %141 : vector<128x64xf32> to vector<128x64xbf16>
    %143 = vector.extract_strided_slice %30 {offsets = [0, 256], sizes = [128, 64], strides = [1, 1]} : vector<128x384xf32> to vector<128x64xf32>
    %144 = arith.truncf %143 : vector<128x64xf32> to vector<128x64xbf16>
    %cst_53 = arith.constant dense<0.000000e+00> : vector<128x128xf32>
    %145 = tpu.matmul %140, %142, %cst_53 {dimension_numbers = #tpu.dot_dimension_numbers<[1], [1], [0], [0], [0, 0, 1, 0], [], []>} : vector<128x64xbf16>, vector<128x64xbf16>, vector<128x128xf32> -> vector<128x128xf32>
    %cst_54 = arith.constant 1.250000e-01 : f32
    %146 = vector.broadcast %cst_54 : f32 to vector<128x128xf32>
    %147 = arith.mulf %145, %146 : vector<128x128xf32>
    %cst_55 = arith.constant -1.000000e+30 : f32
    %148 = vector.broadcast %cst_55 : f32 to vector<128x128xf32>
    %149 = arith.select %33, %147, %148 : vector<128x128xi1>, vector<128x128xf32>
    %cst_56 = arith.constant dense<0xFF800000> : vector<128xf32>
    %150 = vector.multi_reduction <maximumf>, %149, %cst_56 [1] : vector<128x128xf32> to vector<128xf32>
    %151 = vector.shape_cast %150 : vector<128xf32> to vector<128x1xf32>
    %152 = vector.broadcast %151 : vector<128x1xf32> to vector<128x128xf32>
    %153 = arith.subf %149, %152 : vector<128x128xf32>
    %154 = math.exp %153 : vector<128x128xf32>
    %cst_57 = arith.constant dense<0.000000e+00> : vector<128xf32>
    %155 = vector.multi_reduction <add>, %154, %cst_57 [1] : vector<128x128xf32> to vector<128xf32>
    %156 = vector.shape_cast %155 : vector<128xf32> to vector<128x1xf32>
    %157 = vector.broadcast %156 : vector<128x1xf32> to vector<128x128xf32>
    %158 = arith.divf %154, %157 : vector<128x128xf32>
    %159 = arith.truncf %158 : vector<128x128xf32> to vector<128x128xbf16>
    %cst_58 = arith.constant dense<0.000000e+00> : vector<128x64xf32>
    %160 = tpu.matmul %159, %144, %cst_58 {dimension_numbers = #tpu.dot_dimension_numbers<[1], [0], [0], [1], [0, 0, 1, 1], [], []>} : vector<128x128xbf16>, vector<128x64xbf16>, vector<128x64xf32> -> vector<128x64xf32>
    %161 = arith.truncf %160 : vector<128x64xf32> to vector<128x64xbf16>
    %c256 = arith.constant 256 : index
    %c0_59 = arith.constant 0 : index
    %162 = vector.load %arg8[%c256, %c0_59] : memref<384x384xbf16, #tpu.memory_space<vmem>>, vector<64x384xbf16>
    %cst_60 = arith.constant dense<0.000000e+00> : vector<128x384xf32>
    %163 = tpu.matmul %161, %162, %cst_60 {dimension_numbers = #tpu.dot_dimension_numbers<[1], [0], [0], [1], [0, 0, 1, 1], [], []>} : vector<128x64xbf16>, vector<64x384xbf16>, vector<128x384xf32> -> vector<128x384xf32>
    %164 = arith.addf %138, %163 : vector<128x384xf32>
    %165 = vector.extract_strided_slice %26 {offsets = [0, 320], sizes = [128, 64], strides = [1, 1]} : vector<128x384xf32> to vector<128x64xf32>
    %166 = arith.truncf %165 : vector<128x64xf32> to vector<128x64xbf16>
    %167 = vector.extract_strided_slice %28 {offsets = [0, 320], sizes = [128, 64], strides = [1, 1]} : vector<128x384xf32> to vector<128x64xf32>
    %168 = arith.truncf %167 : vector<128x64xf32> to vector<128x64xbf16>
    %169 = vector.extract_strided_slice %30 {offsets = [0, 320], sizes = [128, 64], strides = [1, 1]} : vector<128x384xf32> to vector<128x64xf32>
    %170 = arith.truncf %169 : vector<128x64xf32> to vector<128x64xbf16>
    %cst_61 = arith.constant dense<0.000000e+00> : vector<128x128xf32>
    %171 = tpu.matmul %166, %168, %cst_61 {dimension_numbers = #tpu.dot_dimension_numbers<[1], [1], [0], [0], [0, 0, 1, 0], [], []>} : vector<128x64xbf16>, vector<128x64xbf16>, vector<128x128xf32> -> vector<128x128xf32>
    %cst_62 = arith.constant 1.250000e-01 : f32
    %172 = vector.broadcast %cst_62 : f32 to vector<128x128xf32>
    %173 = arith.mulf %171, %172 : vector<128x128xf32>
    %cst_63 = arith.constant -1.000000e+30 : f32
    %174 = vector.broadcast %cst_63 : f32 to vector<128x128xf32>
    %175 = arith.select %33, %173, %174 : vector<128x128xi1>, vector<128x128xf32>
    %cst_64 = arith.constant dense<0xFF800000> : vector<128xf32>
    %176 = vector.multi_reduction <maximumf>, %175, %cst_64 [1] : vector<128x128xf32> to vector<128xf32>
    %177 = vector.shape_cast %176 : vector<128xf32> to vector<128x1xf32>
    %178 = vector.broadcast %177 : vector<128x1xf32> to vector<128x128xf32>
    %179 = arith.subf %175, %178 : vector<128x128xf32>
    %180 = math.exp %179 : vector<128x128xf32>
    %cst_65 = arith.constant dense<0.000000e+00> : vector<128xf32>
    %181 = vector.multi_reduction <add>, %180, %cst_65 [1] : vector<128x128xf32> to vector<128xf32>
    %182 = vector.shape_cast %181 : vector<128xf32> to vector<128x1xf32>
    %183 = vector.broadcast %182 : vector<128x1xf32> to vector<128x128xf32>
    %184 = arith.divf %180, %183 : vector<128x128xf32>
    %185 = arith.truncf %184 : vector<128x128xf32> to vector<128x128xbf16>
    %cst_66 = arith.constant dense<0.000000e+00> : vector<128x64xf32>
    %186 = tpu.matmul %185, %170, %cst_66 {dimension_numbers = #tpu.dot_dimension_numbers<[1], [0], [0], [1], [0, 0, 1, 1], [], []>} : vector<128x128xbf16>, vector<128x64xbf16>, vector<128x64xf32> -> vector<128x64xf32>
    %187 = arith.truncf %186 : vector<128x64xf32> to vector<128x64xbf16>
    %c320 = arith.constant 320 : index
    %c0_67 = arith.constant 0 : index
    %188 = vector.load %arg8[%c320, %c0_67] : memref<384x384xbf16, #tpu.memory_space<vmem>>, vector<64x384xbf16>
    %cst_68 = arith.constant dense<0.000000e+00> : vector<128x384xf32>
    %189 = tpu.matmul %187, %188, %cst_68 {dimension_numbers = #tpu.dot_dimension_numbers<[1], [0], [0], [1], [0, 0, 1, 1], [], []>} : vector<128x64xbf16>, vector<64x384xbf16>, vector<128x384xf32> -> vector<128x384xf32>
    %190 = arith.addf %164, %189 : vector<128x384xf32>
    %c0_69 = arith.constant 0 : index
    %c0_70 = arith.constant 0 : index
    %191 = vector.load %arg9[%c0_69, %c0_70] : memref<1x384xf32, #tpu.memory_space<vmem>>, vector<1x384xf32>
    %192 = vector.broadcast %191 : vector<1x384xf32> to vector<128x384xf32>
    %193 = arith.addf %190, %192 : vector<128x384xf32>
    %194 = arith.addf %1, %193 : vector<128x384xf32>
    %c0_71 = arith.constant 0 : index
    %c0_72 = arith.constant 0 : index
    %c0_73 = arith.constant 0 : index
    %195 = vector.load %arg10[%c0_71, %c0_72, %c0_73] : memref<1x128x384xf32, #tpu.memory_space<vmem>>, vector<1x128x384xf32>
    %196 = vector.shape_cast %195 : vector<1x128x384xf32> to vector<128x384xf32>
    %197 = vector.shape_cast %194 : vector<128x384xf32> to vector<1x128x384xf32>
    tpu.vector_store %arg10[%c0_71, %c0_72, %c0_73], %197 {strides = array<i32>} : memref<1x128x384xf32, #tpu.memory_space<vmem>>, vector<1x128x384xf32>,
    return
  }
  func.func @transform_0(%arg0: i32, %arg1: memref<1xi32, #tpu.memory_space<smem>>) -> (i32, i32, i32) {
    %c0_i32 = arith.constant 0 : i32
    %c0_i32_0 = arith.constant 0 : i32
    %c0_i32_1 = arith.constant 0 : i32
    return %arg0, %c0_i32, %c0_i32_0 : i32, i32, i32
  }
  func.func @transform_1(%arg0: i32, %arg1: memref<1xi32, #tpu.memory_space<smem>>) -> (i32, i32) {
    %c0_i32 = arith.constant 0 : i32
    %c0_i32_0 = arith.constant 0 : i32
    %c0_i32_1 = arith.constant 0 : i32
    return %c0_i32, %c0_i32_0 : i32, i32
  }
  func.func @transform_2(%arg0: i32, %arg1: memref<1xi32, #tpu.memory_space<smem>>) -> (i32, i32) {
    %c0_i32 = arith.constant 0 : i32
    %c0_i32_0 = arith.constant 0 : i32
    %c0_i32_1 = arith.constant 0 : i32
    return %c0_i32, %c0_i32_0 : i32, i32
  }
  func.func @transform_3(%arg0: i32, %arg1: memref<1xi32, #tpu.memory_space<smem>>) -> (i32, i32) {
    %c0_i32 = arith.constant 0 : i32
    %c0_i32_0 = arith.constant 0 : i32
    %c0_i32_1 = arith.constant 0 : i32
    return %c0_i32, %c0_i32_0 : i32, i32
  }
  func.func @transform_4(%arg0: i32, %arg1: memref<1xi32, #tpu.memory_space<smem>>) -> (i32, i32) {
    %c0_i32 = arith.constant 0 : i32
    %c0_i32_0 = arith.constant 0 : i32
    %c0_i32_1 = arith.constant 0 : i32
    return %c0_i32, %c0_i32_0 : i32, i32
  }
  func.func @transform_5(%arg0: i32, %arg1: memref<1xi32, #tpu.memory_space<smem>>) -> (i32, i32) {
    %c0_i32 = arith.constant 0 : i32
    %c0_i32_0 = arith.constant 0 : i32
    %c0_i32_1 = arith.constant 0 : i32
    return %c0_i32, %c0_i32_0 : i32, i32
  }
  func.func @transform_6(%arg0: i32, %arg1: memref<1xi32, #tpu.memory_space<smem>>) -> (i32, i32) {
    %c0_i32 = arith.constant 0 : i32
    %c0_i32_0 = arith.constant 0 : i32
    %c0_i32_1 = arith.constant 0 : i32
    return %c0_i32, %c0_i32_0 : i32, i32
  }
  func.func @transform_7(%arg0: i32, %arg1: memref<1xi32, #tpu.memory_space<smem>>) -> (i32, i32) {
    %c0_i32 = arith.constant 0 : i32
    %c0_i32_0 = arith.constant 0 : i32
    %c0_i32_1 = arith.constant 0 : i32
    return %c0_i32, %c0_i32_0 : i32, i32
  }
  func.func @transform_8(%arg0: i32, %arg1: memref<1xi32, #tpu.memory_space<smem>>) -> (i32, i32, i32) {
    %c0_i32 = arith.constant 0 : i32
    %c0_i32_0 = arith.constant 0 : i32
    %c0_i32_1 = arith.constant 0 : i32
    return %arg0, %c0_i32, %c0_i32_0 : i32, i32, i32
  }
}

</mosaic_0001>

<bundles_post_ra>
// kernel: tpu_custom_call.1
= control target key start
LH: loop header
LB: loop body
LE: loop exit
PB: predicated region body
PF: predicated region fallthrough
CT: control target
= control target key end

     0   :  { %15 = vsyncpa [#allocation5], 0  ;;  %s15248_s0 = inlined_call_operand.<no memory space> [shape: s32[1], index: 0, kind: input, shape index: {}]   ;;  %s15249_s1 = inlined_call_operand.hbm [shape: f32[2,128,384], index: 1, kind: input, shape index: {}]   ;;  %s15250_s2 = inlined_call_operand.vmem [shape: f32[1,384], index: 2, kind: input, shape index: {}]   ;;  %s15251_s3 = inlined_call_operand.vmem [shape: f32[1,384], index: 3, kind: input, shape index: {}]   ;;  %s15252_s4 = inlined_call_operand.hbm [shape: bf16[384,384], index: 4, kind: input, shape index: {}]   ;;  %s15253_s5 = inlined_call_operand.hbm [shape: bf16[384,384], index: 5, kind: input, shape index: {}]   ;;  %s15254_s6 = inlined_call_operand.hbm [shape: bf16[384,384], index: 6, kind: input, shape index: {}]   ;;  %s15255_s7 = inlined_call_operand.hbm [shape: bf16[384,384], index: 7, kind: input, shape index: {}]   ;;  %s15256_s8 = inlined_call_operand.vmem [shape: f32[1,384], index: 8, kind: input, shape index: {}]   ;;  %s15257_s9 = inlined_call_operand.hbm [shape: f32[2,128,384], index: 9, kind: output, shape index: {}]  }
   0x1   :  { %17 = vsyncpa [#allocation5 + $0x1], 0 }
   0x2   :  { %18 = vsyncpa [#allocation8], 0 }
   0x3   :  { %19 = vsyncpa [#allocation11], 0 }
   0x4   :  { %20 = vsyncpa [#allocation6], 0 }
   0x5   :  { %22 = vsyncpa [#allocation6 + $0x1], 0  ;;  %s12191_s29 = smov 0   ;;  %s12193_s30 = smov 0  }
   0x6   :  { %s12195_s10 = smov 0   ;;  %s12197_s11 = smov 0  }
   0x7 LB: > { %15396 = sst [smem:[#allocation18_spill]] %s12113_s29  ;;  %s12212_s12 = sadd.s32 4294967295, %s12125_s11   ;;  %s12125_s11 = sphi %s12197_s11, %s15817_s11   ;;  %s12121_s10 = sphi %s12195_s10, %s15816_s10   ;;  %s12117_s30 = sphi %s12193_s30, %s15815_s30   ;;  %s12113_s29 = sphi %s12191_s29, %s15814_s29  }
   0x8   : > { %s8938_s13 = sadd.s32 4294967294, %s12125_s11   ;;  %p48_p0 = scmp.ne.s32.totalorder %s12117_s30, %s12113_s29 }
   0x9   : > { %p15258_p1 = scmp.eq.s32.totalorder %s12212_s12, 0  ;;  %p225_p3 = scmp.eq.s32.totalorder %s8938_s13, 1 }
   0xa   : > { %p8939_p5 = scmp.ge.s32.totalorder %s12125_s11, 1  ;;  %p232_p7 = scmp.lt.s32.totalorder %s12125_s11, 3 }
   0xb   : > { %p12221_p4 = por %p15258_p1, %p48_p0  ;;  %p12226_p6 = por %p225_p3, %p48_p0 }
   0xc   : > { %p12231_p8 = pnand %p8939_p5, %p232_p7  ;;  %s12127_s17 = smov [#allocation7]  }
   0xd   : > { %s15397_s14 = scalar_select %p12221_p4, 1, 0 }
   0xe   : > { %s15398_s15 = scalar_select %p12226_p6, 1, 0 }
   0xf   : > { %s15400_s16 = scalar_select %p12231_p8, 1, 0 }
  0x10   : > { %15399 = sst [smem:[#allocation19_spill]] %s15398_s15  ;;  %s250_s18 = sshll.u32 %s12127_s17, 4  ;;  %s12235_s18 = int_to_ptr.vmem [resolvable:$true] %s250_s18 }
  0x11   : > { %p10938_p9 = pneg %p12231_p8  ;;  %s12128_s20 = smov [#allocation10]  }
  0x12   : > { %s276_s21 = sshll.u32 %s12128_s20, 4  ;;  %s12129_s22 = smov [#allocation9]   ;;  %s12246_s21 = int_to_ptr.vmem [resolvable:$true] %s276_s21 }
  0x13   : > { %p12242_p11 = pnand %p10938_p9, %p15258_p1  ;;  %s12248_s23 = sshll.u32 %s12129_s22, 4  ;;  %s264_s23 = int_to_ptr.vmem [resolvable:$true] %s12248_s23 }
  0x14   : > { %s11909_s25 = scalar_lea.hbm %s15252_s4, 9216 }
  0x15   : > { %p11910_p12 = scmp.ne.s32.totalorder %s15252_s4, %s11909_s25  ;;  %p12258_p13 = pneg %p12242_p11 }
  0x16   : > { %p11916_p5 = scmp.lt.u32.totalorder %s11909_s25, %s15252_s4 }
  0x17   : > { %p11912_p0 = pnand %p12258_p13, %p11910_p12 }
  0x19   : > { %p11913_p3 = pneg %p11912_p0 }
  0x1b   : > { %p11918_p7 = pnand %p11916_p5, %p11913_p3 }
  0x1d   : > { %11921 = shalt.err (!%p11918_p7)
}
  0x1e   : > { %s11922_s20 = scalar_lea.vmem %s12235_s18, 9216  ;;  %p11930_p2 = scmp.lt.s32.totalorder %s12235_s18, %s12235_s18 }
  0x1f   : > { %p11923_p9 = scmp.ne.s32.totalorder %s12235_s18, %s11922_s20  ;;  %p11931_p6 = scmp.lt.s32.totalorder %s11922_s20, %s11922_s20 }
  0x21   : > { %p11925_p10 = pnand %p11923_p9, %p12258_p13  ;;  %p11932_p12 = por %p11931_p6, %p11930_p2 }
  0x23   : > { %p11926_p1 = pneg %p11925_p10 }
  0x25   : > { %p11933_p0 = pnand %p11932_p12, %p11926_p1 }
  0x27   : > { %11936 = shalt.err (!%p11933_p0)
}
  0x28   : > { %s12130_s22 = smov 192   ;;  %s12131_s24 = smov 12  }
  0x29   : > { %10941 = dma.hbm_to_vmem [thread:$0]  (!%p12242_p11), %s15252_s4, 9216, %s12235_s18, [#allocation8], %s12130_s22, %s12130_s22, %s12131_s24  }
  0x2a   : > { %s11937_s13 = scalar_lea.hbm %s15254_s6, 9216 }
  0x2b   : > { %p11938_p1 = scmp.ne.s32.totalorder %s15254_s6, %s11937_s13  ;;  %p11944_p10 = scmp.lt.u32.totalorder %s11937_s13, %s15254_s6 }
  0x2d   : > { %p11940_p2 = pnand %p11938_p1, %p12258_p13 }
  0x2f   : > { %p11941_p6 = pneg %p11940_p2 }
  0x31   : > { %p11946_p3 = pnand %p11944_p10, %p11941_p6 }
  0x33   : > { %11949 = shalt.err (!%p11946_p3)
}
  0x34   : > { %s11950_s18 = scalar_lea.vmem %s12246_s21, 9216  ;;  %p11958_p12 = scmp.lt.s32.totalorder %s12246_s21, %s12246_s21 }
  0x35   : > { %p11951_p5 = scmp.ne.s32.totalorder %s12246_s21, %s11950_s18  ;;  %p11959_p0 = scmp.lt.s32.totalorder %s11950_s18, %s11950_s18 }
  0x37   : > { %p11953_p7 = pnand %p11951_p5, %p12258_p13  ;;  %p11960_p1 = por %p11959_p0, %p11958_p12 }
  0x39   : > { %p11954_p9 = pneg %p11953_p7 }
  0x3b   : > { %p11961_p2 = pnand %p11960_p1, %p11954_p9 }
  0x3d   : > { %11964 = shalt.err (!%p11961_p2)
}
  0x3e   : > { %10947 = dma.hbm_to_vmem [thread:$0]  (!%p12242_p11), %s15254_s6, 9216, %s12246_s21, [#allocation11], %s12130_s22, %s12130_s22, %s12131_s24  }
  0x3f   : > { %s11965_s26 = scalar_lea.hbm %s15253_s5, 9216 }
  0x40   : > { %p11966_p6 = scmp.ne.s32.totalorder %s15253_s5, %s11965_s26  ;;  %p11972_p5 = scmp.lt.u32.totalorder %s11965_s26, %s15253_s5 }
  0x42   : > { %p11968_p10 = pnand %p11966_p6, %p12258_p13 }
  0x44   : > { %p11969_p3 = pneg %p11968_p10 }
  0x46   : > { %p11974_p7 = pnand %p11972_p5, %p11969_p3 }
  0x48   : > { %11977 = shalt.err (!%p11974_p7)
}
  0x49   : > { %s11978_s18 = scalar_lea.vmem %s264_s23, 9216  ;;  %p11986_p1 = scmp.lt.s32.totalorder %s264_s23, %s264_s23 }
  0x4a   : > { %p11979_p9 = scmp.ne.s32.totalorder %s264_s23, %s11978_s18  ;;  %p11987_p2 = scmp.lt.s32.totalorder %s11978_s18, %s11978_s18 }
  0x4c   : > { %p11981_p12 = pnand %p11979_p9, %p12258_p13  ;;  %p11988_p4 = por %p11987_p2, %p11986_p1 }
  0x4e   : > { %p11982_p0 = pneg %p11981_p12 }
  0x50   : > { %p11989_p8 = pnand %p11988_p4, %p11982_p0 }
  0x52   : > { %11992 = shalt.err (!%p11989_p8)
}
  0x53   : > { %10944 = dma.hbm_to_vmem [thread:$0]  (!%p12242_p11), %s15253_s5, 9216, %s264_s23, [#allocation8], %s12130_s22, %s12130_s22, %s12131_s24  }
  0x54   : > { %s12132_s15 = smov [#allocation12]   ;;  %s11993_s27 = scalar_lea.hbm %s15255_s7, 9216 }
  0x55   : > { %s289_s0 = sshll.u32 %s12132_s15, 4  ;;  %p11994_p4 = scmp.ne.s32.totalorder %s15255_s7, %s11993_s27  ;;  %s290_s0 = int_to_ptr.vmem [resolvable:$true] %s289_s0 }
  0x56   : > { %p12000_p10 = scmp.lt.u32.totalorder %s11993_s27, %s15255_s7 }
  0x57   : > { %p11996_p8 = pnand %p11994_p4, %p12258_p13 }
  0x59   : > { %p11997_p6 = pneg %p11996_p8 }
  0x5b   : > { %p12002_p3 = pnand %p12000_p10, %p11997_p6 }
  0x5d   : > { %12005 = shalt.err (!%p12002_p3)
}
  0x5e   : > { %s12006_s23 = scalar_lea.vmem %s290_s0, 9216  ;;  %p12014_p12 = scmp.lt.s32.totalorder %s290_s0, %s290_s0 }
  0x5f   : > { %p12007_p5 = scmp.ne.s32.totalorder %s290_s0, %s12006_s23  ;;  %p12015_p0 = scmp.lt.s32.totalorder %s12006_s23, %s12006_s23 }
  0x61   : > { %p12009_p7 = pnand %p12007_p5, %p12258_p13  ;;  %p12016_p1 = por %p12015_p0, %p12014_p12 }
  0x63   : > { %p12010_p9 = pneg %p12009_p7 }
  0x65   : > { %p12017_p2 = pnand %p12016_p1, %p12010_p9 }
  0x67   : > { %12020 = shalt.err (!%p12017_p2)
}
  0x68   : > { %10950 = dma.hbm_to_vmem [thread:$0]  (!%p12242_p11), %s15255_s7, 9216, %s290_s0, [#allocation11], %s12130_s22, %s12130_s22, %s12131_s24  }
  0x69   : > { %s12352_s28 = sadd.s32 1, %s12125_s11   ;;  %s35_s19 = sadd.s32 1, %s12121_s10 }
  0x6a   : > { %s32_s15 = ssub.s32 %s12125_s11, %s12352_s28  ;;  %p42_p13 = scmp.ne.s32.totalorder %s12121_s10, %s12117_s30 }
  0x6b   : > { %p33_p4 = scmp.eq.s32.totalorder %s32_s15, 0  ;;  %p43_p8 = scmp.eq.s32.totalorder %s12125_s11, 0 }
  0x6c   : > { %p15403_p6 = scmp.eq.s32.totalorder %s12212_s12, 1  ;;  %p10963_p3 = scmp.lt.s32.totalorder %s12125_s11, 2 }
  0x6d   : > { %s12368_s26 = scalar_select %p33_p4, %s12121_s10, %s35_s19  }
  0x6e   : > { %p12362_p10 = por %p15403_p6, %p42_p13  ;;  %p44_p5 = por %p43_p8, %p42_p13 }
  0x6f   : > { %s306_s27 = sand.u32 1, %s12121_s10   ;;  %s10915_s22 = smul.u32 6144, %s12125_s11 }
  0x70   : > { %s10914_s13 = smul.u32 384, %s306_s27  ;;  %p12372_p11 = pnand %p10963_p3, %p44_p5 }
  0x71   : > { %s12379_s20 = scalar_lea.hbm %s15249_s1, %s10915_s22  ;;  %s12383_s21 = scalar_lea.sflag [#allocation5], %s306_s27 }
  0x72   : > { %s310_s18 = scalar_lea.vmem [#allocation4], %s10914_s13  ;;  %s12021_s29 = scalar_lea.hbm %s12379_s20, 6144 }
  0x73   : > { %s317_s23 = sshll.u32 %s310_s18, 4  ;;  %p12022_p7 = scmp.ne.s32.totalorder %s12379_s20, %s12021_s29  ;;  %s12381_s23 = int_to_ptr.vmem [resolvable:$true] %s317_s23 }
  0x74   : > { %p12023_p9 = pneg %p12372_p11  ;;  %s12026_s22 = scalar_lea.hbm %s15249_s1, 12288 }
  0x75   : > { %p12027_p1 = scmp.lt.u32.totalorder %s12379_s20, %s15249_s1  ;;  %p12028_p2 = scmp.lt.u32.totalorder %s12026_s22, %s12021_s29 }
  0x76   : > { %p12024_p12 = pnand %p12023_p9, %p12022_p7  ;;  %p12030_p4 = scmp.lt.u32.totalorder %s12021_s29, %s12379_s20 }
  0x77   : > { %p12029_p13 = por %p12028_p2, %p12027_p1 }
  0x78   : > { %p12025_p0 = pneg %p12024_p12 }
  0x79   : > { %p12031_p8 = por %p12030_p4, %p12029_p13 }
  0x7b   : > { %p12032_p6 = pnand %p12031_p8, %p12025_p0 }
  0x7d   : > { %12035 = shalt.err (!%p12032_p6)
}
  0x7e   : > { %s12036_s27 = scalar_lea.vmem %s12381_s23, 6144  ;;  %s12133_s13 = smov [#allocation4]  }
  0x7f   : > { %p12037_p3 = scmp.ne.s32.totalorder %s12381_s23, %s12036_s27  ;;  %s12041_s18 = sshll.u32 %s12133_s13, 4  ;;  %s12042_s18 = int_to_ptr.vmem [resolvable:$false] %s12041_s18 }
  0x80   : > { %s12043_s19 = scalar_lea.vmem %s12042_s18, 12288  ;;  %p12044_p12 = scmp.lt.s32.totalorder %s12381_s23, %s12042_s18 }
  0x81   : > { %p12039_p5 = pnand %p12037_p3, %p12023_p9  ;;  %p12045_p1 = scmp.lt.s32.totalorder %s12043_s19, %s12036_s27 }
  0x83   : > { %p12040_p7 = pneg %p12039_p5  ;;  %p12046_p2 = por %p12045_p1, %p12044_p12 }
  0x85   : > { %p12047_p13 = pnand %p12046_p2, %p12040_p7 }
  0x87   : > { %12050 = shalt.err (!%p12047_p13)
}
  0x88   : > { %s12134_s29 = smov 384   ;;  %s12135_s15 = smov 24  }
  0x89   : > { %10954 = dma.hbm_to_vmem [thread:$0]  (!%p12372_p11), %s12379_s20, 6144, %s12381_s23, %s12383_s21, %s12134_s29, %s12134_s29, %s12135_s15  }
  0x8a   : > { %p15406_p9 = scmp.ne.s32.totalorder %s15400_s16, 0 }
  0x8c   : > { %329 = sbr.rel (%p15406_p9) target bundleno = 5549 (0x15ad), region = 52 }
  0x93   : > { %s12414_s22 = sand.u32 1, %s12117_s30   ;;  %p15407_p0 = scmp.ne.s32.totalorder %s15397_s14, 0 }
  0x94   : > { %s10916_s0 = smul.u32 384, %s12414_s22  ;;  %s332_s17 = scalar_lea.sflag [#allocation5], %s12414_s22 }
  0x96   : > { %s12420_s27 = scalar_lea.vmem [#allocation4], %s10916_s0 }
  0x97   : > { %12096 = dma.done.wait (%p15407_p0), %s332_s17, 6144  }
  0x98   : > { %12098 = vsyncadd (%p15407_p0), %s332_s17, 4294961152  ;;  %p15408_p11 = scmp.eq.s32.totalorder %s12212_s12, 0 }
  0x9a   : > { %12100 = dma.done.wait (%p15408_p11), [#allocation8], 18432   ;;  %p15409_p4 = pmov %p15408_p11 }
  0x9c   : > { %12102 = vsyncadd (%p15409_p4), [#allocation8], 4294948864  ;;  %p15410_p8 = pmov %p15409_p4 }
  0x9d   : > { %p15411_p6 = pmov %p15409_p4 }
  0x9e   : > { %12104 = dma.done.wait (%p15410_p8), [#allocation11], 18432  }
  0x9f   : > { %12106 = vsyncadd (%p15411_p6), [#allocation11], 4294948864  ;;  %v385_v0 = vld [vmem:[%s12420_s27] sm:$0xff]  ;;  %v386_v1 = vld [vmem:[%s12420_s27 + $0x8] sm:$0xff]  ;;  %vm15314_vm0 = vcmask 523264   ;;  %s12137_s23 = smov 64  }
  0xa0   : > { %v387_v2 = vld [vmem:[%s12420_s27 + $0x10] sm:$0xff]  ;;  %v433_v3 = vadd.f32 %v386_v1, %v385_v0  ;;  %v392_v5 = vld [vmem:[%s12420_s27 + $0x38] sm:$0xff]  ;;  %v393_v6 = vld [vmem:[%s12420_s27 + $0x40] sm:$0xff]  ;;  %s15061_s18 = scalar_lea.vmem [#allocation13], %s10916_s0  ;;  %s10917_s19 = smul.u32 6144, %s12212_s12 }
  0xa1   : > { %v391_v4 = vld [vmem:[%s12420_s27 + $0x30] sm:$0xff]  ;;  %v388_v8 = vld [vmem:[%s12420_s27 + $0x18] sm:$0xff]  ;;  %v389_v9 = vld [vmem:[%s12420_s27 + $0x20] sm:$0xff]  ;;  %s8827_s29 = sshll.u32 %s15061_s18, 4  ;;  %s8814_s17 = scalar_lea.sflag [#allocation6], %s12414_s22  ;;  %s15202_s29 = int_to_ptr.vmem [resolvable:$true] %s8827_s29 }
  0xa2   : > { %v441_v7 = vadd.f32 %v392_v5, %v391_v4  ;;  %v390_v10 = vld [vmem:[%s12420_s27 + $0x28] sm:$0xff]  ;;  %v434_v11 = vadd.f32 %v433_v3, %v387_v2  ;;  %v437_v12 = vadd.f32 %v389_v9, %v388_v8  ;;  %v395_v14 = vld [vmem:[%s12420_s27 + $0x50] sm:$0xff]  ;;  %v396_v15 = vld [vmem:[%s12420_s27 + $0x58] sm:$0xff]  ;;  %s15198_s0 = scalar_lea.hbm %s15257_s9, %s10917_s19  ;;  %s12051_s14 = scalar_lea.vmem %s15202_s29, 6144 }
  0xa3   : > { %v394_v13 = vld [vmem:[%s12420_s27 + $0x48] sm:$0xff]  ;;  %v397_v18 = vld [vmem:[%s12420_s27 + $0x60] sm:$0xff]  ;;  %v400_v22 = vld [vmem:[%s12420_s27 + $0x78] sm:$0xff]  ;;  %p12052_p3 = scmp.ne.s32.totalorder %s15202_s29, %s12051_s14  ;;  %s12138_s16 = smov [#allocation13]  }
  0xa4   : > { %v442_v16 = vadd.f32 %v441_v7, %v393_v6  ;;  %v445_v17 = vadd.f32 %v395_v14, %v394_v13  ;;  %v398_v19 = vld [vmem:[%s12420_s27 + $0x68] sm:$0xff]  ;;  %435 = vadd.xlane.f32.xlu0 %v434_v11  ;;  %v438_v20 = vadd.f32 %v437_v12, %v390_v10  ;;  %v401_v23 = vld [vmem:[%s12420_s27 + $0x80] sm:$0xff]  ;;  %v399_v25 = vld [vmem:[%s12420_s27 + $0x70] sm:$0xff]  ;;  %s12055_s24 = sshll.u32 %s12138_s16, 4  ;;  %s12056_s24 = int_to_ptr.vmem [resolvable:$false] %s12055_s24 }
  0xa5   : > { %v449_v21 = vadd.f32 %v398_v19, %v397_v18  ;;  %v453_v26 = vadd.f32 %v401_v23, %v400_v22  ;;  %v403_v27 = vld [vmem:[%s12420_s27 + $0x90] sm:$0xff]  ;;  %v404_v28 = vld [vmem:[%s12420_s27 + $0x98] sm:$0xff]  ;;  %v402_v29 = vld [vmem:[%s12420_s27 + $0x88] sm:$0xff]  ;;  %p12053_p5 = pnand %p12052_p3, %p12362_p10  ;;  %s12057_s20 = scalar_lea.vmem %s12056_s24, 12288 }
  0xa6   : > { %443 = vadd.xlane.f32.xlu1 %v442_v16  ;;  %v446_v24 = vadd.f32 %v445_v17, %v396_v15  ;;  %v406_v30 = vld [vmem:[%s12420_s27 + $0xa8] sm:$0xff]  ;;  %v407_v31 = vld [vmem:[%s12420_s27 + $0xb0] sm:$0xff]  ;;  %v457_v33 = vadd.f32 %v404_v28, %v403_v27  ;;  %v405_v35 = vld [vmem:[%s12420_s27 + $0xa0] sm:$0xff]  ;;  %p12058_p12 = scmp.lt.s32.totalorder %s15202_s29, %s12056_s24  ;;  %p12059_p1 = scmp.lt.s32.totalorder %s12057_s20, %s12051_s14 }
  0xa7   : > { %v450_v32 = vadd.f32 %v449_v21, %v399_v25  ;;  %v454_v34 = vadd.f32 %v453_v26, %v402_v29  ;;  %v461_v36 = vadd.f32 %v407_v31, %v406_v30  ;;  %v409_v37 = vld [vmem:[%s12420_s27 + $0xc0] sm:$0xff]  ;;  %v410_v38 = vld [vmem:[%s12420_s27 + $0xc8] sm:$0xff]  ;;  %v408_v39 = vld [vmem:[%s12420_s27 + $0xb8] sm:$0xff]  ;;  %p12054_p7 = pneg %p12053_p5 }
  0xa8   : > { %439 = vadd.xlane.f32.xlu0 %v438_v20  ;;  %v412_v40 = vld [vmem:[%s12420_s27 + $0xd8] sm:$0xff]  ;;  %v413_v41 = vld [vmem:[%s12420_s27 + $0xe0] sm:$0xff]  ;;  %v458_v42 = vadd.f32 %v457_v33, %v405_v35  ;;  %v465_v43 = vadd.f32 %v410_v38, %v409_v37  ;;  %v411_v45 = vld [vmem:[%s12420_s27 + $0xd0] sm:$0xff]  ;;  %p12060_p2 = por %p12059_p1, %p12058_p12 }
  0xa9   : > { %v462_v44 = vadd.f32 %v461_v36, %v408_v39  ;;  %v469_v46 = vadd.f32 %v413_v41, %v412_v40  ;;  %v415_v47 = vld [vmem:[%s12420_s27 + $0xf0] sm:$0xff]  ;;  %v416_v48 = vld [vmem:[%s12420_s27 + $0xf8] sm:$0xff]  ;;  %v414_v49 = vld [vmem:[%s12420_s27 + $0xe8] sm:$0xff] }
  0xaa   : > { %447 = vadd.xlane.f32.xlu1 %v446_v24  ;;  %v418_v50 = vld [vmem:[%s12420_s27 + $0x108] sm:$0xff]  ;;  %v419_v51 = vld [vmem:[%s12420_s27 + $0x110] sm:$0xff]  ;;  %v417_v52 = vld [vmem:[%s12420_s27 + $0x100] sm:$0xff]  ;;  %v466_v55 = vadd.f32 %v465_v43, %v411_v45  ;;  %v473_v56 = vadd.f32 %v416_v48, %v415_v47  ;;  %p12061_p13 = pnand %p12060_p2, %p12054_p7 }
  0xab   : > { %v421_v53 = vld [vmem:[%s12420_s27 + $0x120] sm:$0xff]  ;;  %v422_v54 = vld [vmem:[%s12420_s27 + $0x128] sm:$0xff]  ;;  %v420_v57 = vld [vmem:[%s12420_s27 + $0x118] sm:$0xff]  ;;  %v470_v60 = vadd.f32 %v469_v46, %v414_v49  ;;  %v477_v61 = vadd.f32 %v419_v51, %v418_v50 }
  0xac   : > { %451 = vadd.xlane.f32.xlu0 %v450_v32  ;;  %v424_v58 = vld [vmem:[%s12420_s27 + $0x138] sm:$0xff]  ;;  %v425_v59 = vld [vmem:[%s12420_s27 + $0x140] sm:$0xff]  ;;  %v423_v62 = vld [vmem:[%s12420_s27 + $0x130] sm:$0xff]  ;;  %v474_v1 = vadd.f32 %v473_v56, %v417_v52  ;;  %v481_v2 = vadd.f32 %v422_v54, %v421_v53 }
  0xad   : > { %v427_v63 = vld [vmem:[%s12420_s27 + $0x150] sm:$0xff]  ;;  %v428_v0 = vld [vmem:[%s12420_s27 + $0x158] sm:$0xff]  ;;  %v426_v3 = vld [vmem:[%s12420_s27 + $0x148] sm:$0xff]  ;;  %v478_v6 = vadd.f32 %v477_v61, %v420_v57  ;;  %v485_v7 = vadd.f32 %v425_v59, %v424_v58 }
  0xae   : > { %455 = vadd.xlane.f32.xlu1 %v454_v34  ;;  %v430_v4 = vld [vmem:[%s12420_s27 + $0x168] sm:$0xff]  ;;  %v431_v5 = vld [vmem:[%s12420_s27 + $0x170] sm:$0xff]  ;;  %v429_v8 = vld [vmem:[%s12420_s27 + $0x160] sm:$0xff]  ;;  %v482_v9 = vadd.f32 %v481_v2, %v423_v62  ;;  %v489_v10 = vadd.f32 %v428_v0, %v427_v63 }
  0xaf   : > { %v432_v11 = vld [vmem:[%s12420_s27 + $0x178] sm:$0xff]  ;;  %v486_v12 = vadd.f32 %v485_v7, %v426_v3  ;;  %v493_v13 = vadd.f32 %v431_v5, %v430_v4  ;;  %v11013_v16 = vld [vmem:[#allocation7 + $0x4] ss:$12 sps:$4 sm:$0xff]   ;;  %v11015_v17 = vld [vmem:[#allocation7] ss:$12 sps:$4 sm:$0xff]  }
  0xb0   : > { %459 = vadd.xlane.f32.xlu0 %v458_v42  ;;  %v490_v14 = vadd.f32 %v489_v10, %v429_v8  ;;  %v11016_v18 = vld [vmem:[#allocation7 + $0x1c] ss:$12 sps:$4 sm:$0xff]   ;;  %1404 = vmatprep.subr.bf16.mxu0 %v11013_v16  ;;  %v11018_v19 = vld [vmem:[#allocation7 + $0x18] ss:$12 sps:$4 sm:$0xff]   ;;  %v11019_v20 = vld [vmem:[#allocation7 + $0x34] ss:$12 sps:$4 sm:$0xff]  }
  0xb1   : > { %v494_v15 = vadd.f32 %v493_v13, %v432_v11  ;;  %1405 = vmatpush1.bf16.msra.mxu0 %v11015_v17  ;;  %v11021_v21 = vld [vmem:[#allocation7 + $0x30] ss:$12 sps:$4 sm:$0xff]   ;;  %v11039_v22 = vld [vmem:[#allocation7 + $0xc8] ss:$12 sps:$4 sm:$0xff]   ;;  %v11022_v23 = vld [vmem:[#allocation7 + $0x4c] ss:$12 sps:$4 sm:$0xff]  }
  0xb2   : > { %463 = vadd.xlane.f32.xlu1 %v462_v44  ;;  %1406 = vmatprep.subr.bf16.mxu0 %v11016_v18  ;;  %v11041_v24 = vld [vmem:[#allocation7 + $0x8] ss:$12 sps:$4 sm:$0xff]   ;;  %v11025_v26 = vld [vmem:[#allocation7 + $0x64] ss:$12 sps:$4 sm:$0xff]   ;;  %v11027_v27 = vld [vmem:[#allocation7 + $0x60] ss:$12 sps:$4 sm:$0xff]  }
  0xb3   : > { %9386 = vmatprep.subr.bf16.mxu1 %v11039_v22  ;;  %v11024_v25 = vld [vmem:[#allocation7 + $0x48] ss:$12 sps:$4 sm:$0xff]   ;;  %v11030_v29 = vld [vmem:[#allocation7 + $0x78] ss:$12 sps:$4 sm:$0xff]   ;;  %v11033_v31 = vld [vmem:[#allocation7 + $0x90] ss:$12 sps:$4 sm:$0xff]  }
  0xb4   : > { %467 = vadd.xlane.f32.xlu0 %v466_v55  ;;  %9387 = vmatpush3.bf16.msra.mxu1 %v11041_v24  ;;  %v11028_v28 = vld [vmem:[#allocation7 + $0x7c] ss:$12 sps:$4 sm:$0xff]   ;;  %v11031_v30 = vld [vmem:[#allocation7 + $0x94] ss:$12 sps:$4 sm:$0xff]   ;;  %v11034_v32 = vld [vmem:[#allocation7 + $0xac] ss:$12 sps:$4 sm:$0xff]  }
  0xb5   : > { %1407 = vmatpush1.bf16.msra.mxu0 %v11018_v19  ;;  %v11036_v33 = vld [vmem:[#allocation7 + $0xa8] ss:$12 sps:$4 sm:$0xff]   ;;  %v11037_v34 = vld [vmem:[#allocation7 + $0xc4] ss:$12 sps:$4 sm:$0xff]   ;;  %v11040_v35 = vld [vmem:[#allocation7 + $0xc0] ss:$12 sps:$4 sm:$0xff]  }
  0xb6   : > { %471 = vadd.xlane.f32.xlu1 %v470_v60  ;;  %1408 = vmatprep.subr.bf16.mxu0 %v11019_v20  ;;  %v11813_v40 = vld [vmem:[%s12420_s27] sm:$0xff]  ;;  %v11814_v42 = vld [vmem:[%s12420_s27 + $0x8] sm:$0xff]  ;;  %v11815_v44 = vld [vmem:[%s12420_s27 + $0x10] sm:$0xff] }
  0xb7   : > { %v11816_v46 = vld [vmem:[%s12420_s27 + $0x30] sm:$0xff]  ;;  %v11817_v48 = vld [vmem:[%s12420_s27 + $0x38] sm:$0xff]  ;;  %v11818_v51 = vld [vmem:[%s12420_s27 + $0x40] sm:$0xff] }
  0xb8   : > { %475 = vadd.xlane.f32.xlu0 %v474_v1  ;;  %v11819_v62 = vld [vmem:[%s12420_s27 + $0x18] sm:$0xff]  ;;  %v11820_v0 = vld [vmem:[%s12420_s27 + $0x20] sm:$0xff]  ;;  %v11821_v3 = vld [vmem:[%s12420_s27 + $0x28] sm:$0xff] }
  0xb9   : > { %1409 = vmatpush1.bf16.msra.mxu0 %v11021_v21  ;;  %v11822_v5 = vld [vmem:[%s12420_s27 + $0x48] sm:$0xff]  ;;  %v11823_v7 = vld [vmem:[%s12420_s27 + $0x50] sm:$0xff]  ;;  %v11824_v11 = vld [vmem:[%s12420_s27 + $0x58] sm:$0xff] }
  0xba   : > { %479 = vadd.xlane.f32.xlu1 %v478_v6  ;;  %1410 = vmatprep.subr.bf16.mxu0 %v11022_v23  ;;  %v11825_v22 = vld [vmem:[%s12420_s27 + $0x60] sm:$0xff]  ;;  %v11826_v24 = vld [vmem:[%s12420_s27 + $0x68] sm:$0xff] }
  0xbc   : > { %483 = vadd.xlane.f32.xlu0 %v482_v9 }
  0xbd   : > { %1411 = vmatpush1.bf16.msra.mxu0 %v11024_v25 }
  0xbe   : > { %487 = vadd.xlane.f32.xlu1 %v486_v12  ;;  %1412 = vmatprep.subr.bf16.mxu0 %v11025_v26 }
  0xc0   : > { %491 = vadd.xlane.f32.xlu0 %v490_v14 }
  0xc1   : > { %1413 = vmatpush1.bf16.msra.mxu0 %v11027_v27 }
  0xc2   : > { %495 = vadd.xlane.f32.xlu1 %v494_v15  ;;  %1414 = vmatprep.subr.bf16.mxu0 %v11028_v28  ;;  %v11827_v28 = vld [vmem:[%s12420_s27 + $0x78] sm:$0xff] }
  0xc5   : > { %1415 = vmatpush1.bf16.msra.mxu0 %v11030_v29 }
  0xc6   : > { %1416 = vmatprep.subr.bf16.mxu0 %v11031_v30  ;;  %v11828_v30 = vld [vmem:[%s12420_s27 + $0x80] sm:$0xff] }
  0xc9   : > { %1417 = vmatpush1.bf16.msra.mxu0 %v11033_v31 }
  0xca   : > { %1418 = vmatprep.subr.bf16.mxu0 %v11034_v32 }
  0xcd   : > { %1419 = vmatpush1.bf16.msra.mxu0 %v11036_v33 }
  0xce   : > { %1420 = vmatprep.subr.bf16.mxu0 %v11037_v34  ;;  %v11829_v34 = vld [vmem:[%s12420_s27 + $0x70] sm:$0xff] }
  0xd1   : > { %1421 = vmatpush1.bf16.msra.mxu0 %v11040_v35 }
 0x131   : > { %v436_v36 = vpop.xlane.xlu0 %435 }
 0x132   : > { %v498_v37 = vmul.f32 0.0026041667, %v436_v36 }
 0x133   : > { %v444_v38 = vpop.xlane.xlu1 %443 }
 0x134   : > { %v500_v39 = vmul.f32 0.0026041667, %v444_v38  ;;  %v12483_v41 = vsub.f32 %v11813_v40, %v498_v37  ;;  %v12486_v43 = vsub.f32 %v11814_v42, %v498_v37  ;;  %v12489_v45 = vsub.f32 %v11815_v44, %v498_v37 }
 0x135   : > { %v440_v50 = vpop.xlane.xlu0 %439 }
 0x136   : > { %v12492_v47 = vsub.f32 %v11816_v46, %v500_v39  ;;  %v12495_v49 = vsub.f32 %v11817_v48, %v500_v39  ;;  %v12498_v52 = vsub.f32 %v11818_v51, %v500_v39  ;;  %v499_v53 = vmul.f32 0.0026041667, %v440_v50  ;;  %v11830_v48 = vld [vmem:[%s12420_s27 + $0x88] sm:$0xff]  ;;  %v11831_v51 = vld [vmem:[%s12420_s27 + $0x90] sm:$0xff] }
 0x137   : > { %v448_v54 = vpop.xlane.xlu1 %447  ;;  %v562_v55 = vmul.f32 %v12483_v41, %v12483_v41  ;;  %v563_v56 = vmul.f32 %v12486_v43, %v12486_v43  ;;  %v564_v57 = vmul.f32 %v12489_v45, %v12489_v45 }
 0x138   : > { %v501_v58 = vmul.f32 0.0026041667, %v448_v54  ;;  %v568_v59 = vmul.f32 %v12492_v47, %v12492_v47  ;;  %v569_v60 = vmul.f32 %v12495_v49, %v12495_v49  ;;  %v570_v61 = vmul.f32 %v12498_v52, %v12498_v52  ;;  %v11832_v54 = vld [vmem:[%s12420_s27 + $0x98] sm:$0xff] }
 0x139   : > { %v12513_v63 = vsub.f32 %v11819_v62, %v499_v53  ;;  %v12516_v1 = vsub.f32 %v11820_v0, %v499_v53  ;;  %v610_v2 = vadd.f32 %v563_v56, %v562_v55  ;;  %v12519_v4 = vsub.f32 %v11821_v3, %v499_v53  ;;  %v452_v9 = vpop.xlane.xlu0 %451 }
 0x13a   : > { %v12522_v6 = vsub.f32 %v11822_v5, %v501_v58  ;;  %v12525_v8 = vsub.f32 %v11823_v7, %v501_v58  ;;  %v618_v10 = vadd.f32 %v569_v60, %v568_v59  ;;  %v12528_v12 = vsub.f32 %v11824_v11, %v501_v58  ;;  %v11834_v59 = vld [vmem:[%s12420_s27 + $0xb0] sm:$0xff] }
 0x13b   : > { %v502_v13 = vmul.f32 0.0026041667, %v452_v9  ;;  %v611_v14 = vadd.f32 %v610_v2, %v564_v57  ;;  %v456_v15 = vpop.xlane.xlu1 %455  ;;  %v565_v16 = vmul.f32 %v12513_v63, %v12513_v63  ;;  %v566_v17 = vmul.f32 %v12516_v1, %v12516_v1  ;;  %v11833_v57 = vld [vmem:[%s12420_s27 + $0xa8] sm:$0xff]  ;;  %v11835_v9 = vld [vmem:[%s12420_s27 + $0xa0] sm:$0xff] }
 0x13c   : > { %v503_v18 = vmul.f32 0.0026041667, %v456_v15  ;;  %v619_v19 = vadd.f32 %v618_v10, %v570_v61  ;;  %v567_v20 = vmul.f32 %v12519_v4, %v12519_v4  ;;  %v571_v21 = vmul.f32 %v12522_v6, %v12522_v6 }
 0x13d   : > { %v12539_v23 = vsub.f32 %v11825_v22, %v502_v13  ;;  %v12542_v25 = vsub.f32 %v11826_v24, %v502_v13  ;;  %612 = vadd.xlane.f32.xlu0 %v611_v14  ;;  %v614_v26 = vadd.f32 %v566_v17, %v565_v16  ;;  %v572_v27 = vmul.f32 %v12525_v8, %v12525_v8  ;;  %v460_v32 = vpop.xlane.xlu0 %459  ;;  %v11836_v16 = vld [vmem:[%s12420_s27 + $0xc0] sm:$0xff]  ;;  %v11838_v22 = vld [vmem:[%s12420_s27 + $0xd8] sm:$0xff] }
 0x13e   : > { %v12547_v29 = vsub.f32 %v11827_v28, %v503_v18  ;;  %v12550_v31 = vsub.f32 %v11828_v30, %v503_v18  ;;  %v573_v33 = vmul.f32 %v12528_v12, %v12528_v12  ;;  %v12555_v35 = vsub.f32 %v11829_v34, %v502_v13 }
 0x13f   : > { %v504_v36 = vmul.f32 0.0026041667, %v460_v32  ;;  %v615_v37 = vadd.f32 %v614_v26, %v567_v20  ;;  %v464_v38 = vpop.xlane.xlu1 %463  ;;  %v622_v39 = vadd.f32 %v572_v27, %v571_v21  ;;  %v574_v40 = vmul.f32 %v12539_v23, %v12539_v23  ;;  %v11839_v26 = vld [vmem:[%s12420_s27 + $0xe0] sm:$0xff]  ;;  %v11840_v32 = vld [vmem:[%s12420_s27 + $0xb8] sm:$0xff] }
 0x140   : > { %v505_v42 = vmul.f32 0.0026041667, %v464_v38  ;;  %v575_v44 = vmul.f32 %v12542_v25, %v12542_v25  ;;  %v576_v46 = vmul.f32 %v12555_v35, %v12555_v35  ;;  %v12564_v50 = vsub.f32 %v11830_v48, %v503_v18  ;;  %v11837_v18 = vld [vmem:[%s12420_s27 + $0xc8] sm:$0xff]  ;;  %v11841_v48 = vld [vmem:[%s12420_s27 + $0xd0] sm:$0xff] }
 0x141   : > { %v12567_v53 = vsub.f32 %v11831_v51, %v504_v36  ;;  %v12570_v55 = vsub.f32 %v11832_v54, %v504_v36  ;;  %620 = vadd.xlane.f32.xlu0 %v619_v19  ;;  %616 = vadd.xlane.f32.xlu1 %v615_v37  ;;  %v623_v56 = vadd.f32 %v622_v39, %v573_v33  ;;  %v468_v61 = vpop.xlane.xlu0 %467 }
 0x142   : > { %v12573_v58 = vsub.f32 %v11833_v57, %v505_v42  ;;  %v12576_v60 = vsub.f32 %v11834_v59, %v505_v42  ;;  %v626_v62 = vadd.f32 %v575_v44, %v574_v40  ;;  %v577_v0 = vmul.f32 %v12547_v29, %v12547_v29 }
 0x143   : > { %v506_v2 = vmul.f32 0.0026041667, %v468_v61  ;;  %v472_v3 = vpop.xlane.xlu1 %471  ;;  %v578_v5 = vmul.f32 %v12550_v31, %v12550_v31  ;;  %v579_v7 = vmul.f32 %v12564_v50, %v12564_v50  ;;  %v12585_v10 = vsub.f32 %v11835_v9, %v504_v36 }
 0x144   : > { %v627_v11 = vadd.f32 %v626_v62, %v576_v46  ;;  %v507_v13 = vmul.f32 0.0026041667, %v472_v3  ;;  %v580_v14 = vmul.f32 %v12567_v53, %v12567_v53  ;;  %v581_v15 = vmul.f32 %v12570_v55, %v12570_v55  ;;  %v11844_v62 = vld [vmem:[%s12420_s27 + $0x108] sm:$0xff]  ;;  %v11845_v3 = vld [vmem:[%s12420_s27 + $0x110] sm:$0xff] }
 0x145   : > { %v12592_v17 = vsub.f32 %v11836_v16, %v506_v2  ;;  %v12595_v19 = vsub.f32 %v11837_v18, %v506_v2  ;;  %624 = vadd.xlane.f32.xlu1 %v623_v56  ;;  %v630_v20 = vadd.f32 %v578_v5, %v577_v0  ;;  %v582_v21 = vmul.f32 %v12585_v10, %v12585_v10  ;;  %v476_v28 = vpop.xlane.xlu0 %475  ;;  %v11843_v56 = vld [vmem:[%s12420_s27 + $0xf8] sm:$0xff]  ;;  %v11846_v16 = vld [vmem:[%s12420_s27 + $0xe8] sm:$0xff] }
 0x146   : > { %628 = vadd.xlane.f32.xlu0 %v627_v11  ;;  %v12600_v24 = vsub.f32 %v11838_v22, %v507_v13  ;;  %v12603_v27 = vsub.f32 %v11839_v26, %v507_v13  ;;  %v634_v30 = vadd.f32 %v581_v15, %v580_v14  ;;  %v12606_v33 = vsub.f32 %v11840_v32, %v505_v42  ;;  %v11842_v42 = vld [vmem:[%s12420_s27 + $0xf0] sm:$0xff]  ;;  %v11848_v32 = vld [vmem:[%s12420_s27 + $0x120] sm:$0xff] }
 0x147   : > { %v508_v34 = vmul.f32 0.0026041667, %v476_v28  ;;  %v631_v36 = vadd.f32 %v630_v20, %v579_v7  ;;  %v480_v37 = vpop.xlane.xlu1 %479  ;;  %v583_v38 = vmul.f32 %v12573_v58, %v12573_v58  ;;  %v584_v39 = vmul.f32 %v12576_v60, %v12576_v60  ;;  %v11847_v28 = vld [vmem:[%s12420_s27 + $0x100] sm:$0xff] }
 0x148   : > { %v635_v40 = vadd.f32 %v634_v30, %v582_v21  ;;  %v509_v44 = vmul.f32 0.0026041667, %v480_v37  ;;  %v585_v46 = vmul.f32 %v12606_v33, %v12606_v33  ;;  %v12615_v51 = vsub.f32 %v11841_v48, %v506_v2  ;;  %v11849_v37 = vld [vmem:[%s12420_s27 + $0x128] sm:$0xff] }
 0x149   : > { %v12618_v54 = vsub.f32 %v11842_v42, %v508_v34  ;;  %v12621_v57 = vsub.f32 %v11843_v56, %v508_v34  ;;  %632 = vadd.xlane.f32.xlu1 %v631_v36  ;;  %v638_v59 = vadd.f32 %v584_v39, %v583_v38  ;;  %v586_v61 = vmul.f32 %v12592_v17, %v12592_v17  ;;  %v484_v5 = vpop.xlane.xlu0 %483  ;;  %v11850_v42 = vld [vmem:[%s12420_s27 + $0x138] sm:$0xff]  ;;  %v11851_v56 = vld [vmem:[%s12420_s27 + $0x140] sm:$0xff] }
 0x14a   : > { %15412 = vst [vmem:[#allocation20_spill] sm:$0xff] %v12615_v51  ;;  %636 = vadd.xlane.f32.xlu0 %v635_v40  ;;  %v12626_v0 = vsub.f32 %v11844_v62, %v509_v44  ;;  %v12629_v2 = vsub.f32 %v11845_v3, %v509_v44  ;;  %v587_v7 = vmul.f32 %v12595_v19, %v12595_v19  ;;  %v510_v11 = vmul.f32 0.0026041667, %v484_v5  ;;  %v11042_v40 = vld [vmem:[#allocation7 + $0xdc] ss:$12 sps:$4 sm:$0xff]  }
 0x14b   : > { %v588_v9 = vmul.f32 %v12615_v51, %v12615_v51  ;;  %v639_v14 = vadd.f32 %v638_v59, %v585_v46  ;;  %v488_v15 = vpop.xlane.xlu1 %487  ;;  %v12636_v18 = vsub.f32 %v11846_v16, %v507_v13  ;;  %v589_v20 = vmul.f32 %v12600_v24, %v12600_v24  ;;  %v11044_v46 = vld [vmem:[#allocation7 + $0xe0] ss:$12 sps:$4 sm:$0xff]   ;;  %v11045_v3 = vld [vmem:[#allocation7 + $0xd8] ss:$12 sps:$4 sm:$0xff]   ;;  %1422 = vmatprep.subr.bf16.mxu0 %v11042_v40 }
 0x14c   : > { %v642_v21 = vadd.f32 %v587_v7, %v586_v61  ;;  %v511_v22 = vmul.f32 0.0026041667, %v488_v15  ;;  %v590_v26 = vmul.f32 %v12603_v27, %v12603_v27  ;;  %v12643_v30 = vsub.f32 %v11847_v28, %v508_v34  ;;  %v11046_v5 = vld [vmem:[#allocation7 + $0x20] ss:$12 sps:$4 sm:$0xff]   ;;  %v11852_v16 = vld [vmem:[%s12420_s27 + $0x118] sm:$0xff]  ;;  %9388 = vmatprep.subr.bf16.mxu1 %v11044_v46  ;;  %1423 = vmatpush1.bf16.msra.mxu0 %v11045_v3  ;;  %v11856_v3 = vld [vmem:[%s12420_s27 + $0x170] sm:$0xff] }
 0x14d   : > { %15413 = vst [vmem:[#allocation21_spill] sm:$0xff] %v12636_v18  ;;  %v12646_v36 = vsub.f32 %v11848_v32, %v510_v11  ;;  %v12649_v38 = vsub.f32 %v11849_v37, %v510_v11  ;;  %640 = vadd.xlane.f32.xlu1 %v639_v14  ;;  %v591_v13 = vmul.f32 %v12636_v18, %v12636_v18  ;;  %v492_v61 = vpop.xlane.xlu0 %491  ;;  %v11853_v37 = vld [vmem:[%s12420_s27 + $0x150] sm:$0xff]  ;;  %v11860_v51 = vld [vmem:[%s12420_s27 + $0x178] sm:$0xff] }
 0x14e   : > { %15414 = vst [vmem:[#allocation22_spill] sm:$0xff] %v12643_v30  ;;  %v592_v39 = vmul.f32 %v12618_v54, %v12618_v54  ;;  %v643_v48 = vadd.f32 %v642_v21, %v588_v9  ;;  %v12656_v34 = vsub.f32 %v11850_v42, %v511_v22  ;;  %v12659_v59 = vsub.f32 %v11851_v56, %v511_v22  ;;  %v11047_v46 = vld [vmem:[#allocation7 + $0xf4] ss:$12 sps:$4 sm:$0xff]  }
 0x14f   : > { %15415 = vst [vmem:[#allocation23_spill] sm:$0xff] %v12646_v36  ;;  %v646_v62 = vadd.f32 %v590_v26, %v589_v20  ;;  %v512_v7 = vmul.f32 0.0026041667, %v492_v61  ;;  %v593_v14 = vmul.f32 %v12621_v57, %v12621_v57  ;;  %v594_v15 = vmul.f32 %v12643_v30, %v12643_v30  ;;  %v496_v9 = vpop.xlane.xlu1 %495  ;;  %9389 = vmatpush3.bf16.msra.mxu1 %v11046_v5  ;;  %v11855_v61 = vld [vmem:[%s12420_s27 + $0x168] sm:$0xff] }
 0x150   : > { %v12666_v21 = vsub.f32 %v11852_v16, %v509_v44  ;;  %644 = vadd.xlane.f32.xlu0 %v643_v48  ;;  %v513_v26 = vmul.f32 0.0026041667, %v496_v9  ;;  %v595_v28 = vmul.f32 %v12626_v0, %v12626_v0  ;;  %v596_v32 = vmul.f32 %v12629_v2, %v12629_v2  ;;  %v11854_v44 = vld [vmem:[%s12420_s27 + $0x158] sm:$0xff]  ;;  %1424 = vmatprep.subr.bf16.mxu0 %v11047_v46 }
 0x151   : > { %v647_v20 = vadd.f32 %v646_v62, %v591_v13  ;;  %v12673_v42 = vsub.f32 %v11853_v37, %v512_v7  ;;  %v12676_v56 = vsub.f32 %v11854_v44, %v512_v7  ;;  %v650_v40 = vadd.f32 %v593_v14, %v592_v39  ;;  %v11049_v48 = vld [vmem:[#allocation7 + $0xf8] ss:$12 sps:$4 sm:$0xff]   ;;  %v11857_v37 = vld [vmem:[%s12420_s27 + $0x130] sm:$0xff]  ;;  %v11858_v14 = vld [vmem:[%s12420_s27 + $0x148] sm:$0xff] }
 0x152   : > { %15416 = vst [vmem:[#allocation24_spill] sm:$0xff] %v12666_v21  ;;  %v597_v13 = vmul.f32 %v12666_v21, %v12666_v21  ;;  %v12681_v62 = vsub.f32 %v11855_v61, %v513_v26  ;;  %v12684_v9 = vsub.f32 %v11856_v3, %v513_v26  ;;  %v654_v16 = vadd.f32 %v596_v32, %v595_v28  ;;  %v11050_v61 = vld [vmem:[#allocation7 + $0xf0] ss:$12 sps:$4 sm:$0xff]   ;;  %v11051_v21 = vld [vmem:[#allocation7 + $0x38] ss:$12 sps:$4 sm:$0xff]  }
 0x153   : > { %15417 = vst [vmem:[#allocation25_spill] sm:$0xff] %v12673_v42  ;;  %15418 = vst [vmem:[#allocation26_spill] sm:$0xff] %v12676_v56  ;;  %648 = vadd.xlane.f32.xlu1 %v647_v20  ;;  %v12687_v30 = vsub.f32 %v11857_v37, %v510_v11  ;;  %v651_v44 = vadd.f32 %v650_v40, %v594_v15  ;;  %v598_v39 = vmul.f32 %v12646_v36, %v12646_v36  ;;  %v11859_v40 = vld [vmem:[%s12420_s27 + $0x160] sm:$0xff]  ;;  %v11054_v37 = vld [vmem:[#allocation7 + $0x110] ss:$12 sps:$4 sm:$0xff]  }
 0x154   : > { %15419 = vst [vmem:[#allocation27_spill] sm:$0xff] %v12681_v62  ;;  %15420 = vst [vmem:[#allocation28_spill] sm:$0xff] %v12684_v9  ;;  %v599_v5 = vmul.f32 %v12649_v38, %v12649_v38  ;;  %v12694_v20 = vsub.f32 %v11858_v14, %v511_v22  ;;  %v655_v3 = vadd.f32 %v654_v16, %v597_v13  ;;  %9390 = vmatprep.subr.bf16.mxu1 %v11049_v48  ;;  %v11052_v16 = vld [vmem:[#allocation7 + $0x10c] ss:$12 sps:$4 sm:$0xff]  }
 0x155   : > { %15421 = vst [vmem:[#allocation29_spill] sm:$0xff] %v12687_v30  ;;  %v600_v11 = vmul.f32 %v12687_v30, %v12687_v30  ;;  %v601_v15 = vmul.f32 %v12656_v34, %v12656_v34  ;;  %v602_v28 = vmul.f32 %v12659_v59, %v12659_v59  ;;  %652 = vadd.xlane.f32.xlu0 %v651_v44  ;;  %v11078_v36 = vld [vmem:[#allocation7 + $0x1a0] ss:$12 sps:$4 sm:$0xff]  }
 0x156   : > { %15422 = vst [vmem:[#allocation30_spill] sm:$0xff] %v12694_v20  ;;  %v658_v32 = vadd.f32 %v599_v5, %v598_v39  ;;  %v603_v22 = vmul.f32 %v12694_v20, %v12694_v20  ;;  %v12705_v46 = vsub.f32 %v11859_v40, %v512_v7  ;;  %v604_v13 = vmul.f32 %v12673_v42, %v12673_v42 }
 0x157   : > { %656 = vadd.xlane.f32.xlu1 %v655_v3  ;;  %v662_v14 = vadd.f32 %v602_v28, %v601_v15  ;;  %v605_v30 = vmul.f32 %v12676_v56, %v12676_v56  ;;  %v12712_v48 = vsub.f32 %v11860_v51, %v513_v26  ;;  %v607_v44 = vmul.f32 %v12681_v62, %v12681_v62  ;;  %v11055_v3 = vld [vmem:[#allocation7 + $0x108] ss:$12 sps:$4 sm:$0xff]   ;;  %v11056_v15 = vld [vmem:[#allocation7 + $0x50] ss:$12 sps:$4 sm:$0xff]  }
 0x158   : > { %15423 = vst [vmem:[#allocation31_spill] sm:$0xff] %v12705_v46  ;;  %v659_v39 = vadd.f32 %v658_v32, %v600_v11  ;;  %v606_v7 = vmul.f32 %v12705_v46, %v12705_v46  ;;  %v608_v5 = vmul.f32 %v12684_v9, %v12684_v9  ;;  %1425 = vmatpush1.bf16.msra.mxu0 %v11050_v61  ;;  %v11057_v11 = vld [vmem:[#allocation7 + $0x124] ss:$12 sps:$4 sm:$0xff]   ;;  %v11059_v32 = vld [vmem:[#allocation7 + $0x128] ss:$12 sps:$4 sm:$0xff]  }
 0x159   : > { %15424 = vst [vmem:[#allocation32_spill] sm:$0xff] %v12712_v48  ;;  %9391 = vmatpush3.bf16.msra.mxu1 %v11051_v21  ;;  %v663_v28 = vadd.f32 %v662_v14, %v603_v22  ;;  %v666_v40 = vadd.f32 %v605_v30, %v604_v13  ;;  %v609_v51 = vmul.f32 %v12712_v48, %v12712_v48  ;;  %v11060_v61 = vld [vmem:[#allocation7 + $0x120] ss:$12 sps:$4 sm:$0xff]   ;;  %v11061_v21 = vld [vmem:[#allocation7 + $0x68] ss:$12 sps:$4 sm:$0xff]  }
 0x15a   : > { %1426 = vmatprep.subr.bf16.mxu0 %v11052_v16  ;;  %9392 = vmatprep.subr.bf16.mxu1 %v11054_v37  ;;  %v670_v26 = vadd.f32 %v608_v5, %v607_v44  ;;  %v11062_v30 = vld [vmem:[#allocation7 + $0x13c] ss:$12 sps:$4 sm:$0xff]   ;;  %v11064_v22 = vld [vmem:[#allocation7 + $0x140] ss:$12 sps:$4 sm:$0xff]   ;;  %v11065_v13 = vld [vmem:[#allocation7 + $0x138] ss:$12 sps:$4 sm:$0xff]  }
 0x15b   : > { %660 = vadd.xlane.f32.xlu0 %v659_v39  ;;  %664 = vadd.xlane.f32.xlu1 %v663_v28  ;;  %v667_v46 = vadd.f32 %v666_v40, %v606_v7  ;;  %v11066_v16 = vld [vmem:[#allocation7 + $0x80] ss:$12 sps:$4 sm:$0xff]   ;;  %v11069_v14 = vld [vmem:[#allocation7 + $0x158] ss:$12 sps:$4 sm:$0xff]   ;;  %v11070_v44 = vld [vmem:[#allocation7 + $0x150] ss:$12 sps:$4 sm:$0xff]  }
 0x15c   : > { %v671_v20 = vadd.f32 %v670_v26, %v609_v51  ;;  %1427 = vmatpush1.bf16.msra.mxu0 %v11055_v3  ;;  %v11067_v37 = vld [vmem:[#allocation7 + $0x154] ss:$12 sps:$4 sm:$0xff]   ;;  %v11071_v39 = vld [vmem:[#allocation7 + $0x98] ss:$12 sps:$4 sm:$0xff]   ;;  %v11074_v5 = vld [vmem:[#allocation7 + $0x170] ss:$12 sps:$4 sm:$0xff]   ;;  %v15269_v26 = vlaneseq }
 0x15d   : > { %9393 = vmatpush3.bf16.msra.mxu1 %v11056_v15  ;;  %1428 = vmatprep.subr.bf16.mxu0 %v11057_v11  ;;  %v11072_v7 = vld [vmem:[#allocation7 + $0x16c] ss:$12 sps:$4 sm:$0xff]   ;;  %v12722_v3 = vld [vmem:[#allocation7 + $0x188] ss:$12 sps:$4 sm:$0xff]   ;;  %v11082_v15 = vld [vmem:[#allocation7 + $0x184] ss:$12 sps:$4 sm:$0xff]  }
 0x15e   : > { %9394 = vmatprep.subr.bf16.mxu1 %v11059_v32 }
 0x15f   : > { %668 = vadd.xlane.f32.xlu0 %v667_v46  ;;  %672 = vadd.xlane.f32.xlu1 %v671_v20  ;;  %v11075_v46 = vld [vmem:[#allocation7 + $0x168] ss:$12 sps:$4 sm:$0xff]   ;;  %v11076_v20 = vld [vmem:[#allocation7 + $0xb0] ss:$12 sps:$4 sm:$0xff]  }
 0x160   : > { %1429 = vmatpush1.bf16.msra.mxu0 %v11060_v61 }
 0x161   : > { %9395 = vmatpush3.bf16.msra.mxu1 %v11061_v21  ;;  %1430 = vmatprep.subr.bf16.mxu0 %v11062_v30 }
 0x162   : > { %9396 = vmatprep.subr.bf16.mxu1 %v11064_v22 }
 0x164   : > { %1431 = vmatpush1.bf16.msra.mxu0 %v11065_v13  ;;  %v12726_v13 = vshrl.u32 %v15269_v26, 7 }
 0x165   : > { %9397 = vmatpush3.bf16.msra.mxu1 %v11066_v16  ;;  %1432 = vmatprep.subr.bf16.mxu0 %v11067_v37 }
 0x166   : > { %9398 = vmatprep.subr.bf16.mxu1 %v11069_v14 }
 0x168   : > { %1433 = vmatpush1.bf16.msra.mxu0 %v11070_v44 }
 0x169   : > { %9399 = vmatpush3.bf16.msra.mxu1 %v11071_v39  ;;  %1434 = vmatprep.subr.bf16.mxu0 %v11072_v7  ;;  %v12729_v7 = vsub.s32 1, %v12726_v13 }
 0x16a   : > { %9400 = vmatprep.subr.bf16.mxu1 %v11074_v5  ;;  %v12732_v5 = vsub.s32 0, %v12726_v13 }
 0x16b   : > { %15425 = vst [vmem:[#allocation33_spill] sm:$0xff] %v12729_v7 }
 0x16c   : > { %1435 = vmatpush1.bf16.msra.mxu0 %v11075_v46  ;;  %15426 = vst [vmem:[#allocation34_spill] sm:$0xff] %v12732_v5 }
 0x16d   : > { %9401 = vmatpush3.bf16.msra.mxu1 %v11076_v20  ;;  %1517 = vmatprep.subr.bf16.mxu0 %v11082_v15  ;;  %v12737_v15 = vld [vmem:[%s15250_s2] sm:$0x7] }
 0x16e   : > { %9890 = vmatprep.subr.bf16.mxu1 %v12722_v3 }
 0x1ca   : > { %v613_v28 = vpop.xlane.xlu0 %612 }
 0x1cb   : > { %v674_v40 = vmul.f32 0.0026041667, %v613_v28 }
 0x1cd   : > { %v690_v51 = vadd.f32 1e-05, %v674_v40 }
 0x1ce   : > { %v617_v11 = vpop.xlane.xlu1 %616  ;;  %v621_v32 = vpop.xlane.xlu0 %620 }
 0x1cf   : > { %11397 = vrsqrt.f32 %v690_v51  ;;  %v675_v61 = vmul.f32 0.0026041667, %v617_v11  ;;  %v676_v21 = vmul.f32 0.0026041667, %v621_v32 }
 0x1d1   : > { %v691_v30 = vadd.f32 1e-05, %v675_v61  ;;  %v692_v22 = vadd.f32 1e-05, %v676_v21  ;;  %v12743_v61 = vrot.slane %v12737_v15, %v12729_v7  ;;  %v12748_v21 = vld [vmem:[%s15251_s3] sm:$0x7] }
 0x1d2   : > { %v625_v16 = vpop.xlane.xlu1 %624 }
 0x1d3   : > { %11399 = vrsqrt.f32 %v691_v30  ;;  %v677_v37 = vmul.f32 0.0026041667, %v625_v16  ;;  %v629_v14 = vpop.xlane.xlu0 %628  ;;  %v12752_v30 = vrot.slane %v12737_v15, %v12732_v5 }
 0x1d4   : > { %11401 = vrsqrt.f32 %v692_v22  ;;  %v678_v44 = vmul.f32 0.0026041667, %v629_v14 }
 0x1d5   : > { %v693_v39 = vadd.f32 1e-05, %v677_v37 }
 0x1d6   : > { %v694_v46 = vadd.f32 1e-05, %v678_v44  ;;  %v633_v20 = vpop.xlane.xlu1 %632 }
 0x1d7   : > { %11403 = vrsqrt.f32 %v693_v39  ;;  %v679_v28 = vmul.f32 0.0026041667, %v633_v20  ;;  %v637_v40 = vpop.xlane.xlu0 %636  ;;  %v12760_v39 = vrot.slane %v12748_v21, %v12729_v7 }
 0x1d8   : > { %v680_v51 = vmul.f32 0.0026041667, %v637_v40  ;;  %11405 = vrsqrt.f32 %v694_v46 }
 0x1d9   : > { %v12739_v11 = vpop.eup %11397  ;;  %v695_v32 = vadd.f32 1e-05, %v679_v28 }
 0x1da   : > { %v641_v22 = vpop.xlane.xlu1 %640  ;;  %v723_v16 = vmul.f32 %v12739_v11, %v12486_v43  ;;  %v722_v37 = vmul.f32 %v12739_v11, %v12483_v41  ;;  %v696_v14 = vadd.f32 1e-05, %v680_v51  ;;  %v12768_v43 = vrot.slane %v12748_v21, %v12732_v5 }
 0x1db   : > { %11407 = vrsqrt.f32 %v695_v32  ;;  %v681_v44 = vmul.f32 0.0026041667, %v641_v22 }
 0x1dc   : > { %v788_v40 = vmul.f32 %v12743_v61, %v723_v16  ;;  %v787_v26 = vmul.f32 %v12752_v30, %v722_v37  ;;  %11409 = vrsqrt.f32 %v696_v14 }
 0x1dd   : > { %v12762_v46 = vpop.eup %11399  ;;  %v697_v20 = vadd.f32 1e-05, %v681_v44  ;;  %v645_v28 = vpop.xlane.xlu0 %644 }
 0x1de   : > { %v12770_v41 = vpop.eup %11401  ;;  %v682_v51 = vmul.f32 0.0026041667, %v645_v28  ;;  %v726_v32 = vmul.f32 %v12762_v46, %v12516_v1  ;;  %v725_v22 = vmul.f32 %v12762_v46, %v12513_v63  ;;  %v853_v28 = vadd.f32 %v12760_v39, %v788_v40 }
 0x1df   : > { %v729_v16 = vmul.f32 %v12770_v41, %v12495_v49  ;;  %11411 = vrsqrt.f32 %v697_v20  ;;  %v852_v1 = vadd.f32 %v12768_v43, %v787_v26  ;;  %v728_v63 = vmul.f32 %v12770_v41, %v12492_v47 }
 0x1e0   : > { %v649_v44 = vpop.xlane.xlu1 %648  ;;  %v791_v7 = vmul.f32 %v12743_v61, %v726_v32  ;;  %v790_v5 = vmul.f32 %v12752_v30, %v725_v22  ;;  %v698_v14 = vadd.f32 1e-05, %v682_v51 }
 0x1e1   : > { %v683_v37 = vmul.f32 0.0026041667, %v649_v44  ;;  %v12780_v48 = vpop.eup %11403  ;;  %v794_v40 = vmul.f32 %v12743_v61, %v729_v16 }
 0x1e2   : > { %v653_v42 = vpop.xlane.xlu0 %652  ;;  %v856_v49 = vadd.f32 %v12760_v39, %v791_v7  ;;  %v855_v20 = vadd.f32 %v12768_v43, %v790_v5  ;;  %v12788_v44 = vpop.eup %11405  ;;  %v732_v62 = vmul.f32 %v12780_v48, %v12525_v8  ;;  %v731_v26 = vmul.f32 %v12780_v48, %v12522_v6  ;;  %v11080_v7 = vld [vmem:[#allocation7 + $0x180] ss:$12 sps:$4 sm:$0xff]   ;;  %v11085_v8 = vld [vmem:[#allocation7 + $0x19c] ss:$12 sps:$4 sm:$0xff]  }
 0x1e3   : > { %v699_v18 = vadd.f32 1e-05, %v683_v37  ;;  %v684_v32 = vmul.f32 0.0026041667, %v653_v42  ;;  %v735_v6 = vmul.f32 %v12788_v44, %v12542_v25 }
 0x1e4   : > { %v657_v22 = vpop.xlane.xlu1 %656  ;;  %v12795_v51 = vpack.c.bf16 %v856_v49, %v853_v28  ;;  %v12797_v37 = vpack.c.bf16 %v855_v20, %v852_v1  ;;  %v797_v42 = vmul.f32 %v12743_v61, %v732_v62  ;;  %v796_v5 = vmul.f32 %v12752_v30, %v731_v26  ;;  %v11089_v26 = vld [vmem:[#allocation7 + $0x1b4] ss:$12 sps:$4 sm:$0xff]  }
 0x1e5   : > { %v685_v47 = vmul.f32 0.0026041667, %v657_v22  ;;  %v12799_v56 = vpop.eup %11407  ;;  %11413 = vrsqrt.f32 %v699_v18  ;;  %v700_v9 = vadd.f32 1e-05, %v684_v32  ;;  %v859_v18 = vadd.f32 %v12760_v39, %v794_v40 }
 0x1e6   : > { %1436 = vmatprep.mubr.bf16.mxu0 %v12795_v51  ;;  %1662 = vmatprep.mubr.bf16.mxu1 %v12795_v51  ;;  %v738_v16 = vmul.f32 %v12799_v56, %v12550_v31  ;;  %11415 = vrsqrt.f32 %v698_v14  ;;  %v862_v62 = vadd.f32 %v12760_v39, %v797_v42  ;;  %v793_v28 = vmul.f32 %v12752_v30, %v728_v63  ;;  %v11083_v31 = vld [vmem:[#allocation7 + $0x198] ss:$12 sps:$4 sm:$0xff]   ;;  %v12817_v14 = vpop.eup %11409 }
 0x1e7   : > { %1437 = vmatmul.mubr.bf16.vlgmr.msra.gmra.mrb[0].mxu0 %v12797_v37  ;;  %1663 = vmatmul.mubr.bf16.vlgmr.msra.gmra.mrb[0].mxu1 %v12797_v37  ;;  %v701_v1 = vadd.f32 1e-05, %v685_v47  ;;  %v800_v20 = vmul.f32 %v12743_v61, %v735_v6  ;;  %v861_v22 = vadd.f32 %v12768_v43, %v796_v5  ;;  %v737_v40 = vmul.f32 %v12799_v56, %v12547_v29  ;;  %v11079_v63 = vld [vmem:[#allocation7 + $0x1b8] ss:$12 sps:$4 sm:$0xff]  }
 0x1e8   : > { %v661_v49 = vpop.xlane.xlu0 %660  ;;  %v803_v25 = vmul.f32 %v12743_v61, %v738_v16  ;;  %9891 = vmatpush3.bf16.msra.mxu1 %v12722_v3  ;;  %1518 = vmatpush1.bf16.msra.mxu0 %v11080_v7  ;;  %v12819_v32 = vpack.c.bf16 %v862_v62, %v859_v18  ;;  %11417 = vrsqrt.f32 %v700_v9  ;;  %v665_v42 = vpop.xlane.xlu1 %664  ;;  %v858_v5 = vadd.f32 %v12768_v43, %v793_v28 }
 0x1e9   : > { %9892 = vmatprep.subr.bf16.mxu1 %v11078_v36  ;;  %1519 = vmatprep.subr.bf16.mxu0 %v11085_v8  ;;  %v12824_v47 = vpop.eup %11411  ;;  %v686_v7 = vmul.f32 0.0026041667, %v661_v49  ;;  %v734_v29 = vmul.f32 %v12788_v44, %v12539_v23  ;;  %11419 = vrsqrt.f32 %v701_v1  ;;  %v865_v8 = vadd.f32 %v12760_v39, %v800_v20  ;;  %v11086_v23 = vld [vmem:[#allocation7 + $0x1d0] ss:$12 sps:$4 sm:$0xff]  }
 0x1ea   : > { %v868_v3 = vadd.f32 %v12760_v39, %v803_v25  ;;  %1446 = vmatprep.mubr.bf16.mxu0 %v12819_v32  ;;  %1670 = vmatprep.mubr.bf16.mxu1 %v12819_v32  ;;  %v741_v6 = vmul.f32 %v12817_v14, %v12570_v55  ;;  %v687_v9 = vmul.f32 0.0026041667, %v665_v42  ;;  %v12835_v16 = vpack.c.bf16 %v861_v22, %v858_v5  ;;  %v11087_v20 = vld [vmem:[#allocation7 + $0x1b0] ss:$12 sps:$4 sm:$0xff]   ;;  %v11092_v25 = vld [vmem:[#allocation7 + $0x1cc] ss:$12 sps:$4 sm:$0xff]  }
 0x1eb   : > { %v802_v18 = vmul.f32 %v12752_v30, %v737_v40  ;;  %v744_v62 = vmul.f32 %v12824_v47, %v12576_v60  ;;  %v702_v49 = vadd.f32 1e-05, %v686_v7  ;;  %v799_v55 = vmul.f32 %v12752_v30, %v734_v29  ;;  %v11093_v29 = vld [vmem:[#allocation7 + $0x1e8] ss:$12 sps:$4 sm:$0xff]  }
 0x1ec   : > { %9893 = vmatpush3.bf16.msra.mxu1 %v11078_v36  ;;  %1520 = vmatpush1.bf16.msra.mxu0 %v11083_v31  ;;  %v12840_v28 = vpack.c.bf16 %v868_v3, %v865_v8  ;;  %v806_v60 = vmul.f32 %v12743_v61, %v741_v6  ;;  %v12852_v31 = vsub.s32 2, %v12726_v13  ;;  %v703_v40 = vadd.f32 1e-05, %v687_v9  ;;  %v673_v3 = vpop.xlane.xlu1 %672 }
 0x1ed   : > { %9894 = vmatprep.subr.bf16.mxu1 %v11079_v63  ;;  %1521 = vmatprep.subr.bf16.mxu0 %v11089_v26  ;;  %v809_v36 = vmul.f32 %v12743_v61, %v744_v62  ;;  %v867_v26 = vadd.f32 %v12768_v43, %v802_v18  ;;  %v743_v42 = vmul.f32 %v12824_v47, %v12573_v58  ;;  %11421 = vrsqrt.f32 %v702_v49  ;;  %v669_v18 = vpop.xlane.xlu0 %668 }
 0x1ee   : > { %15427 = vst [vmem:[#allocation35_spill] sm:$0xff] %v12852_v31  ;;  %v864_v8 = vadd.f32 %v12768_v43, %v799_v55  ;;  %v740_v6 = vmul.f32 %v12817_v14, %v12567_v53  ;;  %v871_v58 = vadd.f32 %v12760_v39, %v806_v60  ;;  %v12874_v62 = vrot.slane %v12737_v15, %v12852_v31  ;;  %v11096_v15 = vld [vmem:[#allocation7 + $0x1e4] ss:$12 sps:$4 sm:$0xff]  }
 0x1ef   : > { %v12842_v1 = vpop.eup %11413  ;;  %1447 = vmatmul.mubr.bf16.gmra.mrb[4].mxu0 %v12835_v16  ;;  %1671 = vmatmul.mubr.bf16.gmra.mrb[4].mxu1 %v12835_v16  ;;  %v874_v7 = vadd.f32 %v12760_v39, %v809_v36  ;;  %11423 = vrsqrt.f32 %v703_v40  ;;  %v689_v49 = vmul.f32 0.0026041667, %v673_v3  ;;  %v808_v55 = vmul.f32 %v12752_v30, %v743_v42  ;;  %v11090_v36 = vld [vmem:[#allocation7 + $0x1c8] ss:$12 sps:$4 sm:$0xff]   ;;  %v11097_v42 = vld [vmem:[#allocation7 + $0x200] ss:$12 sps:$4 sm:$0xff]  }
 0x1f0   : > { %1456 = vmatprep.mubr.bf16.mxu0 %v12840_v28  ;;  %1678 = vmatprep.mubr.bf16.mxu1 %v12840_v28  ;;  %v12854_v22 = vpop.eup %11415  ;;  %v750_v5 = vmul.f32 %v12842_v1, %v12603_v27  ;;  %v749_v27 = vmul.f32 %v12842_v1, %v12600_v24  ;;  %v12876_v53 = vpack.c.bf16 %v867_v26, %v864_v8  ;;  %v688_v40 = vmul.f32 0.0026041667, %v669_v18 }
 0x1f1   : > { %9895 = vmatpush3.bf16.msra.mxu1 %v11079_v63  ;;  %1522 = vmatpush1.bf16.msra.mxu0 %v11087_v20  ;;  %v747_v63 = vmul.f32 %v12854_v22, %v12595_v19  ;;  %v12881_v60 = vpack.c.bf16 %v874_v7, %v871_v58  ;;  %v746_v24 = vmul.f32 %v12854_v22, %v12592_v17  ;;  %v11100_v58 = vld [vmem:[#allocation7 + $0x1fc] ss:$12 sps:$4 sm:$0xff]  }
 0x1f2   : > { %9896 = vmatprep.subr.bf16.mxu1 %v11086_v23  ;;  %v12865_v9 = vpop.eup %11417  ;;  %1523 = vmatprep.subr.bf16.mxu0 %v11092_v25  ;;  %v815_v19 = vmul.f32 %v12743_v61, %v750_v5  ;;  %v724_v25 = vmul.f32 %v12739_v11, %v12489_v45  ;;  %v814_v3 = vmul.f32 %v12752_v30, %v749_v27  ;;  %v705_v11 = vadd.f32 1e-05, %v689_v49 }
 0x1f3   : > { %v12879_v20 = vpop.eup %11419  ;;  %v753_v26 = vmul.f32 %v12865_v9, %v12621_v57  ;;  %v812_v17 = vmul.f32 %v12743_v61, %v747_v63  ;;  %v12899_v45 = vrot.slane %v12748_v21, %v12852_v31  ;;  %v873_v7 = vadd.f32 %v12768_v43, %v808_v55  ;;  %v11094_v57 = vld [vmem:[#allocation7 + $0x1e0] ss:$12 sps:$4 sm:$0xff]  }
 0x1f4   : > { %v756_v5 = vmul.f32 %v12879_v20, %v12629_v2  ;;  %v727_v8 = vmul.f32 %v12762_v46, %v12519_v4  ;;  %v811_v18 = vmul.f32 %v12752_v30, %v746_v24  ;;  %v789_v21 = vmul.f32 %v12874_v62, %v724_v25 }
 0x1f5   : > { %9897 = vmatpush3.bf16.msra.mxu1 %v11086_v23  ;;  %v805_v23 = vmul.f32 %v12752_v30, %v740_v6  ;;  %1524 = vmatpush1.bf16.msra.mxu0 %v11090_v36  ;;  %v880_v6 = vadd.f32 %v12760_v39, %v815_v19  ;;  %v704_v63 = vadd.f32 1e-05, %v688_v40  ;;  %v818_v49 = vmul.f32 %v12743_v61, %v753_v26  ;;  %v11098_v36 = vld [vmem:[#allocation7 + $0x1f8] ss:$12 sps:$4 sm:$0xff]   ;;  %v11104_v40 = vld [vmem:[#allocation7 + $0x214] ss:$12 sps:$4 sm:$0xff]  }
 0x1f6   : > { %9898 = vmatprep.subr.bf16.mxu1 %v11093_v29  ;;  %1525 = vmatprep.subr.bf16.mxu0 %v11096_v15  ;;  %v877_v2 = vadd.f32 %v12760_v39, %v812_v17  ;;  %v879_v55 = vadd.f32 %v12768_v43, %v814_v3  ;;  %11425 = vrsqrt.f32 %v705_v11  ;;  %v11101_v19 = vld [vmem:[#allocation7 + $0x218] ss:$12 sps:$4 sm:$0xff]   ;;  %v792_v24 = vmul.f32 %v12874_v62, %v727_v8 }
 0x1f7   : > { %1457 = vmatmul.mubr.bf16.gmra.mrb[8].mxu0 %v12876_v53  ;;  %1679 = vmatmul.mubr.bf16.gmra.mrb[8].mxu1 %v12876_v53  ;;  %v870_v27 = vadd.f32 %v12768_v43, %v805_v23  ;;  %v12913_v4 = vpop.eup %11421  ;;  %v876_v25 = vadd.f32 %v12768_v43, %v811_v18  ;;  %v854_v23 = vadd.f32 %v12899_v45, %v789_v21  ;;  %11427 = vrsqrt.f32 %v704_v63 }
 0x1f8   : > { %1466 = vmatprep.mubr.bf16.mxu0 %v12881_v60  ;;  %1686 = vmatprep.mubr.bf16.mxu1 %v12881_v60  ;;  %v12919_v15 = vpack.c.bf16 %v880_v6, %v877_v2  ;;  %v883_v17 = vadd.f32 %v12760_v39, %v818_v49  ;;  %v752_v3 = vmul.f32 %v12865_v9, %v12618_v54  ;;  %v11102_v54 = vld [vmem:[#allocation7 + $0x210] ss:$12 sps:$4 sm:$0xff]   ;;  %v11106_v49 = vld [vmem:[#allocation7 + $0x228] ss:$12 sps:$4 sm:$0xff]  }
 0x1f9   : > { %9899 = vmatpush3.bf16.msra.mxu1 %v11093_v29  ;;  %v12915_v46 = vpack.c.bf16 %v873_v7, %v870_v27  ;;  %v821_v29 = vmul.f32 %v12743_v61, %v756_v5  ;;  %1526 = vmatpush1.bf16.msra.mxu0 %v11094_v57  ;;  %v12923_v26 = vpop.eup %11423  ;;  %v755_v11 = vmul.f32 %v12879_v20, %v12626_v0  ;;  %v11105_v7 = vld [vmem:[#allocation7 + $0x230] ss:$12 sps:$4 sm:$0xff]  }
 0x1fa   : > { %9900 = vmatprep.subr.bf16.mxu1 %v11097_v42  ;;  %1527 = vmatprep.subr.bf16.mxu0 %v11100_v58  ;;  %v759_v5 = vmul.f32 %v12913_v4, %v12649_v38  ;;  %v857_v57 = vadd.f32 %v12899_v45, %v792_v24  ;;  %v730_v0 = vmul.f32 %v12770_v41, %v12498_v52  ;;  %v11108_v38 = vld [vmem:[#allocation7 + $0x22c] ss:$12 sps:$4 sm:$0xff]   ;;  %v11111_v2 = vld [vmem:[#allocation9 + $0x4] ss:$12 sps:$4 sm:$0xff]  }
 0x1fb   : > { %v886_v8 = vadd.f32 %v12760_v39, %v821_v29  ;;  %v733_v6 = vmul.f32 %v12780_v48, %v12528_v12  ;;  %v762_v18 = vmul.f32 %v12923_v26, %v12659_v59  ;;  %v736_v21 = vmul.f32 %v12788_v44, %v12555_v35 }
 0x1fc   : > { %v12946_v58 = vpack.c.bf16 %v857_v57, %v854_v23  ;;  %v817_v63 = vmul.f32 %v12752_v30, %v752_v3  ;;  %v795_v27 = vmul.f32 %v12874_v62, %v730_v0  ;;  %v739_v12 = vmul.f32 %v12799_v56, %v12564_v50 }
 0x1fd   : > { %9901 = vmatpush3.bf16.msra.mxu1 %v11097_v42  ;;  %v12934_v42 = vpack.c.bf16 %v879_v55, %v876_v25  ;;  %1528 = vmatpush1.bf16.msra.mxu0 %v11098_v36  ;;  %v798_v52 = vmul.f32 %v12874_v62, %v733_v6  ;;  %v820_v59 = vmul.f32 %v12752_v30, %v755_v11  ;;  %v15429_v6 = vld [vmem:[#allocation23_spill] sm:$0xff] }
 0x1fe   : > { %9902 = vmatprep.subr.bf16.mxu1 %v11101_v19  ;;  %1529 = vmatprep.subr.bf16.mxu0 %v11104_v40  ;;  %v801_v48 = vmul.f32 %v12874_v62, %v736_v21  ;;  %v742_v41 = vmul.f32 %v12817_v14, %v12585_v10  ;;  %v745_v35 = vmul.f32 %v12824_v47, %v12606_v33  ;;  %v11136_v33 = vld [vmem:[#allocation9 + $0xc8] ss:$12 sps:$4 sm:$0xff]  }
 0x1ff   : > { %1467 = vmatmul.mubr.bf16.gmra.mrb[12].mxu0 %v12915_v46  ;;  %1687 = vmatmul.mubr.bf16.gmra.mrb[12].mxu1 %v12915_v46  ;;  %v12961_v44 = vpack.c.bf16 %v886_v8, %v883_v17  ;;  %v860_v55 = vadd.f32 %v12899_v45, %v795_v27  ;;  %v863_v29 = vadd.f32 %v12899_v45, %v798_v52  ;;  %v15428_v8 = vld [vmem:[#allocation28_spill] sm:$0xff] }
 0x200   : > { %1476 = vmatprep.mubr.bf16.mxu0 %v12919_v15  ;;  %1694 = vmatprep.mubr.bf16.mxu1 %v12919_v15  ;;  %v804_v50 = vmul.f32 %v12874_v62, %v739_v12  ;;  %v827_v56 = vmul.f32 %v12743_v61, %v762_v18  ;;  %v807_v10 = vmul.f32 %v12874_v62, %v742_v41  ;;  %v12969_v47 = vpop.eup %11425 }
 0x201   : > { %9903 = vmatpush3.bf16.msra.mxu1 %v11101_v19  ;;  %1530 = vmatpush1.bf16.msra.mxu0 %v11102_v54  ;;  %v810_v14 = vmul.f32 %v12874_v62, %v745_v35  ;;  %v12973_v36 = vpack.c.bf16 %v863_v29, %v860_v55  ;;  %v866_v19 = vadd.f32 %v12899_v45, %v801_v48  ;;  %v12982_v17 = vpop.eup %11427  ;;  %v15431_v35 = vld [vmem:[#allocation27_spill] sm:$0xff]  ;;  %v15432_v29 = vld [vmem:[#allocation25_spill] sm:$0xff] }
 0x202   : > { %9904 = vmatprep.subr.bf16.mxu1 %v11105_v7  ;;  %1531 = vmatprep.subr.bf16.mxu0 %v11108_v38  ;;  %v869_v24 = vadd.f32 %v12899_v45, %v804_v50  ;;  %v824_v25 = vmul.f32 %v12743_v61, %v759_v5  ;;  %v872_v40 = vadd.f32 %v12899_v45, %v807_v10 }
 0x203   : > { %v875_v23 = vadd.f32 %v12899_v45, %v810_v14  ;;  %v885_v3 = vadd.f32 %v12768_v43, %v820_v59  ;;  %v761_v11 = vmul.f32 %v12923_v26, %v12656_v34  ;;  %v892_v57 = vadd.f32 %v12760_v39, %v827_v56  ;;  %v15430_v34 = vld [vmem:[#allocation26_spill] sm:$0xff] }
 0x204   : > { %v768_v5 = vmul.f32 %v12969_v47, %v15428_v8  ;;  %v882_v0 = vadd.f32 %v12768_v43, %v817_v63  ;;  %v758_v18 = vmul.f32 %v12913_v4, %v15429_v6  ;;  %v889_v38 = vadd.f32 %v12760_v39, %v824_v25  ;;  %v11137_v8 = vld [vmem:[#allocation9 + $0x8] ss:$12 sps:$4 sm:$0xff]  }
 0x205   : > { %9905 = vmatpush3.bf16.msra.mxu1 %v11105_v7  ;;  %1532 = vmatpush1.bf16.msra.mxu0 %v11106_v49  ;;  %v12987_v7 = vpack.c.bf16 %v869_v24, %v866_v19  ;;  %v12992_v54 = vpack.c.bf16 %v875_v23, %v872_v40  ;;  %v765_v21 = vmul.f32 %v12982_v17, %v15430_v34  ;;  %v15279_v25 = vmov 0   ;;  %v11109_v23 = vld [vmem:[#allocation9] ss:$12 sps:$4 sm:$0xff]   ;;  %v15436_v34 = vld [vmem:[#allocation30_spill] sm:$0xff] }
 0x206   : > { %2304 = vmatprep.subr.bf16.mxu1 %v11111_v2  ;;  %9466 = vmatprep.subr.bf16.mxu0 %v11136_v33  ;;  %v13000_v27 = vpack.c.bf16 %v885_v3, %v882_v0  ;;  %v826_v52 = vmul.f32 %v12752_v30, %v761_v11  ;;  %v13003_v12 = vpack.c.bf16 %v892_v57, %v889_v38  ;;  %v15434_v3 = vld [vmem:[#allocation20_spill] sm:$0xff]  ;;  %v11114_v57 = vld [vmem:[#allocation9 + $0x1c] ss:$12 sps:$4 sm:$0xff]  }
 0x207   : > { %1477 = vmatmul.mubr.bf16.gmra.mrb[16].mxu0 %v12934_v42  ;;  %1695 = vmatmul.mubr.bf16.gmra.mrb[16].mxu1 %v12934_v42  ;;  %v833_v59 = vmul.f32 %v12743_v61, %v768_v5  ;;  %v823_v63 = vmul.f32 %v12752_v30, %v758_v18  ;;  %v830_v48 = vmul.f32 %v12743_v61, %v765_v21  ;;  %v11141_v5 = vld [vmem:[#allocation9 + $0xe0] ss:$12 sps:$4 sm:$0xff]   ;;  %v11112_v0 = vld [vmem:[#allocation9 + $0x18] ss:$12 sps:$4 sm:$0xff]  }
 0x208   : > { %1486 = vmatprep.mubr.bf16.mxu0 %v12961_v44  ;;  %1702 = vmatprep.mubr.bf16.mxu1 %v12961_v44  ;;  %v891_v41 = vadd.f32 %v12768_v43, %v826_v52  ;;  %v767_v49 = vmul.f32 %v12969_v47, %v15431_v35  ;;  %v764_v50 = vmul.f32 %v12982_v17, %v15432_v29  ;;  %v11142_v52 = vld [vmem:[#allocation9 + $0x20] ss:$12 sps:$4 sm:$0xff]   ;;  %v11146_v29 = vld [vmem:[#allocation9 + $0xf8] ss:$12 sps:$4 sm:$0xff]  }
 0x209   : > { %v898_v2 = vadd.f32 %v12760_v39, %v833_v59  ;;  %v888_v55 = vadd.f32 %v12768_v43, %v823_v63  ;;  %v895_v56 = vadd.f32 %v12760_v39, %v830_v48  ;;  %v748_v11 = vmul.f32 %v12854_v22, %v15434_v3  ;;  %v15435_v22 = vld [vmem:[#allocation24_spill] sm:$0xff]  ;;  %v15437_v59 = vld [vmem:[#allocation22_spill] sm:$0xff]  ;;  %v15438_v35 = vld [vmem:[#allocation29_spill] sm:$0xff] }
 0x20a   : > { %v832_v14 = vmul.f32 %v12752_v30, %v767_v49  ;;  %v829_v61 = vmul.f32 %v12752_v30, %v764_v50  ;;  %v15433_v30 = vld [vmem:[#allocation21_spill] sm:$0xff]  ;;  %v757_v18 = vmul.f32 %v12879_v20, %v15435_v22  ;;  %v763_v21 = vmul.f32 %v12923_v26, %v15436_v34  ;;  %v11115_v48 = vld [vmem:[#allocation9 + $0x30] ss:$12 sps:$4 sm:$0xff]   ;;  %v11147_v50 = vld [vmem:[#allocation9 + $0x38] ss:$12 sps:$4 sm:$0xff]  }
 0x20b   : > { %v13020_v10 = vpack.c.bf16 %v891_v41, %v888_v55  ;;  %v13023_v33 = vpack.c.bf16 %v898_v2, %v895_v56  ;;  %v751_v40 = vmul.f32 %v12842_v1, %v15433_v30  ;;  %v813_v6 = vmul.f32 %v12874_v62, %v748_v11  ;;  %v11117_v1 = vld [vmem:[#allocation9 + $0x34] ss:$12 sps:$4 sm:$0xff]   ;;  %v11120_v20 = vld [vmem:[#allocation9 + $0x4c] ss:$12 sps:$4 sm:$0xff]  }
 0x20c   : > { %v897_v19 = vadd.f32 %v12768_v43, %v832_v14  ;;  %v894_v39 = vadd.f32 %v12768_v43, %v829_v61  ;;  %v754_v63 = vmul.f32 %v12865_v9, %v15437_v59  ;;  %v760_v49 = vmul.f32 %v12913_v4, %v15438_v35  ;;  %v11118_v4 = vld [vmem:[#allocation9 + $0x48] ss:$12 sps:$4 sm:$0xff]   ;;  %v11151_v14 = vld [vmem:[#allocation9 + $0x110] ss:$12 sps:$4 sm:$0xff]   ;;  %v11124_v22 = vld [vmem:[#allocation9 + $0x78] ss:$12 sps:$4 sm:$0xff]  }
 0x20d   : > { %v816_v43 = vmul.f32 %v12874_v62, %v751_v40  ;;  %v878_v41 = vadd.f32 %v12899_v45, %v813_v6  ;;  %v822_v2 = vmul.f32 %v12874_v62, %v757_v18  ;;  %v828_v26 = vmul.f32 %v12874_v62, %v763_v21  ;;  %v11123_v61 = vld [vmem:[#allocation9 + $0x64] ss:$12 sps:$4 sm:$0xff]   ;;  %v15440_v3 = vld [vmem:[#allocation31_spill] sm:$0xff]  ;;  %v11129_v18 = vld [vmem:[#allocation9 + $0x94] ss:$12 sps:$4 sm:$0xff]  }
 0x20e   : > { %v13032_v24 = vpack.c.bf16 %v897_v19, %v894_v39  ;;  %v819_v9 = vmul.f32 %v12874_v62, %v754_v63  ;;  %v825_v56 = vmul.f32 %v12874_v62, %v760_v49  ;;  %v15439_v39 = vld [vmem:[#allocation32_spill] sm:$0xff]  ;;  %v766_v11 = vmul.f32 %v12982_v17, %v15440_v3  ;;  %v11152_v6 = vld [vmem:[#allocation9 + $0x50] ss:$12 sps:$4 sm:$0xff]   ;;  %v11157_v34 = vld [vmem:[#allocation9 + $0x68] ss:$12 sps:$4 sm:$0xff]  }
 0x20f   : > { %1487 = vmatmul.mubr.bf16.gmra.mrb[20].mxu0 %v13000_v27  ;;  %1703 = vmatmul.mubr.bf16.gmra.mrb[20].mxu1 %v13000_v27  ;;  %v881_v38 = vadd.f32 %v12899_v45, %v816_v43  ;;  %v887_v19 = vadd.f32 %v12899_v45, %v822_v2  ;;  %v769_v30 = vmul.f32 %v12969_v47, %v15439_v39  ;;  %v11132_v59 = vld [vmem:[#allocation9 + $0xac] ss:$12 sps:$4 sm:$0xff]   ;;  %v11163_v3 = vld [vmem:[#allocation9 + $0x150] ss:$12 sps:$4 sm:$0xff]  }
 0x210   : > { %1496 = vmatprep.mubr.bf16.mxu0 %v13003_v12  ;;  %1710 = vmatprep.mubr.bf16.mxu1 %v13003_v12  ;;  %v893_v40 = vadd.f32 %v12899_v45, %v828_v26  ;;  %v890_v43 = vadd.f32 %v12899_v45, %v825_v56  ;;  %v831_v17 = vmul.f32 %v12874_v62, %v766_v11  ;;  %v11161_v63 = vld [vmem:[#allocation9 + $0x140] ss:$12 sps:$4 sm:$0xff]   ;;  %v11166_v35 = vld [vmem:[#allocation9 + $0x158] ss:$12 sps:$4 sm:$0xff]   ;;  %v11171_v26 = vld [vmem:[#allocation9 + $0x170] ss:$12 sps:$4 sm:$0xff]  }
 0x211   : > { %v13059_v55 = vpack.c.bf16 %v881_v38, %v878_v41  ;;  %v834_v47 = vmul.f32 %v12874_v62, %v769_v30  ;;  %v11130_v41 = vld [vmem:[#allocation9 + $0xa8] ss:$12 sps:$4 sm:$0xff]   ;;  %v11133_v49 = vld [vmem:[#allocation9 + $0xc0] ss:$12 sps:$4 sm:$0xff]   ;;  %v11167_v2 = vld [vmem:[#allocation9 + $0x98] ss:$12 sps:$4 sm:$0xff]  }
 0x212   : > { %v896_v21 = vadd.f32 %v12899_v45, %v831_v17  ;;  %v11143_v56 = vld [vmem:[#allocation9 + $0xf0] ss:$12 sps:$4 sm:$0xff]   ;;  %v11153_v39 = vld [vmem:[#allocation9 + $0x120] ss:$12 sps:$4 sm:$0xff]   ;;  %v11176_v17 = vld [vmem:[#allocation9 + $0x198] ss:$12 sps:$4 sm:$0xff]  }
 0x213   : > { %v899_v38 = vadd.f32 %v12899_v45, %v834_v47  ;;  %v11160_v30 = vld [vmem:[#allocation9 + $0x13c] ss:$12 sps:$4 sm:$0xff]   ;;  %v11170_v11 = vld [vmem:[#allocation9 + $0x16c] ss:$12 sps:$4 sm:$0xff]  }
 0x214   : > { %v11178_v47 = vld [vmem:[#allocation9 + $0x19c] ss:$12 sps:$4 sm:$0xff]  }
 0x215   : > { %v13088_v62 = vpack.c.bf16 %v899_v38, %v896_v21  ;;  %v11186_v38 = vld [vmem:[#allocation9 + $0x1cc] ss:$12 sps:$4 sm:$0xff]   ;;  %v11184_v21 = vld [vmem:[#allocation9 + $0x1c8] ss:$12 sps:$4 sm:$0xff]  }
 0x217   : > { %1497 = vmatmul.mubr.bf16.gmra.mrb[24].mxu0 %v13020_v10  ;;  %1711 = vmatmul.mubr.bf16.gmra.mrb[24].mxu1 %v13020_v10 }
 0x218   : > { %1506 = vmatprep.mubr.bf16.mxu0 %v13023_v33  ;;  %1718 = vmatprep.mubr.bf16.mxu1 %v13023_v33 }
 0x21f   : > { %1507 = vmatmul.mubr.bf16.gmra.mrb[28].mxu0 %v13032_v24  ;;  %1719 = vmatmul.mubr.bf16.gmra.mrb[28].mxu1 %v13032_v24 }
 0x220   : > { %9906 = vmatprep.mubr.bf16.mxu1 %v12946_v58  ;;  %1549 = vmatprep.mubr.bf16.mxu0 %v15279_v25 }
 0x227   : > { %1550 = vmatmul.mubr.bf16.vlgmr.msra.gmra.mrb[0].mxu0 %v12946_v58  ;;  %9907 = vmatmul.mubr.bf16.vlgmr.msra.gmra.mrb[32].mxu1 %v12973_v36 }
 0x228   : > { %2305 = vmatpush1.bf16.msra.mxu1 %v11109_v23  ;;  %9910 = vmatprep.mubr.bf16.mxu1 %v12987_v7  ;;  %v884_v23 = vadd.f32 %v12899_v45, %v819_v9  ;;  %v11135_v45 = vld [vmem:[#allocation9 + $0xc4] ss:$12 sps:$4 sm:$0xff]   ;;  %v11145_v9 = vld [vmem:[#allocation9 + $0xf4] ss:$12 sps:$4 sm:$0xff]  }
 0x229   : > { %2306 = vmatprep.subr.bf16.mxu1 %v11114_v57  ;;  %1559 = vmatprep.mubr.bf16.mxu0 %v15279_v25  ;;  %v11121_v57 = vld [vmem:[#allocation9 + $0x60] ss:$12 sps:$4 sm:$0xff]  }
 0x22a   : > { %9467 = vmatpush3.bf16.msra.mxu0 %v11137_v8  ;;  %v13076_v8 = vpack.c.bf16 %v887_v19, %v884_v23  ;;  %v11155_v19 = vld [vmem:[#allocation9 + $0x124] ss:$12 sps:$4 sm:$0xff]   ;;  %v11165_v23 = vld [vmem:[#allocation9 + $0x154] ss:$12 sps:$4 sm:$0xff]  }
 0x22b   : > { %9468 = vmatprep.subr.bf16.mxu0 %v11141_v5  ;;  %v11126_v5 = vld [vmem:[#allocation9 + $0x7c] ss:$12 sps:$4 sm:$0xff]  }
 0x22c   : > { %2307 = vmatpush1.bf16.msra.mxu1 %v11112_v0  ;;  %v13079_v0 = vpack.c.bf16 %v893_v40, %v890_v43  ;;  %v11158_v40 = vld [vmem:[#allocation9 + $0x138] ss:$12 sps:$4 sm:$0xff]  }
 0x22d   : > { %2308 = vmatprep.subr.bf16.mxu1 %v11117_v1  ;;  %v11156_v1 = vld [vmem:[#allocation9 + $0x128] ss:$12 sps:$4 sm:$0xff]   ;;  %v11175_v43 = vld [vmem:[#allocation9 + $0x184] ss:$12 sps:$4 sm:$0xff]  }
 0x22e   : > { %9469 = vmatpush3.bf16.msra.mxu0 %v11142_v52  ;;  %v11127_v52 = vld [vmem:[#allocation9 + $0x90] ss:$12 sps:$4 sm:$0xff]  }
 0x22f   : > { %1560 = vmatmul.mubr.bf16.gmra.mrb[4].mxu0 %v12973_v36  ;;  %9911 = vmatmul.mubr.bf16.gmra.mrb[36].mxu1 %v12992_v54 }
 0x230   : > { %2309 = vmatpush1.bf16.msra.mxu1 %v11115_v48  ;;  %9914 = vmatprep.mubr.bf16.mxu1 %v13059_v55  ;;  %v11162_v48 = vld [vmem:[#allocation9 + $0x80] ss:$12 sps:$4 sm:$0xff]  }
 0x231   : > { %2310 = vmatprep.subr.bf16.mxu1 %v11120_v20  ;;  %1569 = vmatprep.mubr.bf16.mxu0 %v15279_v25  ;;  %v11140_v20 = vld [vmem:[#allocation9 + $0xdc] ss:$12 sps:$4 sm:$0xff]  }
 0x232   : > { %9470 = vmatprep.subr.bf16.mxu0 %v11146_v29  ;;  %v11138_v29 = vld [vmem:[#allocation9 + $0xd8] ss:$12 sps:$4 sm:$0xff]  }
 0x233   : > { %9471 = vmatpush3.bf16.msra.mxu0 %v11147_v50  ;;  %v11172_v50 = vld [vmem:[#allocation9 + $0xb0] ss:$12 sps:$4 sm:$0xff]  }
 0x234   : > { %2311 = vmatpush1.bf16.msra.mxu1 %v11118_v4  ;;  %9472 = vmatprep.subr.bf16.mxu0 %v11151_v14  ;;  %v11182_v4 = vld [vmem:[#allocation9 + $0x188] ss:$12 sps:$4 sm:$0xff]   ;;  %v11150_v14 = vld [vmem:[#allocation9 + $0x10c] ss:$12 sps:$4 sm:$0xff]  }
 0x235   : > { %2312 = vmatprep.subr.bf16.mxu1 %v11123_v61  ;;  %v11148_v61 = vld [vmem:[#allocation9 + $0x108] ss:$12 sps:$4 sm:$0xff]  }
 0x237   : > { %1570 = vmatmul.mubr.bf16.gmra.mrb[8].mxu0 %v12987_v7  ;;  %9915 = vmatmul.mubr.bf16.gmra.mrb[40].mxu1 %v13076_v8 }
 0x238   : > { %2313 = vmatpush1.bf16.msra.mxu1 %v11121_v57  ;;  %9918 = vmatprep.mubr.bf16.mxu1 %v13079_v0  ;;  %v11168_v57 = vld [vmem:[#allocation9 + $0x168] ss:$12 sps:$4 sm:$0xff]  }
 0x239   : > { %2314 = vmatprep.subr.bf16.mxu1 %v11126_v5  ;;  %1579 = vmatprep.mubr.bf16.mxu0 %v15279_v25  ;;  %v11173_v5 = vld [vmem:[#allocation9 + $0x180] ss:$12 sps:$4 sm:$0xff]  }
 0x23a   : > { %9473 = vmatpush3.bf16.msra.mxu0 %v11152_v6  ;;  %v11183_v6 = vld [vmem:[#allocation9 + $0x1a0] ss:$12 sps:$4 sm:$0xff]  }
 0x23b   : > { %9474 = vmatprep.subr.bf16.mxu0 %v11156_v1  ;;  %v11181_v1 = vld [vmem:[#allocation9 + $0x1b4] ss:$12 sps:$4 sm:$0xff]  }
 0x23c   : > { %2315 = vmatpush1.bf16.msra.mxu1 %v11124_v22  ;;  %v11187_v22 = vld [vmem:[#allocation9 + $0x1b8] ss:$12 sps:$4 sm:$0xff]  }
 0x23d   : > { %2316 = vmatprep.subr.bf16.mxu1 %v11129_v18  ;;  %v11179_v18 = vld [vmem:[#allocation9 + $0x1b0] ss:$12 sps:$4 sm:$0xff]  }
 0x23e   : > { %9475 = vmatpush3.bf16.msra.mxu0 %v11157_v34  ;;  %v11188_v34 = vld [vmem:[#allocation9 + $0x1d0] ss:$12 sps:$4 sm:$0xff]  }
 0x23f   : > { %1580 = vmatmul.mubr.bf16.gmra.mrb[12].mxu0 %v12992_v54  ;;  %9919 = vmatmul.mubr.bf16.gmra.mrb[44].mxu1 %v13088_v62 }
 0x240   : > { %2317 = vmatpush1.bf16.msra.mxu1 %v11127_v52  ;;  %2336 = vmatprep.mubr.bf16.mxu1 %v12795_v51  ;;  %v11191_v52 = vld [vmem:[#allocation9 + $0x1e4] ss:$12 sps:$4 sm:$0xff]  }
 0x241   : > { %2318 = vmatprep.subr.bf16.mxu1 %v11132_v59  ;;  %1589 = vmatprep.mubr.bf16.mxu0 %v15279_v25  ;;  %v11192_v59 = vld [vmem:[#allocation9 + $0x1e8] ss:$12 sps:$4 sm:$0xff]  }
 0x242   : > { %9476 = vmatprep.subr.bf16.mxu0 %v11161_v63  ;;  %v11189_v63 = vld [vmem:[#allocation9 + $0x1e0] ss:$12 sps:$4 sm:$0xff]  }
 0x243   : > { %9477 = vmatpush3.bf16.msra.mxu0 %v11162_v48  ;;  %v11195_v48 = vld [vmem:[#allocation9 + $0x1fc] ss:$12 sps:$4 sm:$0xff]  }
 0x244   : > { %2319 = vmatpush1.bf16.msra.mxu1 %v11130_v41  ;;  %9478 = vmatprep.subr.bf16.mxu0 %v11166_v35  ;;  %v11196_v41 = vld [vmem:[#allocation9 + $0x200] ss:$12 sps:$4 sm:$0xff]   ;;  %v11193_v35 = vld [vmem:[#allocation9 + $0x1f8] ss:$12 sps:$4 sm:$0xff]  }
 0x245   : > { %2320 = vmatprep.subr.bf16.mxu1 %v11135_v45  ;;  %v11199_v45 = vld [vmem:[#allocation9 + $0x214] ss:$12 sps:$4 sm:$0xff]  }
 0x247   : > { %1590 = vmatmul.mubr.bf16.gmra.mrb[16].mxu0 %v13059_v55 }
 0x248   : > { %2321 = vmatpush1.bf16.msra.mxu1 %v11133_v49  ;;  %1599 = vmatprep.mubr.bf16.mxu0 %v15279_v25  ;;  %v11200_v49 = vld [vmem:[#allocation9 + $0x218] ss:$12 sps:$4 sm:$0xff]  }
 0x249   : > { %2322 = vmatprep.subr.bf16.mxu1 %v11140_v20  ;;  %9479 = vmatpush3.bf16.msra.mxu0 %v11167_v2  ;;  %v11197_v20 = vld [vmem:[#allocation9 + $0x210] ss:$12 sps:$4 sm:$0xff]   ;;  %v11203_v2 = vld [vmem:[#allocation9 + $0x22c] ss:$12 sps:$4 sm:$0xff]  }
 0x24a   : > { %9480 = vmatprep.subr.bf16.mxu0 %v11171_v26  ;;  %v11204_v26 = vld [vmem:[#allocation9 + $0x230] ss:$12 sps:$4 sm:$0xff]  }
 0x24c   : > { %2323 = vmatpush1.bf16.msra.mxu1 %v11138_v29  ;;  %v11201_v29 = vld [vmem:[#allocation9 + $0x228] ss:$12 sps:$4 sm:$0xff]  }
 0x24d   : > { %2324 = vmatprep.subr.bf16.mxu1 %v11145_v9  ;;  %9481 = vmatpush3.bf16.msra.mxu0 %v11172_v50  ;;  %v11207_v9 = vld [vmem:[#allocation10 + $0x4] ss:$12 sps:$4 sm:$0xff]   ;;  %v11208_v50 = vld [vmem:[#allocation10 + $0xc8] ss:$12 sps:$4 sm:$0xff]  }
 0x24e   : > { %9922 = vmatprep.subr.bf16.mxu0 %v11182_v4 }
 0x24f   : > { %1600 = vmatmul.mubr.bf16.gmra.mrb[20].mxu0 %v13076_v8 }
 0x250   : > { %2325 = vmatpush1.bf16.msra.mxu1 %v11143_v56  ;;  %1609 = vmatprep.mubr.bf16.mxu0 %v15279_v25  ;;  %v11209_v56 = vld [vmem:[#allocation10 + $0x8] ss:$12 sps:$4 sm:$0xff]  }
 0x251   : > { %2326 = vmatprep.subr.bf16.mxu1 %v11150_v14  ;;  %v11212_v14 = vld [vmem:[#allocation10 + $0x1c] ss:$12 sps:$4 sm:$0xff]  }
 0x254   : > { %2327 = vmatpush1.bf16.msra.mxu1 %v11148_v61  ;;  %v11213_v61 = vld [vmem:[#allocation10 + $0xe0] ss:$12 sps:$4 sm:$0xff]  }
 0x255   : > { %2328 = vmatprep.subr.bf16.mxu1 %v11155_v19  ;;  %v11210_v19 = vld [vmem:[#allocation10 + $0x18] ss:$12 sps:$4 sm:$0xff]  }
 0x257   : > { %1610 = vmatmul.mubr.bf16.gmra.mrb[24].mxu0 %v13079_v0 }
 0x258   : > { %2329 = vmatpush1.bf16.msra.mxu1 %v11153_v39  ;;  %1619 = vmatprep.mubr.bf16.mxu0 %v15279_v25  ;;  %v11214_v39 = vld [vmem:[#allocation10 + $0x20] ss:$12 sps:$4 sm:$0xff]  }
 0x259   : > { %2330 = vmatprep.subr.bf16.mxu1 %v11160_v30  ;;  %v11217_v30 = vld [vmem:[#allocation10 + $0x34] ss:$12 sps:$4 sm:$0xff]  }
 0x25c   : > { %2331 = vmatpush1.bf16.msra.mxu1 %v11158_v40  ;;  %v11218_v40 = vld [vmem:[#allocation10 + $0xf8] ss:$12 sps:$4 sm:$0xff]  }
 0x25d   : > { %2332 = vmatprep.subr.bf16.mxu1 %v11165_v23  ;;  %v11215_v23 = vld [vmem:[#allocation10 + $0x30] ss:$12 sps:$4 sm:$0xff]  }
 0x25f   : > { %1620 = vmatmul.mubr.bf16.gmra.mrb[28].mxu0 %v13088_v62 }
 0x260   : > { %2333 = vmatpush1.bf16.msra.mxu1 %v11163_v3  ;;  %2562 = vmatprep.mubr.bf16.mxu0 %v12795_v51  ;;  %v11219_v3 = vld [vmem:[#allocation10 + $0x38] ss:$12 sps:$4 sm:$0xff]  }
 0x261   : > { %2334 = vmatprep.subr.bf16.mxu1 %v11170_v11  ;;  %v11222_v11 = vld [vmem:[#allocation10 + $0x4c] ss:$12 sps:$4 sm:$0xff]  }
 0x264   : > { %2335 = vmatpush1.bf16.msra.mxu1 %v11168_v57  ;;  %v11223_v57 = vld [vmem:[#allocation10 + $0x110] ss:$12 sps:$4 sm:$0xff]  }
 0x265   : > { %2417 = vmatprep.subr.bf16.mxu1 %v11175_v43  ;;  %v11220_v43 = vld [vmem:[#allocation10 + $0x48] ss:$12 sps:$4 sm:$0xff]  }
 0x267   : > { %2337 = vmatmul.mubr.bf16.vlgmr.msra.gmra.mrb[48].mxu1 %v12797_v37  ;;  %2563 = vmatmul.mubr.bf16.vlgmr.msra.gmra.mrb[32].mxu0 %v12797_v37 }
 0x268   : > { %2346 = vmatprep.mubr.bf16.mxu1 %v12819_v32  ;;  %2570 = vmatprep.mubr.bf16.mxu0 %v12819_v32 }
 0x269   : > { %2418 = vmatpush1.bf16.msra.mxu1 %v11173_v5  ;;  %9923 = vmatpush3.bf16.msra.mxu0 %v11182_v4  ;;  %v11205_v4 = vld [vmem:[#allocation10] ss:$12 sps:$4 sm:$0xff]   ;;  %v11224_v5 = vld [vmem:[#allocation10 + $0x50] ss:$12 sps:$4 sm:$0xff]  }
 0x26a   : > { %2419 = vmatprep.subr.bf16.mxu1 %v11178_v47  ;;  %9924 = vmatprep.subr.bf16.mxu0 %v11183_v6  ;;  %v11227_v47 = vld [vmem:[#allocation10 + $0x64] ss:$12 sps:$4 sm:$0xff]  }
 0x26d   : > { %2420 = vmatpush1.bf16.msra.mxu1 %v11176_v17  ;;  %9925 = vmatpush3.bf16.msra.mxu0 %v11183_v6  ;;  %v11228_v6 = vld [vmem:[#allocation10 + $0x128] ss:$12 sps:$4 sm:$0xff]   ;;  %v11225_v17 = vld [vmem:[#allocation10 + $0x60] ss:$12 sps:$4 sm:$0xff]  }
 0x26e   : > { %2421 = vmatprep.subr.bf16.mxu1 %v11181_v1  ;;  %9926 = vmatprep.subr.bf16.mxu0 %v11187_v22  ;;  %v11229_v1 = vld [vmem:[#allocation10 + $0x68] ss:$12 sps:$4 sm:$0xff]  }
 0x26f   : > { %2347 = vmatmul.mubr.bf16.gmra.mrb[52].mxu1 %v12835_v16  ;;  %2571 = vmatmul.mubr.bf16.gmra.mrb[36].mxu0 %v12835_v16 }
 0x270   : > { %2356 = vmatprep.mubr.bf16.mxu1 %v12840_v28  ;;  %2578 = vmatprep.mubr.bf16.mxu0 %v12840_v28 }
 0x271   : > { %2422 = vmatpush1.bf16.msra.mxu1 %v11179_v18  ;;  %9927 = vmatpush3.bf16.msra.mxu0 %v11187_v22  ;;  %v11232_v22 = vld [vmem:[#allocation10 + $0x7c] ss:$12 sps:$4 sm:$0xff]   ;;  %v11233_v18 = vld [vmem:[#allocation10 + $0x140] ss:$12 sps:$4 sm:$0xff]  }
 0x272   : > { %2423 = vmatprep.subr.bf16.mxu1 %v11186_v38  ;;  %9928 = vmatprep.subr.bf16.mxu0 %v11188_v34  ;;  %v11230_v38 = vld [vmem:[#allocation10 + $0x78] ss:$12 sps:$4 sm:$0xff]  }
 0x275   : > { %2424 = vmatpush1.bf16.msra.mxu1 %v11184_v21  ;;  %9929 = vmatpush3.bf16.msra.mxu0 %v11188_v34  ;;  %v11234_v34 = vld [vmem:[#allocation10 + $0x80] ss:$12 sps:$4 sm:$0xff]  }
 0x276   : > { %2425 = vmatprep.subr.bf16.mxu1 %v11191_v52  ;;  %9930 = vmatprep.subr.bf16.mxu0 %v11192_v59  ;;  %v11237_v21 = vld [vmem:[#allocation10 + $0x94] ss:$12 sps:$4 sm:$0xff]  }
 0x277   : > { %2357 = vmatmul.mubr.bf16.gmra.mrb[56].mxu1 %v12876_v53  ;;  %2579 = vmatmul.mubr.bf16.gmra.mrb[40].mxu0 %v12876_v53 }
 0x278   : > { %2366 = vmatprep.mubr.bf16.mxu1 %v12881_v60  ;;  %2586 = vmatprep.mubr.bf16.mxu0 %v12881_v60 }
 0x279   : > { %2426 = vmatpush1.bf16.msra.mxu1 %v11189_v63  ;;  %9931 = vmatpush3.bf16.msra.mxu0 %v11192_v59  ;;  %v11238_v59 = vld [vmem:[#allocation10 + $0x158] ss:$12 sps:$4 sm:$0xff]  }
 0x27a   : > { %2427 = vmatprep.subr.bf16.mxu1 %v11195_v48  ;;  %9932 = vmatprep.subr.bf16.mxu0 %v11196_v41 }
 0x27d   : > { %2428 = vmatpush1.bf16.msra.mxu1 %v11193_v35  ;;  %9933 = vmatpush3.bf16.msra.mxu0 %v11196_v41  ;;  %v11235_v35 = vld [vmem:[#allocation10 + $0x90] ss:$12 sps:$4 sm:$0xff]  }
 0x27e   : > { %2429 = vmatprep.subr.bf16.mxu1 %v11199_v45  ;;  %9934 = vmatprep.subr.bf16.mxu0 %v11200_v49 }
 0x27f   : > { %2367 = vmatmul.mubr.bf16.gmra.mrb[60].mxu1 %v12915_v46  ;;  %2587 = vmatmul.mubr.bf16.gmra.mrb[44].mxu0 %v12915_v46 }
 0x280   : > { %2376 = vmatprep.mubr.bf16.mxu1 %v12919_v15  ;;  %2594 = vmatprep.mubr.bf16.mxu0 %v12919_v15 }
 0x281   : > { %2430 = vmatpush1.bf16.msra.mxu1 %v11197_v20  ;;  %9935 = vmatpush3.bf16.msra.mxu0 %v11200_v49  ;;  %v11239_v49 = vld [vmem:[#allocation10 + $0x98] ss:$12 sps:$4 sm:$0xff]  }
 0x282   : > { %2431 = vmatprep.subr.bf16.mxu1 %v11203_v2  ;;  %9936 = vmatprep.subr.bf16.mxu0 %v11204_v26  ;;  %v11242_v20 = vld [vmem:[#allocation10 + $0xac] ss:$12 sps:$4 sm:$0xff]  }
 0x285   : > { %2432 = vmatpush1.bf16.msra.mxu1 %v11201_v29  ;;  %9937 = vmatpush3.bf16.msra.mxu0 %v11204_v26  ;;  %v11243_v26 = vld [vmem:[#allocation10 + $0x170] ss:$12 sps:$4 sm:$0xff]   ;;  %v11240_v29 = vld [vmem:[#allocation10 + $0xa8] ss:$12 sps:$4 sm:$0xff]  }
 0x286   : > { %3204 = vmatprep.subr.bf16.mxu1 %v11207_v9  ;;  %9546 = vmatprep.subr.bf16.mxu0 %v11208_v50  ;;  %v11244_v9 = vld [vmem:[#allocation10 + $0xb0] ss:$12 sps:$4 sm:$0xff]  }
 0x287   : > { %2377 = vmatmul.mubr.bf16.gmra.mrb[64].mxu1 %v12934_v42  ;;  %2595 = vmatmul.mubr.bf16.gmra.mrb[48].mxu0 %v12934_v42  ;;  %v11247_v50 = vld [vmem:[#allocation10 + $0xc4] ss:$12 sps:$4 sm:$0xff]  }
 0x288   : > { %2386 = vmatprep.mubr.bf16.mxu1 %v12961_v44  ;;  %2602 = vmatprep.mubr.bf16.mxu0 %v12961_v44 }
 0x28f   : > { %2387 = vmatmul.mubr.bf16.gmra.mrb[68].mxu1 %v13000_v27  ;;  %2603 = vmatmul.mubr.bf16.gmra.mrb[52].mxu0 %v13000_v27 }
 0x290   : > { %2396 = vmatprep.mubr.bf16.mxu1 %v13003_v12  ;;  %2610 = vmatprep.mubr.bf16.mxu0 %v13003_v12 }
 0x297   : > { %2397 = vmatmul.mubr.bf16.gmra.mrb[72].mxu1 %v13020_v10  ;;  %2611 = vmatmul.mubr.bf16.gmra.mrb[56].mxu0 %v13020_v10 }
 0x298   : > { %2406 = vmatprep.mubr.bf16.mxu1 %v13023_v33  ;;  %2618 = vmatprep.mubr.bf16.mxu0 %v13023_v33 }
 0x29f   : > { %2407 = vmatmul.mubr.bf16.gmra.mrb[76].mxu1 %v13032_v24  ;;  %2619 = vmatmul.mubr.bf16.gmra.mrb[60].mxu0 %v13032_v24 }
 0x2a0   : > { %9938 = vmatprep.mubr.bf16.mxu0 %v12946_v58  ;;  %2449 = vmatprep.mubr.bf16.mxu1 %v15279_v25 }
 0x2a7   : > { %2450 = vmatmul.mubr.bf16.vlgmr.msra.gmra.mrb[48].mxu1 %v12946_v58  ;;  %9939 = vmatmul.mubr.bf16.vlgmr.msra.gmra.mrb[64].mxu0 %v12973_v36 }
 0x2a8   : > { %3205 = vmatpush1.bf16.msra.mxu1 %v11205_v4  ;;  %9942 = vmatprep.mubr.bf16.mxu0 %v12987_v7 }
 0x2a9   : > { %9547 = vmatpush3.bf16.msra.mxu0 %v11209_v56  ;;  %3206 = vmatprep.subr.bf16.mxu1 %v11212_v14  ;;  %v11269_v56 = vld [vmem:[#allocation10 + $0x188] ss:$12 sps:$4 sm:$0xff]  }
 0x2aa   : > { %9548 = vmatprep.subr.bf16.mxu0 %v11213_v61  ;;  %2459 = vmatprep.mubr.bf16.mxu1 %v15279_v25 }
 0x2ac   : > { %3207 = vmatpush1.bf16.msra.mxu1 %v11210_v19 }
 0x2ad   : > { %9549 = vmatpush3.bf16.msra.mxu0 %v11214_v39  ;;  %3208 = vmatprep.subr.bf16.mxu1 %v11217_v30  ;;  %v11245_v39 = vld [vmem:[#allocation10 + $0xc0] ss:$12 sps:$4 sm:$0xff]  }
 0x2ae   : > { %9550 = vmatprep.subr.bf16.mxu0 %v11218_v40  ;;  %v11250_v40 = vld [vmem:[#allocation10 + $0xdc] ss:$12 sps:$4 sm:$0xff]  }
 0x2af   : > { %2460 = vmatmul.mubr.bf16.gmra.mrb[52].mxu1 %v12973_v36  ;;  %9943 = vmatmul.mubr.bf16.gmra.mrb[68].mxu0 %v12992_v54 }
 0x2b0   : > { %3209 = vmatpush1.bf16.msra.mxu1 %v11215_v23  ;;  %9946 = vmatprep.mubr.bf16.mxu0 %v13059_v55 }
 0x2b1   : > { %9551 = vmatpush3.bf16.msra.mxu0 %v11219_v3  ;;  %3210 = vmatprep.subr.bf16.mxu1 %v11222_v11  ;;  %v11270_v3 = vld [vmem:[#allocation10 + $0x1a0] ss:$12 sps:$4 sm:$0xff]   ;;  %v11248_v11 = vld [vmem:[#allocation10 + $0xd8] ss:$12 sps:$4 sm:$0xff]  }
 0x2b2   : > { %9552 = vmatprep.subr.bf16.mxu0 %v11223_v57  ;;  %2469 = vmatprep.mubr.bf16.mxu1 %v15279_v25  ;;  %v11253_v57 = vld [vmem:[#allocation10 + $0xf4] ss:$12 sps:$4 sm:$0xff]  }
 0x2b4   : > { %3211 = vmatpush1.bf16.msra.mxu1 %v11220_v43 }
 0x2b5   : > { %9553 = vmatpush3.bf16.msra.mxu0 %v11224_v5  ;;  %3212 = vmatprep.subr.bf16.mxu1 %v11227_v47  ;;  %v11271_v47 = vld [vmem:[#allocation10 + $0x1b8] ss:$12 sps:$4 sm:$0xff]  }
 0x2b6   : > { %9554 = vmatprep.subr.bf16.mxu0 %v11228_v6 }
 0x2b7   : > { %2470 = vmatmul.mubr.bf16.gmra.mrb[56].mxu1 %v12987_v7  ;;  %9947 = vmatmul.mubr.bf16.gmra.mrb[72].mxu0 %v13076_v8 }
 0x2b8   : > { %3213 = vmatpush1.bf16.msra.mxu1 %v11225_v17  ;;  %9950 = vmatprep.mubr.bf16.mxu0 %v13079_v0 }
 0x2b9   : > { %9555 = vmatpush3.bf16.msra.mxu0 %v11229_v1  ;;  %3214 = vmatprep.subr.bf16.mxu1 %v11232_v22  ;;  %v11251_v1 = vld [vmem:[#allocation10 + $0xf0] ss:$12 sps:$4 sm:$0xff]  }
 0x2ba   : > { %v9402_v52 = vpop.f32.mrb[0].mxu1  ;;  %9556 = vmatprep.subr.bf16.mxu0 %v11233_v18  ;;  %2479 = vmatprep.mubr.bf16.mxu1 %v15279_v25  ;;  %v11256_v18 = vld [vmem:[#allocation10 + $0x10c] ss:$12 sps:$4 sm:$0xff]  }
 0x2bb   : > { %v9403_v63 = vpop.f32.mrb[1].mxu1 }
 0x2bc   : > { %v13146_v48 = vadd.f32 %v9403_v63, %v9402_v52  ;;  %3215 = vmatpush1.bf16.msra.mxu1 %v11230_v38  ;;  %v9405_v41 = vpop.f32.mrb[2].mxu1  ;;  %v11259_v52 = vld [vmem:[#allocation10 + $0x124] ss:$12 sps:$4 sm:$0xff]  }
 0x2bd   : > { %9557 = vmatpush3.bf16.msra.mxu0 %v11234_v34  ;;  %v9406_v45 = vpop.f32.mrb[3].mxu1  ;;  %3216 = vmatprep.subr.bf16.mxu1 %v11237_v21  ;;  %v11272_v34 = vld [vmem:[#allocation10 + $0x1d0] ss:$12 sps:$4 sm:$0xff]   ;;  %v11254_v21 = vld [vmem:[#allocation10 + $0x108] ss:$12 sps:$4 sm:$0xff]  }
 0x2be   : > { %v13148_v2 = vadd.f32 %v9406_v45, %v9405_v41  ;;  %9558 = vmatprep.subr.bf16.mxu0 %v11238_v59  ;;  %v11273_v41 = vld [vmem:[#allocation10 + $0x1e8] ss:$12 sps:$4 sm:$0xff]  }
 0x2bf   : > { %2480 = vmatmul.mubr.bf16.gmra.mrb[60].mxu1 %v12992_v54  ;;  %9951 = vmatmul.mubr.bf16.gmra.mrb[76].mxu0 %v13088_v62 }
 0x2c0   : > { %3217 = vmatpush1.bf16.msra.mxu1 %v11235_v35  ;;  %3462 = vmatprep.mubr.bf16.mxu0 %v12795_v51 }
 0x2c1   : > { %9559 = vmatpush3.bf16.msra.mxu0 %v11239_v49  ;;  %3218 = vmatprep.subr.bf16.mxu1 %v11242_v20  ;;  %v11257_v49 = vld [vmem:[#allocation10 + $0x120] ss:$12 sps:$4 sm:$0xff]  }
 0x2c2   : > { %v9408_v4 = vpop.f32.mrb[4].mxu1  ;;  %9560 = vmatprep.subr.bf16.mxu0 %v11243_v26  ;;  %2489 = vmatprep.mubr.bf16.mxu1 %v15279_v25  ;;  %v11262_v26 = vld [vmem:[#allocation10 + $0x13c] ss:$12 sps:$4 sm:$0xff]  }
 0x2c3   : > { %v9409_v14 = vpop.f32.mrb[5].mxu1 }
 0x2c4   : > { %v13154_v61 = vadd.f32 %v9409_v14, %v9408_v4  ;;  %3219 = vmatpush1.bf16.msra.mxu1 %v11240_v29  ;;  %v9411_v19 = vpop.f32.mrb[6].mxu1  ;;  %v11265_v4 = vld [vmem:[#allocation10 + $0x154] ss:$12 sps:$4 sm:$0xff]  }
 0x2c5   : > { %9561 = vmatpush3.bf16.msra.mxu0 %v11244_v9  ;;  %v9412_v30 = vpop.f32.mrb[7].mxu1  ;;  %3220 = vmatprep.subr.bf16.mxu1 %v11247_v50  ;;  %v11274_v9 = vld [vmem:[#allocation10 + $0x200] ss:$12 sps:$4 sm:$0xff]   ;;  %v11260_v50 = vld [vmem:[#allocation10 + $0x138] ss:$12 sps:$4 sm:$0xff]  }
 0x2c6   : > { %v13156_v23 = vadd.f32 %v9412_v30, %v9411_v19  ;;  %9954 = vmatprep.subr.bf16.mxu0 %v11269_v56  ;;  %v11275_v19 = vld [vmem:[#allocation10 + $0x218] ss:$12 sps:$4 sm:$0xff]  }
 0x2c7   : > { %2490 = vmatmul.mubr.bf16.gmra.mrb[64].mxu1 %v13059_v55 }
 0x2c8   : > { %3221 = vmatpush1.bf16.msra.mxu1 %v11245_v39  ;;  %3463 = vmatmul.mubr.bf16.vlgmr.msra.gmra.mrb[80].mxu0 %v12797_v37 }
 0x2c9   : > { %3470 = vmatprep.mubr.bf16.mxu0 %v12819_v32  ;;  %3222 = vmatprep.subr.bf16.mxu1 %v11250_v40  ;;  %v11263_v40 = vld [vmem:[#allocation10 + $0x150] ss:$12 sps:$4 sm:$0xff]  }
 0x2ca   : > { %v9414_v43 = vpop.f32.mrb[8].mxu1  ;;  %2499 = vmatprep.mubr.bf16.mxu1 %v15279_v25  ;;  %9955 = vmatpush3.bf16.msra.mxu0 %v11269_v56 }
 0x2cb   : > { %v9415_v5 = vpop.f32.mrb[9].mxu1  ;;  %9956 = vmatprep.subr.bf16.mxu0 %v11270_v3 }
 0x2cc   : > { %v13162_v6 = vadd.f32 %v9415_v5, %v9414_v43  ;;  %3223 = vmatpush1.bf16.msra.mxu1 %v11248_v11  ;;  %v9417_v17 = vpop.f32.mrb[10].mxu1  ;;  %v11268_v11 = vld [vmem:[#allocation10 + $0x16c] ss:$12 sps:$4 sm:$0xff]   ;;  %v11276_v43 = vld [vmem:[#allocation10 + $0x230] ss:$12 sps:$4 sm:$0xff]  }
 0x2cd   : > { %v9418_v22 = vpop.f32.mrb[11].mxu1  ;;  %3224 = vmatprep.subr.bf16.mxu1 %v11253_v57  ;;  %v11266_v5 = vld [vmem:[#allocation10 + $0x168] ss:$12 sps:$4 sm:$0xff]  }
 0x2ce   : > { %v13164_v38 = vadd.f32 %v9418_v22, %v9417_v17  ;;  %9957 = vmatpush3.bf16.msra.mxu0 %v11270_v3 }
 0x2cf   : > { %2500 = vmatmul.mubr.bf16.gmra.mrb[68].mxu1 %v13076_v8  ;;  %9958 = vmatprep.subr.bf16.mxu0 %v11271_v47 }
 0x2d0   : > { %3225 = vmatpush1.bf16.msra.mxu1 %v11251_v1  ;;  %3471 = vmatmul.mubr.bf16.gmra.mrb[84].mxu0 %v12835_v16 }
 0x2d1   : > { %3478 = vmatprep.mubr.bf16.mxu0 %v12840_v28  ;;  %3226 = vmatprep.subr.bf16.mxu1 %v11256_v18 }
 0x2d2   : > { %v9420_v59 = vpop.f32.mrb[12].mxu1  ;;  %2509 = vmatprep.mubr.bf16.mxu1 %v15279_v25  ;;  %9959 = vmatpush3.bf16.msra.mxu0 %v11271_v47  ;;  %v11279_v47 = vld [vmem:[#allocation10 + $0x184] ss:$12 sps:$4 sm:$0xff]  }
 0x2d3   : > { %v9421_v63 = vpop.f32.mrb[13].mxu1  ;;  %9960 = vmatprep.subr.bf16.mxu0 %v11272_v34 }
 0x2d4   : > { %v13170_v35 = vadd.f32 %v9421_v63, %v9420_v59  ;;  %3227 = vmatpush1.bf16.msra.mxu1 %v11254_v21  ;;  %v9423_v45 = vpop.f32.mrb[14].mxu1  ;;  %v11280_v59 = vld [vmem:[#allocation10 + $0x198] ss:$12 sps:$4 sm:$0xff]   ;;  %v11285_v63 = vld [vmem:[#allocation10 + $0x1b4] ss:$12 sps:$4 sm:$0xff]  }
 0x2d5   : > { %v9424_v20 = vpop.f32.mrb[15].mxu1  ;;  %3228 = vmatprep.subr.bf16.mxu1 %v11259_v52  ;;  %v11282_v52 = vld [vmem:[#allocation10 + $0x19c] ss:$12 sps:$4 sm:$0xff]  }
 0x2d6   : > { %v13172_v29 = vadd.f32 %v9424_v20, %v9423_v45  ;;  %9961 = vmatpush3.bf16.msra.mxu0 %v11272_v34  ;;  %v11277_v34 = vld [vmem:[#allocation10 + $0x180] ss:$12 sps:$4 sm:$0xff]  }
 0x2d7   : > { %2510 = vmatmul.mubr.bf16.gmra.mrb[72].mxu1 %v13079_v0  ;;  %9962 = vmatprep.subr.bf16.mxu0 %v11273_v41 }
 0x2d8   : > { %3229 = vmatpush1.bf16.msra.mxu1 %v11257_v49  ;;  %3479 = vmatmul.mubr.bf16.gmra.mrb[88].mxu0 %v12876_v53 }
 0x2d9   : > { %3486 = vmatprep.mubr.bf16.mxu0 %v12881_v60  ;;  %3230 = vmatprep.subr.bf16.mxu1 %v11262_v26  ;;  %v11283_v26 = vld [vmem:[#allocation10 + $0x1b0] ss:$12 sps:$4 sm:$0xff]  }
 0x2da   : > { %v9426_v56 = vpop.f32.mrb[16].mxu1  ;;  %2519 = vmatprep.mubr.bf16.mxu1 %v15279_v25  ;;  %9963 = vmatpush3.bf16.msra.mxu0 %v11273_v41 }
 0x2db   : > { %v9427_v14 = vpop.f32.mrb[17].mxu1  ;;  %9964 = vmatprep.subr.bf16.mxu0 %v11274_v9 }
 0x2dc   : > { %v13178_v39 = vadd.f32 %v9427_v14, %v9426_v56  ;;  %3231 = vmatpush1.bf16.msra.mxu1 %v11260_v50  ;;  %v9429_v30 = vpop.f32.mrb[18].mxu1 }
 0x2dd   : > { %v9430_v3 = vpop.f32.mrb[19].mxu1  ;;  %3232 = vmatprep.subr.bf16.mxu1 %v11265_v4  ;;  %v11291_v4 = vld [vmem:[#allocation10 + $0x1e4] ss:$12 sps:$4 sm:$0xff]  }
 0x2de   : > { %v13180_v57 = vadd.f32 %v9430_v3, %v9429_v30  ;;  %9965 = vmatpush3.bf16.msra.mxu0 %v11274_v9 }
 0x2df   : > { %2520 = vmatmul.mubr.bf16.gmra.mrb[76].mxu1 %v13088_v62  ;;  %9966 = vmatprep.subr.bf16.mxu0 %v11275_v19 }
 0x2e0   : > { %3233 = vmatpush1.bf16.msra.mxu1 %v11263_v40  ;;  %3236 = vmatprep.mubr.bf16.mxu1 %v12795_v51  ;;  %v11289_v40 = vld [vmem:[#allocation10 + $0x1e0] ss:$12 sps:$4 sm:$0xff]  }
 0x2e1   : > { %3487 = vmatmul.mubr.bf16.gmra.mrb[92].mxu0 %v12915_v46  ;;  %3234 = vmatprep.subr.bf16.mxu1 %v11268_v11 }
 0x2e2   : > { %3494 = vmatprep.mubr.bf16.mxu0 %v12919_v15  ;;  %v9432_v17 = vpop.f32.mrb[20].mxu1  ;;  %9967 = vmatpush3.bf16.msra.mxu0 %v11275_v19 }
 0x2e3   : > { %v9433_v1 = vpop.f32.mrb[21].mxu1  ;;  %9968 = vmatprep.subr.bf16.mxu0 %v11276_v43 }
 0x2e4   : > { %v13186_v22 = vadd.f32 %v9433_v1, %v9432_v17  ;;  %3235 = vmatpush1.bf16.msra.mxu1 %v11266_v5  ;;  %v9435_v18 = vpop.f32.mrb[22].mxu1 }
 0x2e5   : > { %v9436_v21 = vpop.f32.mrb[23].mxu1  ;;  %3317 = vmatprep.subr.bf16.mxu1 %v11279_v47 }
 0x2e6   : > { %v13188_v51 = vadd.f32 %v9436_v21, %v9435_v18  ;;  %9969 = vmatpush3.bf16.msra.mxu0 %v11276_v43  ;;  %v11297_v43 = vld [vmem:[#allocation10 + $0x214] ss:$12 sps:$4 sm:$0xff]  }
 0x2e7   : > { %3237 = vmatmul.mubr.bf16.vlgmr.msra.gmra.mrb[80].mxu1 %v12797_v37  ;;  %v11288_v37 = vld [vmem:[#allocation10 + $0x1cc] ss:$12 sps:$4 sm:$0xff]  }
 0x2e8   : > { %3246 = vmatprep.mubr.bf16.mxu1 %v12819_v32  ;;  %3318 = vmatpush1.bf16.msra.mxu1 %v11277_v34  ;;  %v11286_v32 = vld [vmem:[#allocation10 + $0x1c8] ss:$12 sps:$4 sm:$0xff]  }
 0x2e9   : > { %3495 = vmatmul.mubr.bf16.gmra.mrb[96].mxu0 %v12934_v42  ;;  %3319 = vmatprep.subr.bf16.mxu1 %v11282_v52 }
 0x2ea   : > { %3502 = vmatprep.mubr.bf16.mxu0 %v12961_v44  ;;  %v9438_v41 = vpop.f32.mrb[24].mxu1 }
 0x2eb   : > { %v9439_v45 = vpop.f32.mrb[25].mxu1 }
 0x2ec   : > { %v13194_v49 = vadd.f32 %v9439_v45, %v9438_v41  ;;  %v9441_v20 = vpop.f32.mrb[26].mxu1  ;;  %3320 = vmatpush1.bf16.msra.mxu1 %v11280_v59  ;;  %v11300_v45 = vld [vmem:[#allocation10 + $0x22c] ss:$12 sps:$4 sm:$0xff]  }
 0x2ed   : > { %v9442_v9 = vpop.f32.mrb[27].mxu1  ;;  %3321 = vmatprep.subr.bf16.mxu1 %v11285_v63 }
 0x2ee   : > { %v13196_v50 = vadd.f32 %v9442_v9, %v9441_v20  ;;  %v11298_v9 = vld [vmem:[#allocation10 + $0x228] ss:$12 sps:$4 sm:$0xff]  }
 0x2ef   : > { %3247 = vmatmul.mubr.bf16.gmra.mrb[84].mxu1 %v12835_v16  ;;  %v11294_v16 = vld [vmem:[#allocation10 + $0x1fc] ss:$12 sps:$4 sm:$0xff]  }
 0x2f0   : > { %3256 = vmatprep.mubr.bf16.mxu1 %v12840_v28  ;;  %3322 = vmatpush1.bf16.msra.mxu1 %v11283_v26  ;;  %v11292_v28 = vld [vmem:[#allocation10 + $0x1f8] ss:$12 sps:$4 sm:$0xff]  }
 0x2f1   : > { %3503 = vmatmul.mubr.bf16.gmra.mrb[100].mxu0 %v13000_v27  ;;  %3323 = vmatprep.subr.bf16.mxu1 %v11288_v37 }
 0x2f2   : > { %3510 = vmatprep.mubr.bf16.mxu0 %v13003_v12  ;;  %v9444_v56 = vpop.f32.mrb[28].mxu1 }
 0x2f3   : > { %v9445_v14 = vpop.f32.mrb[29].mxu1 }
 0x2f4   : > { %v13202_v19 = vadd.f32 %v9445_v14, %v9444_v56  ;;  %v9447_v30 = vpop.f32.mrb[30].mxu1  ;;  %3324 = vmatpush1.bf16.msra.mxu1 %v11286_v32 }
 0x2f5   : > { %v9448_v3 = vpop.f32.mrb[31].mxu1  ;;  %3325 = vmatprep.subr.bf16.mxu1 %v11291_v4 }
 0x2f6   : > { %v13204_v11 = vadd.f32 %v9448_v3, %v9447_v30 }
 0x2f7   : > { %3257 = vmatmul.mubr.bf16.gmra.mrb[88].mxu1 %v12876_v53 }
 0x2f8   : > { %3266 = vmatprep.mubr.bf16.mxu1 %v12881_v60  ;;  %3326 = vmatpush1.bf16.msra.mxu1 %v11289_v40  ;;  %v11295_v60 = vld [vmem:[#allocation10 + $0x210] ss:$12 sps:$4 sm:$0xff]  }
 0x2f9   : > { %3511 = vmatmul.mubr.bf16.gmra.mrb[104].mxu0 %v13020_v10  ;;  %3327 = vmatprep.subr.bf16.mxu1 %v11294_v16 }
 0x2fa   : > { %3518 = vmatprep.mubr.bf16.mxu0 %v13023_v33  ;;  %v1551_v5 = vpop.f32.mrb[0].mxu0  ;;  %v9908_v47 = vpop.f32.mrb[32].mxu1 }
 0x2fb   : > { %v1770_v17 = vadd.f32 %v9908_v47, %v13154_v61  ;;  %v1553_v1 = vpop.f32.mrb[1].mxu0  ;;  %v1761_v18 = vpop.f32.mrb[33].mxu1 }
 0x2fc   : > { %v1762_v34 = vadd.f32 %v13146_v48, %v1761_v18  ;;  %v1555_v21 = vpop.f32.mrb[2].mxu0  ;;  %v9909_v53 = vpop.f32.mrb[34].mxu1  ;;  %3328 = vmatpush1.bf16.msra.mxu1 %v11292_v28 }
 0x2fd   : > { %v13212_v52 = vpack.c.bf16 %v1555_v21, %v1551_v5  ;;  %v1773_v59 = vadd.f32 %v9909_v53, %v13156_v23  ;;  %v1557_v63 = vpop.f32.mrb[3].mxu0  ;;  %v1764_v41 = vpop.f32.mrb[35].mxu1  ;;  %3329 = vmatprep.subr.bf16.mxu1 %v11297_v43 }
 0x2fe   : > { %v13215_v20 = vpack.c.bf16 %v1557_v63, %v1553_v1  ;;  %v1765_v61 = vadd.f32 %v13148_v2, %v1764_v41 }
 0x2ff   : > { %v13218_v26 = vpack.c.bf16 %v1773_v59, %v1770_v17  ;;  %3267 = vmatmul.mubr.bf16.gmra.mrb[92].mxu1 %v12915_v46 }
 0x300   : > { %15441 = vst [vmem:[#allocation28_spill] sm:$0xff] %v13215_v20  ;;  %v13221_v48 = vpack.c.bf16 %v1765_v61, %v1762_v34  ;;  %3276 = vmatprep.mubr.bf16.mxu1 %v12919_v15  ;;  %3330 = vmatpush1.bf16.msra.mxu1 %v11295_v60 }
 0x301   : > { %15442 = vst [vmem:[#allocation23_spill] sm:$0xff] %v13218_v26  ;;  %3519 = vmatmul.mubr.bf16.gmra.mrb[108].mxu0 %v13032_v24  ;;  %3331 = vmatprep.subr.bf16.mxu1 %v11300_v45 }
 0x302   : > { %15443 = vst [vmem:[#allocation26_spill] sm:$0xff] %v13221_v48  ;;  %9970 = vmatprep.mubr.bf16.mxu0 %v12946_v58  ;;  %v1561_v23 = vpop.f32.mrb[4].mxu0  ;;  %v9912_v37 = vpop.f32.mrb[36].mxu1 }
 0x303   : > { %v1786_v32 = vadd.f32 %v9912_v37, %v13170_v35  ;;  %v1563_v2 = vpop.f32.mrb[5].mxu0  ;;  %v1777_v4 = vpop.f32.mrb[37].mxu1 }
 0x304   : > { %v1778_v56 = vadd.f32 %v13162_v6, %v1777_v4  ;;  %v1565_v46 = vpop.f32.mrb[6].mxu0  ;;  %v9913_v14 = vpop.f32.mrb[38].mxu1  ;;  %3332 = vmatpush1.bf16.msra.mxu1 %v11298_v9 }
 0x305   : > { %v13228_v30 = vpack.c.bf16 %v1565_v46, %v1561_v23  ;;  %v1789_v15 = vadd.f32 %v9913_v14, %v13172_v29  ;;  %v1567_v40 = vpop.f32.mrb[7].mxu0  ;;  %v1780_v3 = vpop.f32.mrb[39].mxu1 }
 0x306   : > { %v13231_v16 = vpack.c.bf16 %v1567_v40, %v1563_v2  ;;  %v1781_v28 = vadd.f32 %v13164_v38, %v1780_v3 }
 0x307   : > { %v13234_v43 = vpack.c.bf16 %v1789_v15, %v1786_v32  ;;  %3277 = vmatmul.mubr.bf16.gmra.mrb[96].mxu1 %v12934_v42 }
 0x308   : > { %15444 = vst [vmem:[#allocation27_spill] sm:$0xff] %v13231_v16  ;;  %v13237_v35 = vpack.c.bf16 %v1781_v28, %v1778_v56  ;;  %3286 = vmatprep.mubr.bf16.mxu1 %v12961_v44 }
 0x309   : > { %15445 = vst [vmem:[#allocation25_spill] sm:$0xff] %v13234_v43  ;;  %9971 = vmatmul.mubr.bf16.vlgmr.msra.gmra.mrb[112].mxu0 %v12973_v36 }
 0x30a   : > { %15446 = vst [vmem:[#allocation21_spill] sm:$0xff] %v13237_v35  ;;  %9974 = vmatprep.mubr.bf16.mxu0 %v12987_v7  ;;  %v1571_v6 = vpop.f32.mrb[8].mxu0  ;;  %v9916_v29 = vpop.f32.mrb[40].mxu1 }
 0x30b   : > { %v1802_v5 = vadd.f32 %v9916_v29, %v13186_v22  ;;  %v1573_v47 = vpop.f32.mrb[9].mxu0  ;;  %v1793_v17 = vpop.f32.mrb[41].mxu1 }
 0x30c   : > { %v1794_v38 = vadd.f32 %v13178_v39, %v1793_v17  ;;  %v1575_v1 = vpop.f32.mrb[10].mxu0  ;;  %v9917_v18 = vpop.f32.mrb[42].mxu1 }
 0x30d   : > { %v13244_v34 = vpack.c.bf16 %v1575_v1, %v1571_v6  ;;  %v1805_v42 = vadd.f32 %v9917_v18, %v13188_v51  ;;  %v1577_v21 = vpop.f32.mrb[11].mxu0  ;;  %v1796_v44 = vpop.f32.mrb[43].mxu1 }
 0x30e   : > { %v13247_v53 = vpack.c.bf16 %v1577_v21, %v1573_v47  ;;  %v1797_v60 = vadd.f32 %v13180_v57, %v1796_v44 }
 0x30f   : > { %v13250_v59 = vpack.c.bf16 %v1805_v42, %v1802_v5  ;;  %3287 = vmatmul.mubr.bf16.gmra.mrb[100].mxu1 %v13000_v27 }
 0x310   : > { %15447 = vst [vmem:[#allocation20_spill] sm:$0xff] %v13247_v53  ;;  %v13253_v22 = vpack.c.bf16 %v1797_v60, %v1794_v38  ;;  %3296 = vmatprep.mubr.bf16.mxu1 %v13003_v12 }
 0x311   : > { %15448 = vst [vmem:[#allocation24_spill] sm:$0xff] %v13250_v59  ;;  %9975 = vmatmul.mubr.bf16.gmra.mrb[116].mxu0 %v12992_v54 }
 0x312   : > { %15449 = vst [vmem:[#allocation30_spill] sm:$0xff] %v13253_v22  ;;  %9978 = vmatprep.mubr.bf16.mxu0 %v13059_v55  ;;  %v1581_v39 = vpop.f32.mrb[12].mxu0  ;;  %v9920_v51 = vpop.f32.mrb[44].mxu1  ;;  %v15489_v22 = vmov 0 }
 0x313   : > { %v1818_v63 = vadd.f32 %v9920_v51, %v13202_v19  ;;  %v1583_v41 = vpop.f32.mrb[13].mxu0  ;;  %v1809_v45 = vpop.f32.mrb[45].mxu1 }
 0x314   : > { %v1810_v57 = vadd.f32 %v13194_v49, %v1809_v45  ;;  %v1585_v61 = vpop.f32.mrb[14].mxu0  ;;  %v9921_v9 = vpop.f32.mrb[46].mxu1 }
 0x315   : > { %v13260_v23 = vpack.c.bf16 %v1585_v61, %v1581_v39  ;;  %v1821_v27 = vadd.f32 %v9921_v9, %v13204_v11  ;;  %v1587_v37 = vpop.f32.mrb[15].mxu0  ;;  %v1812_v12 = vpop.f32.mrb[47].mxu1 }
 0x316   : > { %v13263_v32 = vpack.c.bf16 %v1587_v37, %v1583_v41  ;;  %v1813_v2 = vadd.f32 %v13196_v50, %v1812_v12 }
 0x317   : > { %v13266_v4 = vpack.c.bf16 %v1821_v27, %v1818_v63  ;;  %3297 = vmatmul.mubr.bf16.gmra.mrb[104].mxu1 %v13020_v10 }
 0x318   : > { %15450 = vst [vmem:[#allocation22_spill] sm:$0xff] %v13263_v32  ;;  %v13269_v19 = vpack.c.bf16 %v1813_v2, %v1810_v57  ;;  %3306 = vmatprep.mubr.bf16.mxu1 %v13023_v33 }
 0x319   : > { %15451 = vst [vmem:[#allocation29_spill] sm:$0xff] %v13266_v4  ;;  %9979 = vmatmul.mubr.bf16.gmra.mrb[120].mxu0 %v13076_v8 }
 0x31a   : > { %15452 = vst [vmem:[#allocation32_spill] sm:$0xff] %v13269_v19  ;;  %9982 = vmatprep.mubr.bf16.mxu0 %v13079_v0  ;;  %v1591_v49 = vpop.f32.mrb[16].mxu0 }
 0x31b   : > { %v1593_v11 = vpop.f32.mrb[17].mxu0 }
 0x31c   : > { %v1595_v56 = vpop.f32.mrb[18].mxu0 }
 0x31d   : > { %v13274_v46 = vpack.c.bf16 %v1595_v56, %v1591_v49  ;;  %v1597_v14 = vpop.f32.mrb[19].mxu0 }
 0x31e   : > { %v13276_v15 = vpack.c.bf16 %v1597_v14, %v1593_v11 }
 0x31f   : > { %3307 = vmatmul.mubr.bf16.gmra.mrb[108].mxu1 %v13032_v24 }
 0x320   : > { %15453 = vst [vmem:[#allocation31_spill] sm:$0xff] %v13276_v15  ;;  %3349 = vmatprep.mubr.bf16.mxu1 %v15279_v25 }
 0x321   : > { %9983 = vmatmul.mubr.bf16.gmra.mrb[124].mxu0 %v13088_v62 }
 0x322   : > { %10002 = vmatprep.mubr.msk.bf16.mxu0 %vm15314_vm0, %v13212_v52  ;;  %v1601_v10 = vpop.f32.mrb[20].mxu0 }
 0x323   : > { %v1603_v33 = vpop.f32.mrb[21].mxu0 }
 0x324   : > { %v1605_v50 = vpop.f32.mrb[22].mxu0 }
 0x325   : > { %v13283_v40 = vpack.c.bf16 %v1605_v50, %v1601_v10  ;;  %v1607_v3 = vpop.f32.mrb[23].mxu0 }
 0x326   : > { %v13285_v28 = vpack.c.bf16 %v1607_v3, %v1603_v33 }
 0x327   : > { %3350 = vmatmul.mubr.bf16.vlgmr.msra.gmra.mrb[80].mxu1 %v12946_v58 }
 0x328   : > { %15454 = vst [vmem:[#allocation36_spill] sm:$0xff] %v13285_v28  ;;  %3359 = vmatprep.mubr.bf16.mxu1 %v15279_v25 }
 0x32a   : > { %v1611_v24 = vpop.f32.mrb[24].mxu0 }
 0x32b   : > { %v1613_v6 = vpop.f32.mrb[25].mxu0 }
 0x32c   : > { %v1615_v29 = vpop.f32.mrb[26].mxu0 }
 0x32d   : > { %v13289_v5 = vpack.c.bf16 %v1615_v29, %v1611_v24  ;;  %v1617_v47 = vpop.f32.mrb[27].mxu0 }
 0x32e   : > { %v13291_v17 = vpack.c.bf16 %v1617_v47, %v1613_v6 }
 0x32f   : > { %3360 = vmatmul.mubr.bf16.gmra.mrb[84].mxu1 %v12973_v36 }
 0x330   : > { %15455 = vst [vmem:[#allocation37_spill] sm:$0xff] %v13291_v17  ;;  %3369 = vmatprep.mubr.bf16.mxu1 %v15279_v25 }
 0x332   : > { %v1621_v38 = vpop.f32.mrb[28].mxu0 }
 0x333   : > { %v1623_v1 = vpop.f32.mrb[29].mxu0 }
 0x334   : > { %v1625_v18 = vpop.f32.mrb[30].mxu0 }
 0x335   : > { %v13295_v42 = vpack.c.bf16 %v1625_v18, %v1621_v38  ;;  %v1627_v58 = vpop.f32.mrb[31].mxu0 }
 0x336   : > { %v13297_v21 = vpack.c.bf16 %v1627_v58, %v1623_v1 }
 0x337   : > { %3370 = vmatmul.mubr.bf16.gmra.mrb[88].mxu1 %v12987_v7 }
 0x338   : > { %15456 = vst [vmem:[#allocation38_spill] sm:$0xff] %v13297_v21  ;;  %3379 = vmatprep.mubr.bf16.mxu1 %v15279_v25 }
 0x33a   : > { %v9482_v44 = vpop.f32.mrb[32].mxu0 }
 0x33b   : > { %v9483_v60 = vpop.f32.mrb[33].mxu0 }
 0x33c   : > { %v9484_v39 = vadd.f32 %v9483_v60, %v9482_v44  ;;  %v9485_v51 = vpop.f32.mrb[34].mxu0 }
 0x33d   : > { %v9486_v63 = vpop.f32.mrb[35].mxu0 }
 0x33e   : > { %v13301_v36 = vadd.f32 %v9486_v63, %v9485_v51 }
 0x33f   : > { %3380 = vmatmul.mubr.bf16.gmra.mrb[92].mxu1 %v12992_v54 }
 0x340   : > { %3389 = vmatprep.mubr.bf16.mxu1 %v15279_v25 }
 0x342   : > { %v9488_v41 = vpop.f32.mrb[36].mxu0 }
 0x343   : > { %v9489_v45 = vpop.f32.mrb[37].mxu0 }
 0x344   : > { %v9490_v57 = vadd.f32 %v9489_v45, %v9488_v41  ;;  %v9491_v61 = vpop.f32.mrb[38].mxu0 }
 0x345   : > { %v9492_v9 = vpop.f32.mrb[39].mxu0 }
 0x346   : > { %v9493_v27 = vadd.f32 %v9492_v9, %v9491_v61 }
 0x347   : > { %3390 = vmatmul.mubr.bf16.gmra.mrb[96].mxu1 %v13059_v55 }
 0x348   : > { %3399 = vmatprep.mubr.bf16.mxu1 %v15279_v25 }
 0x34a   : > { %v9494_v7 = vpop.f32.mrb[40].mxu0 }
 0x34b   : > { %v9495_v37 = vpop.f32.mrb[41].mxu0 }
 0x34c   : > { %v13307_v12 = vadd.f32 %v9495_v37, %v9494_v7  ;;  %v9497_v2 = vpop.f32.mrb[42].mxu0 }
 0x34d   : > { %v9498_v49 = vpop.f32.mrb[43].mxu0 }
 0x34e   : > { %v13309_v11 = vadd.f32 %v9498_v49, %v9497_v2 }
 0x34f   : > { %3400 = vmatmul.mubr.bf16.gmra.mrb[100].mxu1 %v13076_v8 }
 0x350   : > { %3409 = vmatprep.mubr.bf16.mxu1 %v15279_v25 }
 0x352   : > { %v9500_v54 = vpop.f32.mrb[44].mxu0 }
 0x353   : > { %v9501_v56 = vpop.f32.mrb[45].mxu0 }
 0x354   : > { %v9502_v14 = vadd.f32 %v9501_v56, %v9500_v54  ;;  %v9503_v10 = vpop.f32.mrb[46].mxu0 }
 0x355   : > { %v9504_v33 = vpop.f32.mrb[47].mxu0 }
 0x356   : > { %v9505_v55 = vadd.f32 %v9504_v33, %v9503_v10 }
 0x357   : > { %3410 = vmatmul.mubr.bf16.gmra.mrb[104].mxu1 %v13079_v0 }
 0x358   : > { %3419 = vmatprep.mubr.bf16.mxu1 %v15279_v25 }
 0x35a   : > { %v9506_v50 = vpop.f32.mrb[48].mxu0 }
 0x35b   : > { %v9507_v3 = vpop.f32.mrb[49].mxu0 }
 0x35c   : > { %v13315_v24 = vadd.f32 %v9507_v3, %v9506_v50  ;;  %v9509_v6 = vpop.f32.mrb[50].mxu0 }
 0x35d   : > { %v9510_v29 = vpop.f32.mrb[51].mxu0 }
 0x35e   : > { %v13317_v47 = vadd.f32 %v9510_v29, %v9509_v6 }
 0x35f   : > { %3420 = vmatmul.mubr.bf16.gmra.mrb[108].mxu1 %v13088_v62 }
 0x362   : > { %v9512_v8 = vpop.f32.mrb[52].mxu0 }
 0x363   : > { %v9513_v38 = vpop.f32.mrb[53].mxu0 }
 0x364   : > { %v9514_v1 = vadd.f32 %v9513_v38, %v9512_v8  ;;  %v9515_v18 = vpop.f32.mrb[54].mxu0 }
 0x365   : > { %v9516_v58 = vpop.f32.mrb[55].mxu0 }
 0x366   : > { %v13320_v44 = vadd.f32 %v9516_v58, %v9515_v18 }
 0x36a   : > { %v9518_v0 = vpop.f32.mrb[56].mxu0 }
 0x36b   : > { %v9519_v60 = vpop.f32.mrb[57].mxu0 }
 0x36c   : > { %v13322_v51 = vadd.f32 %v9519_v60, %v9518_v0  ;;  %v9521_v63 = vpop.f32.mrb[58].mxu0 }
 0x36d   : > { %v9522_v41 = vpop.f32.mrb[59].mxu0 }
 0x36e   : > { %v13324_v45 = vadd.f32 %v9522_v41, %v9521_v63 }
 0x372   : > { %v9524_v61 = vpop.f32.mrb[60].mxu0 }
 0x373   : > { %v9525_v9 = vpop.f32.mrb[61].mxu0 }
 0x374   : > { %v13326_v7 = vadd.f32 %v9525_v9, %v9524_v61  ;;  %v9527_v62 = vpop.f32.mrb[62].mxu0 }
 0x375   : > { %v9528_v37 = vpop.f32.mrb[63].mxu0 }
 0x376   : > { %v13328_v2 = vadd.f32 %v9528_v37, %v9527_v62 }
 0x37a   : > { %v2451_v49 = vpop.f32.mrb[48].mxu1  ;;  %v9940_v54 = vpop.f32.mrb[64].mxu0 }
 0x37b   : > { %v2453_v56 = vpop.f32.mrb[49].mxu1  ;;  %v2670_v10 = vadd.f32 %v9940_v54, %v9490_v57  ;;  %v2661_v33 = vpop.f32.mrb[65].mxu0 }
 0x37c   : > { %v2455_v50 = vpop.f32.mrb[50].mxu1  ;;  %v2662_v3 = vadd.f32 %v9484_v39, %v2661_v33  ;;  %v9941_v6 = vpop.f32.mrb[66].mxu0 }
 0x37d   : > { %v3667_v29 = vpack.c.bf16 %v2455_v50, %v2451_v49  ;;  %v2457_v8 = vpop.f32.mrb[51].mxu1  ;;  %v2673_v38 = vadd.f32 %v9941_v6, %v9493_v27  ;;  %v2664_v18 = vpop.f32.mrb[67].mxu0 }
 0x37e   : > { %v13330_v58 = vpack.c.bf16 %v2457_v8, %v2453_v56  ;;  %v2665_v0 = vadd.f32 %v13301_v36, %v2664_v18 }
 0x37f   : > { %v13333_v60 = vpack.c.bf16 %v2673_v38, %v2670_v10  ;;  %4166 = vrot.lane.b32.xlu0 %v3667_v29, %s12137_s23  ;;  %10866 = vmatprep.subr.msk.bf16.mxu0 %vm15314_vm0, %v3667_v29  ;;  %v3709_v57 = vsel %vm15314_vm0, %v3667_v29, 0 }
 0x380   : > { %v13338_v63 = vpack.c.bf16 %v2665_v0, %v2662_v3  ;;  %9987 = vmatpush3.bf16.xpose.msra.mxu0 %v3709_v57 }
 0x381   : > { %15457 = vst [vmem:[#allocation39_spill] sm:$0xff] %v13333_v60 }
 0x382   : > { %15458 = vst [vmem:[#allocation40_spill] sm:$0xff] %v13338_v63  ;;  %v2461_v39 = vpop.f32.mrb[52].mxu1  ;;  %v9944_v41 = vpop.f32.mrb[68].mxu0 }
 0x383   : > { %v2463_v27 = vpop.f32.mrb[53].mxu1  ;;  %v2686_v61 = vadd.f32 %v9944_v41, %v9502_v14  ;;  %v2677_v9 = vpop.f32.mrb[69].mxu0 }
 0x384   : > { %v2465_v62 = vpop.f32.mrb[54].mxu1  ;;  %v2678_v36 = vadd.f32 %v13307_v12, %v2677_v9  ;;  %v9945_v37 = vpop.f32.mrb[70].mxu0 }
 0x385   : > { %v3668_v49 = vpack.c.bf16 %v2465_v62, %v2461_v39  ;;  %v2467_v54 = vpop.f32.mrb[55].mxu1  ;;  %v2689_v56 = vadd.f32 %v9945_v37, %v9505_v55  ;;  %v2680_v10 = vpop.f32.mrb[71].mxu0 }
 0x386   : > { %v13341_v33 = vpack.c.bf16 %v2467_v54, %v2463_v27  ;;  %v2681_v50 = vadd.f32 %v13309_v11, %v2680_v10 }
 0x387   : > { %v13344_v3 = vpack.c.bf16 %v2689_v56, %v2686_v61  ;;  %4168 = vrot.lane.b32.xlu1 %v3668_v49, %s12137_s23  ;;  %10867 = vmatprep.subr.msk.bf16.mxu0 %vm15314_vm0, %v3668_v49  ;;  %v3712_v14 = vsel %vm15314_vm0, %v3668_v49, 0 }
 0x388   : > { %v13349_v6 = vpack.c.bf16 %v2681_v50, %v2678_v36  ;;  %9989 = vmatpush3.bf16.xpose.msra.mxu0 %v3712_v14 }
 0x389   : > { %15459 = vst [vmem:[#allocation41_spill] sm:$0xff] %v13344_v3 }
 0x38a   : > { %15460 = vst [vmem:[#allocation42_spill] sm:$0xff] %v13349_v6  ;;  %v2471_v12 = vpop.f32.mrb[56].mxu1  ;;  %v9948_v29 = vpop.f32.mrb[72].mxu0 }
 0x38b   : > { %v2473_v8 = vpop.f32.mrb[57].mxu1  ;;  %v2702_v55 = vadd.f32 %v9948_v29, %v9514_v1  ;;  %v2693_v38 = vpop.f32.mrb[73].mxu0 }
 0x38c   : > { %v2475_v18 = vpop.f32.mrb[58].mxu1  ;;  %v2694_v0 = vadd.f32 %v13315_v24, %v2693_v38  ;;  %v9949_v11 = vpop.f32.mrb[74].mxu0 }
 0x38d   : > { %v3669_v57 = vpack.c.bf16 %v2475_v18, %v2471_v12  ;;  %v2477_v39 = vpop.f32.mrb[59].mxu1  ;;  %v2705_v41 = vadd.f32 %v9949_v11, %v13320_v44  ;;  %v2696_v27 = vpop.f32.mrb[75].mxu0 }
 0x38e   : > { %v13353_v61 = vpack.c.bf16 %v2477_v39, %v2473_v8  ;;  %v2697_v9 = vadd.f32 %v13317_v47, %v2696_v27 }
 0x38f   : > { %v13356_v62 = vpack.c.bf16 %v2705_v41, %v2702_v55  ;;  %4170 = vrot.lane.b32.xlu1 %v3669_v57, %s12137_s23  ;;  %10868 = vmatprep.subr.msk.bf16.mxu0 %vm15314_vm0, %v3669_v57  ;;  %v3715_v1 = vsel %vm15314_vm0, %v3669_v57, 0 }
 0x390   : > { %v13361_v36 = vpack.c.bf16 %v2697_v9, %v2694_v0  ;;  %9991 = vmatpush3.bf16.xpose.msra.mxu0 %v3715_v1 }
 0x391   : > { %15461 = vst [vmem:[#allocation43_spill] sm:$0xff] %v13356_v62 }
 0x392   : > { %15462 = vst [vmem:[#allocation44_spill] sm:$0xff] %v13361_v36  ;;  %v2481_v24 = vpop.f32.mrb[60].mxu1  ;;  %v9952_v37 = vpop.f32.mrb[76].mxu0 }
 0x393   : > { %v2483_v49 = vpop.f32.mrb[61].mxu1  ;;  %v2718_v44 = vadd.f32 %v9952_v37, %v13326_v7  ;;  %v2709_v54 = vpop.f32.mrb[77].mxu0 }
 0x394   : > { %v2485_v56 = vpop.f32.mrb[62].mxu1  ;;  %v2710_v47 = vadd.f32 %v13322_v51, %v2709_v54  ;;  %v9953_v10 = vpop.f32.mrb[78].mxu0 }
 0x395   : > { %v3670_v50 = vpack.c.bf16 %v2485_v56, %v2481_v24  ;;  %v2487_v14 = vpop.f32.mrb[63].mxu1  ;;  %v2721_v12 = vadd.f32 %v9953_v10, %v13328_v2  ;;  %v2712_v29 = vpop.f32.mrb[79].mxu0 }
 0x396   : > { %v13366_v8 = vpack.c.bf16 %v2487_v14, %v2483_v49  ;;  %v2713_v55 = vadd.f32 %v13324_v45, %v2712_v29 }
 0x397   : > { %v13369_v38 = vpack.c.bf16 %v2721_v12, %v2718_v44  ;;  %4172 = vrot.lane.b32.xlu1 %v3670_v50, %s12137_s23  ;;  %10869 = vmatprep.subr.msk.bf16.mxu0 %vm15314_vm0, %v3670_v50  ;;  %v3718_v7 = vsel %vm15314_vm0, %v3670_v50, 0 }
 0x398   : > { %15463 = vst [vmem:[#allocation45_spill] sm:$0xff] %v13366_v8  ;;  %v13374_v18 = vpack.c.bf16 %v2713_v55, %v2710_v47  ;;  %9993 = vmatpush3.bf16.xpose.msra.mxu0 %v3718_v7 }
 0x399   : > { %15464 = vst [vmem:[#allocation46_spill] sm:$0xff] %v13369_v38 }
 0x39a   : > { %15465 = vst [vmem:[#allocation47_spill] sm:$0xff] %v13374_v18  ;;  %v2491_v51 = vpop.f32.mrb[64].mxu1  ;;  %v3630_v18 = vadd.s32 40, %v12726_v13 }
 0x39b   : > { %v2493_v0 = vpop.f32.mrb[65].mxu1  ;;  %v9562_v11 = vpop.f32.mrb[80].mxu0 }
 0x39c   : > { %v2495_v2 = vpop.f32.mrb[66].mxu1  ;;  %v9563_v57 = vpop.f32.mrb[81].mxu0 }
 0x39d   : > { %v3671_v39 = vpack.c.bf16 %v2495_v2, %v2491_v51  ;;  %v13376_v41 = vadd.f32 %v9563_v57, %v9562_v11  ;;  %v2497_v45 = vpop.f32.mrb[67].mxu1  ;;  %v9565_v27 = vpop.f32.mrb[82].mxu0 }
 0x39e   : > { %v13378_v9 = vpack.c.bf16 %v2497_v45, %v2493_v0  ;;  %v9566_v1 = vpop.f32.mrb[83].mxu0 }
 0x39f   : > { %v13380_v24 = vadd.f32 %v9566_v1, %v9565_v27  ;;  %4174 = vrot.lane.b32.xlu0 %v3671_v39, %s12137_s23  ;;  %10870 = vmatprep.subr.msk.bf16.mxu0 %vm15314_vm0, %v3671_v39  ;;  %v3721_v37 = vsel %vm15314_vm0, %v3671_v39, 0 }
 0x3a0   : > { %15466 = vst [vmem:[#allocation48_spill] sm:$0xff] %v13378_v9  ;;  %9995 = vmatpush3.bf16.xpose.msra.mxu0 %v3721_v37 }
 0x3a2   : > { %v2501_v49 = vpop.f32.mrb[68].mxu1 }
 0x3a3   : > { %v2503_v44 = vpop.f32.mrb[69].mxu1  ;;  %v9568_v54 = vpop.f32.mrb[84].mxu0 }
 0x3a4   : > { %v2505_v56 = vpop.f32.mrb[70].mxu1  ;;  %v9569_v47 = vpop.f32.mrb[85].mxu0 }
 0x3a5   : > { %v3672_v10 = vpack.c.bf16 %v2505_v56, %v2501_v49  ;;  %v13385_v50 = vadd.f32 %v9569_v47, %v9568_v54  ;;  %v2507_v14 = vpop.f32.mrb[71].mxu1  ;;  %v9571_v12 = vpop.f32.mrb[86].mxu0 }
 0x3a6   : > { %v13387_v29 = vpack.c.bf16 %v2507_v14, %v2503_v44  ;;  %v9572_v55 = vpop.f32.mrb[87].mxu0 }
 0x3a7   : > { %v13389_v7 = vadd.f32 %v9572_v55, %v9571_v12  ;;  %4176 = vrot.lane.b32.xlu1 %v3672_v10, %s12137_s23  ;;  %10871 = vmatprep.subr.msk.bf16.mxu0 %vm15314_vm0, %v3672_v10  ;;  %v3724_v51 = vsel %vm15314_vm0, %v3672_v10, 0 }
 0x3a8   : > { %15467 = vst [vmem:[#allocation49_spill] sm:$0xff] %v13387_v29  ;;  %9997 = vmatpush3.bf16.xpose.msra.mxu0 %v3724_v51 }
 0x3aa   : > { %v2511_v0 = vpop.f32.mrb[72].mxu1 }
 0x3ab   : > { %v2513_v11 = vpop.f32.mrb[73].mxu1  ;;  %v9574_v2 = vpop.f32.mrb[88].mxu0 }
 0x3ac   : > { %v2515_v57 = vpop.f32.mrb[74].mxu1  ;;  %v9575_v39 = vpop.f32.mrb[89].mxu0 }
 0x3ad   : > { %v3673_v45 = vpack.c.bf16 %v2515_v57, %v2511_v0  ;;  %v13394_v27 = vadd.f32 %v9575_v39, %v9574_v2  ;;  %v2517_v1 = vpop.f32.mrb[75].mxu1  ;;  %v9577_v37 = vpop.f32.mrb[90].mxu0 }
 0x3ae   : > { %v13396_v49 = vpack.c.bf16 %v2517_v1, %v2513_v11  ;;  %v9578_v44 = vpop.f32.mrb[91].mxu0 }
 0x3af   : > { %v13398_v54 = vadd.f32 %v9578_v44, %v9577_v37  ;;  %4178 = vrot.lane.b32.xlu0 %v3673_v45, %s12137_s23  ;;  %10872 = vmatprep.subr.msk.bf16.mxu0 %vm15314_vm0, %v3673_v45  ;;  %v3727_v56 = vsel %vm15314_vm0, %v3673_v45, 0 }
 0x3b0   : > { %15468 = vst [vmem:[#allocation50_spill] sm:$0xff] %v13396_v49  ;;  %9999 = vmatpush3.bf16.xpose.msra.mxu0 %v3727_v56 }
 0x3b2   : > { %v2521_v47 = vpop.f32.mrb[76].mxu1 }
 0x3b3   : > { %v2523_v10 = vpop.f32.mrb[77].mxu1  ;;  %4142 = vrot.lane.b32.xlu0 %v13212_v52, %s12137_s23 }
 0x3b4   : > { %v9580_v14 = vpop.f32.mrb[92].mxu0  ;;  %v2525_v12 = vpop.f32.mrb[78].mxu1 }
 0x3b5   : > { %v3674_v55 = vpack.c.bf16 %v2525_v12, %v2521_v47  ;;  %v9581_v51 = vpop.f32.mrb[93].mxu0  ;;  %v2527_v0 = vpop.f32.mrb[79].mxu1 }
 0x3b6   : > { %v9582_v11 = vadd.f32 %v9581_v51, %v9580_v14  ;;  %v13405_v2 = vpack.c.bf16 %v2527_v0, %v2523_v10  ;;  %v9583_v57 = vpop.f32.mrb[94].mxu0 }
 0x3b7   : > { %v9584_v39 = vpop.f32.mrb[95].mxu0  ;;  %4180 = vrot.lane.b32.xlu1 %v3674_v55, %s12137_s23  ;;  %10873 = vmatprep.subr.msk.bf16.mxu0 %vm15314_vm0, %v3674_v55  ;;  %v3730_v45 = vsel %vm15314_vm0, %v3674_v55, 0 }
 0x3b8   : > { %15469 = vst [vmem:[#allocation51_spill] sm:$0xff] %v13405_v2  ;;  %v9585_v1 = vadd.f32 %v9584_v39, %v9583_v57  ;;  %4146 = vrot.lane.b32.xlu0 %v13244_v34, %s12137_s23  ;;  %10001 = vmatpush3.bf16.xpose.msra.mxu0 %v3730_v45 }
 0x3bb   : > { %4144 = vrot.lane.b32.xlu1 %v13228_v30, %s12137_s23 }
 0x3bc   : > { %4150 = vrot.lane.b32.xlu0 %v13274_v46, %s12137_s23  ;;  %v9586_v52 = vpop.f32.mrb[96].mxu0 }
 0x3bd   : > { %v9587_v37 = vpop.f32.mrb[97].mxu0 }
 0x3be   : > { %v9588_v44 = vadd.f32 %v9587_v37, %v9586_v52  ;;  %v9589_v56 = vpop.f32.mrb[98].mxu0 }
 0x3bf   : > { %v9590_v47 = vpop.f32.mrb[99].mxu0  ;;  %10003 = vmatmul.mubr.msk.bf16.vlgmr.msra.gmra.mrb[128].mxu0 %vm15314_vm0, %v13228_v30  ;;  %4148 = vrot.lane.b32.xlu1 %v13260_v23, %s12137_s23 }
 0x3c0   : > { %v9591_v10 = vadd.f32 %v9590_v47, %v9589_v56  ;;  %4154 = vrot.lane.b32.xlu0 %v13289_v5, %s12137_s23  ;;  %10006 = vmatprep.mubr.msk.bf16.mxu0 %vm15314_vm0, %v13244_v34 }
 0x3c3   : > { %4152 = vrot.lane.b32.xlu1 %v13283_v40, %s12137_s23 }
 0x3c4   : > { %v9592_v14 = vpop.f32.mrb[100].mxu0 }
 0x3c5   : > { %v9593_v12 = vpop.f32.mrb[101].mxu0 }
 0x3c6   : > { %v9594_v55 = vadd.f32 %v9593_v12, %v9592_v14  ;;  %v9595_v51 = vpop.f32.mrb[102].mxu0 }
 0x3c7   : > { %v9596_v0 = vpop.f32.mrb[103].mxu0  ;;  %10007 = vmatmul.mubr.msk.bf16.gmra.mrb[132].mxu0 %vm15314_vm0, %v13260_v23  ;;  %4156 = vrot.lane.b32.xlu1 %v13295_v42, %s12137_s23 }
 0x3c8   : > { %v9597_v30 = vadd.f32 %v9596_v0, %v9595_v51  ;;  %10010 = vmatprep.mubr.msk.bf16.mxu0 %vm15314_vm0, %v13274_v46 }
 0x3cc   : > { %v9598_v57 = vpop.f32.mrb[104].mxu0 }
 0x3cd   : > { %v9599_v34 = vpop.f32.mrb[105].mxu0 }
 0x3ce   : > { %v9600_v39 = vadd.f32 %v9599_v34, %v9598_v57  ;;  %v9601_v45 = vpop.f32.mrb[106].mxu0 }
 0x3cf   : > { %v9602_v52 = vpop.f32.mrb[107].mxu0  ;;  %10011 = vmatmul.mubr.msk.bf16.gmra.mrb[136].mxu0 %vm15314_vm0, %v13283_v40 }
 0x3d0   : > { %v9603_v37 = vadd.f32 %v9602_v52, %v9601_v45  ;;  %10014 = vmatprep.mubr.msk.bf16.mxu0 %vm15314_vm0, %v13289_v5 }
 0x3d4   : > { %v9604_v23 = vpop.f32.mrb[108].mxu0 }
 0x3d5   : > { %v9605_v56 = vpop.f32.mrb[109].mxu0 }
 0x3d6   : > { %v9606_v47 = vadd.f32 %v9605_v56, %v9604_v23  ;;  %v9607_v14 = vpop.f32.mrb[110].mxu0 }
 0x3d7   : > { %v9608_v12 = vpop.f32.mrb[111].mxu0  ;;  %10015 = vmatmul.mubr.msk.bf16.gmra.mrb[140].mxu0 %vm15314_vm0, %v13295_v42 }
 0x3d8   : > { %v9609_v46 = vadd.f32 %v9608_v12, %v9607_v14 }
 0x3dc   : > { %v9972_v51 = vpop.f32.mrb[112].mxu0 }
 0x3dd   : > { %v3570_v0 = vadd.f32 %v9972_v51, %v13385_v50  ;;  %v3561_v57 = vpop.f32.mrb[113].mxu0 }
 0x3de   : > { %v3562_v34 = vadd.f32 %v13376_v41, %v3561_v57  ;;  %v9973_v40 = vpop.f32.mrb[114].mxu0 }
 0x3df   : > { %v3573_v45 = vadd.f32 %v9973_v40, %v13389_v7  ;;  %v3564_v52 = vpop.f32.mrb[115].mxu0 }
 0x3e0   : > { %v3565_v5 = vadd.f32 %v13380_v24, %v3564_v52 }
 0x3e1   : > { %v13442_v25 = vpack.c.bf16 %v3573_v45, %v3570_v0 }
 0x3e2   : > { %v13444_v23 = vpack.c.bf16 %v3565_v5, %v3562_v34 }
 0x3e3   : > { %15470 = vst [vmem:[#allocation52_spill] sm:$0xff] %v13442_v25 }
 0x3e4   : > { %15471 = vst [vmem:[#allocation53_spill] sm:$0xff] %v13444_v23  ;;  %v9976_v56 = vpop.f32.mrb[116].mxu0 }
 0x3e5   : > { %v3586_v31 = vadd.f32 %v9976_v56, %v9582_v11  ;;  %v3577_v42 = vpop.f32.mrb[117].mxu0 }
 0x3e6   : > { %v3578_v14 = vadd.f32 %v13394_v27, %v3577_v42  ;;  %v9977_v12 = vpop.f32.mrb[118].mxu0 }
 0x3e7   : > { %v3589_v50 = vadd.f32 %v9977_v12, %v9585_v1  ;;  %v3580_v51 = vpop.f32.mrb[119].mxu0 }
 0x3e8   : > { %v3581_v41 = vadd.f32 %v13398_v54, %v3580_v51 }
 0x3e9   : > { %v13448_v57 = vpack.c.bf16 %v3589_v50, %v3586_v31 }
 0x3ea   : > { %v13450_v7 = vpack.c.bf16 %v3581_v41, %v3578_v14 }
 0x3eb   : > { %15472 = vst [vmem:[#allocation54_spill] sm:$0xff] %v13448_v57 }
 0x3ec   : > { %15473 = vst [vmem:[#allocation55_spill] sm:$0xff] %v13450_v7  ;;  %v9980_v40 = vpop.f32.mrb[120].mxu0 }
 0x3ed   : > { %v3602_v24 = vadd.f32 %v9980_v40, %v9594_v55  ;;  %v3593_v0 = vpop.f32.mrb[121].mxu0 }
 0x3ee   : > { %v3594_v45 = vadd.f32 %v9588_v44, %v3593_v0  ;;  %v9981_v34 = vpop.f32.mrb[122].mxu0 }
 0x3ef   : > { %v3605_v52 = vadd.f32 %v9981_v34, %v9597_v30  ;;  %v3596_v5 = vpop.f32.mrb[123].mxu0 }
 0x3f0   : > { %v3597_v11 = vadd.f32 %v9591_v10, %v3596_v5 }
 0x3f1   : > { %v13452_v56 = vpack.c.bf16 %v3605_v52, %v3602_v24  ;;  %v4167_v27 = vpop.permute.xlu0 %4166 }
 0x3f2   : > { %v13454_v42 = vpack.c.bf16 %v3597_v11, %v3594_v45  ;;  %10874 = vmatprep.subr.msk.bf16.mxu0 %vm15314_vm0, %v4167_v27  ;;  %v4207_v31 = vsel %vm15314_vm0, %v4167_v27, 0 }
 0x3f3   : > { %15474 = vst [vmem:[#allocation56_spill] sm:$0xff] %v13452_v56  ;;  %10051 = vmatpush3.bf16.xpose.msra.mxu0 %v4207_v31 }
 0x3f4   : > { %15475 = vst [vmem:[#allocation57_spill] sm:$0xff] %v13454_v42  ;;  %v9984_v54 = vpop.f32.mrb[124].mxu0 }
 0x3f5   : > { %v3618_v1 = vadd.f32 %v9984_v54, %v9606_v47  ;;  %v3609_v14 = vpop.f32.mrb[125].mxu0 }
 0x3f6   : > { %v3610_v55 = vadd.f32 %v9600_v39, %v3609_v14  ;;  %v9985_v12 = vpop.f32.mrb[126].mxu0 }
 0x3f7   : > { %v3621_v44 = vadd.f32 %v9985_v12, %v9609_v46  ;;  %v3612_v50 = vpop.f32.mrb[127].mxu0 }
 0x3f8   : > { %v3613_v30 = vadd.f32 %v9603_v37, %v3612_v50 }
 0x3f9   : > { %v13458_v51 = vpack.c.bf16 %v3621_v44, %v3618_v1  ;;  %v4169_v10 = vpop.permute.xlu1 %4168 }
 0x3fa   : > { %v13460_v41 = vpack.c.bf16 %v3613_v30, %v3610_v55  ;;  %v3351_v40 = vpop.f32.mrb[80].mxu1  ;;  %10875 = vmatprep.subr.msk.bf16.mxu0 %vm15314_vm0, %v4169_v10  ;;  %v4210_v24 = vsel %vm15314_vm0, %v4169_v10, 0 }
 0x3fb   : > { %15476 = vst [vmem:[#allocation58_spill] sm:$0xff] %v13458_v51  ;;  %v3353_v0 = vpop.f32.mrb[81].mxu1  ;;  %10053 = vmatpush3.bf16.xpose.msra.mxu0 %v4210_v24 }
 0x3fc   : > { %15477 = vst [vmem:[#allocation59_spill] sm:$0xff] %v13460_v41  ;;  %v3355_v45 = vpop.f32.mrb[82].mxu1  ;;  %v15501_v41 = vmov 0 }
 0x3fd   : > { %v3675_v47 = vpack.c.bf16 %v3355_v45, %v3351_v40  ;;  %v3357_v34 = vpop.f32.mrb[83].mxu1 }
 0x3fe   : > { %v13464_v39 = vpack.c.bf16 %v3357_v34, %v3353_v0 }
 0x3ff   : > { %10018 = vmatprep.subr.bf16.mxu1 %v3675_v47  ;;  %4519 = vrot.lane.b32.xlu0 %v3675_v47, %s12137_s23 }
 0x400   : > { %10019 = vmatpush3.bf16.msra.mxu1 %v3675_v47 }
 0x401   : > { %v4171_v37 = vpop.permute.xlu1 %4170 }
 0x402   : > { %v3361_v46 = vpop.f32.mrb[84].mxu1  ;;  %10876 = vmatprep.subr.msk.bf16.mxu0 %vm15314_vm0, %v4171_v37  ;;  %v4213_v52 = vsel %vm15314_vm0, %v4171_v37, 0 }
 0x403   : > { %v3363_v5 = vpop.f32.mrb[85].mxu1  ;;  %10055 = vmatpush3.bf16.xpose.msra.mxu0 %v4213_v52 }
 0x404   : > { %v3365_v11 = vpop.f32.mrb[86].mxu1 }
 0x405   : > { %v3676_v27 = vpack.c.bf16 %v3365_v11, %v3361_v46  ;;  %v3367_v31 = vpop.f32.mrb[87].mxu1 }
 0x406   : > { %v13469_v54 = vpack.c.bf16 %v3367_v31, %v3363_v5 }
 0x407   : > { %10020 = vmatprep.subr.bf16.mxu1 %v3676_v27  ;;  %4521 = vrot.lane.b32.xlu1 %v3676_v27, %s12137_s23 }
 0x408   : > { %15478 = vst [vmem:[#allocation60_spill] sm:$0xff] %v13469_v54  ;;  %10021 = vmatpush3.bf16.msra.mxu1 %v3676_v27 }
 0x409   : > { %v4173_v1 = vpop.permute.xlu1 %4172 }
 0x40a   : > { %v3371_v14 = vpop.f32.mrb[88].mxu1  ;;  %10877 = vmatprep.subr.msk.bf16.mxu0 %vm15314_vm0, %v4173_v1  ;;  %v4216_v55 = vsel %vm15314_vm0, %v4173_v1, 0 }
 0x40b   : > { %v3373_v12 = vpop.f32.mrb[89].mxu1  ;;  %10057 = vmatpush3.bf16.xpose.msra.mxu0 %v4216_v55 }
 0x40c   : > { %v3375_v44 = vpop.f32.mrb[90].mxu1 }
 0x40d   : > { %v3677_v50 = vpack.c.bf16 %v3375_v44, %v3371_v14  ;;  %v3377_v30 = vpop.f32.mrb[91].mxu1 }
 0x40e   : > { %v13474_v10 = vpack.c.bf16 %v3377_v30, %v3373_v12 }
 0x40f   : > { %10022 = vmatprep.subr.bf16.mxu1 %v3677_v50  ;;  %4523 = vrot.lane.b32.xlu1 %v3677_v50, %s12137_s23 }
 0x410   : > { %15479 = vst [vmem:[#allocation61_spill] sm:$0xff] %v13474_v10  ;;  %10023 = vmatpush3.bf16.msra.mxu1 %v3677_v50 }
 0x411   : > { %v4175_v40 = vpop.permute.xlu0 %4174 }
 0x412   : > { %v3381_v24 = vpop.f32.mrb[92].mxu1  ;;  %10878 = vmatprep.subr.msk.bf16.mxu0 %vm15314_vm0, %v4175_v40  ;;  %v4219_v0 = vsel %vm15314_vm0, %v4175_v40, 0 }
 0x413   : > { %v3383_v45 = vpop.f32.mrb[93].mxu1  ;;  %10059 = vmatpush3.bf16.xpose.msra.mxu0 %v4219_v0 }
 0x414   : > { %v3385_v47 = vpop.f32.mrb[94].mxu1 }
 0x415   : > { %v3678_v34 = vpack.c.bf16 %v3385_v47, %v3381_v24  ;;  %v3387_v37 = vpop.f32.mrb[95].mxu1 }
 0x416   : > { %v13479_v46 = vpack.c.bf16 %v3387_v37, %v3383_v45 }
 0x417   : > { %10024 = vmatprep.subr.bf16.mxu1 %v3678_v34  ;;  %4525 = vrot.lane.b32.xlu0 %v3678_v34, %s12137_s23 }
 0x418   : > { %15480 = vst [vmem:[#allocation62_spill] sm:$0xff] %v13479_v46  ;;  %10025 = vmatpush3.bf16.msra.mxu1 %v3678_v34 }
 0x419   : > { %v4177_v52 = vpop.permute.xlu1 %4176 }
 0x41a   : > { %v3391_v5 = vpop.f32.mrb[96].mxu1  ;;  %10879 = vmatprep.subr.msk.bf16.mxu0 %vm15314_vm0, %v4177_v52  ;;  %v4222_v11 = vsel %vm15314_vm0, %v4177_v52, 0 }
 0x41b   : > { %v3393_v27 = vpop.f32.mrb[97].mxu1  ;;  %10061 = vmatpush3.bf16.xpose.msra.mxu0 %v4222_v11 }
 0x41c   : > { %v3395_v31 = vpop.f32.mrb[98].mxu1 }
 0x41d   : > { %v3679_v1 = vpack.c.bf16 %v3395_v31, %v3391_v5  ;;  %v3397_v14 = vpop.f32.mrb[99].mxu1 }
 0x41e   : > { %v13484_v55 = vpack.c.bf16 %v3397_v14, %v3393_v27 }
 0x41f   : > { %10026 = vmatprep.subr.bf16.mxu1 %v3679_v1  ;;  %4527 = vrot.lane.b32.xlu1 %v3679_v1, %s12137_s23 }
 0x420   : > { %15481 = vst [vmem:[#allocation63_spill] sm:$0xff] %v13484_v55  ;;  %10027 = vmatpush3.bf16.msra.mxu1 %v3679_v1 }
 0x421   : > { %v4179_v12 = vpop.permute.xlu0 %4178 }
 0x422   : > { %v3401_v44 = vpop.f32.mrb[100].mxu1  ;;  %10880 = vmatprep.subr.msk.bf16.mxu0 %vm15314_vm0, %v4179_v12  ;;  %v4225_v50 = vsel %vm15314_vm0, %v4179_v12, 0 }
 0x423   : > { %v3403_v30 = vpop.f32.mrb[101].mxu1  ;;  %10063 = vmatpush3.bf16.xpose.msra.mxu0 %v4225_v50 }
 0x424   : > { %v3405_v40 = vpop.f32.mrb[102].mxu1 }
 0x425   : > { %v3680_v24 = vpack.c.bf16 %v3405_v40, %v3401_v44  ;;  %v3407_v0 = vpop.f32.mrb[103].mxu1  ;;  %v4143_v45 = vpop.permute.xlu0 %4142 }
 0x426   : > { %v13489_v47 = vpack.c.bf16 %v3407_v0, %v3403_v30  ;;  %10066 = vmatprep.mubr.msk.bf16.mxu0 %vm15314_vm0, %v4143_v45 }
 0x427   : > { %10028 = vmatprep.subr.bf16.mxu1 %v3680_v24  ;;  %4529 = vrot.lane.b32.xlu1 %v3680_v24, %s12137_s23 }
 0x428   : > { %15482 = vst [vmem:[#allocation64_spill] sm:$0xff] %v13489_v47  ;;  %10029 = vmatpush3.bf16.msra.mxu1 %v3680_v24 }
 0x429   : > { %v4181_v34 = vpop.permute.xlu1 %4180 }
 0x42a   : > { %v3411_v37 = vpop.f32.mrb[104].mxu1  ;;  %10881 = vmatprep.subr.msk.bf16.mxu0 %vm15314_vm0, %v4181_v34  ;;  %v4228_v52 = vsel %vm15314_vm0, %v4181_v34, 0  ;;  %v4147_v12 = vpop.permute.xlu0 %4146 }
 0x42b   : > { %v3413_v5 = vpop.f32.mrb[105].mxu1  ;;  %10065 = vmatpush3.bf16.xpose.msra.mxu0 %v4228_v52 }
 0x42c   : > { %v3415_v11 = vpop.f32.mrb[106].mxu1 }
 0x42d   : > { %v13495_v27 = vpack.c.bf16 %v3415_v11, %v3411_v37  ;;  %v3417_v31 = vpop.f32.mrb[107].mxu1  ;;  %v4145_v14 = vpop.permute.xlu1 %4144 }
 0x42e   : > { %v13497_v1 = vpack.c.bf16 %v3417_v31, %v3413_v5  ;;  %v4151_v34 = vpop.permute.xlu0 %4150 }
 0x42f   : > { %10030 = vmatprep.subr.bf16.mxu1 %v13495_v27 }
 0x430   : > { %15483 = vst [vmem:[#allocation65_spill] sm:$0xff] %v13497_v1  ;;  %10031 = vmatpush3.bf16.msra.mxu1 %v13495_v27 }
 0x431   : > { %v4149_v45 = vpop.permute.xlu1 %4148 }
 0x432   : > { %v3421_v44 = vpop.f32.mrb[108].mxu1  ;;  %10067 = vmatmul.mubr.msk.bf16.vlgmr.msra.gmra.mrb[144].mxu0 %vm15314_vm0, %v4145_v14  ;;  %v4155_v52 = vpop.permute.xlu0 %4154 }
 0x433   : > { %v3423_v50 = vpop.f32.mrb[109].mxu1  ;;  %10070 = vmatprep.mubr.msk.bf16.mxu0 %vm15314_vm0, %v4147_v12 }
 0x434   : > { %v3425_v30 = vpop.f32.mrb[110].mxu1 }
 0x435   : > { %v13503_v40 = vpack.c.bf16 %v3425_v30, %v3421_v44  ;;  %v3427_v24 = vpop.f32.mrb[111].mxu1  ;;  %v4153_v37 = vpop.permute.xlu1 %4152  ;;  %v3627_v44 = vadd.s32 16, %v12726_v13 }
 0x436   : > { %v13505_v0 = vpack.c.bf16 %v3427_v24, %v3423_v50  ;;  %v15485_v50 = vlaneseq }
 0x437   : > { %10032 = vmatprep.subr.bf16.mxu1 %v13503_v40 }
 0x438   : > { %15484 = vst [vmem:[#allocation66_spill] sm:$0xff] %v13505_v0  ;;  %10033 = vmatpush3.bf16.msra.mxu1 %v13503_v40  ;;  %v13533_v30 = vand.u32 127, %v15485_v50 }
 0x439   : > { %v4157_v5 = vpop.permute.xlu1 %4156 }
 0x43a   : > { %10071 = vmatmul.mubr.msk.bf16.gmra.mrb[148].mxu0 %vm15314_vm0, %v4149_v45  ;;  %v3626_v45 = vadd.s32 8, %v12726_v13  ;;  %vm13540_vm1 = vcmp.ge.s32.totalorder %v3627_v44, %v13533_v30  ;;  %vm13557_vm3 = vcmp.ge.s32.totalorder %v12726_v13, %v13533_v30  ;;  %vm13606_vm7 = vcmp.ge.s32.totalorder %v3630_v18, %v13533_v30 }
 0x43b   : > { %10074 = vmatprep.mubr.msk.bf16.mxu0 %vm15314_vm0, %v4151_v34  ;;  %v3635_v18 = vadd.s32 80, %v12726_v13 }
 0x43c   : > { %vm13550_vm2 = vcmp.ge.s32.totalorder %v3626_v45, %v13533_v30  ;;  %v3632_v45 = vadd.s32 56, %v12726_v13 }
 0x43d   : > { %v15490_v22 = vsel %vm13550_vm2, 4294967295, %v15489_v22  ;;  %vm13639_vm10 = vcmp.ge.s32.totalorder %v3635_v18, %v13533_v30 }
 0x43e   : > { %15491 = vst [vmem:[#allocation68_spill] sm:$0xff] %v15490_v22  ;;  %vm13584_vm5 = vcmp.ge.s32.totalorder %v3632_v45, %v13533_v30  ;;  %v3629_v45 = vadd.s32 32, %v12726_v13 }
 0x440   : > { %vm13617_vm8 = vcmp.ge.s32.totalorder %v3629_v45, %v13533_v30  ;;  %v3634_v45 = vadd.s32 72, %v12726_v13 }
 0x442   : > { %10075 = vmatmul.mubr.msk.bf16.gmra.mrb[152].mxu0 %vm15314_vm0, %v4153_v37  ;;  %v15486_v37 = vmov 0  ;;  %vm13650_vm11 = vcmp.ge.s32.totalorder %v3634_v45, %v13533_v30  ;;  %v3639_v45 = vadd.s32 112, %v12726_v13 }
 0x443   : > { %10078 = vmatprep.mubr.msk.bf16.mxu0 %vm15314_vm0, %v4155_v52  ;;  %v15487_v37 = vsel %vm13540_vm1, 4294967295, %v15486_v37 }
 0x444   : > { %15488 = vst [vmem:[#allocation67_spill] sm:$0xff] %v15487_v37  ;;  %vm13683_vm14 = vcmp.ge.s32.totalorder %v3639_v45, %v13533_v30 }
 0x44a   : > { %10079 = vmatmul.mubr.msk.bf16.gmra.mrb[156].mxu0 %vm15314_vm0, %v4157_v5 }
 0x471   : > { %v13514_v11 = vpop.permute.xlu0 %4519 }
 0x472   : > { %10082 = vmatprep.subr.bf16.mxu0 %v13514_v11  ;;  %10514 = vmatprep.subr.bf16.mxu1 %v13514_v11 }
 0x473   : > { %10083 = vmatpush3.bf16.msra.mxu0 %v13514_v11 }
 0x479   : > { %v13519_v31 = vpop.permute.xlu1 %4521 }
 0x47a   : > { %10084 = vmatprep.subr.bf16.mxu0 %v13519_v31 }
 0x47b   : > { %10085 = vmatpush3.bf16.msra.mxu0 %v13519_v31 }
 0x481   : > { %v13523_v14 = vpop.permute.xlu1 %4523 }
 0x482   : > { %10086 = vmatprep.subr.bf16.mxu0 %v13523_v14 }
 0x483   : > { %10087 = vmatpush3.bf16.msra.mxu0 %v13523_v14 }
 0x489   : > { %v13527_v12 = vpop.permute.xlu0 %4525 }
 0x48a   : > { %10088 = vmatprep.subr.bf16.mxu0 %v13527_v12 }
 0x48b   : > { %10089 = vmatpush3.bf16.msra.mxu0 %v13527_v12 }
 0x491   : > { %v13535_v24 = vpop.permute.xlu1 %4527 }
 0x492   : > { %v10004_v34 = vpop.f32.mrb[128].mxu0  ;;  %10090 = vmatprep.subr.bf16.mxu0 %v13535_v24 }
 0x493   : > { %v3831_v52 = vmul.f32 0.125, %v10004_v34  ;;  %v3766_v5 = vpop.f32.mrb[129].mxu0  ;;  %10091 = vmatpush3.bf16.msra.mxu0 %v13535_v24  ;;  %v15492_v34 = vmov 0 }
 0x494   : > { %v10005_v4 = vpop.f32.mrb[130].mxu0  ;;  %v3829_v19 = vmul.f32 0.125, %v3766_v5  ;;  %v15493_v34 = vsel %vm13557_vm3, 4294967295, %v15492_v34  ;;  %v3628_v5 = vadd.s32 24, %v12726_v13 }
 0x495   : > { %v3769_v50 = vpop.f32.mrb[131].mxu0  ;;  %v13547_v59 = vsel %vm13540_vm1, %v3831_v52, -1e+30  ;;  %15494 = vst [vmem:[#allocation69_spill] sm:$0xff] %v15493_v34  ;;  %v3832_v43 = vmul.f32 0.125, %v10005_v4  ;;  %v3631_v4 = vadd.s32 48, %v12726_v13 }
 0x496   : > { %v3830_v44 = vmul.f32 0.125, %v3769_v50  ;;  %3865 = vmax.xlane.f32.xlu0 %v13547_v59  ;;  %v13572_v50 = vsel %vm13557_vm3, %v3829_v19, -1e+30  ;;  %vm13577_vm4 = vcmp.ge.s32.totalorder %v3628_v5, %v13533_v30  ;;  %v15498_v19 = vmov 0 }
 0x497   : > { %v15499_v19 = vsel %vm13584_vm5, 4294967295, %v15498_v19  ;;  %v13591_v5 = vsel %vm13577_vm4, %v3832_v43, -1e+30  ;;  %vm13595_vm6 = vcmp.ge.s32.totalorder %v3631_v4, %v13533_v30  ;;  %v3636_v43 = vadd.s32 88, %v12726_v13 }
 0x498   : > { %v13564_v52 = vsel %vm13550_vm2, %v3830_v44, -1e+30  ;;  %v15495_v44 = vmov 0  ;;  %15500 = vst [vmem:[#allocation71_spill] sm:$0xff] %v15499_v19  ;;  %v15502_v41 = vsel %vm13595_vm6, 4294967295, %v15501_v41 }
 0x499   : > { %v13567_v35 = vpop.permute.xlu1 %4529  ;;  %3863 = vmax.xlane.f32.xlu1 %v13564_v52  ;;  %v15496_v44 = vsel %vm13577_vm4, 4294967295, %v15495_v44  ;;  %15503 = vst [vmem:[#allocation72_spill] sm:$0xff] %v15502_v41  ;;  %vm13628_vm9 = vcmp.ge.s32.totalorder %v3636_v43, %v13533_v30  ;;  %v3633_v43 = vadd.s32 64, %v12726_v13 }
 0x49a   : > { %10092 = vmatprep.subr.bf16.mxu0 %v13567_v35  ;;  %3861 = vmax.xlane.f32.xlu0 %v13572_v50  ;;  %v10008_v26 = vpop.f32.mrb[132].mxu0  ;;  %15497 = vst [vmem:[#allocation70_spill] sm:$0xff] %v15496_v44 }
 0x49b   : > { %v3782_v48 = vpop.f32.mrb[133].mxu0  ;;  %10093 = vmatpush3.bf16.msra.mxu0 %v13567_v35  ;;  %v3835_v62 = vmul.f32 0.125, %v10008_v26  ;;  %v15504_v26 = vmov 0  ;;  %vm13661_vm12 = vcmp.ge.s32.totalorder %v3633_v43, %v13533_v30  ;;  %v3638_v43 = vadd.s32 104, %v12726_v13 }
 0x49c   : > { %v10009_v38 = vpop.f32.mrb[134].mxu0  ;;  %v15505_v26 = vsel %vm13606_vm7, 4294967295, %v15504_v26 }
 0x49d   : > { %v3836_v36 = vmul.f32 0.125, %v10009_v38  ;;  %v3785_v51 = vpop.f32.mrb[135].mxu0  ;;  %15506 = vst [vmem:[#allocation73_spill] sm:$0xff] %v15505_v26  ;;  %v3833_v38 = vmul.f32 0.125, %v3782_v48  ;;  %v13613_v4 = vsel %vm13595_vm6, %v3835_v62, -1e+30  ;;  %vm13694_vm15 = vcmp.ge.s32.totalorder %v3638_v43, %v13533_v30 }
 0x49e   : > { %3867 = vmax.xlane.f32.xlu0 %v13591_v5  ;;  %v3834_v3 = vmul.f32 0.125, %v3785_v51  ;;  %v15510_v62 = vmov 0 }
 0x49f   : > { %v13602_v56 = vsel %vm13584_vm5, %v3836_v36, -1e+30  ;;  %v15507_v36 = vmov 0  ;;  %v15511_v62 = vsel %vm13628_vm9, 4294967295, %v15510_v62  ;;  %v13635_v25 = vsel %vm13617_vm8, %v3833_v38, -1e+30 }
 0x4a0   : > { %3875 = vmax.xlane.f32.xlu1 %v13602_v56  ;;  %v15508_v36 = vsel %vm13617_vm8, 4294967295, %v15507_v36  ;;  %v13624_v6 = vsel %vm13606_vm7, %v3834_v3, -1e+30  ;;  %15512 = vst [vmem:[#allocation75_spill] sm:$0xff] %v15511_v62  ;;  %v15513_v3 = vmov 0  ;;  %v15516_v38 = vmov 0 }
 0x4a1   : > { %15509 = vst [vmem:[#allocation74_spill] sm:$0xff] %v15508_v36  ;;  %v15514_v3 = vsel %vm13639_vm10, 4294967295, %v15513_v3  ;;  %v15517_v38 = vsel %vm13650_vm11, 4294967295, %v15516_v38 }
 0x4a2   : > { %3873 = vmax.xlane.f32.xlu0 %v13613_v4  ;;  %v10012_v51 = vpop.f32.mrb[136].mxu0  ;;  %15515 = vst [vmem:[#allocation76_spill] sm:$0xff] %v15514_v3  ;;  %15518 = vst [vmem:[#allocation77_spill] sm:$0xff] %v15517_v38 }
 0x4a3   : > { %v3798_v42 = vpop.f32.mrb[137].mxu0  ;;  %v3839_v57 = vmul.f32 0.125, %v10012_v51  ;;  %v3640_v51 = vadd.s32 120, %v12726_v13 }
 0x4a4   : > { %3871 = vmax.xlane.f32.xlu1 %v13624_v6  ;;  %v10013_v48 = vpop.f32.mrb[138].mxu0  ;;  %v3837_v18 = vmul.f32 0.125, %v3798_v42 }
 0x4a5   : > { %v3840_v7 = vmul.f32 0.125, %v10013_v48  ;;  %v3801_v60 = vpop.f32.mrb[139].mxu0  ;;  %v13657_v48 = vsel %vm13639_vm10, %v3839_v57, -1e+30  ;;  %vm13672_vm13 = vcmp.ge.s32.totalorder %v3640_v51, %v13533_v30  ;;  %v15522_v57 = vmov 0 }
 0x4a6   : > { %3869 = vmax.xlane.f32.xlu0 %v13635_v25  ;;  %v3838_v23 = vmul.f32 0.125, %v3801_v60  ;;  %v15523_v57 = vsel %vm13672_vm13, 4294967295, %v15522_v57  ;;  %v13679_v53 = vsel %vm13661_vm12, %v3837_v18, -1e+30  ;;  %v3637_v51 = vadd.s32 96, %v12726_v13 }
 0x4a7   : > { %v13646_v63 = vsel %vm13628_vm9, %v3840_v7, -1e+30  ;;  %v15519_v7 = vmov 0  ;;  %15524 = vst [vmem:[#allocation79_spill] sm:$0xff] %v15523_v57  ;;  %v15528_v18 = vmov 0  ;;  %v15531_v13 = vmov 0 }
 0x4a8   : > { %3883 = vmax.xlane.f32.xlu1 %v13646_v63  ;;  %v15520_v7 = vsel %vm13661_vm12, 4294967295, %v15519_v7  ;;  %v13668_v17 = vsel %vm13650_vm11, %v3838_v23, -1e+30  ;;  %v15525_v23 = vmov 0  ;;  %v15529_v18 = vsel %vm13694_vm15, 4294967295, %v15528_v18 }
 0x4a9   : > { %15521 = vst [vmem:[#allocation78_spill] sm:$0xff] %v15520_v7  ;;  %v15526_v23 = vsel %vm13683_vm14, 4294967295, %v15525_v23  ;;  %15530 = vst [vmem:[#allocation81_spill] sm:$0xff] %v15529_v18  ;;  %vm13704_vm0 = vcmp.ge.s32.totalorder %v3637_v51, %v13533_v30 }
 0x4aa   : > { %3881 = vmax.xlane.f32.xlu0 %v13657_v48  ;;  %v10016_v60 = vpop.f32.mrb[140].mxu0  ;;  %15527 = vst [vmem:[#allocation80_spill] sm:$0xff] %v15526_v23  ;;  %v15532_v13 = vsel %vm13704_vm0, 4294967295, %v15531_v13 }
 0x4ab   : > { %v3814_v21 = vpop.f32.mrb[141].mxu0  ;;  %v3843_v28 = vmul.f32 0.125, %v10016_v60  ;;  %15533 = vst [vmem:[#allocation82_spill] sm:$0xff] %v15532_v13 }
 0x4ac   : > { %3879 = vmax.xlane.f32.xlu1 %v13668_v17  ;;  %v10017_v42 = vpop.f32.mrb[142].mxu0  ;;  %v3841_v60 = vmul.f32 0.125, %v3814_v21 }
 0x4ad   : > { %v3844_v15 = vmul.f32 0.125, %v10017_v42  ;;  %v3817_v32 = vpop.f32.mrb[143].mxu0  ;;  %v13700_v45 = vsel %vm13683_vm14, %v3843_v28, -1e+30 }
 0x4ae   : > { %3877 = vmax.xlane.f32.xlu0 %v13679_v53  ;;  %v3842_v16 = vmul.f32 0.125, %v3817_v32 }
 0x4af   : > { %v13690_v2 = vsel %vm13672_vm13, %v3844_v15, -1e+30  ;;  %v13715_v15 = vsel %vm13704_vm0, %v3841_v60, -1e+30 }
 0x4b0   : > { %3891 = vmax.xlane.f32.xlu1 %v13690_v2  ;;  %v13710_v32 = vsel %vm13694_vm15, %v3842_v16, -1e+30 }
 0x4b2   : > { %3889 = vmax.xlane.f32.xlu0 %v13700_v45 }
 0x4b4   : > { %3887 = vmax.xlane.f32.xlu1 %v13710_v32 }
 0x4b6   : > { %3885 = vmax.xlane.f32.xlu0 %v13715_v15 }
 0x505   : > { %v10068_v28 = vpop.f32.mrb[144].mxu0 }
 0x506   : > { %v4329_v21 = vmul.f32 0.125, %v10068_v28  ;;  %v4264_v42 = vpop.f32.mrb[145].mxu0 }
 0x507   : > { %v10069_v43 = vpop.f32.mrb[146].mxu0  ;;  %v4327_v30 = vmul.f32 0.125, %v4264_v42 }
 0x508   : > { %v4330_v51 = vmul.f32 0.125, %v10069_v43  ;;  %v4267_v49 = vpop.f32.mrb[147].mxu0  ;;  %v13720_v29 = vsel %vm13540_vm1, %v4329_v21, -1e+30 }
 0x509   : > { %4363 = vmax.xlane.f32.xlu0 %v13720_v29  ;;  %v4328_v16 = vmul.f32 0.125, %v4267_v49  ;;  %v13730_v28 = vsel %vm13557_vm3, %v4327_v30, -1e+30 }
 0x50a   : > { %v13725_v60 = vsel %vm13577_vm4, %v4330_v51, -1e+30 }
 0x50b   : > { %4365 = vmax.xlane.f32.xlu1 %v13725_v60  ;;  %v13735_v21 = vsel %vm13550_vm2, %v4328_v16, -1e+30 }
 0x50d   : > { %4359 = vmax.xlane.f32.xlu0 %v13730_v28  ;;  %v10072_v42 = vpop.f32.mrb[148].mxu0 }
 0x50e   : > { %v4333_v43 = vmul.f32 0.125, %v10072_v42  ;;  %v4280_v37 = vpop.f32.mrb[149].mxu0 }
 0x50f   : > { %v10073_v49 = vpop.f32.mrb[150].mxu0  ;;  %4361 = vmax.xlane.f32.xlu1 %v13735_v21  ;;  %v4331_v51 = vmul.f32 0.125, %v4280_v37 }
 0x510   : > { %v4334_v44 = vmul.f32 0.125, %v10073_v49  ;;  %v4283_v0 = vpop.f32.mrb[151].mxu0  ;;  %v13740_v34 = vsel %vm13595_vm6, %v4333_v43, -1e+30 }
 0x511   : > { %4371 = vmax.xlane.f32.xlu0 %v13740_v34  ;;  %v4332_v30 = vmul.f32 0.125, %v4283_v0  ;;  %v13750_v16 = vsel %vm13617_vm8, %v4331_v51, -1e+30 }
 0x512   : > { %v13745_v42 = vsel %vm13584_vm5, %v4334_v44, -1e+30 }
 0x513   : > { %4373 = vmax.xlane.f32.xlu1 %v13745_v42  ;;  %v13755_v43 = vsel %vm13606_vm7, %v4332_v30, -1e+30 }
 0x515   : > { %4367 = vmax.xlane.f32.xlu0 %v13750_v16  ;;  %v10076_v37 = vpop.f32.mrb[152].mxu0 }
 0x516   : > { %v4337_v49 = vmul.f32 0.125, %v10076_v37  ;;  %v4296_v41 = vpop.f32.mrb[153].mxu0 }
 0x517   : > { %v10077_v0 = vpop.f32.mrb[154].mxu0  ;;  %4369 = vmax.xlane.f32.xlu1 %v13755_v43  ;;  %v4335_v44 = vmul.f32 0.125, %v4296_v41 }
 0x518   : > { %v4338_v19 = vmul.f32 0.125, %v10077_v0  ;;  %v4299_v22 = vpop.f32.mrb[155].mxu0  ;;  %v13760_v36 = vsel %vm13639_vm10, %v4337_v49, -1e+30 }
 0x519   : > { %4379 = vmax.xlane.f32.xlu0 %v13760_v36  ;;  %v4336_v51 = vmul.f32 0.125, %v4299_v22  ;;  %v13770_v30 = vsel %vm13661_vm12, %v4335_v44, -1e+30 }
 0x51a   : > { %v13765_v37 = vsel %vm13628_vm9, %v4338_v19, -1e+30 }
 0x51b   : > { %4381 = vmax.xlane.f32.xlu1 %v13765_v37  ;;  %v13775_v49 = vsel %vm13650_vm11, %v4336_v51, -1e+30 }
 0x51d   : > { %4375 = vmax.xlane.f32.xlu0 %v13770_v30  ;;  %v10080_v41 = vpop.f32.mrb[156].mxu0 }
 0x51e   : > { %v4341_v0 = vmul.f32 0.125, %v10080_v41  ;;  %v4312_v3 = vpop.f32.mrb[157].mxu0 }
 0x51f   : > { %v10081_v22 = vpop.f32.mrb[158].mxu0  ;;  %4377 = vmax.xlane.f32.xlu1 %v13775_v49  ;;  %v4339_v19 = vmul.f32 0.125, %v4312_v3 }
 0x520   : > { %v4342_v62 = vmul.f32 0.125, %v10081_v22  ;;  %v4315_v26 = vpop.f32.mrb[159].mxu0  ;;  %v13780_v7 = vsel %vm13683_vm14, %v4341_v0, -1e+30 }
 0x521   : > { %4387 = vmax.xlane.f32.xlu0 %v13780_v7  ;;  %v4340_v44 = vmul.f32 0.125, %v4315_v26  ;;  %v13791_v3 = vsel %vm13704_vm0, %v4339_v19, -1e+30 }
 0x522   : > { %v13785_v41 = vsel %vm13672_vm13, %v4342_v62, -1e+30  ;;  %vm15535_vm13 = vcmask 523264  }
 0x523   : > { %v3866_v38 = vpop.xlane.xlu0 %3865  ;;  %4389 = vmax.xlane.f32.xlu1 %v13785_v41  ;;  %v13796_v22 = vsel %vm13694_vm15, %v4340_v44, -1e+30  ;;  %vm15536_vm15 = vmmov %vm15535_vm13 }
 0x524   : > { %v3895_v51 = vsub.f32 %v13547_v59, %v3866_v38  ;;  %vm15537_vm0 = vmmov %vm15535_vm13 }
 0x525   : > { %4383 = vmax.xlane.f32.xlu0 %v13791_v3  ;;  %vm15540_vm11 = vmmov %vm15537_vm0 }
 0x526   : > { %v3913_v0 = vmul.f32 1.442695, %v3895_v51  ;;  %v3864_v62 = vpop.xlane.xlu1 %3863  ;;  %vm15541_vm9 = vmmov %vm15537_vm0 }
 0x527   : > { %v3862_v26 = vpop.xlane.xlu0 %3861  ;;  %4385 = vmax.xlane.f32.xlu1 %v13796_v22  ;;  %v3894_v59 = vsub.f32 %v13564_v52, %v3864_v62  ;;  %vm15545_vm12 = vmmov %vm15537_vm0 }
 0x528   : > { %11429 = vpow2.f32 %v3913_v0  ;;  %v3893_v57 = vsub.f32 %v13572_v50, %v3862_v26  ;;  %vm15551_vm10 = vmmov %vm15537_vm0 }
 0x529   : > { %v3911_v1 = vmul.f32 1.442695, %v3894_v59 }
 0x52a   : > { %v3909_v23 = vmul.f32 1.442695, %v3893_v57 }
 0x52b   : > { %v3868_v38 = vpop.xlane.xlu0 %3867 }
 0x52c   : > { %11431 = vpow2.f32 %v3909_v23  ;;  %v3896_v19 = vsub.f32 %v13591_v5, %v3868_v38 }
 0x52d   : > { %v3876_v13 = vpop.xlane.xlu1 %3875 }
 0x52e   : > { %v3915_v51 = vmul.f32 1.442695, %v3896_v19  ;;  %v3900_v44 = vsub.f32 %v13602_v56, %v3876_v13 }
 0x52f   : > { %v3874_v18 = vpop.xlane.xlu0 %3873 }
 0x530   : > { %11433 = vpow2.f32 %v3915_v51  ;;  %v3899_v20 = vsub.f32 %v13613_v4, %v3874_v18  ;;  %v3923_v57 = vmul.f32 1.442695, %v3900_v44 }
 0x531   : > { %v3872_v0 = vpop.xlane.xlu1 %3871  ;;  %11435 = vpow2.f32 %v3911_v1 }
 0x532   : > { %v13804_v9 = vpop.eup %11429  ;;  %v3921_v50 = vmul.f32 1.442695, %v3899_v20  ;;  %v3898_v5 = vsub.f32 %v13624_v6, %v3872_v0 }
 0x533   : > { %v3870_v52 = vpop.xlane.xlu0 %3869  ;;  %3945 = vadd.xlane.f32.xlu0 %v13804_v9 }
 0x534   : > { %11437 = vpow2.f32 %v3921_v50  ;;  %v3897_v23 = vsub.f32 %v13635_v25, %v3870_v52  ;;  %v3919_v18 = vmul.f32 1.442695, %v3898_v5 }
 0x535   : > { %v3884_v26 = vpop.xlane.xlu1 %3883  ;;  %11439 = vpow2.f32 %v3923_v57 }
 0x536   : > { %v13809_v56 = vpop.eup %11431  ;;  %v3917_v13 = vmul.f32 1.442695, %v3897_v23  ;;  %v3904_v44 = vsub.f32 %v13646_v63, %v3884_v26 }
 0x537   : > { %v3882_v4 = vpop.xlane.xlu0 %3881  ;;  %3941 = vadd.xlane.f32.xlu0 %v13809_v56 }
 0x538   : > { %11441 = vpow2.f32 %v3917_v13  ;;  %v3903_v20 = vsub.f32 %v13657_v48, %v3882_v4  ;;  %v3931_v13 = vmul.f32 1.442695, %v3904_v44 }
 0x539   : > { %v3880_v1 = vpop.xlane.xlu1 %3879  ;;  %11443 = vpow2.f32 %v3919_v18 }
 0x53a   : > { %v13813_v62 = vpop.eup %11433  ;;  %v3929_v25 = vmul.f32 1.442695, %v3903_v20  ;;  %v3902_v63 = vsub.f32 %v13668_v17, %v3880_v1 }
 0x53b   : > { %v3878_v59 = vpop.xlane.xlu0 %3877  ;;  %3947 = vadd.xlane.f32.xlu1 %v13813_v62  ;;  %v13817_v38 = vpop.eup %11435 }
 0x53c   : > { %v3901_v6 = vsub.f32 %v13679_v53, %v3878_v59  ;;  %11445 = vpow2.f32 %v3929_v25  ;;  %v3927_v18 = vmul.f32 1.442695, %v3902_v63 }
 0x53d   : > { %v3892_v19 = vpop.xlane.xlu1 %3891 }
 0x53e   : > { %v13819_v51 = vpop.eup %11437  ;;  %v3925_v0 = vmul.f32 1.442695, %v3901_v6  ;;  %v3908_v48 = vsub.f32 %v13690_v2, %v3892_v19 }
 0x53f   : > { %v3890_v50 = vpop.xlane.xlu0 %3889  ;;  %3953 = vadd.xlane.f32.xlu0 %v13819_v51  ;;  %3943 = vadd.xlane.f32.xlu1 %v13817_v38  ;;  %v13826_v52 = vpop.eup %11439 }
 0x540   : > { %v3907_v57 = vsub.f32 %v13700_v45, %v3890_v50  ;;  %11447 = vpow2.f32 %v3925_v0  ;;  %v3939_v26 = vmul.f32 1.442695, %v3908_v48 }
 0x541   : > { %v3888_v53 = vpop.xlane.xlu1 %3887 }
 0x542   : > { %v13828_v5 = vpop.eup %11441  ;;  %v3937_v23 = vmul.f32 1.442695, %v3907_v57  ;;  %v3906_v2 = vsub.f32 %v13710_v32, %v3888_v53 }
 0x543   : > { %3949 = vadd.xlane.f32.xlu0 %v13828_v5  ;;  %3955 = vadd.xlane.f32.xlu1 %v13826_v52  ;;  %v3886_v4 = vpop.xlane.xlu0 %3885  ;;  %v13834_v45 = vpop.eup %11443 }
 0x544   : > { %11449 = vpow2.f32 %v3937_v23  ;;  %v3935_v20 = vmul.f32 1.442695, %v3906_v2  ;;  %v3905_v17 = vsub.f32 %v13715_v15, %v3886_v4 }
 0x545   : > { %11451 = vpow2.f32 %v3931_v13 }
 0x546   : > { %11453 = vpow2.f32 %v3939_v26  ;;  %v13838_v1 = vpop.eup %11445  ;;  %v3933_v59 = vmul.f32 1.442695, %v3905_v17 }
 0x547   : > { %3951 = vadd.xlane.f32.xlu1 %v13834_v45  ;;  %11455 = vpow2.f32 %v3927_v18 }
 0x548   : > { %11457 = vpow2.f32 %v3935_v20 }
 0x549   : > { %11459 = vpow2.f32 %v3933_v59 }
 0x54a   : > { %v13841_v25 = vpop.eup %11447 }
 0x54b   : > { %3961 = vadd.xlane.f32.xlu1 %v13838_v1 }
 0x54e   : > { %v13843_v32 = vpop.eup %11449 }
 0x54f   : > { %3969 = vadd.xlane.f32.xlu0 %v13843_v32  ;;  %3957 = vadd.xlane.f32.xlu1 %v13841_v25  ;;  %v13847_v6 = vpop.eup %11451 }
 0x550   : > { %v13849_v19 = vpop.eup %11453 }
 0x551   : > { %v13853_v15 = vpop.eup %11455 }
 0x552   : > { %v13855_v44 = vpop.eup %11457 }
 0x553   : > { %3971 = vadd.xlane.f32.xlu0 %v13849_v19  ;;  %3963 = vadd.xlane.f32.xlu1 %v13847_v6  ;;  %v13859_v0 = vpop.eup %11459 }
 0x557   : > { %3959 = vadd.xlane.f32.xlu1 %v13853_v15  ;;  %3967 = vadd.xlane.f32.xlu0 %v13855_v44 }
 0x55b   : > { %3965 = vadd.xlane.f32.xlu1 %v13859_v0 }
 0x596   : > { %v4364_v50 = vpop.xlane.xlu0 %4363 }
 0x597   : > { %v4393_v48 = vsub.f32 %v13720_v29, %v4364_v50 }
 0x598   : > { %v4366_v57 = vpop.xlane.xlu1 %4365 }
 0x599   : > { %v4411_v53 = vmul.f32 1.442695, %v4393_v48  ;;  %v4394_v23 = vsub.f32 %v13725_v60, %v4366_v57 }
 0x59a   : > { %v4360_v13 = vpop.xlane.xlu0 %4359 }
 0x59b   : > { %11461 = vpow2.f32 %v4411_v53  ;;  %v4391_v63 = vsub.f32 %v13730_v28, %v4360_v13  ;;  %v4413_v4 = vmul.f32 1.442695, %v4394_v23 }
 0x59c   : > { %v4362_v26 = vpop.xlane.xlu1 %4361 }
 0x59d   : > { %v4407_v2 = vmul.f32 1.442695, %v4391_v63  ;;  %v4392_v18 = vsub.f32 %v13735_v21, %v4362_v26 }
 0x59e   : > { %v4372_v20 = vpop.xlane.xlu0 %4371 }
 0x59f   : > { %11463 = vpow2.f32 %v4407_v2  ;;  %v4397_v17 = vsub.f32 %v13740_v34, %v4372_v20  ;;  %v4409_v29 = vmul.f32 1.442695, %v4392_v18 }
 0x5a0   : > { %v4374_v59 = vpop.xlane.xlu1 %4373  ;;  %11465 = vpow2.f32 %v4413_v4 }
 0x5a1   : > { %v4419_v47 = vmul.f32 1.442695, %v4397_v17  ;;  %v4398_v60 = vsub.f32 %v13745_v42, %v4374_v59 }
 0x5a2   : > { %v4368_v50 = vpop.xlane.xlu0 %4367 }
 0x5a3   : > { %11467 = vpow2.f32 %v4419_v47  ;;  %v4395_v48 = vsub.f32 %v13750_v16, %v4368_v50  ;;  %v4421_v34 = vmul.f32 1.442695, %v4398_v60 }
 0x5a4   : > { %v4370_v28 = vpop.xlane.xlu1 %4369  ;;  %11469 = vpow2.f32 %v4409_v29 }
 0x5a5   : > { %v13869_v57 = vpop.eup %11461  ;;  %v4415_v53 = vmul.f32 1.442695, %v4395_v48  ;;  %v4396_v21 = vsub.f32 %v13755_v43, %v4370_v28 }
 0x5a6   : > { %v4380_v23 = vpop.xlane.xlu0 %4379  ;;  %4443 = vadd.xlane.f32.xlu0 %v13869_v57 }
 0x5a7   : > { %11471 = vpow2.f32 %v4415_v53  ;;  %v4417_v63 = vmul.f32 1.442695, %v4396_v21  ;;  %v4401_v47 = vsub.f32 %v13760_v36, %v4380_v23 }
 0x5a8   : > { %v4382_v42 = vpop.xlane.xlu1 %4381  ;;  %11473 = vpow2.f32 %v4421_v34 }
 0x5a9   : > { %v13873_v13 = vpop.eup %11463  ;;  %11475 = vpow2.f32 %v4417_v63  ;;  %v4427_v18 = vmul.f32 1.442695, %v4401_v47  ;;  %v4402_v20 = vsub.f32 %v13765_v37, %v4382_v42 }
 0x5aa   : > { %v4376_v26 = vpop.xlane.xlu0 %4375  ;;  %4439 = vadd.xlane.f32.xlu1 %v13873_v13  ;;  %v13878_v2 = vpop.eup %11465 }
 0x5ab   : > { %v4399_v16 = vsub.f32 %v13770_v30, %v4376_v26  ;;  %v4429_v60 = vmul.f32 1.442695, %v4402_v20 }
 0x5ac   : > { %v4378_v30 = vpop.xlane.xlu1 %4377 }
 0x5ad   : > { %v13880_v43 = vpop.eup %11467  ;;  %v4423_v4 = vmul.f32 1.442695, %v4399_v16  ;;  %v4400_v37 = vsub.f32 %v13775_v49, %v4378_v30 }
 0x5ae   : > { %v4388_v17 = vpop.xlane.xlu0 %4387  ;;  %4451 = vadd.xlane.f32.xlu0 %v13880_v43  ;;  %4445 = vadd.xlane.f32.xlu1 %v13878_v2  ;;  %v13886_v59 = vpop.eup %11469 }
 0x5af   : > { %11477 = vpow2.f32 %v4423_v4  ;;  %v4405_v36 = vsub.f32 %v13780_v7, %v4388_v17  ;;  %v4425_v21 = vmul.f32 1.442695, %v4400_v37 }
 0x5b0   : > { %11479 = vpow2.f32 %v4427_v18  ;;  %v13907_v63 = vpop.xlane.xlu1 %4389 }
 0x5b1   : > { %v13888_v29 = vpop.eup %11471  ;;  %v4435_v50 = vmul.f32 1.442695, %v4405_v36 }
 0x5b2   : > { %v4384_v48 = vpop.xlane.xlu0 %4383  ;;  %4447 = vadd.xlane.f32.xlu0 %v13888_v29  ;;  %4441 = vadd.xlane.f32.xlu1 %v13886_v59  ;;  %v13894_v53 = vpop.eup %11473 }
 0x5b3   : > { %11481 = vpow2.f32 %v4435_v50  ;;  %v4403_v28 = vsub.f32 %v13791_v3, %v4384_v48  ;;  %v13897_v23 = vpop.eup %11475 }
 0x5b4   : > { %11483 = vpow2.f32 %v4429_v60  ;;  %v13917_v16 = vpop.xlane.xlu1 %4385 }
 0x5b5   : > { %v4431_v7 = vmul.f32 1.442695, %v4403_v28 }
 0x5b6   : > { %4453 = vadd.xlane.f32.xlu0 %v13894_v53 }
 0x5b7   : > { %11485 = vpow2.f32 %v4431_v7 }
 0x5b8   : > { %11487 = vpow2.f32 %v4425_v21 }
 0x5b9   : > { %v13899_v34 = vpop.eup %11477 }
 0x5ba   : > { %4455 = vadd.xlane.f32.xlu1 %v13899_v34  ;;  %4449 = vadd.xlane.f32.xlu0 %v13897_v23  ;;  %v13903_v49 = vpop.eup %11479 }
 0x5bd   : > { %v13905_v3 = vpop.eup %11481 }
 0x5be   : > { %4467 = vadd.xlane.f32.xlu1 %v13905_v3  ;;  %4459 = vadd.xlane.f32.xlu0 %v13903_v49  ;;  %v13911_v47 = vpop.eup %11483 }
 0x5c0   : > { %v3946_v26 = vpop.xlane.xlu0 %3945 }
 0x5c1   : > { %v13913_v42 = vpop.eup %11485 }
 0x5c2   : > { %4463 = vadd.xlane.f32.xlu1 %v13913_v42  ;;  %4461 = vadd.xlane.f32.xlu0 %v13911_v47  ;;  %v13919_v4 = vpop.eup %11487 }
 0x5c4   : > { %v3942_v18 = vpop.xlane.xlu0 %3941 }
 0x5c6   : > { %4457 = vadd.xlane.f32.xlu0 %v13919_v4 }
 0x5c8   : > { %v3948_v20 = vpop.xlane.xlu1 %3947 }
 0x5c9   : > { %11489 = vrcp.f32 %v3948_v20 }
 0x5ca   : > { %11491 = vrcp.f32 %v3942_v18 }
 0x5cb   : > { %11493 = vrcp.f32 %v3946_v26 }
 0x5cc   : > { %v3954_v17 = vpop.xlane.xlu0 %3953  ;;  %v3944_v36 = vpop.xlane.xlu1 %3943 }
 0x5cd   : > { %11495 = vrcp.f32 %v3944_v36 }
 0x5d0   : > { %v3950_v30 = vpop.xlane.xlu0 %3949  ;;  %v3956_v50 = vpop.xlane.xlu1 %3955 }
 0x5d1   : > { %11497 = vrcp.f32 %v3950_v30 }
 0x5d2   : > { %11499 = vrcp.f32 %v3956_v50 }
 0x5d3   : > { %4533 = vrot.lane.b32.xlu1 %v13503_v40, %s12137_s23  ;;  %11501 = vrcp.f32 %v3954_v17  ;;  %v11490_v48 = vpop.eup %11489 }
 0x5d4   : > { %v3952_v60 = vpop.xlane.xlu1 %3951  ;;  %v11492_v37 = vpop.eup %11491  ;;  %v3980_v21 = vmul.f32 %v11490_v48, %v13813_v62 }
 0x5d5   : > { %11503 = vrcp.f32 %v3952_v60  ;;  %v11494_v28 = vpop.eup %11493  ;;  %v3974_v26 = vmul.f32 %v11492_v37, %v13809_v56 }
 0x5d6   : > { %v3978_v36 = vmul.f32 %v11494_v28, %v13804_v9 }
 0x5d7   : > { %v11496_v7 = vpop.eup %11495 }
 0x5d8   : > { %v3962_v18 = vpop.xlane.xlu1 %3961  ;;  %v3976_v20 = vmul.f32 %v11496_v7, %v13817_v38  ;;  %v4006_v17 = vpack.c.bf16 %v3980_v21, %v3978_v36 }
 0x5da   : > { %v4005_v30 = vpack.c.bf16 %v3976_v20, %v3974_v26 }
 0x5db   : > { %v11498_v50 = vpop.eup %11497 }
 0x5dc   : > { %v3970_v55 = vpop.xlane.xlu0 %3969  ;;  %4531 = vrot.lane.b32.xlu0 %v13495_v27, %s12137_s23  ;;  %v3958_v40 = vpop.xlane.xlu1 %3957  ;;  %10034 = vmatprep.mubr.bf16.mxu1 %v4005_v30  ;;  %v3982_v9 = vmul.f32 %v11498_v50, %v13828_v5 }
 0x5dd   : > { %v11500_v60 = vpop.eup %11499  ;;  %10035 = vmatmul.mubr.bf16.vlgmr.msra.gmra.mrb[112].mxu1 %v4006_v17 }
 0x5de   : > { %v11502_v8 = vpop.eup %11501  ;;  %10522 = vmatpush3.bf16.msra.mxu1 %v13514_v11  ;;  %v3988_v37 = vmul.f32 %v11500_v60, %v13826_v52  ;;  %v4404_v52 = vsub.f32 %v13796_v22, %v13917_v16 }
 0x5df   : > { %v11504_v62 = vpop.eup %11503  ;;  %10515 = vmatprep.subr.bf16.mxu1 %v13519_v31  ;;  %v3986_v28 = vmul.f32 %v11502_v8, %v13819_v51 }
 0x5e0   : > { %v3972_v56 = vpop.xlane.xlu0 %3971  ;;  %v3964_v38 = vpop.xlane.xlu1 %3963  ;;  %v3984_v48 = vmul.f32 %v11504_v62, %v13834_v45  ;;  %v4433_v51 = vmul.f32 1.442695, %v4404_v52 }
 0x5e1   : > { %11505 = vrcp.f32 %v3964_v38  ;;  %v4008_v21 = vpack.c.bf16 %v3988_v37, %v3986_v28 }
 0x5e2   : > { %v4007_v27 = vpack.c.bf16 %v3984_v48, %v3982_v9  ;;  %10523 = vmatpush3.bf16.msra.mxu1 %v13519_v31  ;;  %11507 = vrcp.f32 %v3958_v40  ;;  %v4406_v31 = vsub.f32 %v13785_v41, %v13907_v63 }
 0x5e3   : > { %10516 = vmatprep.subr.bf16.mxu1 %v13523_v14  ;;  %11509 = vrcp.f32 %v3962_v18 }
 0x5e4   : > { %v3968_v11 = vpop.xlane.xlu0 %3967  ;;  %10038 = vmatprep.mubr.bf16.mxu1 %v4007_v27  ;;  %v3960_v7 = vpop.xlane.xlu1 %3959  ;;  %v4437_v16 = vmul.f32 1.442695, %v4406_v31 }
 0x5e5   : > { %11511 = vrcp.f32 %v3960_v7  ;;  %10039 = vmatmul.mubr.bf16.gmra.mrb[116].mxu1 %v4008_v21 }
 0x5e6   : > { %11513 = vrcp.f32 %v3968_v11  ;;  %10524 = vmatpush3.bf16.msra.mxu1 %v13523_v14 }
 0x5e7   : > { %10517 = vmatprep.subr.bf16.mxu1 %v13527_v12 }
 0x5e8   : > { %v3966_v8 = vpop.xlane.xlu1 %3965 }
 0x5e9   : > { %11515 = vrcp.f32 %v3966_v8 }
 0x5ea   : > { %11517 = vrcp.f32 %v3972_v56  ;;  %10525 = vmatpush3.bf16.msra.mxu1 %v13527_v12 }
 0x5eb   : > { %10518 = vmatprep.subr.bf16.mxu1 %v13535_v24  ;;  %v11506_v5 = vpop.eup %11505  ;;  %11519 = vrcp.f32 %v3970_v55 }
 0x5ec   : > { %v11508_v45 = vpop.eup %11507  ;;  %11521 = vpow2.f32 %v4433_v51  ;;  %v3996_v18 = vmul.f32 %v11506_v5, %v13847_v6 }
 0x5ed   : > { %v11510_v14 = vpop.eup %11509  ;;  %v3990_v26 = vmul.f32 %v11508_v45, %v13841_v25  ;;  %11523 = vpow2.f32 %v4437_v16  ;;  %v11303_v16 = vld [vmem:[#allocation12 + $0x64] ss:$12 sps:$4 sm:$0xff]  }
 0x5ee   : > { %10526 = vmatpush3.bf16.msra.mxu1 %v13535_v24  ;;  %v3994_v63 = vmul.f32 %v11510_v14, %v13838_v1 }
 0x5ef   : > { %v11512_v22 = vpop.eup %11511  ;;  %10519 = vmatprep.subr.bf16.mxu1 %v13567_v35 }
 0x5f0   : > { %v11514_v12 = vpop.eup %11513  ;;  %v3992_v41 = vmul.f32 %v11512_v22, %v13853_v15  ;;  %v4010_v24 = vpack.c.bf16 %v3996_v18, %v3994_v63  ;;  %v11304_v18 = vld [vmem:[#allocation12 + $0x68] ss:$12 sps:$4 sm:$0xff]  }
 0x5f1   : > { %v4000_v30 = vmul.f32 %v11514_v12, %v13855_v44 }
 0x5f2   : > { %10527 = vmatpush3.bf16.msra.mxu1 %v13567_v35  ;;  %v4009_v55 = vpack.c.bf16 %v3992_v41, %v3990_v26 }
 0x5f3   : > { %v11516_v20 = vpop.eup %11515 }
 0x5f4   : > { %v3998_v36 = vmul.f32 %v11516_v20, %v13859_v0  ;;  %v11518_v50 = vpop.eup %11517  ;;  %10042 = vmatprep.mubr.bf16.mxu1 %v4009_v55 }
 0x5f5   : > { %10043 = vmatmul.mubr.bf16.gmra.mrb[120].mxu1 %v4010_v24  ;;  %v11520_v40 = vpop.eup %11519  ;;  %v4004_v25 = vmul.f32 %v11518_v50, %v13849_v19 }
 0x5f6   : > { %v4011_v6 = vpack.c.bf16 %v4000_v30, %v3998_v36  ;;  %v13956_v15 = vpop.eup %11521  ;;  %v4002_v1 = vmul.f32 %v11520_v40, %v13843_v32 }
 0x5f7   : > { %v13960_v17 = vpop.eup %11523 }
 0x5f8   : > { %10046 = vmatprep.mubr.bf16.mxu1 %v4011_v6  ;;  %v4012_v35 = vpack.c.bf16 %v4004_v25, %v4002_v1 }
 0x5fb   : > { %4465 = vadd.xlane.f32.xlu0 %v13956_v15 }
 0x5fd   : > { %10047 = vmatmul.mubr.bf16.gmra.mrb[124].mxu1 %v4012_v35 }
 0x5ff   : > { %4469 = vadd.xlane.f32.xlu0 %v13960_v17 }
 0x633   : > { %v4444_v44 = vpop.xlane.xlu0 %4443 }
 0x637   : > { %v4440_v0 = vpop.xlane.xlu1 %4439 }
 0x638   : > { %11525 = vrcp.f32 %v4440_v0  ;;  %v11312_v0 = vld [vmem:[#allocation12 + $0x98] ss:$12 sps:$4 sm:$0xff]  }
 0x63b   : > { %v4452_v60 = vpop.xlane.xlu0 %4451  ;;  %v4446_v62 = vpop.xlane.xlu1 %4445 }
 0x63f   : > { %v4448_v56 = vpop.xlane.xlu0 %4447  ;;  %v4442_v38 = vpop.xlane.xlu1 %4441 }
 0x640   : > { %11527 = vrcp.f32 %v4442_v38 }
 0x641   : > { %11529 = vrcp.f32 %v4446_v62  ;;  %v11309_v62 = vld [vmem:[#allocation12 + $0x90] ss:$12 sps:$4 sm:$0xff]  }
 0x642   : > { %v11526_v32 = vpop.eup %11525 }
 0x643   : > { %v4454_v19 = vpop.xlane.xlu0 %4453  ;;  %v4472_v28 = vmul.f32 %v11526_v32, %v13873_v13 }
 0x647   : > { %v4450_v9 = vpop.xlane.xlu0 %4449  ;;  %v4456_v48 = vpop.xlane.xlu1 %4455 }
 0x648   : > { %11531 = vrcp.f32 %v4450_v9 }
 0x649   : > { %11533 = vrcp.f32 %v4444_v44  ;;  %v11307_v44 = vld [vmem:[#allocation12 + $0x7c] ss:$12 sps:$4 sm:$0xff]  }
 0x64a   : > { %v11528_v37 = vpop.eup %11527  ;;  %11535 = vrcp.f32 %v4448_v56 }
 0x64b   : > { %v4460_v27 = vpop.xlane.xlu0 %4459  ;;  %v4474_v11 = vmul.f32 %v11528_v37, %v13886_v59  ;;  %v13965_v7 = vpop.xlane.xlu1 %4467 }
 0x64c   : > { %v11530_v13 = vpop.eup %11529 }
 0x64d   : > { %v4503_v21 = vpack.c.bf16 %v4474_v11, %v4472_v28  ;;  %v4478_v22 = vmul.f32 %v11530_v13, %v13878_v2  ;;  %v11308_v2 = vld [vmem:[#allocation12 + $0x80] ss:$12 sps:$4 sm:$0xff]   ;;  %v11313_v13 = vld [vmem:[#allocation12 + $0xa8] ss:$12 sps:$4 sm:$0xff]  }
 0x64f   : > { %v4462_v52 = vpop.xlane.xlu0 %4461  ;;  %10098 = vmatprep.mubr.bf16.mxu0 %v4503_v21  ;;  %v13967_v8 = vpop.xlane.xlu1 %4463  ;;  %v15534_v21 = vmov 0  }
 0x650   : > { %11537 = vrcp.f32 %v4462_v52 }
 0x651   : > { %11539 = vrcp.f32 %v4456_v48 }
 0x652   : > { %11541 = vrcp.f32 %v4460_v27  ;;  %v11532_v51 = vpop.eup %11531 }
 0x653   : > { %v4458_v31 = vpop.xlane.xlu0 %4457  ;;  %v11534_v5 = vpop.eup %11533  ;;  %v4482_v26 = vmul.f32 %v11532_v51, %v13897_v23  ;;  %v11316_v51 = vld [vmem:[#allocation12 + $0xb0] ss:$12 sps:$4 sm:$0xff]  }
 0x654   : > { %11543 = vrcp.f32 %v4458_v31  ;;  %v4534_v45 = vpop.permute.xlu1 %4533  ;;  %v11536_v14 = vpop.eup %11535  ;;  %v4476_v63 = vmul.f32 %v11534_v5, %v13869_v57 }
 0x655   : > { %11545 = vrcp.f32 %v4454_v19  ;;  %v4480_v55 = vmul.f32 %v11536_v14, %v13888_v29  ;;  %v11301_v29 = vld [vmem:[#allocation12 + $0x60] ss:$12 sps:$4 sm:$0xff]  }
 0x656   : > { %11547 = vrcp.f32 %v4452_v60  ;;  %v4504_v30 = vpack.c.bf16 %v4478_v22, %v4476_v63  ;;  %v11311_v60 = vld [vmem:[#allocation12 + $0x94] ss:$12 sps:$4 sm:$0xff]  }
 0x657   : > { %v4532_v59 = vpop.permute.xlu0 %4531  ;;  %v4505_v6 = vpack.c.bf16 %v4482_v26, %v4480_v55  ;;  %11549 = vrcp.f32 %v13967_v8 }
 0x658   : > { %10094 = vmatprep.subr.bf16.mxu0 %v4532_v59  ;;  %10520 = vmatprep.subr.bf16.mxu1 %v4532_v59 }
 0x659   : > { %10095 = vmatpush3.bf16.msra.mxu0 %v4532_v59  ;;  %10528 = vmatpush3.bf16.msra.mxu1 %v4532_v59 }
 0x65a   : > { %10096 = vmatprep.subr.bf16.mxu0 %v4534_v45  ;;  %10521 = vmatprep.subr.bf16.mxu1 %v4534_v45  ;;  %v11538_v12 = vpop.eup %11537 }
 0x65b   : > { %v11540_v41 = vpop.eup %11539  ;;  %v4494_v36 = vmul.f32 %v11538_v12, %v13911_v47 }
 0x65c   : > { %v11542_v20 = vpop.eup %11541  ;;  %v4488_v40 = vmul.f32 %v11540_v41, %v13899_v34 }
 0x65d   : > { %10097 = vmatpush3.bf16.msra.mxu0 %v4534_v45  ;;  %10529 = vmatpush3.bf16.msra.mxu1 %v4534_v45  ;;  %v4492_v57 = vmul.f32 %v11542_v20, %v13903_v49  ;;  %v11320_v45 = vld [vmem:[#allocation12 + $0x8] ss:$12 sps:$4 sm:$0xff]  }
 0x65e   : > { %v11544_v24 = vpop.eup %11543  ;;  %4752 = vmatprep.subr.bf16.mxu1 %v11303_v16  ;;  %10114 = vmatprep.subr.bf16.mxu0 %v11304_v18 }
 0x65f   : > { %v11546_v50 = vpop.eup %11545  ;;  %v4490_v23 = vmul.f32 %v11544_v24, %v13919_v4  ;;  %v4508_v35 = vpack.c.bf16 %v4494_v36, %v4492_v57  ;;  %v11305_v4 = vld [vmem:[#allocation12 + $0x78] ss:$12 sps:$4 sm:$0xff]  }
 0x660   : > { %10099 = vmatmul.mubr.bf16.vlgmr.msra.gmra.mrb[160].mxu0 %v4504_v30  ;;  %v11548_v25 = vpop.eup %11547  ;;  %v4486_v47 = vmul.f32 %v11546_v50, %v13894_v53 }
 0x661   : > { %10102 = vmatprep.mubr.bf16.mxu0 %v4505_v6  ;;  %v4507_v1 = vpack.c.bf16 %v4490_v23, %v4488_v40  ;;  %10115 = vmatpush3.bf16.msra.mxu0 %v11304_v18  ;;  %v4484_v34 = vmul.f32 %v11548_v25, %v13880_v43  ;;  %v11550_v56 = vpop.eup %11549 }
 0x662   : > { %10116 = vmatprep.subr.bf16.mxu0 %v11308_v2  ;;  %v4496_v19 = vmul.f32 %v11550_v56, %v13913_v42  ;;  %v11327_v56 = vld [vmem:[#allocation12 + $0x34] ss:$12 sps:$4 sm:$0xff]  }
 0x663   : > { %10106 = vmatprep.mubr.bf16.mxu1 %v4507_v1  ;;  %v4506_v49 = vpack.c.bf16 %v4486_v47, %v4484_v34  ;;  %v11324_v34 = vld [vmem:[#allocation12 + $0x20] ss:$12 sps:$4 sm:$0xff]  }
 0x664   : > { %10107 = vmatmul.mubr.bf16.vlgmr.msra.gmra.mrb[128].mxu1 %v4508_v35 }
 0x665   : > { %4753 = vmatpush1.bf16.msra.mxu1 %v11301_v29  ;;  %10117 = vmatpush3.bf16.msra.mxu0 %v11308_v2  ;;  %v11317_v29 = vld [vmem:[#allocation12] ss:$12 sps:$4 sm:$0xff]  }
 0x666   : > { %4754 = vmatprep.subr.bf16.mxu1 %v11307_v44  ;;  %10118 = vmatprep.subr.bf16.mxu0 %v11312_v0  ;;  %v11323_v44 = vld [vmem:[#allocation12 + $0x1c] ss:$12 sps:$4 sm:$0xff]  }
 0x668   : > { %10103 = vmatmul.mubr.bf16.gmra.mrb[164].mxu0 %v4506_v49 }
 0x669   : > { %4755 = vmatpush1.bf16.msra.mxu1 %v11305_v4  ;;  %10119 = vmatpush3.bf16.msra.mxu0 %v11312_v0 }
 0x66a   : > { %4756 = vmatprep.subr.bf16.mxu1 %v11311_v60  ;;  %10120 = vmatprep.subr.bf16.mxu0 %v11316_v51 }
 0x66d   : > { %4757 = vmatpush1.bf16.msra.mxu1 %v11309_v62  ;;  %10121 = vmatpush3.bf16.msra.mxu0 %v11316_v51  ;;  %v11321_v62 = vld [vmem:[#allocation12 + $0x18] ss:$12 sps:$4 sm:$0xff]  }
 0x66e   : > { %10138 = vmatprep.subr.bf16.mxu0 %v11320_v45 }
 0x688   : > { %v4466_v53 = vpop.xlane.xlu0 %4465 }
 0x689   : > { %11551 = vrcp.f32 %v4466_v53 }
 0x68a   : > { %11553 = vrcp.f32 %v13965_v7 }
 0x68c   : > { %v4470_v43 = vpop.xlane.xlu0 %4469 }
 0x68d   : > { %11555 = vrcp.f32 %v4470_v43 }
 0x693   : > { %v11552_v38 = vpop.eup %11551 }
 0x694   : > { %v4498_v9 = vmul.f32 %v11552_v38, %v13956_v15  ;;  %v11554_v48 = vpop.eup %11553  ;;  %v11315_v15 = vld [vmem:[#allocation12 + $0xac] ss:$12 sps:$4 sm:$0xff]  }
 0x695   : > { %v4500_v27 = vmul.f32 %v11554_v48, %v13905_v3  ;;  %4758 = vmatprep.subr.bf16.mxu1 %v11315_v15  ;;  %v11319_v3 = vld [vmem:[#allocation12 + $0x4] ss:$12 sps:$4 sm:$0xff]  }
 0x696   : > { %v4509_v32 = vpack.c.bf16 %v4498_v9, %v4496_v19  ;;  %4759 = vmatpush1.bf16.msra.mxu1 %v11313_v13  ;;  %v11328_v19 = vld [vmem:[#allocation12 + $0x38] ss:$12 sps:$4 sm:$0xff]  }
 0x697   : > { %v11556_v37 = vpop.eup %11555  ;;  %5050 = vmatprep.subr.bf16.mxu1 %v11319_v3  ;;  %v5309_v3 = vsel %vm15551_vm10, %v13330_v58, 0  ;;  %vm15556_vm10 = vmmov %vm15537_vm0 }
 0x698   : > { %10110 = vmatprep.mubr.bf16.mxu1 %v4509_v32  ;;  %v4502_v28 = vmul.f32 %v11556_v37, %v13960_v17  ;;  %v11325_v37 = vld [vmem:[#allocation12 + $0x30] ss:$12 sps:$4 sm:$0xff]  }
 0x69a   : > { %v4510_v11 = vpack.c.bf16 %v4502_v28, %v4500_v27  ;;  %v11331_v28 = vld [vmem:[#allocation12 + $0x4c] ss:$12 sps:$4 sm:$0xff]  }
 0x69c   : > { %10111 = vmatmul.mubr.bf16.gmra.mrb[132].mxu1 %v4510_v11  ;;  %v11332_v11 = vld [vmem:[#allocation12 + $0x50] ss:$12 sps:$4 sm:$0xff]  }
 0x69d   : > { %4784 = vmatprep.mubr.bf16.mxu1 %v15534_v21 }
 0x6b0   : > { %v10036_v7 = vpop.f32.mrb[112].mxu1 }
 0x6b1   : > { %v4047_v52 = vpop.f32.mrb[113].mxu1 }
 0x6b2   : > { %v10037_v8 = vpop.f32.mrb[114].mxu1 }
 0x6b3   : > { %v13986_v31 = vpack.c.bf16 %v10037_v8, %v10036_v7  ;;  %v4050_v42 = vpop.f32.mrb[115].mxu1  ;;  %v11329_v7 = vld [vmem:[#allocation12 + $0x48] ss:$12 sps:$4 sm:$0xff]  }
 0x6b4   : > { %v13988_v59 = vpack.c.bf16 %v4050_v42, %v4047_v52 }
 0x6b8   : > { %v10040_v17 = vpop.f32.mrb[116].mxu1 }
 0x6b9   : > { %v4063_v5 = vpop.f32.mrb[117].mxu1 }
 0x6ba   : > { %v10041_v14 = vpop.f32.mrb[118].mxu1 }
 0x6bb   : > { %v13990_v22 = vpack.c.bf16 %v10041_v14, %v10040_v17  ;;  %v4066_v16 = vpop.f32.mrb[119].mxu1  ;;  %v15567_v14 = vld [vmem:[#allocation64_spill] sm:$0xff] }
 0x6bc   : > { %v13992_v18 = vpack.c.bf16 %v4066_v16, %v4063_v5  ;;  %v15561_v5 = vld [vmem:[#allocation45_spill] sm:$0xff]  ;;  %v15568_v16 = vld [vmem:[#allocation48_spill] sm:$0xff] }
 0x6c8   : > { %v10044_v12 = vpop.f32.mrb[120].mxu1 }
 0x6c9   : > { %v4079_v26 = vpop.f32.mrb[121].mxu1 }
 0x6ca   : > { %v10045_v41 = vpop.f32.mrb[122].mxu1 }
 0x6cb   : > { %v13994_v63 = vpack.c.bf16 %v10045_v41, %v10044_v12  ;;  %v4082_v20 = vpop.f32.mrb[123].mxu1  ;;  %v15569_v12 = vld [vmem:[#allocation28_spill] sm:$0xff]  ;;  %v15574_v41 = vld [vmem:[#allocation66_spill] sm:$0xff] }
 0x6cc   : > { %v13996_v55 = vpack.c.bf16 %v4082_v20, %v4079_v26  ;;  %v15575_v20 = vld [vmem:[#allocation49_spill] sm:$0xff] }
 0x6d0   : > { %v10048_v24 = vpop.f32.mrb[124].mxu1 }
 0x6d1   : > { %v4095_v36 = vpop.f32.mrb[125].mxu1 }
 0x6d2   : > { %v10049_v30 = vpop.f32.mrb[126].mxu1 }
 0x6d3   : > { %v13998_v2 = vpack.c.bf16 %v10049_v30, %v10048_v24  ;;  %v4098_v50 = vpop.f32.mrb[127].mxu1  ;;  %v15579_v24 = vld [vmem:[#allocation50_spill] sm:$0xff]  ;;  %v15582_v30 = vld [vmem:[#allocation51_spill] sm:$0xff] }
 0x6d4   : > { %v14000_v6 = vpack.c.bf16 %v4098_v50, %v4095_v36  ;;  %v15588_v50 = vld [vmem:[#allocation20_spill] sm:$0xff] }
 0x733   : > { %v10100_v40 = vpop.f32.mrb[160].mxu0 }
 0x734   : > { %v4577_v23 = vpop.f32.mrb[161].mxu0 }
 0x735   : > { %v10101_v57 = vpop.f32.mrb[162].mxu0 }
 0x736   : > { %v4641_v25 = vpack.c.bf16 %v10101_v57, %v10100_v40  ;;  %v4580_v1 = vpop.f32.mrb[163].mxu0  ;;  %v15590_v40 = vld [vmem:[#allocation22_spill] sm:$0xff]  ;;  %v15596_v57 = vld [vmem:[#allocation37_spill] sm:$0xff] }
 0x737   : > { %v4640_v35 = vpack.c.bf16 %v4580_v1, %v4577_v23  ;;  %v10108_v47 = vpop.f32.mrb[128].mxu1  ;;  %v15592_v23 = vld [vmem:[#allocation31_spill] sm:$0xff] }
 0x738   : > { %v4609_v0 = vpop.f32.mrb[129].mxu1 }
 0x739   : > { %v10109_v4 = vpop.f32.mrb[130].mxu1  ;;  %9195 = vmatmul.mubr.msk.bf16.vlgmr.msra.gmra.mrb[136].mxu1 %vm15535_vm13, %v4640_v35  ;;  %10122 = vmatprep.mubr.msk.bf16.mxu0 %vm15536_vm15, %v4640_v35  ;;  %vm15538_vm13 = vmmov %vm15537_vm0 }
 0x73a   : > { %v4645_v49 = vpack.c.bf16 %v10109_v4, %v10108_v47  ;;  %5051 = vmatpush1.bf16.msra.mxu1 %v11317_v29  ;;  %v4612_v60 = vpop.f32.mrb[131].mxu1  ;;  %10123 = vmatmul.mubr.msk.bf16.vlgmr.msra.gmra.mrb[168].mxu0 %vm15537_vm0, %v4641_v25  ;;  %vm15539_vm15 = vmmov %vm15537_vm0 }
 0x73b   : > { %v4644_v53 = vpack.c.bf16 %v4612_v60, %v4609_v0  ;;  %10139 = vmatpush3.bf16.msra.mxu0 %v11320_v45  ;;  %v10104_v43 = vpop.f32.mrb[164].mxu0  ;;  %5052 = vmatprep.subr.bf16.mxu1 %v11323_v44 }
 0x73c   : > { %v4593_v38 = vpop.f32.mrb[165].mxu0  ;;  %10140 = vmatprep.subr.bf16.mxu0 %v11324_v34  ;;  %4794 = vmatprep.mubr.bf16.mxu1 %v15534_v21 }
 0x73d   : > { %v10105_v9 = vpop.f32.mrb[166].mxu0 }
 0x73e   : > { %v4643_v48 = vpack.c.bf16 %v10105_v9, %v10104_v43  ;;  %5053 = vmatpush1.bf16.msra.mxu1 %v11321_v62  ;;  %v4596_v32 = vpop.f32.mrb[167].mxu0 }
 0x73f   : > { %v4642_v27 = vpack.c.bf16 %v4596_v32, %v4593_v38  ;;  %10141 = vmatpush3.bf16.msra.mxu0 %v11324_v34  ;;  %5054 = vmatprep.subr.bf16.mxu1 %v11327_v56  ;;  %v15603_v32 = vld [vmem:[#allocation74_spill] sm:$0xff] }
 0x740   : > { %10142 = vmatprep.subr.bf16.mxu0 %v11328_v19 }
 0x741   : > { %9196 = vmatmul.mubr.msk.bf16.gmra.mrb[140].mxu1 %vm15537_vm0, %v4641_v25  ;;  %10126 = vmatprep.mubr.msk.bf16.mxu0 %vm15538_vm13, %v4642_v27  ;;  %vm15542_vm13 = vmmov %vm15537_vm0  ;;  %v15598_v25 = vld [vmem:[#allocation38_spill] sm:$0xff] }
 0x742   : > { %5055 = vmatpush1.bf16.msra.mxu1 %v11325_v37  ;;  %10127 = vmatmul.mubr.msk.bf16.gmra.mrb[172].mxu0 %vm15539_vm15, %v4643_v48  ;;  %vm15543_vm15 = vmmov %vm15537_vm0 }
 0x743   : > { %10143 = vmatpush3.bf16.msra.mxu0 %v11328_v19  ;;  %10130 = vmatprep.mubr.msk.bf16.mxu0 %vm15540_vm11, %v4644_v53  ;;  %vm15544_vm11 = vmmov %vm15537_vm0 }
 0x744   : > { %5056 = vmatprep.subr.bf16.mxu1 %v11331_v28  ;;  %10144 = vmatprep.subr.bf16.mxu0 %v11332_v11 }
 0x745   : > { %4804 = vmatprep.mubr.bf16.mxu1 %v15534_v21 }
 0x746   : > { %5057 = vmatpush1.bf16.msra.mxu1 %v11329_v7 }
 0x747   : > { %10145 = vmatpush3.bf16.msra.mxu0 %v11332_v11  ;;  %10194 = vmatprep.subr.bf16.mxu1 %v13464_v39 }
 0x748   : > { %10882 = vmatprep.subr.msk.bf16.mxu0 %vm15541_vm9, %v13330_v58  ;;  %vm15546_vm9 = vmmov %vm15537_vm0 }
 0x749   : > { %9197 = vmatmul.mubr.msk.bf16.gmra.mrb[144].mxu1 %vm15537_vm0, %v4642_v27 }
 0x74a   : > { %10131 = vmatmul.mubr.msk.bf16.gmra.mrb[176].mxu0 %vm15542_vm13, %v4645_v49  ;;  %4814 = vmatprep.mubr.bf16.mxu1 %v15534_v21  ;;  %vm15547_vm13 = vmmov %vm15537_vm0 }
 0x751   : > { %9198 = vmatmul.mubr.msk.bf16.gmra.mrb[148].mxu1 %vm15543_vm15, %v4643_v48  ;;  %vm15548_vm15 = vmmov %vm15537_vm0 }
 0x752   : > { %4824 = vmatprep.mubr.bf16.mxu1 %v15534_v21 }
 0x759   : > { %9199 = vmatmul.mubr.msk.bf16.gmra.mrb[152].mxu1 %vm15544_vm11, %v4644_v53  ;;  %vm15550_vm11 = vmmov %vm15537_vm0 }
 0x75a   : > { %4834 = vmatprep.mubr.bf16.mxu1 %v15534_v21 }
 0x761   : > { %9200 = vmatmul.mubr.msk.bf16.gmra.mrb[156].mxu1 %vm15545_vm12, %v4645_v49  ;;  %vm15549_vm12 = vmmov %vm15537_vm0 }
 0x762   : > { %4844 = vmatprep.mubr.bf16.mxu1 %v15534_v21 }
 0x76f   : > { %v10112_v52 = vpop.f32.mrb[132].mxu1 }
 0x770   : > { %v4625_v8 = vpop.f32.mrb[133].mxu1 }
 0x771   : > { %v10113_v42 = vpop.f32.mrb[134].mxu1 }
 0x772   : > { %v4647_v13 = vpack.c.bf16 %v10113_v42, %v10112_v52  ;;  %v4628_v15 = vpop.f32.mrb[135].mxu1 }
 0x773   : > { %v4646_v51 = vpack.c.bf16 %v4628_v15, %v4625_v8  ;;  %v15605_v15 = vld [vmem:[#allocation72_spill] sm:$0xff] }
 0x775   : > { %9201 = vmatmul.mubr.msk.bf16.gmra.mrb[160].mxu1 %vm15546_vm9, %v4646_v51  ;;  %10134 = vmatprep.mubr.msk.bf16.mxu0 %vm15537_vm0, %v4646_v51  ;;  %vm15552_vm9 = vmmov %vm15537_vm0 }
 0x776   : > { %10135 = vmatmul.mubr.msk.bf16.gmra.mrb[180].mxu0 %vm15547_vm13, %v4647_v13  ;;  %4854 = vmatprep.mubr.bf16.mxu1 %v15534_v21  ;;  %vm15553_vm13 = vmmov %vm15537_vm0 }
 0x777   : > { %10146 = vmatprep.mubr.msk.bf16.mxu0 %vm15548_vm15, %v13988_v59  ;;  %vm15554_vm15 = vmmov %vm15537_vm0 }
 0x77d   : > { %9202 = vmatmul.mubr.msk.bf16.gmra.mrb[164].mxu1 %vm15549_vm12, %v4647_v13  ;;  %vm15555_vm12 = vmmov %vm15537_vm0 }
 0x77e   : > { %10147 = vmatmul.mubr.msk.bf16.vlgmr.msra.gmra.mrb[168].mxu0 %vm15550_vm11, %v13986_v31  ;;  %5082 = vmatprep.mubr.bf16.mxu1 %v15534_v21  ;;  %v5312_v17 = vsel %vm15555_vm12, %v13341_v33, 0  ;;  %vm15557_vm11 = vmmov %vm15537_vm0 }
 0x77f   : > { %10163 = vmatpush3.bf16.xpose.msra.mxu0 %v5309_v3  ;;  %10150 = vmatprep.mubr.msk.bf16.mxu0 %vm15552_vm9, %v13992_v18  ;;  %vm15558_vm9 = vmmov %vm15537_vm0 }
 0x780   : > { %10883 = vmatprep.subr.msk.bf16.mxu0 %vm15537_vm0, %v13341_v33  ;;  %vm15562_vm12 = vmmov %vm15537_vm0 }
 0x785   : > { %9223 = vmatmul.mubr.msk.bf16.vlgmr.msra.gmra.mrb[136].mxu1 %vm15553_vm13, %v13988_v59  ;;  %vm15559_vm13 = vmmov %vm15537_vm0 }
 0x786   : > { %10195 = vmatpush3.bf16.msra.mxu1 %v13464_v39  ;;  %10151 = vmatmul.mubr.msk.bf16.gmra.mrb[172].mxu0 %vm15554_vm15, %v13990_v22  ;;  %v5315_v59 = vsel %vm15559_vm13, %v13353_v61, 0  ;;  %vm15560_vm15 = vmmov %vm15537_vm0 }
 0x787   : > { %10165 = vmatpush3.bf16.xpose.msra.mxu0 %v5312_v17  ;;  %10196 = vmatprep.subr.bf16.mxu1 %v13469_v54  ;;  %vm15570_vm13 = vmmov %vm15537_vm0 }
 0x788   : > { %10154 = vmatprep.mubr.msk.bf16.mxu0 %vm15556_vm10, %v13996_v55  ;;  %10884 = vmatprep.subr.msk.bf16.mxu0 %vm15557_vm11, %v13353_v61  ;;  %vm15564_vm10 = vmmov %vm15537_vm0 }
 0x789   : > { %5092 = vmatprep.mubr.bf16.mxu1 %v15534_v21  ;;  %vm15565_vm11 = vmmov %vm15537_vm0 }
 0x78a   : > { %10197 = vmatpush3.bf16.msra.mxu1 %v13469_v54 }
 0x78b   : > { %10198 = vmatprep.subr.bf16.mxu1 %v13474_v10 }
 0x78d   : > { %9224 = vmatmul.mubr.msk.bf16.gmra.mrb[140].mxu1 %vm15558_vm9, %v13986_v31  ;;  %v15563_v31 = vld [vmem:[#allocation63_spill] sm:$0xff]  ;;  %vm15566_vm9 = vmmov %vm15537_vm0 }
 0x78e   : > { %10199 = vmatpush3.bf16.msra.mxu1 %v13474_v10  ;;  %10155 = vmatmul.mubr.msk.bf16.gmra.mrb[176].mxu0 %vm15537_vm0, %v13994_v63  ;;  %v5318_v45 = vsel %vm15566_vm9, %v15561_v5, 0  ;;  %vm15578_vm9 = vmmov %vm15537_vm0 }
 0x78f   : > { %10167 = vmatpush3.bf16.xpose.msra.mxu0 %v5315_v59  ;;  %10200 = vmatprep.subr.bf16.mxu1 %v13479_v46 }
 0x790   : > { %10158 = vmatprep.mubr.msk.bf16.mxu0 %vm15560_vm15, %v14000_v6  ;;  %10885 = vmatprep.subr.msk.bf16.mxu0 %vm15562_vm12, %v15561_v5  ;;  %vm15572_vm15 = vmmov %vm15537_vm0 }
 0x791   : > { %5102 = vmatprep.mubr.bf16.mxu1 %v15534_v21  ;;  %vm15573_vm12 = vmmov %vm15537_vm0 }
 0x792   : > { %10201 = vmatpush3.bf16.msra.mxu1 %v13479_v46  ;;  %v5321_v26 = vsel %vm15573_vm12, %v15568_v16, 0  ;;  %vm15583_vm12 = vmmov %vm15537_vm0 }
 0x793   : > { %10202 = vmatprep.subr.bf16.mxu1 %v15563_v31 }
 0x795   : > { %9225 = vmatmul.mubr.msk.bf16.gmra.mrb[144].mxu1 %vm15564_vm10, %v13992_v18  ;;  %v15571_v18 = vld [vmem:[#allocation65_spill] sm:$0xff]  ;;  %vm15576_vm10 = vmmov %vm15537_vm0 }
 0x796   : > { %10203 = vmatpush3.bf16.msra.mxu1 %v15563_v31  ;;  %10159 = vmatmul.mubr.msk.bf16.gmra.mrb[180].mxu0 %vm15565_vm11, %v13998_v2  ;;  %vm15577_vm11 = vmmov %vm15537_vm0 }
 0x797   : > { %10169 = vmatpush3.bf16.xpose.msra.mxu0 %v5318_v45  ;;  %10204 = vmatprep.subr.bf16.mxu1 %v15567_v14 }
 0x798   : > { %10886 = vmatprep.subr.msk.bf16.mxu0 %vm15537_vm0, %v15568_v16  ;;  %10178 = vmatprep.mubr.msk.bf16.mxu0 %vm15570_vm13, %v15569_v12  ;;  %vm15580_vm13 = vmmov %vm15537_vm0 }
 0x799   : > { %5112 = vmatprep.mubr.bf16.mxu1 %v15534_v21 }
 0x79a   : > { %10205 = vmatpush3.bf16.msra.mxu1 %v15567_v14 }
 0x79b   : > { %10206 = vmatprep.subr.bf16.mxu1 %v15571_v18 }
 0x79d   : > { %9226 = vmatmul.mubr.msk.bf16.gmra.mrb[148].mxu1 %vm15572_vm15, %v13990_v22  ;;  %v5324_v22 = vsel %vm15578_vm9, %v15575_v20, 0  ;;  %vm15581_vm15 = vmmov %vm15537_vm0 }
 0x79e   : > { %10207 = vmatpush3.bf16.msra.mxu1 %v15571_v18  ;;  %5122 = vmatprep.mubr.bf16.mxu1 %v15534_v21  ;;  %v5327_v36 = vsel %vm15581_vm15, %v15579_v24, 0  ;;  %vm15586_vm9 = vmmov %vm15537_vm0 }
 0x79f   : > { %10171 = vmatpush3.bf16.xpose.msra.mxu0 %v5321_v26  ;;  %10208 = vmatprep.subr.bf16.mxu1 %v15574_v41  ;;  %vm15591_vm15 = vmmov %vm15537_vm0 }
 0x7a0   : > { %10887 = vmatprep.subr.msk.bf16.mxu0 %vm15576_vm10, %v15575_v20  ;;  %vm15584_vm10 = vmmov %vm15537_vm0 }
 0x7a2   : > { %10209 = vmatpush3.bf16.msra.mxu1 %v15574_v41 }
 0x7a5   : > { %9227 = vmatmul.mubr.msk.bf16.gmra.mrb[152].mxu1 %vm15577_vm11, %v13996_v55  ;;  %vm15585_vm11 = vmmov %vm15537_vm0 }
 0x7a6   : > { %5132 = vmatprep.mubr.bf16.mxu1 %v15534_v21  ;;  %v5330_v55 = vsel %vm15585_vm11, %v15582_v30, 0  ;;  %vm15597_vm11 = vmmov %vm15537_vm0 }
 0x7a7   : > { %10173 = vmatpush3.bf16.xpose.msra.mxu0 %v5324_v22 }
 0x7a8   : > { %10888 = vmatprep.subr.msk.bf16.mxu0 %vm15537_vm0, %v15579_v24 }
 0x7ad   : > { %9228 = vmatmul.mubr.msk.bf16.gmra.mrb[156].mxu1 %vm15580_vm13, %v13994_v63  ;;  %v15587_v63 = vld [vmem:[#allocation27_spill] sm:$0xff]  ;;  %vm15589_vm13 = vmmov %vm15537_vm0 }
 0x7ae   : > { %5142 = vmatprep.mubr.bf16.mxu1 %v15534_v21 }
 0x7af   : > { %10175 = vmatpush3.bf16.xpose.msra.mxu0 %v5327_v36 }
 0x7b0   : > { %10889 = vmatprep.subr.msk.bf16.mxu0 %vm15583_vm12, %v15582_v30  ;;  %vm15593_vm12 = vmmov %vm15537_vm0 }
 0x7b5   : > { %9229 = vmatmul.mubr.msk.bf16.gmra.mrb[160].mxu1 %vm15584_vm10, %v14000_v6  ;;  %v15594_v6 = vld [vmem:[#allocation36_spill] sm:$0xff]  ;;  %vm15595_vm10 = vmmov %vm15537_vm0 }
 0x7b6   : > { %5152 = vmatprep.mubr.bf16.mxu1 %v15534_v21 }
 0x7b7   : > { %10177 = vmatpush3.bf16.xpose.msra.mxu0 %v5330_v55 }
 0x7bd   : > { %9230 = vmatmul.mubr.msk.bf16.gmra.mrb[164].mxu1 %vm15586_vm9, %v13998_v2  ;;  %vm15599_vm9 = vmmov %vm15537_vm0 }
 0x7be   : > { %10179 = vmatmul.mubr.msk.bf16.vlgmr.msra.gmra.mrb[184].mxu0 %vm15537_vm0, %v15587_v63 }
 0x7bf   : > { %10182 = vmatprep.mubr.msk.bf16.mxu0 %vm15589_vm13, %v15588_v50 }
 0x7c6   : > { %10183 = vmatmul.mubr.msk.bf16.gmra.mrb[188].mxu0 %vm15591_vm15, %v15590_v40 }
 0x7c7   : > { %10186 = vmatprep.mubr.msk.bf16.mxu0 %vm15593_vm12, %v15592_v23 }
 0x7ce   : > { %10187 = vmatmul.mubr.msk.bf16.gmra.mrb[192].mxu0 %vm15595_vm10, %v15594_v6 }
 0x7cf   : > { %10190 = vmatprep.mubr.msk.bf16.mxu0 %vm15597_vm11, %v15596_v57 }
 0x7d6   : > { %10191 = vmatmul.mubr.msk.bf16.gmra.mrb[196].mxu0 %vm15599_vm9, %v15598_v25 }
 0x891   : > { %v10180_v2 = vpop.f32.mrb[184].mxu0 }
 0x892   : > { %v5431_v1 = vmul.f32 0.125, %v10180_v2  ;;  %v5366_v29 = vpop.f32.mrb[185].mxu0 }
 0x893   : > { %v10181_v35 = vpop.f32.mrb[186].mxu0  ;;  %v5429_v47 = vmul.f32 0.125, %v5366_v29 }
 0x894   : > { %v5369_v44 = vpop.f32.mrb[187].mxu0  ;;  %v14131_v34 = vsel %vm13540_vm1, %v5431_v1, -1e+30  ;;  %v5432_v38 = vmul.f32 0.125, %v10181_v35 }
 0x895   : > { %5465 = vmax.xlane.f32.xlu0 %v14131_v34  ;;  %v5430_v4 = vmul.f32 0.125, %v5369_v44  ;;  %v5445_v60 = vsel %vm13557_vm3, %v5429_v47, -1e+30 }
 0x896   : > { %v5448_v11 = vsel %vm13577_vm4, %v5432_v38, -1e+30 }
 0x897   : > { %v5446_v48 = vsel %vm13550_vm2, %v5430_v4, -1e+30  ;;  %v15609_v4 = vld [vmem:[#allocation76_spill] sm:$0xff] }
 0x898   : > { %vm15610_vm0 = vnez %v15609_v4 }
 0x899   : > { %5461 = vmax.xlane.f32.xlu0 %v5445_v60  ;;  %v10184_v62 = vpop.f32.mrb[188].mxu0 }
 0x89a   : > { %v5382_v53 = vpop.f32.mrb[189].mxu0  ;;  %v5435_v27 = vmul.f32 0.125, %v10184_v62 }
 0x89b   : > { %v5433_v43 = vmul.f32 0.125, %v5382_v53  ;;  %v10185_v56 = vpop.f32.mrb[190].mxu0 }
 0x89c   : > { %v5385_v19 = vpop.f32.mrb[191].mxu0  ;;  %v5436_v42 = vmul.f32 0.125, %v10185_v56  ;;  %v5451_v51 = vsel %vm13595_vm6, %v5435_v27, -1e+30 }
 0x89d   : > { %5463 = vmax.xlane.f32.xlu0 %v5446_v48  ;;  %v5449_v37 = vsel %vm13617_vm8, %v5433_v43, -1e+30  ;;  %v5434_v3 = vmul.f32 0.125, %v5385_v19  ;;  %v15611_v43 = vld [vmem:[#allocation78_spill] sm:$0xff]  ;;  %v15613_v19 = vld [vmem:[#allocation75_spill] sm:$0xff] }
 0x89e   : > { %5469 = vmax.xlane.f32.xlu1 %v5449_v37  ;;  %v14146_v59 = vsel %vm13584_vm5, %v5436_v42, -1e+30  ;;  %vm15612_vm13 = vnez %v15611_v43  ;;  %vm15614_vm15 = vnez %v15613_v19 }
 0x89f   : > { %v5450_v29 = vsel %vm13606_vm7, %v5434_v3, -1e+30  ;;  %v15617_v3 = vld [vmem:[#allocation82_spill] sm:$0xff] }
 0x8a0   : > { %vm15618_vm10 = vnez %v15617_v3 }
 0x8a1   : > { %5467 = vmax.xlane.f32.xlu0 %v5448_v11  ;;  %v10188_v7 = vpop.f32.mrb[192].mxu0 }
 0x8a2   : > { %v5398_v52 = vpop.f32.mrb[193].mxu0  ;;  %v5439_v55 = vmul.f32 0.125, %v10188_v7 }
 0x8a3   : > { %v10189_v8 = vpop.f32.mrb[194].mxu0  ;;  %v5437_v44 = vmul.f32 0.125, %v5398_v52  ;;  %v15615_v52 = vld [vmem:[#allocation77_spill] sm:$0xff] }
 0x8a4   : > { %v5401_v13 = vpop.f32.mrb[195].mxu0  ;;  %v14158_v62 = vsel %vm15610_vm0, %v5439_v55, -1e+30  ;;  %v5440_v53 = vmul.f32 0.125, %v10189_v8  ;;  %vm15616_vm12 = vnez %v15615_v52 }
 0x8a5   : > { %5473 = vmax.xlane.f32.xlu0 %v5451_v51  ;;  %v14163_v56 = vsel %vm15612_vm13, %v5437_v44, -1e+30  ;;  %v5438_v38 = vmul.f32 0.125, %v5401_v13 }
 0x8a6   : > { %v14168_v27 = vsel %vm15614_vm15, %v5440_v53, -1e+30 }
 0x8a7   : > { %v14173_v42 = vsel %vm15616_vm12, %v5438_v38, -1e+30 }
 0x8a9   : > { %5475 = vmax.xlane.f32.xlu0 %v14146_v59  ;;  %v10192_v45 = vpop.f32.mrb[196].mxu0 }
 0x8aa   : > { %v5443_v26 = vmul.f32 0.125, %v10192_v45  ;;  %v5414_v22 = vpop.f32.mrb[197].mxu0 }
 0x8ab   : > { %v10193_v36 = vpop.f32.mrb[198].mxu0  ;;  %v5441_v7 = vmul.f32 0.125, %v5414_v22  ;;  %v15621_v22 = vld [vmem:[#allocation79_spill] sm:$0xff] }
 0x8ac   : > { %v5417_v2 = vpop.f32.mrb[199].mxu0  ;;  %v14153_v47 = vsel %vm13683_vm14, %v5443_v26, -1e+30  ;;  %v5444_v13 = vmul.f32 0.125, %v10193_v36  ;;  %v15619_v26 = vld [vmem:[#allocation81_spill] sm:$0xff]  ;;  %vm15622_vm9 = vnez %v15621_v22 }
 0x8ad   : > { %5471 = vmax.xlane.f32.xlu0 %v5450_v29  ;;  %5489 = vmax.xlane.f32.xlu1 %v14153_v47  ;;  %v5442_v8 = vmul.f32 0.125, %v5417_v2  ;;  %v14178_v45 = vsel %vm15618_vm10, %v5441_v7, -1e+30  ;;  %vm15620_vm11 = vnez %v15619_v26  ;;  %vm15623_vm10 = vcmask 523264  }
 0x8ae   : > { %v14188_v44 = vsel %vm15622_vm9, %v5444_v13, -1e+30  ;;  %vm15624_vm14 = vmmov %vm15623_vm10 }
 0x8af   : > { %v14183_v55 = vsel %vm15620_vm11, %v5442_v8, -1e+30  ;;  %vm15625_vm13 = vmmov %vm15623_vm10 }
 0x8b0   : > { %vm15626_vm0 = vmmov %vm15623_vm10 }
 0x8b1   : > { %5481 = vmax.xlane.f32.xlu0 %v14158_v62  ;;  %vm15627_vm8 = vmmov %vm15626_vm0 }
 0x8b2   : > { %vm15628_vm6 = vmmov %vm15626_vm0 }
 0x8b3   : > { %vm15629_vm11 = vmmov %vm15626_vm0 }
 0x8b4   : > { %vm15648_vm9 = vmmov %vm15626_vm0 }
 0x8b5   : > { %5477 = vmax.xlane.f32.xlu0 %v14163_v56 }
 0x8b9   : > { %5483 = vmax.xlane.f32.xlu0 %v14168_v27 }
 0x8bd   : > { %5479 = vmax.xlane.f32.xlu0 %v14173_v42 }
 0x8c1   : > { %5485 = vmax.xlane.f32.xlu0 %v14178_v45 }
 0x8c5   : > { %5487 = vmax.xlane.f32.xlu0 %v14183_v55 }
 0x8c9   : > { %5491 = vmax.xlane.f32.xlu0 %v14188_v44 }
 0x922   : > { %v5466_v2 = vpop.xlane.xlu0 %5465 }
 0x923   : > { %v5495_v53 = vsub.f32 %v14131_v34, %v5466_v2 }
 0x925   : > { %v5513_v41 = vmul.f32 1.442695, %v5495_v53 }
 0x926   : > { %v5462_v38 = vpop.xlane.xlu0 %5461 }
 0x927   : > { %v5493_v7 = vsub.f32 %v5445_v60, %v5462_v38 }
 0x929   : > { %v5509_v10 = vmul.f32 1.442695, %v5493_v7 }
 0x92a   : > { %v5464_v36 = vpop.xlane.xlu0 %5463 }
 0x92b   : > { %11557 = vpow2.f32 %v5509_v10  ;;  %v5494_v18 = vsub.f32 %v5446_v48, %v5464_v36  ;;  %v5470_v8 = vpop.xlane.xlu1 %5469 }
 0x92c   : > { %v5497_v14 = vsub.f32 %v5449_v37, %v5470_v8  ;;  %11559 = vpow2.f32 %v5513_v41 }
 0x92d   : > { %v5511_v31 = vmul.f32 1.442695, %v5494_v18 }
 0x92e   : > { %v5517_v46 = vmul.f32 1.442695, %v5497_v14  ;;  %v5468_v54 = vpop.xlane.xlu0 %5467 }
 0x92f   : > { %11561 = vpow2.f32 %v5511_v31  ;;  %v5496_v13 = vsub.f32 %v5448_v11, %v5468_v54 }
 0x930   : > { %11563 = vpow2.f32 %v5517_v46 }
 0x931   : > { %v5515_v3 = vmul.f32 1.442695, %v5496_v13 }
 0x932   : > { %v5474_v35 = vpop.xlane.xlu0 %5473 }
 0x933   : > { %11565 = vpow2.f32 %v5515_v3  ;;  %v5499_v34 = vsub.f32 %v5451_v51, %v5474_v35 }
 0x935   : > { %v14192_v2 = vpop.eup %11557  ;;  %v5521_v60 = vmul.f32 1.442695, %v5499_v34 }
 0x936   : > { %v5476_v53 = vpop.xlane.xlu0 %5475  ;;  %5541 = vadd.xlane.f32.xlu1 %v14192_v2  ;;  %v14195_v10 = vpop.eup %11559 }
 0x937   : > { %11567 = vpow2.f32 %v5521_v60  ;;  %v5500_v54 = vsub.f32 %v14146_v59, %v5476_v53 }
 0x939   : > { %v14197_v18 = vpop.eup %11561  ;;  %v5523_v11 = vmul.f32 1.442695, %v5500_v54 }
 0x93a   : > { %v5472_v14 = vpop.xlane.xlu0 %5471  ;;  %5545 = vadd.xlane.f32.xlu1 %v14195_v10  ;;  %5543 = vadd.xlane.f32.xlu0 %v14197_v18  ;;  %v14202_v31 = vpop.eup %11563 }
 0x93b   : > { %v5498_v46 = vsub.f32 %v5450_v29, %v5472_v14  ;;  %v5490_v34 = vpop.xlane.xlu1 %5489 }
 0x93d   : > { %v14204_v41 = vpop.eup %11565  ;;  %v5519_v48 = vmul.f32 1.442695, %v5498_v46 }
 0x93e   : > { %v5482_v37 = vpop.xlane.xlu0 %5481  ;;  %5549 = vadd.xlane.f32.xlu1 %v14202_v31  ;;  %5547 = vadd.xlane.f32.xlu0 %v14204_v41 }
 0x93f   : > { %11569 = vpow2.f32 %v5519_v48  ;;  %v5503_v59 = vsub.f32 %v14158_v62, %v5482_v37 }
 0x940   : > { %11571 = vpow2.f32 %v5523_v11 }
 0x941   : > { %v14208_v51 = vpop.eup %11567  ;;  %v5529_v7 = vmul.f32 1.442695, %v5503_v59 }
 0x942   : > { %v5478_v35 = vpop.xlane.xlu0 %5477  ;;  %5553 = vadd.xlane.f32.xlu1 %v14208_v51 }
 0x943   : > { %v5501_v29 = vsub.f32 %v14163_v56, %v5478_v35  ;;  %v5507_v56 = vsub.f32 %v14153_v47, %v5490_v34  ;;  %v11334_v34 = vld [vmem:[#allocation12 + $0xe0] ss:$12 sps:$4 sm:$0xff]  }
 0x945   : > { %v5525_v3 = vmul.f32 1.442695, %v5501_v29  ;;  %v5537_v37 = vmul.f32 1.442695, %v5507_v56 }
 0x946   : > { %v5484_v38 = vpop.xlane.xlu0 %5483 }
 0x947   : > { %11573 = vpow2.f32 %v5525_v3  ;;  %v5504_v8 = vsub.f32 %v14168_v27, %v5484_v38 }
 0x948   : > { %11575 = vpow2.f32 %v5529_v7 }
 0x949   : > { %v14213_v36 = vpop.eup %11569  ;;  %v5531_v14 = vmul.f32 1.442695, %v5504_v8 }
 0x94a   : > { %v5480_v13 = vpop.xlane.xlu0 %5479  ;;  %5551 = vadd.xlane.f32.xlu0 %v14213_v36  ;;  %v14218_v53 = vpop.eup %11571 }
 0x94b   : > { %v5502_v60 = vsub.f32 %v14173_v42, %v5480_v13 }
 0x94d   : > { %v5527_v62 = vmul.f32 1.442695, %v5502_v60  ;;  %v11335_v60 = vld [vmem:[#allocation12 + $0xf8] ss:$12 sps:$4 sm:$0xff]  }
 0x94e   : > { %v5486_v54 = vpop.xlane.xlu0 %5485  ;;  %5555 = vadd.xlane.f32.xlu0 %v14218_v53 }
 0x94f   : > { %11577 = vpow2.f32 %v5527_v62  ;;  %v5505_v46 = vsub.f32 %v14178_v45, %v5486_v54  ;;  %v11336_v62 = vld [vmem:[#allocation12 + $0x110] ss:$12 sps:$4 sm:$0xff]  }
 0x950   : > { %11579 = vpow2.f32 %v5531_v14  ;;  %v11337_v14 = vld [vmem:[#allocation12 + $0xc0] ss:$12 sps:$4 sm:$0xff]  }
 0x951   : > { %v14223_v27 = vpop.eup %11573  ;;  %v5533_v48 = vmul.f32 1.442695, %v5505_v46  ;;  %v11342_v46 = vld [vmem:[#allocation12 + $0xdc] ss:$12 sps:$4 sm:$0xff]  }
 0x952   : > { %5557 = vadd.xlane.f32.xlu1 %v14223_v27  ;;  %v5488_v42 = vpop.xlane.xlu0 %5487  ;;  %v14227_v35 = vpop.eup %11575 }
 0x953   : > { %11581 = vpow2.f32 %v5533_v48  ;;  %v5506_v11 = vsub.f32 %v14183_v55, %v5488_v42 }
 0x954   : > { %11583 = vpow2.f32 %v5537_v37 }
 0x955   : > { %v5535_v47 = vmul.f32 1.442695, %v5506_v11  ;;  %v11343_v11 = vld [vmem:[#allocation12 + $0xf0] ss:$12 sps:$4 sm:$0xff]  }
 0x956   : > { %5561 = vadd.xlane.f32.xlu1 %v14227_v35  ;;  %v5492_v59 = vpop.xlane.xlu0 %5491 }
 0x957   : > { %11585 = vpow2.f32 %v5535_v47  ;;  %v5508_v45 = vsub.f32 %v14188_v44, %v5492_v59  ;;  %v11333_v44 = vld [vmem:[#allocation12 + $0xc8] ss:$12 sps:$4 sm:$0xff]  }
 0x958   : > { %10226 = vmatprep.subr.bf16.mxu0 %v11333_v44 }
 0x959   : > { %v14231_v29 = vpop.eup %11577  ;;  %v5539_v3 = vmul.f32 1.442695, %v5508_v45  ;;  %10227 = vmatpush3.bf16.msra.mxu0 %v11333_v44 }
 0x95a   : > { %5559 = vadd.xlane.f32.xlu0 %v14231_v29  ;;  %v14234_v38 = vpop.eup %11579  ;;  %10228 = vmatprep.subr.bf16.mxu0 %v11334_v34 }
 0x95b   : > { %11587 = vpow2.f32 %v5539_v3 }
 0x95d   : > { %v14236_v7 = vpop.eup %11581  ;;  %10229 = vmatpush3.bf16.msra.mxu0 %v11334_v34 }
 0x95e   : > { %5565 = vadd.xlane.f32.xlu1 %v14236_v7  ;;  %5563 = vadd.xlane.f32.xlu0 %v14234_v38  ;;  %v14240_v55 = vpop.eup %11583 }
 0x95f   : > { %10230 = vmatprep.subr.bf16.mxu0 %v11335_v60 }
 0x961   : > { %v14242_v8 = vpop.eup %11585  ;;  %10231 = vmatpush3.bf16.msra.mxu0 %v11335_v60 }
 0x962   : > { %5569 = vadd.xlane.f32.xlu1 %v14240_v55  ;;  %5567 = vadd.xlane.f32.xlu0 %v14242_v8 }
 0x963   : > { %10232 = vmatprep.subr.bf16.mxu0 %v11336_v62 }
 0x965   : > { %v14246_v13 = vpop.eup %11587  ;;  %10233 = vmatpush3.bf16.msra.mxu0 %v11336_v62 }
 0x966   : > { %5571 = vadd.xlane.f32.xlu0 %v14246_v13 }
 0x973   : > { %6112 = vrot.lane.b32.xlu1 %v13330_v58, %s12137_s23  ;;  %v11339_v58 = vld [vmem:[#allocation12 + $0xc4] ss:$12 sps:$4 sm:$0xff]  }
 0x974   : > { %5822 = vmatprep.subr.bf16.mxu1 %v11339_v58 }
 0x977   : > { %6116 = vrot.lane.b32.xlu1 %v13353_v61, %s12137_s23 }
 0x97b   : > { %6118 = vrot.lane.b32.xlu1 %v15561_v5, %s12137_s23 }
 0x97c   : > { %6114 = vrot.lane.b32.xlu0 %v13341_v33, %s12137_s23 }
 0x97f   : > { %6122 = vrot.lane.b32.xlu1 %v15575_v20, %s12137_s23 }
 0x980   : > { %6120 = vrot.lane.b32.xlu0 %v15568_v16, %s12137_s23 }
 0x983   : > { %6126 = vrot.lane.b32.xlu1 %v15582_v30, %s12137_s23 }
 0x984   : > { %6124 = vrot.lane.b32.xlu0 %v15579_v24, %s12137_s23 }
 0x987   : > { %6090 = vrot.lane.b32.xlu1 %v15587_v63, %s12137_s23 }
 0x988   : > { %6088 = vrot.lane.b32.xlu0 %v15569_v12, %s12137_s23 }
 0x98b   : > { %6094 = vrot.lane.b32.xlu1 %v15590_v40, %s12137_s23 }
 0x98c   : > { %6092 = vrot.lane.b32.xlu0 %v15588_v50, %s12137_s23 }
 0x98f   : > { %6098 = vrot.lane.b32.xlu1 %v15594_v6, %s12137_s23 }
 0x990   : > { %6096 = vrot.lane.b32.xlu0 %v15592_v23, %s12137_s23 }
 0x993   : > { %6102 = vrot.lane.b32.xlu1 %v15598_v25, %s12137_s23 }
 0x994   : > { %6100 = vrot.lane.b32.xlu0 %v15596_v57, %s12137_s23 }
 0x9c3   : > { %v5542_v33 = vpop.xlane.xlu1 %5541 }
 0x9c4   : > { %11589 = vrcp.f32 %v5542_v33 }
 0x9c7   : > { %v5544_v61 = vpop.xlane.xlu0 %5543  ;;  %v5546_v5 = vpop.xlane.xlu1 %5545 }
 0x9c8   : > { %11591 = vrcp.f32 %v5544_v61 }
 0x9c9   : > { %11593 = vrcp.f32 %v5546_v5 }
 0x9cb   : > { %v5548_v16 = vpop.xlane.xlu0 %5547  ;;  %v5550_v20 = vpop.xlane.xlu1 %5549 }
 0x9cc   : > { %11595 = vrcp.f32 %v5548_v16 }
 0x9cd   : > { %11597 = vrcp.f32 %v5550_v20 }
 0x9ce   : > { %v11590_v12 = vpop.eup %11589 }
 0x9cf   : > { %v5574_v30 = vmul.f32 %v11590_v12, %v14192_v2  ;;  %v5554_v6 = vpop.xlane.xlu1 %5553  ;;  %v11340_v2 = vld [vmem:[#allocation12 + $0xd8] ss:$12 sps:$4 sm:$0xff]  }
 0x9d2   : > { %v11592_v24 = vpop.eup %11591 }
 0x9d3   : > { %v5576_v63 = vmul.f32 %v11592_v24, %v14197_v18  ;;  %v11594_v50 = vpop.eup %11593  ;;  %v11345_v18 = vld [vmem:[#allocation12 + $0xf4] ss:$12 sps:$4 sm:$0xff]  }
 0x9d4   : > { %v5578_v25 = vmul.f32 %v11594_v50, %v14195_v10 }
 0x9d5   : > { %v5605_v40 = vpack.c.bf16 %v5576_v63, %v5574_v30 }
 0x9d6   : > { %v11596_v23 = vpop.eup %11595 }
 0x9d7   : > { %v5552_v57 = vpop.xlane.xlu0 %5551  ;;  %v5580_v56 = vmul.f32 %v11596_v23, %v14204_v41  ;;  %10210 = vmatprep.mubr.bf16.mxu1 %v5605_v40  ;;  %v11598_v37 = vpop.eup %11597 }
 0x9d8   : > { %11599 = vrcp.f32 %v5552_v57  ;;  %v5582_v41 = vmul.f32 %v11598_v37, %v14202_v31 }
 0x9d9   : > { %11601 = vrcp.f32 %v5554_v6  ;;  %v5606_v54 = vpack.c.bf16 %v5580_v56, %v5578_v25 }
 0x9db   : > { %v5556_v48 = vpop.xlane.xlu0 %5555  ;;  %10211 = vmatmul.mubr.bf16.vlgmr.msra.gmra.mrb[168].mxu1 %v5606_v54 }
 0x9dc   : > { %11603 = vrcp.f32 %v5556_v48  ;;  %5823 = vmatpush1.bf16.msra.mxu1 %v11337_v14 }
 0x9dd   : > { %5824 = vmatprep.subr.bf16.mxu1 %v11342_v46 }
 0x9df   : > { %v5558_v42 = vpop.xlane.xlu1 %5557 }
 0x9e0   : > { %5825 = vmatpush1.bf16.msra.mxu1 %v11340_v2  ;;  %11605 = vrcp.f32 %v5558_v42 }
 0x9e1   : > { %5826 = vmatprep.subr.bf16.mxu1 %v11345_v18 }
 0x9e2   : > { %v11600_v10 = vpop.eup %11599 }
 0x9e3   : > { %v5584_v47 = vmul.f32 %v11600_v10, %v14213_v36  ;;  %v11602_v59 = vpop.eup %11601  ;;  %v5562_v44 = vpop.xlane.xlu1 %5561 }
 0x9e4   : > { %5827 = vmatpush1.bf16.msra.mxu1 %v11343_v11  ;;  %v5586_v60 = vmul.f32 %v11602_v59, %v14208_v51 }
 0x9e5   : > { %v5607_v45 = vpack.c.bf16 %v5584_v47, %v5582_v41 }
 0x9e6   : > { %v11604_v3 = vpop.eup %11603 }
 0x9e7   : > { %v5560_v34 = vpop.xlane.xlu0 %5559  ;;  %10214 = vmatprep.mubr.bf16.mxu1 %v5607_v45  ;;  %v5588_v62 = vmul.f32 %v11604_v3, %v14218_v53 }
 0x9e8   : > { %11607 = vrcp.f32 %v5560_v34 }
 0x9e9   : > { %v5608_v58 = vpack.c.bf16 %v5588_v62, %v5586_v60  ;;  %11609 = vrcp.f32 %v5562_v44 }
 0x9ea   : > { %v11606_v5 = vpop.eup %11605 }
 0x9eb   : > { %v5566_v33 = vpop.xlane.xlu1 %5565  ;;  %v5564_v61 = vpop.xlane.xlu0 %5563  ;;  %10215 = vmatmul.mubr.bf16.gmra.mrb[172].mxu1 %v5608_v58  ;;  %v5590_v51 = vmul.f32 %v11606_v5, %v14223_v27 }
 0x9ec   : > { %11611 = vrcp.f32 %v5564_v61 }
 0x9ed   : > { %11613 = vrcp.f32 %v5566_v33 }
 0x9ef   : > { %v5570_v31 = vpop.xlane.xlu1 %5569  ;;  %v5568_v36 = vpop.xlane.xlu0 %5567 }
 0x9f0   : > { %11615 = vrcp.f32 %v5568_v36 }
 0x9f1   : > { %11617 = vrcp.f32 %v5570_v31 }
 0x9f2   : > { %v11608_v16 = vpop.eup %11607 }
 0x9f3   : > { %v6113_v12 = vpop.permute.xlu1 %6112  ;;  %v5572_v20 = vpop.xlane.xlu0 %5571  ;;  %v5592_v53 = vmul.f32 %v11608_v16, %v14231_v29 }
 0x9f4   : > { %11619 = vrcp.f32 %v5572_v20  ;;  %10890 = vmatprep.subr.msk.bf16.mxu0 %vm15623_vm10, %v6113_v12  ;;  %v11610_v24 = vpop.eup %11609 }
 0x9f5   : > { %v5609_v30 = vpack.c.bf16 %v5592_v53, %v5590_v51  ;;  %v5594_v50 = vmul.f32 %v11610_v24, %v14227_v35  ;;  %v11346_v35 = vld [vmem:[#allocation12 + $0x108] ss:$12 sps:$4 sm:$0xff]  }
 0x9f6   : > { %v11612_v63 = vpop.eup %11611 }
 0x9f7   : > { %10218 = vmatprep.mubr.bf16.mxu1 %v5609_v30  ;;  %v5596_v40 = vmul.f32 %v11612_v63, %v14234_v38  ;;  %v11614_v23 = vpop.eup %11613  ;;  %v11348_v38 = vld [vmem:[#allocation12 + $0x10c] ss:$12 sps:$4 sm:$0xff]   ;;  %v6117_v41 = vpop.permute.xlu1 %6116 }
 0x9f8   : > { %v5598_v27 = vmul.f32 %v11614_v23, %v14236_v7  ;;  %5828 = vmatprep.subr.bf16.mxu1 %v11348_v38 }
 0x9f9   : > { %v5610_v6 = vpack.c.bf16 %v5596_v40, %v5594_v50  ;;  %5829 = vmatpush1.bf16.msra.mxu1 %v11346_v35 }
 0x9fa   : > { %v11616_v57 = vpop.eup %11615 }
 0x9fb   : > { %v11618_v25 = vpop.eup %11617  ;;  %10219 = vmatmul.mubr.bf16.gmra.mrb[176].mxu1 %v5610_v6  ;;  %v5600_v29 = vmul.f32 %v11616_v57, %v14242_v8  ;;  %v6119_v60 = vpop.permute.xlu1 %6118 }
 0x9fc   : > { %v5602_v54 = vmul.f32 %v11618_v25, %v14240_v55  ;;  %v6153_v55 = vsel %vm15626_vm0, %v6113_v12, 0 }
 0x9fd   : > { %v5611_v14 = vpack.c.bf16 %v5600_v29, %v5598_v27  ;;  %v11349_v27 = vld [vmem:[#allocation12 + $0x128] ss:$12 sps:$4 sm:$0xff]  }
 0x9fe   : > { %v11620_v56 = vpop.eup %11619 }
 0x9ff   : > { %v5604_v46 = vmul.f32 %v11620_v56, %v14246_v13  ;;  %10222 = vmatprep.mubr.bf16.mxu1 %v5611_v14  ;;  %v6115_v13 = vpop.permute.xlu0 %6114  ;;  %v6123_v20 = vpop.permute.xlu1 %6122  ;;  %v11350_v56 = vld [vmem:[#allocation12 + $0x140] ss:$12 sps:$4 sm:$0xff]  }
 0xa00   : > { %v6156_v11 = vsel %vm15629_vm11, %v6115_v13, 0  ;;  %vm15634_vm11 = vmmov %vm15626_vm0 }
 0xa01   : > { %v5612_v48 = vpack.c.bf16 %v5604_v46, %v5602_v54  ;;  %v11351_v46 = vld [vmem:[#allocation12 + $0x158] ss:$12 sps:$4 sm:$0xff]  }
 0xa03   : > { %10223 = vmatmul.mubr.bf16.gmra.mrb[180].mxu1 %v5612_v48  ;;  %v6121_v58 = vpop.permute.xlu0 %6120  ;;  %v6127_v25 = vpop.permute.xlu1 %6126  ;;  %v11352_v48 = vld [vmem:[#allocation12 + $0x170] ss:$12 sps:$4 sm:$0xff]  }
 0xa04   : > { %5854 = vmatprep.mubr.bf16.mxu1 %v15534_v21 }
 0xa07   : > { %v6125_v53 = vpop.permute.xlu0 %6124  ;;  %v6091_v14 = vpop.permute.xlu1 %6090 }
 0xa08   : > { %v6171_v57 = vsel %vm15648_vm9, %v6125_v53, 0  ;;  %vm15653_vm9 = vmmov %vm15626_vm0 }
 0xa0b   : > { %v6089_v23 = vpop.permute.xlu0 %6088  ;;  %v6095_v35 = vpop.permute.xlu1 %6094 }
 0xa0f   : > { %v6093_v54 = vpop.permute.xlu0 %6092 }
 0xa13   : > { %v6097_v38 = vpop.permute.xlu0 %6096 }
 0xaae   : > { %v10212_v2 = vpop.f32.mrb[168].mxu1 }
 0xaaf   : > { %v5647_v18 = vpop.f32.mrb[169].mxu1 }
 0xab0   : > { %v10213_v7 = vpop.f32.mrb[170].mxu1 }
 0xab1   : > { %v5711_v37 = vpack.c.bf16 %v10213_v7, %v10212_v2  ;;  %v5650_v8 = vpop.f32.mrb[171].mxu1  ;;  %v15655_v2 = vld [vmem:[#allocation40_spill] sm:$0xff]  ;;  %v6101_v7 = vpop.permute.xlu0 %6100 }
 0xab2   : > { %v5710_v42 = vpack.c.bf16 %v5650_v8, %v5647_v18  ;;  %v6099_v18 = vpop.permute.xlu1 %6098 }
 0xab4   : > { %9259 = vmatmul.mubr.msk.bf16.vlgmr.msra.gmra.mrb[136].mxu1 %vm15623_vm10, %v5710_v42  ;;  %10234 = vmatprep.mubr.msk.bf16.mxu0 %vm15624_vm14, %v5710_v42  ;;  %vm15630_vm14 = vmmov %vm15626_vm0 }
 0xab5   : > { %10235 = vmatmul.mubr.msk.bf16.vlgmr.msra.gmra.mrb[168].mxu0 %vm15625_vm13, %v5711_v37  ;;  %5864 = vmatprep.mubr.bf16.mxu1 %v15534_v21  ;;  %vm15631_vm13 = vmmov %vm15626_vm0 }
 0xab6   : > { %10251 = vmatpush3.bf16.xpose.msra.mxu0 %v6153_v55  ;;  %vm15635_vm10 = vmmov %vm15626_vm0 }
 0xab7   : > { %10891 = vmatprep.subr.msk.bf16.mxu0 %vm15627_vm8, %v6115_v13  ;;  %vm15632_vm8 = vmmov %vm15626_vm0 }
 0xabc   : > { %9260 = vmatmul.mubr.msk.bf16.gmra.mrb[140].mxu1 %vm15628_vm6, %v5711_v37  ;;  %vm15633_vm6 = vmmov %vm15626_vm0  ;;  %v6103_v37 = vpop.permute.xlu1 %6102 }
 0xabd   : > { %5874 = vmatprep.mubr.bf16.mxu1 %v15534_v21  ;;  %v6159_v34 = vsel %vm15633_vm6, %v6117_v41, 0  ;;  %vm15639_vm6 = vmmov %vm15626_vm0 }
 0xabe   : > { %v10216_v10 = vpop.f32.mrb[172].mxu1  ;;  %10253 = vmatpush3.bf16.xpose.msra.mxu0 %v6156_v11 }
 0xabf   : > { %v5663_v47 = vpop.f32.mrb[173].mxu1  ;;  %10892 = vmatprep.subr.msk.bf16.mxu0 %vm15630_vm14, %v6117_v41  ;;  %vm15636_vm14 = vmmov %vm15626_vm0 }
 0xac0   : > { %v10217_v59 = vpop.f32.mrb[174].mxu1  ;;  %v6162_v62 = vsel %vm15636_vm14, %v6119_v60, 0  ;;  %vm15642_vm14 = vmmov %vm15626_vm0 }
 0xac1   : > { %v5713_v45 = vpack.c.bf16 %v10217_v59, %v10216_v10  ;;  %v5666_v3 = vpop.f32.mrb[175].mxu1 }
 0xac2   : > { %v5712_v44 = vpack.c.bf16 %v5666_v3, %v5663_v47 }
 0xac4   : > { %10238 = vmatprep.mubr.msk.bf16.mxu0 %vm15626_vm0, %v5712_v44  ;;  %9261 = vmatmul.mubr.msk.bf16.gmra.mrb[144].mxu1 %vm15631_vm13, %v5712_v44  ;;  %vm15637_vm13 = vmmov %vm15626_vm0 }
 0xac5   : > { %10239 = vmatmul.mubr.msk.bf16.gmra.mrb[172].mxu0 %vm15632_vm8, %v5713_v45  ;;  %5884 = vmatprep.mubr.bf16.mxu1 %v15534_v21  ;;  %vm15638_vm8 = vmmov %vm15626_vm0 }
 0xac6   : > { %10255 = vmatpush3.bf16.xpose.msra.mxu0 %v6159_v34 }
 0xac7   : > { %10893 = vmatprep.subr.msk.bf16.mxu0 %vm15634_vm11, %v6119_v60  ;;  %vm15640_vm11 = vmmov %vm15626_vm0 }
 0xac8   : > { %v6165_v12 = vsel %vm15640_vm11, %v6121_v58, 0  ;;  %vm15646_vm11 = vmmov %vm15626_vm0 }
 0xacc   : > { %9262 = vmatmul.mubr.msk.bf16.gmra.mrb[148].mxu1 %vm15635_vm10, %v5713_v45  ;;  %vm15641_vm10 = vmmov %vm15626_vm0 }
 0xacd   : > { %5894 = vmatprep.mubr.bf16.mxu1 %v15534_v21 }
 0xace   : > { %10257 = vmatpush3.bf16.xpose.msra.mxu0 %v6162_v62  ;;  %v10220_v33 = vpop.f32.mrb[176].mxu1 }
 0xacf   : > { %10894 = vmatprep.subr.msk.bf16.mxu0 %vm15626_vm0, %v6121_v58  ;;  %v5679_v61 = vpop.f32.mrb[177].mxu1 }
 0xad0   : > { %v10221_v31 = vpop.f32.mrb[178].mxu1 }
 0xad1   : > { %v5715_v36 = vpack.c.bf16 %v10221_v31, %v10220_v33  ;;  %v5682_v5 = vpop.f32.mrb[179].mxu1 }
 0xad2   : > { %v5714_v16 = vpack.c.bf16 %v5682_v5, %v5679_v61 }
 0xad4   : > { %9263 = vmatmul.mubr.msk.bf16.gmra.mrb[152].mxu1 %vm15637_vm13, %v5714_v16  ;;  %10242 = vmatprep.mubr.msk.bf16.mxu0 %vm15638_vm8, %v5714_v16  ;;  %vm15643_vm13 = vmmov %vm15626_vm0 }
 0xad5   : > { %10243 = vmatmul.mubr.msk.bf16.gmra.mrb[176].mxu0 %vm15639_vm6, %v5715_v36  ;;  %5904 = vmatprep.mubr.bf16.mxu1 %v15534_v21  ;;  %vm15644_vm8 = vmmov %vm15626_vm0 }
 0xad6   : > { %10259 = vmatpush3.bf16.xpose.msra.mxu0 %v6165_v12  ;;  %v10224_v51 = vpop.f32.mrb[180].mxu1  ;;  %v6168_v6 = vsel %vm15644_vm8, %v6123_v20, 0  ;;  %vm15645_vm6 = vmmov %vm15626_vm0 }
 0xad7   : > { %10895 = vmatprep.subr.msk.bf16.mxu0 %vm15641_vm10, %v6123_v20  ;;  %v5695_v24 = vpop.f32.mrb[181].mxu1  ;;  %vm15647_vm10 = vmmov %vm15626_vm0 }
 0xad8   : > { %v10225_v30 = vpop.f32.mrb[182].mxu1  ;;  %vm15651_vm8 = vmmov %vm15626_vm0 }
 0xad9   : > { %v5717_v63 = vpack.c.bf16 %v10225_v30, %v10224_v51  ;;  %v5698_v50 = vpop.f32.mrb[183].mxu1 }
 0xada   : > { %v5716_v40 = vpack.c.bf16 %v5698_v50, %v5695_v24 }
 0xadc   : > { %9264 = vmatmul.mubr.msk.bf16.gmra.mrb[156].mxu1 %vm15642_vm14, %v5715_v36  ;;  %10246 = vmatprep.mubr.msk.bf16.mxu0 %vm15626_vm0, %v5716_v40  ;;  %vm15649_vm14 = vmmov %vm15626_vm0 }
 0xadd   : > { %10247 = vmatmul.mubr.msk.bf16.gmra.mrb[180].mxu0 %vm15643_vm13, %v5717_v63  ;;  %5914 = vmatprep.mubr.bf16.mxu1 %v15534_v21  ;;  %vm15650_vm13 = vmmov %vm15626_vm0 }
 0xade   : > { %10261 = vmatpush3.bf16.xpose.msra.mxu0 %v6168_v6  ;;  %10266 = vmatprep.mubr.msk.bf16.mxu0 %vm15645_vm6, %v6089_v23  ;;  %v6174_v29 = vsel %vm15650_vm13, %v6127_v25, 0  ;;  %vm15652_vm6 = vmmov %vm15626_vm0 }
 0xadf   : > { %10896 = vmatprep.subr.msk.bf16.mxu0 %vm15646_vm11, %v6125_v53  ;;  %vm15654_vm11 = vmmov %vm15626_vm0 }
 0xae0   : > { %vm15658_vm13 = vmmov %vm15626_vm0 }
 0xae4   : > { %9265 = vmatmul.mubr.msk.bf16.gmra.mrb[160].mxu1 %vm15647_vm10, %v5716_v40  ;;  %vm15656_vm10 = vmmov %vm15626_vm0 }
 0xae5   : > { %5924 = vmatprep.mubr.bf16.mxu1 %v15534_v21 }
 0xae6   : > { %10263 = vmatpush3.bf16.xpose.msra.mxu0 %v6171_v57 }
 0xae7   : > { %10897 = vmatprep.subr.msk.bf16.mxu0 %vm15649_vm14, %v6127_v25  ;;  %vm15657_vm14 = vmmov %vm15626_vm0 }
 0xaec   : > { %9266 = vmatmul.mubr.msk.bf16.gmra.mrb[164].mxu1 %vm15626_vm0, %v5717_v63 }
 0xaee   : > { %10265 = vmatpush3.bf16.xpose.msra.mxu0 %v6174_v29 }
 0xaef   : > { %10314 = vmatprep.subr.bf16.mxu0 %v11349_v27 }
 0xaf5   : > { %10267 = vmatmul.mubr.msk.bf16.vlgmr.msra.gmra.mrb[200].mxu0 %vm15651_vm8, %v6091_v14  ;;  %vm15659_vm8 = vnez %v15621_v22 }
 0xaf6   : > { %10270 = vmatprep.mubr.msk.bf16.mxu0 %vm15652_vm6, %v6093_v54  ;;  %10315 = vmatpush3.bf16.msra.mxu0 %v11349_v27  ;;  %vm15660_vm6 = vnez %v15619_v26 }
 0xaf7   : > { %10316 = vmatprep.subr.bf16.mxu0 %v11350_v56 }
 0xafa   : > { %10317 = vmatpush3.bf16.msra.mxu0 %v11350_v56 }
 0xafb   : > { %10318 = vmatprep.subr.bf16.mxu0 %v11351_v46 }
 0xafd   : > { %10271 = vmatmul.mubr.msk.bf16.gmra.mrb[204].mxu0 %vm15653_vm9, %v6095_v35  ;;  %vm15661_vm9 = vnez %v15605_v15 }
 0xafe   : > { %10274 = vmatprep.mubr.msk.bf16.mxu0 %vm15654_vm11, %v6097_v38  ;;  %10319 = vmatpush3.bf16.msra.mxu0 %v11351_v46  ;;  %vm15662_vm11 = vnez %v15603_v32 }
 0xaff   : > { %10320 = vmatprep.subr.bf16.mxu0 %v11352_v48 }
 0xb02   : > { %10321 = vmatpush3.bf16.msra.mxu0 %v11352_v48 }
 0xb03   : > { %10898 = vmatprep.subr.msk.bf16.mxu0 %vm15656_vm10, %v15655_v2  ;;  %vm15663_vm10 = vnez %v15609_v4 }
 0xb05   : > { %10275 = vmatmul.mubr.msk.bf16.gmra.mrb[208].mxu0 %vm15657_vm14, %v6099_v18  ;;  %vm15664_vm14 = vnez %v15611_v43 }
 0xb06   : > { %10278 = vmatprep.mubr.msk.bf16.mxu0 %vm15626_vm0, %v6101_v7  ;;  %v15665_v7 = vld [vmem:[#allocation80_spill] sm:$0xff] }
 0xb07   : > { %vm15666_vm0 = vnez %v15665_v7 }
 0xb0d   : > { %10279 = vmatmul.mubr.msk.bf16.gmra.mrb[212].mxu0 %vm15658_vm13, %v6103_v37 }
 0xbc8   : > { %v10268_v8 = vpop.f32.mrb[200].mxu0 }
 0xbc9   : > { %v6275_v42 = vmul.f32 0.125, %v10268_v8  ;;  %v6210_v55 = vpop.f32.mrb[201].mxu0  ;;  %v15667_v8 = vld [vmem:[#allocation82_spill] sm:$0xff] }
 0xbca   : > { %v10269_v13 = vpop.f32.mrb[202].mxu0  ;;  %v6273_v11 = vmul.f32 0.125, %v6210_v55  ;;  %vm15668_vm13 = vnez %v15667_v8  ;;  %v15669_v55 = vld [vmem:[#allocation60_spill] sm:$0xff] }
 0xbcb   : > { %v6213_v10 = vpop.f32.mrb[203].mxu0  ;;  %v14349_v41 = vsel %vm13540_vm1, %v6275_v42, -1e+30  ;;  %v6276_v45 = vmul.f32 0.125, %v10269_v13  ;;  %v15670_v13 = vld [vmem:[#allocation62_spill] sm:$0xff] }
 0xbcc   : > { %v6274_v47 = vmul.f32 0.125, %v6213_v10  ;;  %6309 = vmax.xlane.f32.xlu0 %v14349_v41  ;;  %v14359_v3 = vsel %vm13557_vm3, %v6273_v11, -1e+30  ;;  %v15671_v11 = vld [vmem:[#allocation63_spill] sm:$0xff]  ;;  %v15672_v10 = vld [vmem:[#allocation64_spill] sm:$0xff] }
 0xbcd   : > { %v14364_v33 = vsel %vm13577_vm4, %v6276_v45, -1e+30  ;;  %v15674_v45 = vld [vmem:[#allocation66_spill] sm:$0xff] }
 0xbce   : > { %v14354_v59 = vsel %vm13550_vm2, %v6274_v47, -1e+30  ;;  %v15673_v47 = vld [vmem:[#allocation65_spill] sm:$0xff] }
 0xbcf   : > { %6307 = vmax.xlane.f32.xlu1 %v14354_v59 }
 0xbd0   : > { %6305 = vmax.xlane.f32.xlu0 %v14359_v3  ;;  %v10272_v44 = vpop.f32.mrb[204].mxu0 }
 0xbd1   : > { %v6226_v34 = vpop.f32.mrb[205].mxu0  ;;  %v6279_v27 = vmul.f32 0.125, %v10272_v44 }
 0xbd2   : > { %v10273_v60 = vpop.f32.mrb[206].mxu0  ;;  %v6277_v29 = vmul.f32 0.125, %v6226_v34 }
 0xbd3   : > { %v6280_v62 = vmul.f32 0.125, %v10273_v60  ;;  %v6229_v58 = vpop.f32.mrb[207].mxu0  ;;  %v14401_v56 = vsel %vm15661_vm9, %v6279_v27, -1e+30 }
 0xbd4   : > { %6311 = vmax.xlane.f32.xlu0 %v14364_v33  ;;  %v6278_v61 = vmul.f32 0.125, %v6229_v58  ;;  %v6293_v54 = vsel %vm15662_vm11, %v6277_v29, -1e+30 }
 0xbd5   : > { %v14369_v31 = vsel %vm13584_vm5, %v6280_v62, -1e+30 }
 0xbd6   : > { %v14374_v51 = vsel %vm13606_vm7, %v6278_v61, -1e+30 }
 0xbd8   : > { %6319 = vmax.xlane.f32.xlu0 %v14369_v31  ;;  %v10276_v36 = vpop.f32.mrb[208].mxu0 }
 0xbd9   : > { %v6242_v5 = vpop.f32.mrb[209].mxu0  ;;  %v6283_v14 = vmul.f32 0.125, %v10276_v36 }
 0xbda   : > { %v10277_v16 = vpop.f32.mrb[210].mxu0  ;;  %v6281_v46 = vmul.f32 0.125, %v6242_v5 }
 0xbdb   : > { %v6284_v12 = vmul.f32 0.125, %v10277_v16  ;;  %v6245_v20 = vpop.f32.mrb[211].mxu0  ;;  %v14408_v48 = vsel %vm15663_vm10, %v6283_v14, -1e+30 }
 0xbdc   : > { %6315 = vmax.xlane.f32.xlu0 %v14374_v51  ;;  %v6282_v53 = vmul.f32 0.125, %v6245_v20  ;;  %v6297_v38 = vsel %vm15664_vm14, %v6281_v46, -1e+30 }
 0xbdd   : > { %v14379_v24 = vsel %vm15614_vm15, %v6284_v12, -1e+30 }
 0xbde   : > { %v14386_v6 = vsel %vm15616_vm12, %v6282_v53, -1e+30 }
 0xbe0   : > { %6465 = vrot.lane.b32.xlu1 %v13464_v39, %s12137_s23  ;;  %6327 = vmax.xlane.f32.xlu0 %v14379_v24  ;;  %v10280_v30 = vpop.f32.mrb[212].mxu0 }
 0xbe1   : > { %v6258_v63 = vpop.f32.mrb[213].mxu0  ;;  %v6287_v35 = vmul.f32 0.125, %v10280_v30 }
 0xbe2   : > { %v10281_v50 = vpop.f32.mrb[214].mxu0  ;;  %v6285_v18 = vmul.f32 0.125, %v6258_v63 }
 0xbe3   : > { %v6288_v40 = vmul.f32 0.125, %v10281_v50  ;;  %v6261_v23 = vpop.f32.mrb[215].mxu0  ;;  %v14415_v37 = vsel %vm15666_vm0, %v6287_v35, -1e+30 }
 0xbe4   : > { %6323 = vmax.xlane.f32.xlu0 %v14386_v6  ;;  %v6286_v57 = vmul.f32 0.125, %v6261_v23  ;;  %v14420_v42 = vsel %vm15668_vm13, %v6285_v18, -1e+30 }
 0xbe5   : > { %v14391_v25 = vsel %vm15659_vm8, %v6288_v40, -1e+30  ;;  %vm15677_vm8 = vcmask 523264  }
 0xbe6   : > { %v14396_v39 = vsel %vm15660_vm6, %v6286_v57, -1e+30  ;;  %vm15678_vm0 = vmmov %vm15677_vm8 }
 0xbe7   : > { %vm15679_vm6 = vmmov %vm15678_vm0 }
 0xbe8   : > { %6335 = vmax.xlane.f32.xlu0 %v14391_v25  ;;  %vm15680_vm13 = vmmov %vm15678_vm0 }
 0xbe9   : > { %vm15683_vm15 = vmmov %vm15678_vm0 }
 0xbea   : > { %vm15706_vm10 = vmmov %vm15678_vm0 }
 0xbeb   : > { %vm15721_vm12 = vmmov %vm15678_vm0 }
 0xbec   : > { %6331 = vmax.xlane.f32.xlu0 %v14396_v39 }
 0xc04   : > { %6317 = vmax.xlane.f32.xlu1 %v14401_v56 }
 0xc08   : > { %6313 = vmax.xlane.f32.xlu1 %v6293_v54 }
 0xc0c   : > { %6325 = vmax.xlane.f32.xlu1 %v14408_v48 }
 0xc10   : > { %6321 = vmax.xlane.f32.xlu1 %v6297_v38 }
 0xc14   : > { %6333 = vmax.xlane.f32.xlu1 %v14415_v37 }
 0xc18   : > { %6329 = vmax.xlane.f32.xlu1 %v14420_v42 }
 0xc29   : > { %6467 = vrot.lane.b32.xlu1 %v15669_v55, %s12137_s23 }
 0xc2d   : > { %6471 = vrot.lane.b32.xlu1 %v15670_v13, %s12137_s23 }
 0xc31   : > { %6473 = vrot.lane.b32.xlu1 %v15671_v11, %s12137_s23 }
 0xc35   : > { %6475 = vrot.lane.b32.xlu1 %v15672_v10, %s12137_s23 }
 0xc39   : > { %6477 = vrot.lane.b32.xlu1 %v15673_v47, %s12137_s23 }
 0xc3d   : > { %6479 = vrot.lane.b32.xlu1 %v15674_v45, %s12137_s23 }
 0xc59   : > { %v6310_v44 = vpop.xlane.xlu0 %6309 }
 0xc5a   : > { %v6339_v34 = vsub.f32 %v14349_v41, %v6310_v44 }
 0xc5c   : > { %v6357_v60 = vmul.f32 1.442695, %v6339_v34  ;;  %v6308_v62 = vpop.xlane.xlu1 %6307 }
 0xc5d   : > { %v6306_v58 = vpop.xlane.xlu0 %6305  ;;  %v6338_v12 = vsub.f32 %v14354_v59, %v6308_v62 }
 0xc5e   : > { %11621 = vpow2.f32 %v6357_v60  ;;  %v6337_v61 = vsub.f32 %v14359_v3, %v6306_v58 }
 0xc5f   : > { %v6355_v63 = vmul.f32 1.442695, %v6338_v12 }
 0xc60   : > { %v6353_v36 = vmul.f32 1.442695, %v6337_v61  ;;  %v6466_v5 = vpop.permute.xlu1 %6465 }
 0xc61   : > { %v6312_v16 = vpop.xlane.xlu0 %6311  ;;  %10282 = vmatprep.subr.bf16.mxu1 %v6466_v5 }
 0xc62   : > { %11623 = vpow2.f32 %v6353_v36  ;;  %v6340_v20 = vsub.f32 %v14364_v33, %v6312_v16  ;;  %10283 = vmatpush3.bf16.msra.mxu1 %v6466_v5 }
 0xc64   : > { %v6359_v53 = vmul.f32 1.442695, %v6340_v20 }
 0xc65   : > { %v6320_v30 = vpop.xlane.xlu0 %6319 }
 0xc66   : > { %11625 = vpow2.f32 %v6359_v53  ;;  %v6344_v45 = vsub.f32 %v14369_v31, %v6320_v30 }
 0xc67   : > { %11627 = vpow2.f32 %v6355_v63 }
 0xc68   : > { %v14439_v41 = vpop.eup %11621  ;;  %v6367_v61 = vmul.f32 1.442695, %v6344_v45 }
 0xc69   : > { %v6316_v50 = vpop.xlane.xlu0 %6315  ;;  %6389 = vadd.xlane.f32.xlu0 %v14439_v41 }
 0xc6a   : > { %v6342_v3 = vsub.f32 %v14374_v51, %v6316_v50  ;;  %v15675_v51 = vld [vmem:[#allocation61_spill] sm:$0xff] }
 0xc6c   : > { %v14443_v40 = vpop.eup %11623  ;;  %v6363_v23 = vmul.f32 1.442695, %v6342_v3 }
 0xc6d   : > { %6385 = vadd.xlane.f32.xlu0 %v14443_v40  ;;  %v6328_v14 = vpop.xlane.xlu0 %6327 }
 0xc6e   : > { %11629 = vpow2.f32 %v6363_v23  ;;  %v6348_v31 = vsub.f32 %v14379_v24, %v6328_v14 }
 0xc70   : > { %v14446_v59 = vpop.eup %11625 }
 0xc71   : > { %6391 = vadd.xlane.f32.xlu0 %v14446_v59  ;;  %v14449_v33 = vpop.eup %11627  ;;  %v6324_v13 = vpop.xlane.xlu0 %6323 }
 0xc75   : > { %6387 = vadd.xlane.f32.xlu0 %v14449_v33  ;;  %v6336_v62 = vpop.xlane.xlu0 %6335 }
 0xc76   : > { %v6352_v24 = vsub.f32 %v14391_v25, %v6336_v62 }
 0xc78   : > { %v14452_v57 = vpop.eup %11629 }
 0xc79   : > { %6395 = vadd.xlane.f32.xlu1 %v14452_v57  ;;  %v6332_v5 = vpop.xlane.xlu0 %6331 }
 0xc8b   : > { %6469 = vrot.lane.b32.xlu0 %v15675_v51, %s12137_s23 }
 0xc91   : > { %v6318_v27 = vpop.xlane.xlu1 %6317 }
 0xc92   : > { %v6343_v18 = vsub.f32 %v14401_v56, %v6318_v27 }
 0xc94   : > { %v6365_v44 = vmul.f32 1.442695, %v6343_v18 }
 0xc95   : > { %v6314_v29 = vpop.xlane.xlu1 %6313 }
 0xc96   : > { %v6341_v46 = vsub.f32 %v6293_v54, %v6314_v29  ;;  %v6346_v54 = vsub.f32 %v14386_v6, %v6324_v13  ;;  %v6375_v6 = vmul.f32 1.442695, %v6348_v31 }
 0xc98   : > { %v6361_v55 = vmul.f32 1.442695, %v6341_v46 }
 0xc99   : > { %v6326_v35 = vpop.xlane.xlu1 %6325 }
 0xc9a   : > { %v6347_v10 = vsub.f32 %v14408_v48, %v6326_v35  ;;  %11631 = vpow2.f32 %v6361_v55 }
 0xc9c   : > { %v6373_v58 = vmul.f32 1.442695, %v6347_v10 }
 0xc9d   : > { %v6322_v11 = vpop.xlane.xlu1 %6321 }
 0xc9e   : > { %v6345_v47 = vsub.f32 %v6297_v38, %v6322_v11  ;;  %v6371_v38 = vmul.f32 1.442695, %v6346_v54 }
 0xca0   : > { %v6369_v34 = vmul.f32 1.442695, %v6345_v47 }
 0xca1   : > { %v6334_v60 = vpop.xlane.xlu1 %6333 }
 0xca2   : > { %11633 = vpow2.f32 %v6369_v34  ;;  %v6351_v36 = vsub.f32 %v14415_v37, %v6334_v60  ;;  %v6350_v37 = vsub.f32 %v14396_v39, %v6332_v5  ;;  %v6383_v39 = vmul.f32 1.442695, %v6352_v24  ;;  %v11356_v5 = vld [vmem:[#allocation12 + $0x138] ss:$12 sps:$4 sm:$0xff]  }
 0xca3   : > { %11635 = vpow2.f32 %v6365_v44 }
 0xca4   : > { %11637 = vpow2.f32 %v6373_v58  ;;  %v14464_v12 = vpop.eup %11631  ;;  %v6381_v53 = vmul.f32 1.442695, %v6351_v36  ;;  %v6379_v63 = vmul.f32 1.442695, %v6350_v37 }
 0xca5   : > { %v6330_v56 = vpop.xlane.xlu1 %6329  ;;  %11639 = vpow2.f32 %v6367_v61 }
 0xca6   : > { %v6349_v48 = vsub.f32 %v14420_v42, %v6330_v56 }
 0xca8   : > { %v6377_v16 = vmul.f32 1.442695, %v6349_v48  ;;  %v11355_v48 = vld [vmem:[#allocation12 + $0x124] ss:$12 sps:$4 sm:$0xff]  }
 0xca9   : > { %v6468_v20 = vpop.permute.xlu1 %6467 }
 0xcaa   : > { %11641 = vpow2.f32 %v6377_v16  ;;  %10284 = vmatprep.subr.bf16.mxu1 %v6468_v20  ;;  %6393 = vadd.xlane.f32.xlu0 %v14464_v12  ;;  %v11361_v16 = vld [vmem:[#allocation12 + $0x154] ss:$12 sps:$4 sm:$0xff]  }
 0xcab   : > { %11643 = vpow2.f32 %v6371_v38  ;;  %10285 = vmatpush3.bf16.msra.mxu1 %v6468_v20  ;;  %v11358_v38 = vld [vmem:[#allocation12 + $0x13c] ss:$12 sps:$4 sm:$0xff]  }
 0xcac   : > { %v14468_v42 = vpop.eup %11633  ;;  %11645 = vpow2.f32 %v6381_v53  ;;  %v11359_v20 = vld [vmem:[#allocation12 + $0x150] ss:$12 sps:$4 sm:$0xff]   ;;  %v11364_v53 = vld [vmem:[#allocation12 + $0x16c] ss:$12 sps:$4 sm:$0xff]  }
 0xcad   : > { %v14470_v30 = vpop.eup %11635  ;;  %6401 = vadd.xlane.f32.xlu1 %v14468_v42  ;;  %11647 = vpow2.f32 %v6375_v6  ;;  %v6472_v55 = vpop.permute.xlu1 %6471  ;;  %v15676_v6 = vld [vmem:[#allocation53_spill] sm:$0xff] }
 0xcae   : > { %6397 = vadd.xlane.f32.xlu0 %v14470_v30  ;;  %v14475_v50 = vpop.eup %11637  ;;  %11649 = vpow2.f32 %v6379_v63 }
 0xcaf   : > { %v14477_v3 = vpop.eup %11639  ;;  %11651 = vpow2.f32 %v6383_v39 }
 0xcb1   : > { %6405 = vadd.xlane.f32.xlu1 %v14475_v50  ;;  %v6474_v11 = vpop.permute.xlu1 %6473 }
 0xcb2   : > { %6399 = vadd.xlane.f32.xlu0 %v14477_v3 }
 0xcb4   : > { %v14481_v23 = vpop.eup %11641 }
 0xcb5   : > { %v14483_v51 = vpop.eup %11643  ;;  %6409 = vadd.xlane.f32.xlu1 %v14481_v23  ;;  %v6476_v45 = vpop.permute.xlu1 %6475 }
 0xcb6   : > { %6403 = vadd.xlane.f32.xlu0 %v14483_v51  ;;  %v14487_v25 = vpop.eup %11645 }
 0xcb7   : > { %v14489_v27 = vpop.eup %11647 }
 0xcb8   : > { %v14493_v29 = vpop.eup %11649 }
 0xcb9   : > { %6413 = vadd.xlane.f32.xlu1 %v14487_v25  ;;  %v14496_v14 = vpop.eup %11651  ;;  %v6478_v58 = vpop.permute.xlu1 %6477 }
 0xcba   : > { %6407 = vadd.xlane.f32.xlu0 %v14489_v27 }
 0xcbd   : > { %v6480_v56 = vpop.permute.xlu1 %6479 }
 0xcbe   : > { %6411 = vadd.xlane.f32.xlu0 %v14493_v29 }
 0xcc2   : > { %6415 = vadd.xlane.f32.xlu0 %v14496_v14 }
 0xcf6   : > { %v6390_v46 = vpop.xlane.xlu0 %6389 }
 0xcfa   : > { %v6386_v35 = vpop.xlane.xlu0 %6385 }
 0xcfb   : > { %11653 = vrcp.f32 %v6386_v35 }
 0xcfe   : > { %v6392_v18 = vpop.xlane.xlu0 %6391 }
 0xd02   : > { %v6388_v13 = vpop.xlane.xlu0 %6387 }
 0xd03   : > { %11655 = vrcp.f32 %v6388_v13 }
 0xd04   : > { %11657 = vrcp.f32 %v6392_v18 }
 0xd05   : > { %v11654_v47 = vpop.eup %11653  ;;  %11659 = vrcp.f32 %v6390_v46 }
 0xd06   : > { %v6470_v10 = vpop.permute.xlu0 %6469  ;;  %v6418_v34 = vmul.f32 %v11654_v47, %v14443_v40  ;;  %v11353_v40 = vld [vmem:[#allocation12 + $0x120] ss:$12 sps:$4 sm:$0xff]  }
 0xd07   : > { %10286 = vmatprep.subr.bf16.mxu1 %v6470_v10 }
 0xd08   : > { %10287 = vmatpush3.bf16.msra.mxu1 %v6470_v10 }
 0xd09   : > { %10288 = vmatprep.subr.bf16.mxu1 %v6472_v55 }
 0xd0c   : > { %10289 = vmatpush3.bf16.msra.mxu1 %v6472_v55 }
 0xd0d   : > { %v11656_v44 = vpop.eup %11655  ;;  %10290 = vmatprep.subr.bf16.mxu1 %v6474_v11 }
 0xd0e   : > { %v6420_v60 = vmul.f32 %v11656_v44, %v14449_v33  ;;  %v11658_v61 = vpop.eup %11657 }
 0xd0f   : > { %v11660_v54 = vpop.eup %11659  ;;  %v6424_v36 = vmul.f32 %v11658_v61, %v14446_v59  ;;  %v11362_v59 = vld [vmem:[#allocation12 + $0x168] ss:$12 sps:$4 sm:$0xff]  }
 0xd10   : > { %10291 = vmatpush3.bf16.msra.mxu1 %v6474_v11  ;;  %v6449_v62 = vpack.c.bf16 %v6420_v60, %v6418_v34  ;;  %v6422_v31 = vmul.f32 %v11660_v54, %v14439_v41  ;;  %v6396_v41 = vpop.xlane.xlu1 %6395 }
 0xd11   : > { %10292 = vmatprep.subr.bf16.mxu1 %v6476_v45  ;;  %11661 = vrcp.f32 %v6396_v41 }
 0xd12   : > { %10298 = vmatprep.mubr.bf16.mxu1 %v6449_v62  ;;  %v6450_v33 = vpack.c.bf16 %v6424_v36, %v6422_v31 }
 0xd14   : > { %10293 = vmatpush3.bf16.msra.mxu1 %v6476_v45 }
 0xd15   : > { %10294 = vmatprep.subr.bf16.mxu1 %v6478_v58 }
 0xd18   : > { %10295 = vmatpush3.bf16.msra.mxu1 %v6478_v58 }
 0xd19   : > { %10296 = vmatprep.subr.bf16.mxu1 %v6480_v56 }
 0xd1b   : > { %v11662_v35 = vpop.eup %11661 }
 0xd1c   : > { %10297 = vmatpush3.bf16.msra.mxu1 %v6480_v56  ;;  %v6428_v11 = vmul.f32 %v11662_v35, %v14452_v57  ;;  %v15684_v35 = vld [vmem:[#allocation55_spill] sm:$0xff] }
 0xd1d   : > { %6698 = vmatprep.subr.bf16.mxu1 %v11355_v48 }
 0xd1f   : > { %10299 = vmatmul.mubr.bf16.vlgmr.msra.gmra.mrb[184].mxu1 %v6450_v33 }
 0xd20   : > { %6699 = vmatpush1.bf16.msra.mxu1 %v11353_v40 }
 0xd21   : > { %6700 = vmatprep.subr.bf16.mxu1 %v11358_v38 }
 0xd24   : > { %6701 = vmatpush1.bf16.msra.mxu1 %v11356_v5 }
 0xd25   : > { %6702 = vmatprep.subr.bf16.mxu1 %v11361_v16 }
 0xd28   : > { %6703 = vmatpush1.bf16.msra.mxu1 %v11359_v20 }
 0xd29   : > { %6704 = vmatprep.subr.bf16.mxu1 %v11364_v53 }
 0xd2c   : > { %6705 = vmatpush1.bf16.msra.mxu1 %v11362_v59 }
 0xd2d   : > { %10370 = vmatprep.subr.bf16.mxu1 %v15676_v6 }
 0xd37   : > { %v6394_v37 = vpop.xlane.xlu0 %6393 }
 0xd38   : > { %11663 = vrcp.f32 %v6394_v37 }
 0xd3a   : > { %v6402_v24 = vpop.xlane.xlu1 %6401 }
 0xd3b   : > { %v6398_v63 = vpop.xlane.xlu0 %6397 }
 0xd3c   : > { %11665 = vrcp.f32 %v6398_v63 }
 0xd3e   : > { %v6406_v39 = vpop.xlane.xlu1 %6405 }
 0xd3f   : > { %v6400_v46 = vpop.xlane.xlu0 %6399 }
 0xd40   : > { %11667 = vrcp.f32 %v6400_v46 }
 0xd41   : > { %11669 = vrcp.f32 %v6402_v24 }
 0xd42   : > { %v11664_v18 = vpop.eup %11663  ;;  %v6410_v10 = vpop.xlane.xlu1 %6409 }
 0xd43   : > { %v6404_v55 = vpop.xlane.xlu0 %6403  ;;  %v6426_v13 = vmul.f32 %v11664_v18, %v14464_v12 }
 0xd44   : > { %11671 = vrcp.f32 %v6404_v55  ;;  %v15687_v55 = vld [vmem:[#allocation54_spill] sm:$0xff] }
 0xd45   : > { %v6451_v47 = vpack.c.bf16 %v6428_v11, %v6426_v13  ;;  %11673 = vrcp.f32 %v6406_v39  ;;  %v15688_v13 = vld [vmem:[#allocation42_spill] sm:$0xff]  ;;  %v15690_v11 = vld [vmem:[#allocation57_spill] sm:$0xff] }
 0xd46   : > { %v11666_v44 = vpop.eup %11665  ;;  %v6414_v60 = vpop.xlane.xlu1 %6413 }
 0xd47   : > { %v6408_v45 = vpop.xlane.xlu0 %6407  ;;  %10302 = vmatprep.mubr.bf16.mxu1 %v6451_v47  ;;  %v6430_v58 = vmul.f32 %v11666_v44, %v14470_v30  ;;  %v15691_v47 = vld [vmem:[#allocation56_spill] sm:$0xff]  ;;  %v15694_v44 = vld [vmem:[#allocation59_spill] sm:$0xff] }
 0xd48   : > { %11675 = vrcp.f32 %v6408_v45  ;;  %v15692_v45 = vld [vmem:[#allocation41_spill] sm:$0xff] }
 0xd49   : > { %11677 = vrcp.f32 %v6410_v10  ;;  %v7011_v10 = vsel %vm15678_vm0, %v15688_v13, 0 }
 0xd4a   : > { %v11668_v34 = vpop.eup %11667 }
 0xd4b   : > { %v6412_v62 = vpop.xlane.xlu0 %6411  ;;  %v6432_v61 = vmul.f32 %v11668_v34, %v14477_v3  ;;  %v11670_v54 = vpop.eup %11669 }
 0xd4c   : > { %11679 = vrcp.f32 %v6412_v62  ;;  %v6434_v36 = vmul.f32 %v11670_v54, %v14468_v42  ;;  %v15697_v62 = vld [vmem:[#allocation44_spill] sm:$0xff] }
 0xd4d   : > { %v6452_v12 = vpack.c.bf16 %v6432_v61, %v6430_v58  ;;  %11681 = vrcp.f32 %v6414_v60  ;;  %v15696_v60 = vld [vmem:[#allocation58_spill] sm:$0xff]  ;;  %v15700_v61 = vld [vmem:[#allocation43_spill] sm:$0xff] }
 0xd4e   : > { %v11672_v57 = vpop.eup %11671 }
 0xd4f   : > { %v6416_v56 = vpop.xlane.xlu0 %6415  ;;  %10303 = vmatmul.mubr.bf16.gmra.mrb[188].mxu1 %v6452_v12  ;;  %v6436_v48 = vmul.f32 %v11672_v57, %v14483_v51  ;;  %v11674_v31 = vpop.eup %11673  ;;  %v15702_v57 = vld [vmem:[#allocation47_spill] sm:$0xff] }
 0xd50   : > { %11683 = vrcp.f32 %v6416_v56  ;;  %v6438_v30 = vmul.f32 %v11674_v31, %v14475_v50 }
 0xd51   : > { %v6453_v40 = vpack.c.bf16 %v6436_v48, %v6434_v36 }
 0xd52   : > { %v11676_v33 = vpop.eup %11675 }
 0xd53   : > { %10306 = vmatprep.mubr.bf16.mxu1 %v6453_v40  ;;  %v6440_v3 = vmul.f32 %v11676_v33, %v14489_v27  ;;  %v11678_v38 = vpop.eup %11677  ;;  %v7023_v33 = vsel %vm15678_vm0, %v15702_v57, 0 }
 0xd54   : > { %v6442_v20 = vmul.f32 %v11678_v38, %v14481_v23 }
 0xd55   : > { %v6454_v5 = vpack.c.bf16 %v6440_v3, %v6438_v30  ;;  %v15707_v3 = vld [vmem:[#allocation46_spill] sm:$0xff] }
 0xd56   : > { %v11680_v16 = vpop.eup %11679 }
 0xd57   : > { %10307 = vmatmul.mubr.bf16.gmra.mrb[192].mxu1 %v6454_v5  ;;  %v6444_v53 = vmul.f32 %v11680_v16, %v14493_v29  ;;  %v11682_v42 = vpop.eup %11681  ;;  %v15681_v29 = vld [vmem:[#allocation52_spill] sm:$0xff] }
 0xd58   : > { %v6446_v41 = vmul.f32 %v11682_v42, %v14487_v25  ;;  %v7005_v25 = vsel %vm15680_vm13, %v15655_v2, 0  ;;  %vm15693_vm13 = vmmov %vm15678_vm0 }
 0xd59   : > { %v6455_v59 = vpack.c.bf16 %v6444_v53, %v6442_v20 }
 0xd5a   : > { %v11684_v51 = vpop.eup %11683 }
 0xd5b   : > { %10310 = vmatprep.mubr.bf16.mxu1 %v6455_v59  ;;  %v6448_v37 = vmul.f32 %v11684_v51, %v14496_v14  ;;  %v15682_v14 = vld [vmem:[#allocation39_spill] sm:$0xff] }
 0xd5d   : > { %v6456_v24 = vpack.c.bf16 %v6448_v37, %v6446_v41 }
 0xd5f   : > { %10311 = vmatmul.mubr.bf16.gmra.mrb[196].mxu1 %v6456_v24 }
 0xd60   : > { %6730 = vmatprep.mubr.bf16.mxu1 %v15534_v21 }
 0xdf2   : > { %v10300_v50 = vpop.f32.mrb[184].mxu1 }
 0xdf3   : > { %v6523_v27 = vpop.f32.mrb[185].mxu1 }
 0xdf4   : > { %v10301_v63 = vpop.f32.mrb[186].mxu1 }
 0xdf5   : > { %v6587_v39 = vpack.c.bf16 %v10301_v63, %v10300_v50  ;;  %v6526_v46 = vpop.f32.mrb[187].mxu1  ;;  %v15718_v63 = vld [vmem:[#allocation23_spill] sm:$0xff] }
 0xdf6   : > { %v6586_v23 = vpack.c.bf16 %v6526_v46, %v6523_v27  ;;  %v15715_v27 = vld [vmem:[#allocation26_spill] sm:$0xff]  ;;  %v15722_v46 = vld [vmem:[#allocation25_spill] sm:$0xff] }
 0xdf8   : > { %9295 = vmatmul.mubr.msk.bf16.vlgmr.msra.gmra.mrb[136].mxu1 %vm15677_vm8, %v6586_v23  ;;  %10322 = vmatprep.mubr.msk.bf16.mxu0 %vm15678_vm0, %v6586_v23  ;;  %vm15685_vm8 = vmmov %vm15678_vm0  ;;  %v15724_v23 = vld [vmem:[#allocation30_spill] sm:$0xff] }
 0xdf9   : > { %10371 = vmatpush3.bf16.msra.mxu1 %v15676_v6  ;;  %10323 = vmatmul.mubr.msk.bf16.vlgmr.msra.gmra.mrb[168].mxu0 %vm15679_vm6, %v6587_v39  ;;  %vm15686_vm6 = vmmov %vm15678_vm0 }
 0xdfa   : > { %10339 = vmatpush3.bf16.xpose.msra.mxu0 %v7005_v25  ;;  %10372 = vmatprep.subr.bf16.mxu1 %v15681_v29  ;;  %v7008_v18 = vsel %vm15686_vm6, %v15682_v14, 0  ;;  %vm15698_vm6 = vmmov %vm15678_vm0  ;;  %v15727_v25 = vld [vmem:[#allocation24_spill] sm:$0xff] }
 0xdfb   : > { %10899 = vmatprep.subr.msk.bf16.mxu0 %vm15683_vm15, %v15682_v14  ;;  %6740 = vmatprep.mubr.bf16.mxu1 %v15534_v21  ;;  %vm15689_vm15 = vmmov %vm15678_vm0 }
 0xdfd   : > { %10373 = vmatpush3.bf16.msra.mxu1 %v15681_v29 }
 0xdfe   : > { %10374 = vmatprep.subr.bf16.mxu1 %v15684_v35 }
 0xe00   : > { %9296 = vmatmul.mubr.msk.bf16.gmra.mrb[140].mxu1 %vm15685_vm8, %v6587_v39  ;;  %vm15695_vm8 = vmmov %vm15678_vm0  ;;  %v15720_v39 = vld [vmem:[#allocation21_spill] sm:$0xff] }
 0xe01   : > { %10375 = vmatpush3.bf16.msra.mxu1 %v15684_v35  ;;  %6750 = vmatprep.mubr.bf16.mxu1 %v15534_v21  ;;  %v7014_v34 = vsel %vm15695_vm8, %v15692_v45, 0  ;;  %vm15703_vm8 = vmmov %vm15678_vm0 }
 0xe02   : > { %10341 = vmatpush3.bf16.xpose.msra.mxu0 %v7008_v18  ;;  %10376 = vmatprep.subr.bf16.mxu1 %v15687_v55  ;;  %v15729_v18 = vld [vmem:[#allocation32_spill] sm:$0xff] }
 0xe03   : > { %10900 = vmatprep.subr.msk.bf16.mxu0 %vm15689_vm15, %v15688_v13  ;;  %vm15699_vm15 = vmmov %vm15678_vm0 }
 0xe04   : > { %v7017_v58 = vsel %vm15699_vm15, %v15697_v62, 0  ;;  %vm15705_vm15 = vmmov %vm15678_vm0 }
 0xe05   : > { %10377 = vmatpush3.bf16.msra.mxu1 %v15687_v55 }
 0xe06   : > { %10378 = vmatprep.subr.bf16.mxu1 %v15690_v11 }
 0xe09   : > { %10379 = vmatpush3.bf16.msra.mxu1 %v15690_v11 }
 0xe0a   : > { %10343 = vmatpush3.bf16.xpose.msra.mxu0 %v7011_v10  ;;  %10380 = vmatprep.subr.bf16.mxu1 %v15691_v47  ;;  %v15731_v10 = vld [vmem:[#allocation29_spill] sm:$0xff] }
 0xe0b   : > { %10901 = vmatprep.subr.msk.bf16.mxu0 %vm15693_vm13, %v15692_v45  ;;  %vm15701_vm13 = vmmov %vm15678_vm0 }
 0xe0c   : > { %v7020_v54 = vsel %vm15701_vm13, %v15700_v61, 0  ;;  %vm15708_vm13 = vmmov %vm15678_vm0 }
 0xe0d   : > { %10381 = vmatpush3.bf16.msra.mxu1 %v15691_v47 }
 0xe0e   : > { %10382 = vmatprep.subr.bf16.mxu1 %v15694_v44 }
 0xe11   : > { %10383 = vmatpush3.bf16.msra.mxu1 %v15694_v44 }
 0xe12   : > { %10345 = vmatpush3.bf16.xpose.msra.mxu0 %v7014_v34  ;;  %10384 = vmatprep.subr.bf16.mxu1 %v15696_v60 }
 0xe13   : > { %10902 = vmatprep.subr.msk.bf16.mxu0 %vm15698_vm6, %v15697_v62  ;;  %vm15704_vm6 = vmmov %vm15678_vm0 }
 0xe15   : > { %10385 = vmatpush3.bf16.msra.mxu1 %v15696_v60 }
 0xe1a   : > { %10347 = vmatpush3.bf16.xpose.msra.mxu0 %v7017_v58 }
 0xe1b   : > { %10903 = vmatprep.subr.msk.bf16.mxu0 %vm15678_vm0, %v15700_v61 }
 0xe22   : > { %10349 = vmatpush3.bf16.xpose.msra.mxu0 %v7020_v54  ;;  %v10304_v12 = vpop.f32.mrb[188].mxu1 }
 0xe23   : > { %10904 = vmatprep.subr.msk.bf16.mxu0 %vm15703_vm8, %v15702_v57  ;;  %v6539_v56 = vpop.f32.mrb[189].mxu1  ;;  %vm15709_vm8 = vmmov %vm15678_vm0 }
 0xe24   : > { %v10305_v36 = vpop.f32.mrb[190].mxu1 }
 0xe25   : > { %v6589_v48 = vpack.c.bf16 %v10305_v36, %v10304_v12  ;;  %v6542_v31 = vpop.f32.mrb[191].mxu1 }
 0xe26   : > { %v6588_v40 = vpack.c.bf16 %v6542_v31, %v6539_v56 }
 0xe28   : > { %9297 = vmatmul.mubr.msk.bf16.gmra.mrb[144].mxu1 %vm15704_vm6, %v6588_v40  ;;  %10326 = vmatprep.mubr.msk.bf16.mxu0 %vm15705_vm15, %v6588_v40  ;;  %vm15710_vm6 = vmmov %vm15678_vm0 }
 0xe29   : > { %10327 = vmatmul.mubr.msk.bf16.gmra.mrb[172].mxu0 %vm15706_vm10, %v6589_v48  ;;  %6760 = vmatprep.mubr.bf16.mxu1 %v15534_v21  ;;  %vm15711_vm10 = vmmov %vm15678_vm0 }
 0xe2a   : > { %10351 = vmatpush3.bf16.xpose.msra.mxu0 %v7023_v33  ;;  %v10308_v30 = vpop.f32.mrb[192].mxu1  ;;  %vm15712_vm15 = vmmov %vm15678_vm0 }
 0xe2b   : > { %10905 = vmatprep.subr.msk.bf16.mxu0 %vm15708_vm13, %v15707_v3  ;;  %v6555_v38 = vpop.f32.mrb[193].mxu1  ;;  %v7026_v42 = vsel %vm15712_vm15, %v15707_v3, 0  ;;  %vm15713_vm13 = vmmov %vm15678_vm0 }
 0xe2c   : > { %v10309_v5 = vpop.f32.mrb[194].mxu1  ;;  %vm15719_vm15 = vmmov %vm15678_vm0 }
 0xe2d   : > { %v6591_v16 = vpack.c.bf16 %v10309_v5, %v10308_v30  ;;  %v6558_v20 = vpop.f32.mrb[195].mxu1 }
 0xe2e   : > { %v6590_v53 = vpack.c.bf16 %v6558_v20, %v6555_v38 }
 0xe30   : > { %9298 = vmatmul.mubr.msk.bf16.gmra.mrb[148].mxu1 %vm15709_vm8, %v6589_v48  ;;  %10330 = vmatprep.mubr.msk.bf16.mxu0 %vm15710_vm6, %v6590_v53  ;;  %vm15714_vm8 = vmmov %vm15678_vm0 }
 0xe31   : > { %10331 = vmatmul.mubr.msk.bf16.gmra.mrb[176].mxu0 %vm15711_vm10, %v6591_v16  ;;  %6770 = vmatprep.mubr.bf16.mxu1 %v15534_v21  ;;  %vm15716_vm6 = vmmov %vm15678_vm0 }
 0xe32   : > { %10353 = vmatpush3.bf16.xpose.msra.mxu0 %v7026_v42  ;;  %v10312_v59 = vpop.f32.mrb[196].mxu1  ;;  %vm15717_vm10 = vmmov %vm15678_vm0 }
 0xe33   : > { %v6571_v51 = vpop.f32.mrb[197].mxu1 }
 0xe34   : > { %v10313_v41 = vpop.f32.mrb[198].mxu1 }
 0xe35   : > { %v6593_v37 = vpack.c.bf16 %v10313_v41, %v10312_v59  ;;  %v6574_v24 = vpop.f32.mrb[199].mxu1 }
 0xe36   : > { %v6592_v50 = vpack.c.bf16 %v6574_v24, %v6571_v51 }
 0xe38   : > { %9299 = vmatmul.mubr.msk.bf16.gmra.mrb[152].mxu1 %vm15678_vm0, %v6590_v53  ;;  %10334 = vmatprep.mubr.msk.bf16.mxu0 %vm15713_vm13, %v6592_v50  ;;  %vm15723_vm13 = vmmov %vm15678_vm0 }
 0xe39   : > { %10335 = vmatmul.mubr.msk.bf16.gmra.mrb[180].mxu0 %vm15714_vm8, %v6593_v37  ;;  %6780 = vmatprep.mubr.bf16.mxu1 %v15534_v21  ;;  %vm15725_vm8 = vmmov %vm15678_vm0 }
 0xe3a   : > { %10354 = vmatprep.mubr.msk.bf16.mxu0 %vm15716_vm6, %v15715_v27  ;;  %vm15726_vm6 = vmmov %vm15678_vm0 }
 0xe40   : > { %9300 = vmatmul.mubr.msk.bf16.gmra.mrb[156].mxu1 %vm15717_vm10, %v6591_v16  ;;  %vm15728_vm10 = vmmov %vm15678_vm0 }
 0xe41   : > { %10355 = vmatmul.mubr.msk.bf16.vlgmr.msra.gmra.mrb[216].mxu0 %vm15719_vm15, %v15718_v63  ;;  %6790 = vmatprep.mubr.bf16.mxu1 %v15534_v21  ;;  %vm15730_vm15 = vmmov %vm15678_vm0 }
 0xe42   : > { %10358 = vmatprep.mubr.msk.bf16.mxu0 %vm15721_vm12, %v15720_v39  ;;  %vm15732_vm12 = vmmov %vm15678_vm0 }
 0xe48   : > { %9301 = vmatmul.mubr.msk.bf16.gmra.mrb[160].mxu1 %vm15678_vm0, %v6592_v50  ;;  %vm15733_vm0 = vnez %v15615_v52 }
 0xe49   : > { %10359 = vmatmul.mubr.msk.bf16.gmra.mrb[220].mxu0 %vm15723_vm13, %v15722_v46  ;;  %6800 = vmatprep.mubr.bf16.mxu1 %v15534_v21  ;;  %vm15734_vm13 = vnez %v15609_v4 }
 0xe4a   : > { %10362 = vmatprep.mubr.msk.bf16.mxu0 %vm15725_vm8, %v15724_v23  ;;  %vm15735_vm8 = vnez %v15613_v19 }
 0xe50   : > { %9302 = vmatmul.mubr.msk.bf16.gmra.mrb[164].mxu1 %vm15726_vm6, %v6593_v37  ;;  %vm15736_vm6 = vnez %v15667_v8 }
 0xe51   : > { %10363 = vmatmul.mubr.msk.bf16.gmra.mrb[224].mxu0 %vm15728_vm10, %v15727_v25  ;;  %vm15737_vm10 = vnez %v15619_v26 }
 0xe52   : > { %10366 = vmatprep.mubr.msk.bf16.mxu0 %vm15730_vm15, %v15729_v18  ;;  %vm15738_vm15 = vnez %v15665_v7 }
 0xe59   : > { %10367 = vmatmul.mubr.msk.bf16.gmra.mrb[228].mxu0 %vm15732_vm12, %v15731_v10  ;;  %vm15739_vm12 = vnez %v15621_v22 }
 0xf14   : > { %v10356_v34 = vpop.f32.mrb[216].mxu0 }
 0xf15   : > { %v7062_v58 = vpop.f32.mrb[217].mxu0  ;;  %v7127_v36 = vmul.f32 0.125, %v10356_v34 }
 0xf16   : > { %v7125_v54 = vmul.f32 0.125, %v7062_v58  ;;  %v10357_v12 = vpop.f32.mrb[218].mxu0 }
 0xf17   : > { %v7065_v56 = vpop.f32.mrb[219].mxu0  ;;  %v7128_v40 = vmul.f32 0.125, %v10357_v12  ;;  %v7143_v38 = vsel %vm13540_vm1, %v7127_v36, -1e+30 }
 0xf18   : > { %v7126_v48 = vmul.f32 0.125, %v7065_v56  ;;  %v7141_v31 = vsel %vm13557_vm3, %v7125_v54, -1e+30 }
 0xf19   : > { %7157 = vmax.xlane.f32.xlu1 %v7141_v31  ;;  %v7144_v53 = vsel %vm13577_vm4, %v7128_v40, -1e+30 }
 0xf1a   : > { %v7142_v33 = vsel %vm13550_vm2, %v7126_v48, -1e+30 }
 0xf1b   : > { %7159 = vmax.xlane.f32.xlu0 %v7142_v33 }
 0xf1c   : > { %v10360_v30 = vpop.f32.mrb[220].mxu0 }
 0xf1d   : > { %7161 = vmax.xlane.f32.xlu1 %v7143_v38  ;;  %v7078_v5 = vpop.f32.mrb[221].mxu0  ;;  %v7131_v59 = vmul.f32 0.125, %v10360_v30 }
 0xf1e   : > { %v7129_v16 = vmul.f32 0.125, %v7078_v5  ;;  %v10361_v20 = vpop.f32.mrb[222].mxu0 }
 0xf1f   : > { %7163 = vmax.xlane.f32.xlu0 %v7144_v53  ;;  %v7081_v42 = vpop.f32.mrb[223].mxu0  ;;  %v7132_v37 = vmul.f32 0.125, %v10361_v20  ;;  %v14615_v34 = vsel %vm15661_vm9, %v7131_v59, -1e+30 }
 0xf20   : > { %v7130_v51 = vmul.f32 0.125, %v7081_v42  ;;  %v7145_v41 = vsel %vm15662_vm11, %v7129_v16, -1e+30 }
 0xf21   : > { %7165 = vmax.xlane.f32.xlu1 %v7145_v41  ;;  %v14620_v56 = vsel %vm13584_vm5, %v7132_v37, -1e+30 }
 0xf22   : > { %v7146_v24 = vsel %vm13606_vm7, %v7130_v51, -1e+30 }
 0xf23   : > { %7167 = vmax.xlane.f32.xlu0 %v7146_v24 }
 0xf24   : > { %v10364_v50 = vpop.f32.mrb[224].mxu0 }
 0xf25   : > { %7169 = vmax.xlane.f32.xlu1 %v14615_v34  ;;  %v7094_v58 = vpop.f32.mrb[225].mxu0  ;;  %v7135_v48 = vmul.f32 0.125, %v10364_v50 }
 0xf26   : > { %v7133_v54 = vmul.f32 0.125, %v7094_v58  ;;  %v10365_v12 = vpop.f32.mrb[226].mxu0 }
 0xf27   : > { %7171 = vmax.xlane.f32.xlu0 %v14620_v56  ;;  %v7097_v36 = vpop.f32.mrb[227].mxu0  ;;  %v7136_v5 = vmul.f32 0.125, %v10365_v12  ;;  %v14635_v42 = vsel %vm15734_vm13, %v7135_v48, -1e+30 }
 0xf28   : > { %v7134_v40 = vmul.f32 0.125, %v7097_v36  ;;  %v14625_v30 = vsel %vm15664_vm14, %v7133_v54, -1e+30 }
 0xf29   : > { %7173 = vmax.xlane.f32.xlu1 %v14625_v30  ;;  %v14640_v50 = vsel %vm15735_vm8, %v7136_v5, -1e+30 }
 0xf2a   : > { %v14630_v16 = vsel %vm15733_vm0, %v7134_v40, -1e+30 }
 0xf2b   : > { %7175 = vmax.xlane.f32.xlu0 %v14630_v16 }
 0xf2c   : > { %v10368_v20 = vpop.f32.mrb[228].mxu0 }
 0xf2d   : > { %7177 = vmax.xlane.f32.xlu1 %v14635_v42  ;;  %v7110_v59 = vpop.f32.mrb[229].mxu0  ;;  %v7139_v54 = vmul.f32 0.125, %v10368_v20 }
 0xf2e   : > { %v7137_v51 = vmul.f32 0.125, %v7110_v59  ;;  %v10369_v37 = vpop.f32.mrb[230].mxu0 }
 0xf2f   : > { %7179 = vmax.xlane.f32.xlu0 %v14640_v50  ;;  %v7113_v58 = vpop.f32.mrb[231].mxu0  ;;  %v7140_v48 = vmul.f32 0.125, %v10369_v37  ;;  %v14655_v5 = vsel %vm15738_vm15, %v7139_v54, -1e+30 }
 0xf30   : > { %v7138_v12 = vmul.f32 0.125, %v7113_v58  ;;  %v14645_v36 = vsel %vm15736_vm6, %v7137_v51, -1e+30 }
 0xf31   : > { %7181 = vmax.xlane.f32.xlu1 %v14645_v36  ;;  %v14660_v20 = vsel %vm15739_vm12, %v7140_v48, -1e+30 }
 0xf32   : > { %v14650_v40 = vsel %vm15737_vm10, %v7138_v12, -1e+30  ;;  %vm15740_vm10 = vcmask 523264  }
 0xf33   : > { %7183 = vmax.xlane.f32.xlu0 %v14650_v40  ;;  %vm15741_vm12 = vmmov %vm15740_vm10 }
 0xf34   : > { %vm15742_vm6 = vmmov %vm15740_vm10 }
 0xf35   : > { %7185 = vmax.xlane.f32.xlu1 %v14655_v5  ;;  %vm15743_vm15 = vmmov %vm15742_vm6 }
 0xf36   : > { %vm15744_vm0 = vmmov %vm15742_vm6 }
 0xf37   : > { %7187 = vmax.xlane.f32.xlu0 %v14660_v20  ;;  %vm15757_vm8 = vmmov %vm15744_vm0 }
 0xf38   : > { %vm15758_vm14 = vmmov %vm15744_vm0 }
 0xf39   : > { %vm15759_vm13 = vmmov %vm15744_vm0 }
 0xfa6   : > { %v7158_v59 = vpop.xlane.xlu1 %7157 }
 0xfa7   : > { %v7189_v51 = vsub.f32 %v7141_v31, %v7158_v59 }
 0xfa8   : > { %v7160_v37 = vpop.xlane.xlu0 %7159 }
 0xfa9   : > { %v7205_v58 = vmul.f32 1.442695, %v7189_v51  ;;  %v7190_v12 = vsub.f32 %v7142_v33, %v7160_v37 }
 0xfaa   : > { %v7162_v47 = vpop.xlane.xlu1 %7161 }
 0xfab   : > { %11685 = vpow2.f32 %v7205_v58  ;;  %v7207_v60 = vmul.f32 1.442695, %v7190_v12  ;;  %v7191_v44 = vsub.f32 %v7143_v38, %v7162_v47 }
 0xfac   : > { %v7164_v11 = vpop.xlane.xlu0 %7163 }
 0xfad   : > { %11687 = vpow2.f32 %v7207_v60  ;;  %v7209_v54 = vmul.f32 1.442695, %v7191_v44  ;;  %v7192_v26 = vsub.f32 %v7144_v53, %v7164_v11 }
 0xfae   : > { %v7166_v8 = vpop.xlane.xlu1 %7165 }
 0xfaf   : > { %11689 = vpow2.f32 %v7209_v54  ;;  %v7211_v22 = vmul.f32 1.442695, %v7192_v26  ;;  %v7193_v48 = vsub.f32 %v7145_v41, %v7166_v8 }
 0xfb0   : > { %v7168_v7 = vpop.xlane.xlu0 %7167 }
 0xfb1   : > { %11691 = vpow2.f32 %v7211_v22  ;;  %v7213_v52 = vmul.f32 1.442695, %v7193_v48  ;;  %v7194_v19 = vsub.f32 %v7146_v24, %v7168_v7 }
 0xfb2   : > { %v7170_v31 = vpop.xlane.xlu1 %7169 }
 0xfb3   : > { %11693 = vpow2.f32 %v7213_v52  ;;  %v7215_v59 = vmul.f32 1.442695, %v7194_v19  ;;  %v7195_v33 = vsub.f32 %v14615_v34, %v7170_v31 }
 0xfb4   : > { %v7172_v51 = vpop.xlane.xlu0 %7171 }
 0xfb5   : > { %v14664_v37 = vpop.eup %11685  ;;  %11695 = vpow2.f32 %v7215_v59  ;;  %v7217_v47 = vmul.f32 1.442695, %v7195_v33  ;;  %v7196_v11 = vsub.f32 %v14620_v56, %v7172_v51 }
 0xfb6   : > { %v7174_v44 = vpop.xlane.xlu1 %7173  ;;  %7237 = vadd.xlane.f32.xlu1 %v14664_v37 }
 0xfb7   : > { %v14668_v26 = vpop.eup %11687  ;;  %11697 = vpow2.f32 %v7217_v47  ;;  %v7219_v22 = vmul.f32 1.442695, %v7196_v11  ;;  %v7197_v7 = vsub.f32 %v14625_v30, %v7174_v44 }
 0xfb8   : > { %v7176_v52 = vpop.xlane.xlu0 %7175  ;;  %7239 = vadd.xlane.f32.xlu0 %v14668_v26 }
 0xfb9   : > { %v14672_v19 = vpop.eup %11689  ;;  %11699 = vpow2.f32 %v7219_v22  ;;  %v7221_v8 = vmul.f32 1.442695, %v7197_v7  ;;  %v7198_v60 = vsub.f32 %v14630_v16, %v7176_v52 }
 0xfba   : > { %v7178_v38 = vpop.xlane.xlu1 %7177  ;;  %7241 = vadd.xlane.f32.xlu1 %v14672_v19 }
 0xfbb   : > { %v14676_v53 = vpop.eup %11691  ;;  %11701 = vpow2.f32 %v7221_v8  ;;  %v7223_v41 = vmul.f32 1.442695, %v7198_v60  ;;  %v7199_v24 = vsub.f32 %v14635_v42, %v7178_v38 }
 0xfbc   : > { %v7180_v34 = vpop.xlane.xlu0 %7179  ;;  %7243 = vadd.xlane.f32.xlu0 %v14676_v53 }
 0xfbd   : > { %v14680_v56 = vpop.eup %11693  ;;  %11703 = vpow2.f32 %v7223_v41  ;;  %v7225_v30 = vmul.f32 1.442695, %v7199_v24  ;;  %v7200_v58 = vsub.f32 %v14640_v50, %v7180_v34  ;;  %v11365_v24 = vld [vmem:[#allocation12 + $0x188] ss:$12 sps:$4 sm:$0xff]   ;;  %v11366_v34 = vld [vmem:[#allocation12 + $0x1a0] ss:$12 sps:$4 sm:$0xff]  }
 0xfbe   : > { %7245 = vadd.xlane.f32.xlu1 %v14680_v56  ;;  %v7182_v16 = vpop.xlane.xlu1 %7181  ;;  %10402 = vmatprep.subr.bf16.mxu0 %v11365_v24 }
 0xfbf   : > { %v14684_v12 = vpop.eup %11695  ;;  %11705 = vpow2.f32 %v7225_v30  ;;  %v7227_v54 = vmul.f32 1.442695, %v7200_v58  ;;  %v7201_v48 = vsub.f32 %v14645_v36, %v7182_v16  ;;  %10403 = vmatpush3.bf16.msra.mxu0 %v11365_v24  ;;  %v11367_v30 = vld [vmem:[#allocation12 + $0x1b8] ss:$12 sps:$4 sm:$0xff]   ;;  %v11368_v58 = vld [vmem:[#allocation12 + $0x1d0] ss:$12 sps:$4 sm:$0xff]  }
 0xfc0   : > { %7247 = vadd.xlane.f32.xlu0 %v14684_v12  ;;  %v7184_v42 = vpop.xlane.xlu0 %7183  ;;  %10404 = vmatprep.subr.bf16.mxu0 %v11366_v34 }
 0xfc1   : > { %v14688_v31 = vpop.eup %11697  ;;  %11707 = vpow2.f32 %v7227_v54  ;;  %v7229_v59 = vmul.f32 1.442695, %v7201_v48  ;;  %v7202_v33 = vsub.f32 %v14650_v40, %v7184_v42  ;;  %v11369_v42 = vld [vmem:[#allocation12 + $0x180] ss:$12 sps:$4 sm:$0xff]  }
 0xfc2   : > { %7249 = vadd.xlane.f32.xlu1 %v14688_v31  ;;  %v7186_v50 = vpop.xlane.xlu1 %7185 }
 0xfc3   : > { %v14692_v51 = vpop.eup %11699  ;;  %11709 = vpow2.f32 %v7229_v59  ;;  %v7231_v47 = vmul.f32 1.442695, %v7202_v33  ;;  %v7203_v11 = vsub.f32 %v14655_v5, %v7186_v50  ;;  %10405 = vmatpush3.bf16.msra.mxu0 %v11366_v34 }
 0xfc4   : > { %7251 = vadd.xlane.f32.xlu0 %v14692_v51  ;;  %v7188_v36 = vpop.xlane.xlu0 %7187  ;;  %10406 = vmatprep.subr.bf16.mxu0 %v11367_v30 }
 0xfc5   : > { %v14696_v44 = vpop.eup %11701  ;;  %11711 = vpow2.f32 %v7231_v47  ;;  %v7233_v22 = vmul.f32 1.442695, %v7203_v11  ;;  %v7204_v7 = vsub.f32 %v14660_v20, %v7188_v36 }
 0xfc6   : > { %7253 = vadd.xlane.f32.xlu1 %v14696_v44 }
 0xfc7   : > { %v14700_v40 = vpop.eup %11703  ;;  %11713 = vpow2.f32 %v7233_v22  ;;  %v7235_v52 = vmul.f32 1.442695, %v7204_v7  ;;  %10407 = vmatpush3.bf16.msra.mxu0 %v11367_v30  ;;  %v11377_v7 = vld [vmem:[#allocation12 + $0x1b4] ss:$12 sps:$4 sm:$0xff]  }
 0xfc8   : > { %7255 = vadd.xlane.f32.xlu0 %v14700_v40  ;;  %10408 = vmatprep.subr.bf16.mxu0 %v11368_v58 }
 0xfc9   : > { %v14703_v8 = vpop.eup %11705  ;;  %11715 = vpow2.f32 %v7235_v52 }
 0xfca   : > { %7257 = vadd.xlane.f32.xlu1 %v14703_v8 }
 0xfcb   : > { %v14706_v5 = vpop.eup %11707  ;;  %10409 = vmatpush3.bf16.msra.mxu0 %v11368_v58 }
 0xfcc   : > { %7259 = vadd.xlane.f32.xlu0 %v14706_v5 }
 0xfcd   : > { %v14709_v60 = vpop.eup %11709 }
 0xfce   : > { %7261 = vadd.xlane.f32.xlu1 %v14709_v60 }
 0xfcf   : > { %v14712_v20 = vpop.eup %11711 }
 0xfd0   : > { %7263 = vadd.xlane.f32.xlu0 %v14712_v20 }
 0xfd1   : > { %v14715_v38 = vpop.eup %11713 }
 0xfd2   : > { %7265 = vadd.xlane.f32.xlu1 %v14715_v38 }
 0xfd3   : > { %v14718_v41 = vpop.eup %11715 }
 0xfd4   : > { %7267 = vadd.xlane.f32.xlu0 %v14718_v41 }
 0xfe3   : > { %7808 = vrot.lane.b32.xlu1 %v15655_v2, %s12137_s23  ;;  %v11371_v2 = vld [vmem:[#allocation12 + $0x184] ss:$12 sps:$4 sm:$0xff]  }
 0xfe4   : > { %7518 = vmatprep.subr.bf16.mxu1 %v11371_v2 }
 0xfe7   : > { %7812 = vrot.lane.b32.xlu1 %v15688_v13, %s12137_s23 }
 0xfea   : > { %7810 = vrot.lane.b32.xlu0 %v15682_v14, %s12137_s23 }
 0xfeb   : > { %7814 = vrot.lane.b32.xlu1 %v15692_v45, %s12137_s23 }
 0xfee   : > { %7816 = vrot.lane.b32.xlu0 %v15697_v62, %s12137_s23 }
 0xfef   : > { %7818 = vrot.lane.b32.xlu1 %v15700_v61, %s12137_s23 }
 0xff2   : > { %7820 = vrot.lane.b32.xlu0 %v15702_v57, %s12137_s23 }
 0xff3   : > { %7822 = vrot.lane.b32.xlu1 %v15707_v3, %s12137_s23 }
 0xff6   : > { %7784 = vrot.lane.b32.xlu0 %v15715_v27, %s12137_s23 }
 0xff7   : > { %7786 = vrot.lane.b32.xlu1 %v15718_v63, %s12137_s23 }
 0xffa   : > { %7788 = vrot.lane.b32.xlu0 %v15720_v39, %s12137_s23 }
 0xffb   : > { %7790 = vrot.lane.b32.xlu1 %v15722_v46, %s12137_s23 }
 0xffe   : > { %7792 = vrot.lane.b32.xlu0 %v15724_v23, %s12137_s23 }
 0xfff   : > { %7794 = vrot.lane.b32.xlu1 %v15727_v25, %s12137_s23 }
0x1002   : > { %7796 = vrot.lane.b32.xlu0 %v15729_v18, %s12137_s23 }
0x1003   : > { %7798 = vrot.lane.b32.xlu1 %v15731_v10, %s12137_s23 }
0x1007   : > { %8161 = vrot.lane.b32.xlu1 %v15676_v6, %s12137_s23 }
0x100b   : > { %8163 = vrot.lane.b32.xlu1 %v15681_v29, %s12137_s23 }
0x1043   : > { %v7238_v14 = vpop.xlane.xlu1 %7237 }
0x1044   : > { %11717 = vrcp.f32 %v7238_v14  ;;  %v11380_v14 = vld [vmem:[#allocation12 + $0x1cc] ss:$12 sps:$4 sm:$0xff]  }
0x1045   : > { %v7240_v13 = vpop.xlane.xlu0 %7239 }
0x1046   : > { %11719 = vrcp.f32 %v7240_v13 }
0x1047   : > { %v7242_v45 = vpop.xlane.xlu1 %7241 }
0x1048   : > { %11721 = vrcp.f32 %v7242_v45 }
0x1049   : > { %v7244_v62 = vpop.xlane.xlu0 %7243 }
0x104a   : > { %11723 = vrcp.f32 %v7244_v62 }
0x104b   : > { %v7246_v61 = vpop.xlane.xlu1 %7245 }
0x104c   : > { %11725 = vrcp.f32 %v7246_v61 }
0x104d   : > { %v7248_v57 = vpop.xlane.xlu0 %7247 }
0x104e   : > { %v11718_v3 = vpop.eup %11717  ;;  %11727 = vrcp.f32 %v7248_v57 }
0x104f   : > { %v7250_v27 = vpop.xlane.xlu1 %7249  ;;  %v7270_v39 = vmul.f32 %v11718_v3, %v14664_v37  ;;  %v11374_v37 = vld [vmem:[#allocation12 + $0x19c] ss:$12 sps:$4 sm:$0xff]  }
0x1050   : > { %v11720_v63 = vpop.eup %11719  ;;  %11729 = vrcp.f32 %v7250_v27 }
0x1051   : > { %v7252_v6 = vpop.xlane.xlu0 %7251  ;;  %v7272_v29 = vmul.f32 %v11720_v63, %v14668_v26 }
0x1052   : > { %v11722_v46 = vpop.eup %11721  ;;  %11731 = vrcp.f32 %v7252_v6 }
0x1053   : > { %v7254_v23 = vpop.xlane.xlu1 %7253  ;;  %v7301_v25 = vpack.c.bf16 %v7272_v29, %v7270_v39  ;;  %v7274_v10 = vmul.f32 %v11722_v46, %v14672_v19  ;;  %v11372_v19 = vld [vmem:[#allocation12 + $0x198] ss:$12 sps:$4 sm:$0xff]  }
0x1054   : > { %v11724_v18 = vpop.eup %11723  ;;  %11733 = vrcp.f32 %v7254_v23 }
0x1055   : > { %v7276_v16 = vmul.f32 %v11724_v18, %v14676_v53  ;;  %10386 = vmatprep.mubr.bf16.mxu1 %v7301_v25  ;;  %v7256_v54 = vpop.xlane.xlu0 %7255 }
0x1056   : > { %v11726_v48 = vpop.eup %11725  ;;  %11735 = vrcp.f32 %v7256_v54 }
0x1057   : > { %v7258_v59 = vpop.xlane.xlu1 %7257  ;;  %v7302_v33 = vpack.c.bf16 %v7276_v16, %v7274_v10  ;;  %v7278_v47 = vmul.f32 %v11726_v48, %v14680_v56  ;;  %v11375_v56 = vld [vmem:[#allocation12 + $0x1b0] ss:$12 sps:$4 sm:$0xff]  }
0x1058   : > { %v11728_v50 = vpop.eup %11727  ;;  %11737 = vrcp.f32 %v7258_v59 }
0x1059   : > { %10387 = vmatmul.mubr.bf16.vlgmr.msra.gmra.mrb[200].mxu1 %v7302_v33  ;;  %v7260_v26 = vpop.xlane.xlu0 %7259  ;;  %v7280_v11 = vmul.f32 %v11728_v50, %v14684_v12 }
0x105a   : > { %v11730_v36 = vpop.eup %11729  ;;  %11739 = vrcp.f32 %v7260_v26  ;;  %7519 = vmatpush1.bf16.msra.mxu1 %v11369_v42 }
0x105b   : > { %v7262_v53 = vpop.xlane.xlu1 %7261  ;;  %v7303_v22 = vpack.c.bf16 %v7280_v11, %v7278_v47  ;;  %7520 = vmatprep.subr.bf16.mxu1 %v11374_v37  ;;  %v7282_v34 = vmul.f32 %v11730_v36, %v14688_v31  ;;  %v11378_v31 = vld [vmem:[#allocation12 + $0x1c8] ss:$12 sps:$4 sm:$0xff]  }
0x105c   : > { %v11732_v52 = vpop.eup %11731  ;;  %11741 = vrcp.f32 %v7262_v53 }
0x105d   : > { %10390 = vmatprep.mubr.bf16.mxu1 %v7303_v22  ;;  %v7264_v24 = vpop.xlane.xlu0 %7263  ;;  %v7284_v30 = vmul.f32 %v11732_v52, %v14692_v51 }
0x105e   : > { %v11734_v58 = vpop.eup %11733  ;;  %11743 = vrcp.f32 %v7264_v24  ;;  %7521 = vmatpush1.bf16.msra.mxu1 %v11372_v19 }
0x105f   : > { %v7266_v12 = vpop.xlane.xlu1 %7265  ;;  %v7304_v2 = vpack.c.bf16 %v7284_v30, %v7282_v34  ;;  %7522 = vmatprep.subr.bf16.mxu1 %v11377_v7  ;;  %v7286_v62 = vmul.f32 %v11734_v58, %v14696_v44 }
0x1060   : > { %v11736_v13 = vpop.eup %11735  ;;  %11745 = vrcp.f32 %v7266_v12 }
0x1061   : > { %10391 = vmatmul.mubr.bf16.gmra.mrb[204].mxu1 %v7304_v2  ;;  %v7268_v45 = vpop.xlane.xlu0 %7267  ;;  %v7288_v61 = vmul.f32 %v11736_v13, %v14700_v40 }
0x1062   : > { %v11738_v57 = vpop.eup %11737  ;;  %11747 = vrcp.f32 %v7268_v45  ;;  %7523 = vmatpush1.bf16.msra.mxu1 %v11375_v56 }
0x1063   : > { %v7809_v51 = vpop.permute.xlu1 %7808  ;;  %v7305_v3 = vpack.c.bf16 %v7288_v61, %v7286_v62  ;;  %7524 = vmatprep.subr.bf16.mxu1 %v11380_v14  ;;  %v7290_v63 = vmul.f32 %v11738_v57, %v14703_v8 }
0x1064   : > { %v11740_v27 = vpop.eup %11739  ;;  %10906 = vmatprep.subr.msk.bf16.mxu0 %vm15740_vm10, %v7809_v51  ;;  %v7849_v36 = vsel %vm15742_vm6, %v7809_v51, 0  ;;  %vm15746_vm6 = vmmov %vm15744_vm0 }
0x1065   : > { %10394 = vmatprep.mubr.bf16.mxu1 %v7305_v3  ;;  %v7292_v6 = vmul.f32 %v11740_v27, %v14706_v5  ;;  %v7811_v53 = vpop.permute.xlu0 %7810 }
0x1066   : > { %v11742_v39 = vpop.eup %11741  ;;  %7525 = vmatpush1.bf16.msra.mxu1 %v11378_v31 }
0x1067   : > { %v14770_v44 = vpop.permute.xlu1 %7812  ;;  %v7306_v40 = vpack.c.bf16 %v7292_v6, %v7290_v63  ;;  %v7294_v46 = vmul.f32 %v11742_v39, %v14709_v60 }
0x1068   : > { %v11744_v29 = vpop.eup %11743 }
0x1069   : > { %10395 = vmatmul.mubr.bf16.gmra.mrb[208].mxu1 %v7306_v40  ;;  %v7296_v23 = vmul.f32 %v11744_v29, %v14712_v20  ;;  %v7817_v14 = vpop.permute.xlu0 %7816 }
0x106a   : > { %v11746_v25 = vpop.eup %11745  ;;  %v7861_v40 = vsel %vm15759_vm13, %v7817_v14, 0  ;;  %vm15766_vm13 = vmmov %vm15744_vm0 }
0x106b   : > { %v14774_v18 = vpop.permute.xlu1 %7814  ;;  %v7307_v10 = vpack.c.bf16 %v7296_v23, %v7294_v46  ;;  %v7298_v8 = vmul.f32 %v11746_v25, %v14715_v38 }
0x106c   : > { %v11748_v16 = vpop.eup %11747 }
0x106d   : > { %10398 = vmatprep.mubr.bf16.mxu1 %v7307_v10  ;;  %v7300_v5 = vmul.f32 %v11748_v16, %v14718_v41  ;;  %v7821_v31 = vpop.permute.xlu0 %7820 }
0x106f   : > { %v14778_v54 = vpop.permute.xlu1 %7818  ;;  %v7308_v48 = vpack.c.bf16 %v7300_v5, %v7298_v8 }
0x1071   : > { %10399 = vmatmul.mubr.bf16.gmra.mrb[212].mxu1 %v7308_v48 }
0x1072   : > { %7550 = vmatprep.mubr.bf16.mxu1 %v15534_v21 }
0x1073   : > { %v14781_v42 = vpop.permute.xlu1 %7822 }
0x1077   : > { %v14783_v60 = vpop.permute.xlu1 %7786 }
0x107b   : > { %v14785_v20 = vpop.permute.xlu1 %7790 }
0x107f   : > { %v14787_v59 = vpop.permute.xlu1 %7794 }
0x1083   : > { %v14789_v33 = vpop.permute.xlu1 %7798 }
0x1087   : > { %v8162_v37 = vpop.permute.xlu1 %8161 }
0x1088   : > { %10458 = vmatprep.subr.bf16.mxu1 %v8162_v37 }
0x108b   : > { %v8164_v19 = vpop.permute.xlu1 %8163 }
0x112c   : > { %v10388_v38 = vpop.f32.mrb[200].mxu1 }
0x112d   : > { %v7343_v41 = vpop.f32.mrb[201].mxu1 }
0x112e   : > { %v10389_v50 = vpop.f32.mrb[202].mxu1 }
0x112f   : > { %v7407_v26 = vpack.c.bf16 %v10389_v50, %v10388_v38  ;;  %v7346_v47 = vpop.f32.mrb[203].mxu1 }
0x1130   : > { %v7406_v11 = vpack.c.bf16 %v7346_v47, %v7343_v41 }
0x1132   : > { %9331 = vmatmul.mubr.msk.bf16.vlgmr.msra.gmra.mrb[136].mxu1 %vm15740_vm10, %v7406_v11  ;;  %10410 = vmatprep.mubr.msk.bf16.mxu0 %vm15741_vm12, %v7406_v11  ;;  %vm15745_vm12 = vmmov %vm15744_vm0 }
0x1133   : > { %10459 = vmatpush3.bf16.msra.mxu1 %v8162_v37  ;;  %10411 = vmatmul.mubr.msk.bf16.vlgmr.msra.gmra.mrb[168].mxu0 %vm15743_vm15, %v7407_v26  ;;  %vm15747_vm10 = vmmov %vm15744_vm0 }
0x1134   : > { %10427 = vmatpush3.bf16.xpose.msra.mxu0 %v7849_v36  ;;  %10460 = vmatprep.subr.bf16.mxu1 %v8164_v19  ;;  %v10392_v22 = vpop.f32.mrb[204].mxu1  ;;  %v7852_v58 = vsel %vm15747_vm10, %v7811_v53, 0  ;;  %vm15748_vm15 = vmmov %vm15744_vm0 }
0x1135   : > { %10907 = vmatprep.subr.msk.bf16.mxu0 %vm15744_vm0, %v7811_v53  ;;  %v7359_v7 = vpop.f32.mrb[205].mxu1  ;;  %7560 = vmatprep.mubr.bf16.mxu1 %v15534_v21  ;;  %vm15751_vm10 = vmmov %vm15744_vm0 }
0x1136   : > { %v10393_v52 = vpop.f32.mrb[206].mxu1  ;;  %v7855_v61 = vsel %vm15751_vm10, %v14770_v44, 0  ;;  %vm15755_vm10 = vmmov %vm15744_vm0 }
0x1137   : > { %v7409_v24 = vpack.c.bf16 %v10393_v52, %v10392_v22  ;;  %10461 = vmatpush3.bf16.msra.mxu1 %v8164_v19  ;;  %v7362_v34 = vpop.f32.mrb[207].mxu1  ;;  %v7858_v39 = vsel %vm15755_vm10, %v14774_v18, 0  ;;  %vm15762_vm10 = vmmov %vm15744_vm0 }
0x1138   : > { %v7408_v30 = vpack.c.bf16 %v7362_v34, %v7359_v7  ;;  %v7864_v29 = vsel %vm15762_vm10, %v14778_v54, 0  ;;  %vm15769_vm10 = vmmov %vm15744_vm0 }
0x113a   : > { %9332 = vmatmul.mubr.msk.bf16.gmra.mrb[140].mxu1 %vm15745_vm12, %v7407_v26  ;;  %10414 = vmatprep.mubr.msk.bf16.mxu0 %vm15746_vm6, %v7408_v30  ;;  %vm15749_vm12 = vmmov %vm15744_vm0 }
0x113b   : > { %10415 = vmatmul.mubr.msk.bf16.gmra.mrb[172].mxu0 %vm15748_vm15, %v7409_v24  ;;  %7570 = vmatprep.mubr.bf16.mxu1 %v15534_v21  ;;  %vm15750_vm6 = vmmov %vm15744_vm0 }
0x113c   : > { %10429 = vmatpush3.bf16.xpose.msra.mxu0 %v7852_v58  ;;  %v10396_v56 = vpop.f32.mrb[208].mxu1  ;;  %vm15752_vm15 = vmmov %vm15744_vm0 }
0x113d   : > { %10908 = vmatprep.subr.msk.bf16.mxu0 %vm15744_vm0, %v14770_v44  ;;  %v7375_v12 = vpop.f32.mrb[209].mxu1  ;;  %v7785_v44 = vpop.permute.xlu0 %7784 }
0x113e   : > { %v10397_v2 = vpop.f32.mrb[210].mxu1 }
0x113f   : > { %v7411_v13 = vpack.c.bf16 %v10397_v2, %v10396_v56  ;;  %v7378_v45 = vpop.f32.mrb[211].mxu1 }
0x1140   : > { %v7410_v62 = vpack.c.bf16 %v7378_v45, %v7375_v12  ;;  %v15778_v45 = vld [vmem:[#allocation77_spill] sm:$0xff] }
0x1141   : > { %v7789_v25 = vpop.permute.xlu0 %7788 }
0x1142   : > { %9333 = vmatmul.mubr.msk.bf16.gmra.mrb[144].mxu1 %vm15749_vm12, %v7408_v30  ;;  %10418 = vmatprep.mubr.msk.bf16.mxu0 %vm15750_vm6, %v7410_v62  ;;  %vm15753_vm12 = vmmov %vm15744_vm0 }
0x1143   : > { %10419 = vmatmul.mubr.msk.bf16.gmra.mrb[176].mxu0 %vm15752_vm15, %v7411_v13  ;;  %7580 = vmatprep.mubr.bf16.mxu1 %v15534_v21  ;;  %vm15754_vm6 = vmmov %vm15744_vm0 }
0x1144   : > { %10431 = vmatpush3.bf16.xpose.msra.mxu0 %v7855_v61  ;;  %v10400_v57 = vpop.f32.mrb[212].mxu1  ;;  %vm15756_vm15 = vmmov %vm15744_vm0  ;;  %v15780_v61 = vld [vmem:[#allocation80_spill] sm:$0xff] }
0x1145   : > { %10909 = vmatprep.subr.msk.bf16.mxu0 %vm15744_vm0, %v14774_v18  ;;  %v7391_v51 = vpop.f32.mrb[213].mxu1  ;;  %v7793_v18 = vpop.permute.xlu0 %7792 }
0x1146   : > { %v10401_v3 = vpop.f32.mrb[214].mxu1 }
0x1147   : > { %v7413_v27 = vpack.c.bf16 %v10401_v3, %v10400_v57  ;;  %v7394_v63 = vpop.f32.mrb[215].mxu1  ;;  %v15784_v3 = vld [vmem:[#allocation79_spill] sm:$0xff] }
0x1148   : > { %v7412_v6 = vpack.c.bf16 %v7394_v63, %v7391_v51  ;;  %v15786_v63 = vld [vmem:[#allocation81_spill] sm:$0xff] }
0x1149   : > { %v7797_v10 = vpop.permute.xlu0 %7796 }
0x114a   : > { %9334 = vmatmul.mubr.msk.bf16.gmra.mrb[148].mxu1 %vm15753_vm12, %v7409_v24  ;;  %10422 = vmatprep.mubr.msk.bf16.mxu0 %vm15754_vm6, %v7412_v6  ;;  %vm15760_vm12 = vmmov %vm15744_vm0 }
0x114b   : > { %10423 = vmatmul.mubr.msk.bf16.gmra.mrb[180].mxu0 %vm15756_vm15, %v7413_v27  ;;  %7590 = vmatprep.mubr.bf16.mxu1 %v15534_v21  ;;  %vm15761_vm6 = vmmov %vm15744_vm0 }
0x114c   : > { %10433 = vmatpush3.bf16.xpose.msra.mxu0 %v7858_v39  ;;  %10442 = vmatprep.mubr.msk.bf16.mxu0 %vm15757_vm8, %v7785_v44  ;;  %vm15763_vm8 = vmmov %vm15744_vm0  ;;  %v15788_v39 = vld [vmem:[#allocation57_spill] sm:$0xff] }
0x114d   : > { %10910 = vmatprep.subr.msk.bf16.mxu0 %vm15744_vm0, %v7817_v14  ;;  %vm15764_vm15 = vmmov %vm15744_vm0 }
0x1152   : > { %9335 = vmatmul.mubr.msk.bf16.gmra.mrb[152].mxu1 %vm15758_vm14, %v7410_v62  ;;  %vm15765_vm14 = vmmov %vm15744_vm0 }
0x1153   : > { %7600 = vmatprep.mubr.bf16.mxu1 %v15534_v21  ;;  %v7867_v46 = vsel %vm15765_vm14, %v7821_v31, 0  ;;  %vm15772_vm14 = vmmov %vm15744_vm0 }
0x1154   : > { %10435 = vmatpush3.bf16.xpose.msra.mxu0 %v7861_v40 }
0x1155   : > { %10911 = vmatprep.subr.msk.bf16.mxu0 %vm15760_vm12, %v14778_v54  ;;  %vm15767_vm12 = vmmov %vm15744_vm0 }
0x1156   : > { %v7870_v23 = vsel %vm15767_vm12, %v14781_v42, 0  ;;  %vm15792_vm12 = vmmov %vm15744_vm0 }
0x115a   : > { %9336 = vmatmul.mubr.msk.bf16.gmra.mrb[156].mxu1 %vm15761_vm6, %v7411_v13  ;;  %vm15768_vm6 = vmmov %vm15744_vm0  ;;  %v15776_v13 = vld [vmem:[#allocation75_spill] sm:$0xff] }
0x115b   : > { %7610 = vmatprep.mubr.bf16.mxu1 %v15534_v21 }
0x115c   : > { %10437 = vmatpush3.bf16.xpose.msra.mxu0 %v7864_v29 }
0x115d   : > { %10912 = vmatprep.subr.msk.bf16.mxu0 %vm15763_vm8, %v7821_v31  ;;  %vm15770_vm8 = vmmov %vm15744_vm0  ;;  %v15782_v31 = vld [vmem:[#allocation82_spill] sm:$0xff] }
0x1162   : > { %9337 = vmatmul.mubr.msk.bf16.gmra.mrb[160].mxu1 %vm15764_vm15, %v7412_v6  ;;  %vm15771_vm15 = vmmov %vm15744_vm0 }
0x1163   : > { %7620 = vmatprep.mubr.bf16.mxu1 %v15534_v21 }
0x1164   : > { %10439 = vmatpush3.bf16.xpose.msra.mxu0 %v7867_v46 }
0x1165   : > { %10913 = vmatprep.subr.msk.bf16.mxu0 %vm15766_vm13, %v14781_v42  ;;  %vm15773_vm13 = vmmov %vm15744_vm0 }
0x116a   : > { %9338 = vmatmul.mubr.msk.bf16.gmra.mrb[164].mxu1 %vm15744_vm0, %v7413_v27 }
0x116c   : > { %10441 = vmatpush3.bf16.xpose.msra.mxu0 %v7870_v23 }
0x1173   : > { %10443 = vmatmul.mubr.msk.bf16.vlgmr.msra.gmra.mrb[232].mxu0 %vm15768_vm6, %v14783_v60  ;;  %vm15793_vm6 = vmmov %vm15744_vm0 }
0x1174   : > { %10446 = vmatprep.mubr.msk.bf16.mxu0 %vm15769_vm10, %v7789_v25  ;;  %vm15794_vm10 = vmmov %vm15744_vm0 }
0x117b   : > { %10447 = vmatmul.mubr.msk.bf16.gmra.mrb[236].mxu0 %vm15770_vm8, %v14785_v20  ;;  %vm15795_vm8 = vmmov %vm15744_vm0 }
0x117c   : > { %10450 = vmatprep.mubr.msk.bf16.mxu0 %vm15771_vm15, %v7793_v18  ;;  %vm15796_vm15 = vmmov %vm15744_vm0 }
0x1183   : > { %10451 = vmatmul.mubr.msk.bf16.gmra.mrb[240].mxu0 %vm15772_vm14, %v14787_v59  ;;  %vm15797_vm14 = vmmov %vm15744_vm0 }
0x1184   : > { %10454 = vmatprep.mubr.msk.bf16.mxu0 %vm15773_vm13, %v7797_v10  ;;  %vm15798_vm13 = vmmov %vm15744_vm0 }
0x118b   : > { %10455 = vmatmul.mubr.msk.bf16.gmra.mrb[244].mxu0 %vm15744_vm0, %v14789_v33 }
0x1246   : > { %v10444_v16 = vpop.f32.mrb[232].mxu0 }
0x1247   : > { %v7971_v8 = vmul.f32 0.125, %v10444_v16  ;;  %v7906_v5 = vpop.f32.mrb[233].mxu0 }
0x1248   : > { %v10445_v54 = vpop.f32.mrb[234].mxu0  ;;  %v7969_v48 = vmul.f32 0.125, %v7906_v5 }
0x1249   : > { %v7909_v42 = vpop.f32.mrb[235].mxu0  ;;  %v14851_v60 = vsel %vm13540_vm1, %v7971_v8, -1e+30  ;;  %v7972_v37 = vmul.f32 0.125, %v10445_v54  ;;  %vm15774_vm1 = vnez %v15609_v4 }
0x124a   : > { %v7970_v20 = vmul.f32 0.125, %v7909_v42  ;;  %8005 = vmax.xlane.f32.xlu0 %v14851_v60  ;;  %v7985_v33 = vsel %vm13557_vm3, %v7969_v48, -1e+30  ;;  %vm15777_vm3 = vnez %v15776_v13 }
0x124b   : > { %v14863_v26 = vsel %vm13577_vm4, %v7972_v37, -1e+30  ;;  %vm15779_vm4 = vnez %v15778_v45 }
0x124c   : > { %v14856_v59 = vsel %vm13550_vm2, %v7970_v20, -1e+30  ;;  %vm15775_vm2 = vnez %v15611_v43 }
0x124d   : > { %8003 = vmax.xlane.f32.xlu1 %v14856_v59 }
0x124e   : > { %8001 = vmax.xlane.f32.xlu0 %v7985_v33  ;;  %v10448_v38 = vpop.f32.mrb[236].mxu0 }
0x124f   : > { %v7975_v41 = vmul.f32 0.125, %v10448_v38  ;;  %v7922_v50 = vpop.f32.mrb[237].mxu0 }
0x1250   : > { %v10449_v0 = vpop.f32.mrb[238].mxu0  ;;  %v7973_v47 = vmul.f32 0.125, %v7922_v50 }
0x1251   : > { %v7976_v11 = vmul.f32 0.125, %v10449_v0  ;;  %v7925_v36 = vpop.f32.mrb[239].mxu0  ;;  %v7991_v9 = vsel %vm15661_vm9, %v7975_v41, -1e+30  ;;  %vm15785_vm9 = vnez %v15784_v3 }
0x1252   : > { %8007 = vmax.xlane.f32.xlu0 %v14863_v26  ;;  %8013 = vmax.xlane.f32.xlu1 %v7991_v9  ;;  %v7974_v49 = vmul.f32 0.125, %v7925_v36  ;;  %v14870_v19 = vsel %vm15662_vm11, %v7973_v47, -1e+30  ;;  %vm15787_vm11 = vnez %v15786_v63 }
0x1253   : > { %v14874_v53 = vsel %vm13584_vm5, %v7976_v11, -1e+30  ;;  %vm15781_vm5 = vnez %v15780_v61 }
0x1254   : > { %v14880_v52 = vsel %vm13606_vm7, %v7974_v49, -1e+30  ;;  %vm15783_vm7 = vnez %v15782_v31 }
0x1256   : > { %8009 = vmax.xlane.f32.xlu1 %v14870_v19  ;;  %8015 = vmax.xlane.f32.xlu0 %v14874_v53  ;;  %v10452_v28 = vpop.f32.mrb[240].mxu0 }
0x1257   : > { %v7938_v22 = vpop.f32.mrb[241].mxu0  ;;  %v7979_v30 = vmul.f32 0.125, %v10452_v28 }
0x1258   : > { %v10453_v15 = vpop.f32.mrb[242].mxu0  ;;  %v7977_v58 = vmul.f32 0.125, %v7938_v22 }
0x1259   : > { %v7941_v7 = vpop.f32.mrb[243].mxu0  ;;  %v7980_v56 = vmul.f32 0.125, %v10453_v15  ;;  %v14889_v1 = vsel %vm15774_vm1, %v7979_v30, -1e+30  ;;  %vm15799_vm1 = vmmov %vm15744_vm0 }
0x125a   : > { %8011 = vmax.xlane.f32.xlu0 %v14880_v52  ;;  %v7978_v12 = vmul.f32 0.125, %v7941_v7  ;;  %v14894_v14 = vsel %vm15775_vm2, %v7977_v58, -1e+30  ;;  %v15789_v7 = vld [vmem:[#allocation59_spill] sm:$0xff]  ;;  %vm15800_vm2 = vmmov %vm15744_vm0 }
0x125c   : > { %v14904_v62 = vsel %vm15779_vm4, %v7978_v12, -1e+30  ;;  %vm15802_vm4 = vmmov %vm15744_vm0 }
0x125e   : > { %v10456_v32 = vpop.f32.mrb[244].mxu0 }
0x125f   : > { %v7954_v24 = vpop.f32.mrb[245].mxu0  ;;  %v7983_v2 = vmul.f32 0.125, %v10456_v32  ;;  %v15791_v32 = vld [vmem:[#allocation56_spill] sm:$0xff] }
0x1260   : > { %v10457_v34 = vpop.f32.mrb[246].mxu0 }
0x1261   : > { %v7957_v17 = vpop.f32.mrb[247].mxu0  ;;  %v7984_v4 = vmul.f32 0.125, %v10457_v34  ;;  %v14908_v57 = vsel %vm15781_vm5, %v7983_v2, -1e+30  ;;  %vm15803_vm5 = vmmov %vm15744_vm0 }
0x1262   : > { %v7982_v43 = vmul.f32 0.125, %v7957_v17 }
0x1263   : > { %v14918_v27 = vsel %vm15785_vm9, %v7984_v4, -1e+30  ;;  %vm15805_vm9 = vmmov %vm15744_vm0 }
0x1264   : > { %v14924_v6 = vsel %vm15787_vm11, %v7982_v43, -1e+30  ;;  %vm15806_vm11 = vmmov %vm15744_vm0 }
0x1267   : > { %8167 = vrot.lane.b32.xlu1 %v15687_v55, %s12137_s23  ;;  %v14898_v55 = vsel %vm15777_vm3, %v7980_v56, -1e+30  ;;  %vm15801_vm3 = vmmov %vm15744_vm0 }
0x1270   : > { %8165 = vrot.lane.b32.xlu0 %v15684_v35, %s12137_s23  ;;  %v7981_v35 = vmul.f32 0.125, %v7954_v24 }
0x1272   : > { %v14914_v51 = vsel %vm15783_vm7, %v7981_v35, -1e+30  ;;  %vm15804_vm7 = vmmov %vm15744_vm0 }
0x128b   : > { %8021 = vmax.xlane.f32.xlu1 %v14889_v1 }
0x128f   : > { %8017 = vmax.xlane.f32.xlu1 %v14894_v14  ;;  %8023 = vmax.xlane.f32.xlu0 %v14898_v55 }
0x1293   : > { %8019 = vmax.xlane.f32.xlu0 %v14904_v62  ;;  %8029 = vmax.xlane.f32.xlu1 %v14908_v57 }
0x1297   : > { %8025 = vmax.xlane.f32.xlu1 %v14914_v51  ;;  %8031 = vmax.xlane.f32.xlu0 %v14918_v27 }
0x129b   : > { %8027 = vmax.xlane.f32.xlu0 %v14924_v6 }
0x12a8   : > { %8169 = vrot.lane.b32.xlu1 %v15788_v39, %s12137_s23 }
0x12d7   : > { %v8006_v44 = vpop.xlane.xlu0 %8005 }
0x12d8   : > { %v8035_v40 = vsub.f32 %v14851_v60, %v8006_v44 }
0x12da   : > { %v8053_v29 = vmul.f32 1.442695, %v8035_v40  ;;  %v8004_v46 = vpop.xlane.xlu1 %8003 }
0x12db   : > { %v8002_v23 = vpop.xlane.xlu0 %8001  ;;  %v8034_v54 = vsub.f32 %v14856_v59, %v8004_v46 }
0x12dc   : > { %11749 = vpow2.f32 %v8053_v29  ;;  %v8033_v25 = vsub.f32 %v7985_v33, %v8002_v23 }
0x12dd   : > { %v8051_v41 = vmul.f32 1.442695, %v8034_v54 }
0x12de   : > { %v8049_v18 = vmul.f32 1.442695, %v8033_v25 }
0x12df   : > { %v8014_v10 = vpop.xlane.xlu1 %8013  ;;  %v8008_v16 = vpop.xlane.xlu0 %8007 }
0x12e0   : > { %11751 = vpow2.f32 %v8049_v18  ;;  %v8039_v8 = vsub.f32 %v7991_v9, %v8014_v10  ;;  %v8036_v5 = vsub.f32 %v14863_v26, %v8008_v16  ;;  %v11384_v10 = vld [vmem:[#allocation12 + $0x1e8] ss:$12 sps:$4 sm:$0xff]   ;;  %v11388_v16 = vld [vmem:[#allocation12 + $0x200] ss:$12 sps:$4 sm:$0xff]  }
0x12e1   : > { %10490 = vmatprep.subr.bf16.mxu0 %v11384_v10 }
0x12e2   : > { %v8061_v48 = vmul.f32 1.442695, %v8039_v8  ;;  %v8055_v42 = vmul.f32 1.442695, %v8036_v5  ;;  %10491 = vmatpush3.bf16.msra.mxu0 %v11384_v10  ;;  %v11392_v8 = vld [vmem:[#allocation12 + $0x218] ss:$12 sps:$4 sm:$0xff]  }
0x12e3   : > { %v8010_v20 = vpop.xlane.xlu1 %8009  ;;  %v8016_v37 = vpop.xlane.xlu0 %8015  ;;  %10492 = vmatprep.subr.bf16.mxu0 %v11388_v16 }
0x12e4   : > { %11753 = vpow2.f32 %v8061_v48  ;;  %v8037_v60 = vsub.f32 %v14870_v19, %v8010_v20  ;;  %v8040_v38 = vsub.f32 %v14874_v53, %v8016_v37 }
0x12e5   : > { %11755 = vpow2.f32 %v8055_v42 }
0x12e6   : > { %v14934_v33 = vpop.eup %11749  ;;  %v8057_v50 = vmul.f32 1.442695, %v8037_v60  ;;  %v8063_v0 = vmul.f32 1.442695, %v8040_v38  ;;  %10493 = vmatpush3.bf16.msra.mxu0 %v11388_v16 }
0x12e7   : > { %8085 = vadd.xlane.f32.xlu0 %v14934_v33  ;;  %v8012_v26 = vpop.xlane.xlu0 %8011  ;;  %v8168_v9 = vpop.permute.xlu1 %8167  ;;  %10494 = vmatprep.subr.bf16.mxu0 %v11392_v8 }
0x12e8   : > { %11757 = vpow2.f32 %v8057_v50  ;;  %v8038_v59 = vsub.f32 %v14880_v52, %v8012_v26  ;;  %v15790_v52 = vld [vmem:[#allocation58_spill] sm:$0xff] }
0x12e9   : > { %11759 = vpow2.f32 %v8051_v41 }
0x12ea   : > { %v14938_v47 = vpop.eup %11751  ;;  %v8059_v11 = vmul.f32 1.442695, %v8038_v59  ;;  %11761 = vpow2.f32 %v8063_v0  ;;  %10495 = vmatpush3.bf16.msra.mxu0 %v11392_v8 }
0x12eb   : > { %8081 = vadd.xlane.f32.xlu0 %v14938_v47  ;;  %v8166_v36 = vpop.permute.xlu0 %8165 }
0x12ec   : > { %11763 = vpow2.f32 %v8059_v11  ;;  %10462 = vmatprep.subr.bf16.mxu1 %v8166_v36 }
0x12ed   : > { %10463 = vmatpush3.bf16.msra.mxu1 %v8166_v36 }
0x12ee   : > { %v14941_v49 = vpop.eup %11753  ;;  %10464 = vmatprep.subr.bf16.mxu1 %v8168_v9 }
0x12ef   : > { %v14943_v19 = vpop.eup %11755  ;;  %8093 = vadd.xlane.f32.xlu1 %v14941_v49 }
0x12f0   : > { %8087 = vadd.xlane.f32.xlu0 %v14943_v19 }
0x12f1   : > { %10465 = vmatpush3.bf16.msra.mxu1 %v8168_v9 }
0x12f2   : > { %v14947_v53 = vpop.eup %11757 }
0x12f3   : > { %v14949_v28 = vpop.eup %11759  ;;  %8089 = vadd.xlane.f32.xlu1 %v14947_v53 }
0x12f4   : > { %8083 = vadd.xlane.f32.xlu0 %v14949_v28  ;;  %v14953_v22 = vpop.eup %11761 }
0x12f6   : > { %v14955_v15 = vpop.eup %11763 }
0x12f7   : > { %8095 = vadd.xlane.f32.xlu1 %v14953_v22 }
0x12f8   : > { %8091 = vadd.xlane.f32.xlu0 %v14955_v15 }
0x1308   : > { %8173 = vrot.lane.b32.xlu1 %v15789_v7, %s12137_s23 }
0x130c   : > { %8175 = vrot.lane.b32.xlu1 %v15790_v52, %s12137_s23 }
0x130e   : > { %8171 = vrot.lane.b32.xlu0 %v15791_v32, %s12137_s23 }
0x1318   : > { %v8022_v24 = vpop.xlane.xlu1 %8021 }
0x1319   : > { %v8043_v30 = vsub.f32 %v14889_v1, %v8022_v24 }
0x131b   : > { %v8069_v13 = vmul.f32 1.442695, %v8043_v30 }
0x131c   : > { %v8018_v34 = vpop.xlane.xlu1 %8017  ;;  %v8024_v17 = vpop.xlane.xlu0 %8023 }
0x131d   : > { %v8041_v58 = vsub.f32 %v14894_v14, %v8018_v34  ;;  %v8044_v4 = vsub.f32 %v14898_v55, %v8024_v17  ;;  %v11383_v17 = vld [vmem:[#allocation12 + $0x1e4] ss:$12 sps:$4 sm:$0xff]  }
0x131f   : > { %v8065_v56 = vmul.f32 1.442695, %v8041_v58  ;;  %v8071_v3 = vmul.f32 1.442695, %v8044_v4 }
0x1320   : > { %v8030_v12 = vpop.xlane.xlu1 %8029  ;;  %v8020_v2 = vpop.xlane.xlu0 %8019 }
0x1321   : > { %11765 = vpow2.f32 %v8065_v56  ;;  %v8042_v35 = vsub.f32 %v14904_v62, %v8020_v2  ;;  %v8047_v1 = vsub.f32 %v14908_v57, %v8030_v12  ;;  %v11381_v56 = vld [vmem:[#allocation12 + $0x1e0] ss:$12 sps:$4 sm:$0xff]   ;;  %v11387_v12 = vld [vmem:[#allocation12 + $0x1fc] ss:$12 sps:$4 sm:$0xff]  }
0x1322   : > { %11767 = vpow2.f32 %v8069_v13 }
0x1323   : > { %v8067_v45 = vmul.f32 1.442695, %v8042_v35  ;;  %v8077_v62 = vmul.f32 1.442695, %v8047_v1 }
0x1324   : > { %v8026_v61 = vpop.xlane.xlu1 %8025  ;;  %v8032_v43 = vpop.xlane.xlu0 %8031 }
0x1325   : > { %v8045_v31 = vsub.f32 %v14914_v51, %v8026_v61  ;;  %11769 = vpow2.f32 %v8067_v45  ;;  %v8048_v55 = vsub.f32 %v14918_v27, %v8032_v43  ;;  %v11389_v45 = vld [vmem:[#allocation12 + $0x210] ss:$12 sps:$4 sm:$0xff]  }
0x1327   : > { %v8073_v14 = vmul.f32 1.442695, %v8045_v31  ;;  %v8079_v57 = vmul.f32 1.442695, %v8048_v55 }
0x1328   : > { %v8170_v63 = vpop.permute.xlu1 %8169  ;;  %v8028_v39 = vpop.xlane.xlu0 %8027 }
0x1329   : > { %11771 = vpow2.f32 %v8073_v14  ;;  %v8046_v44 = vsub.f32 %v14924_v6, %v8028_v39  ;;  %10466 = vmatprep.subr.bf16.mxu1 %v8170_v63 }
0x132a   : > { %11773 = vpow2.f32 %v8071_v3  ;;  %10467 = vmatpush3.bf16.msra.mxu1 %v8170_v63 }
0x132b   : > { %v14973_v40 = vpop.eup %11765  ;;  %v8075_v29 = vmul.f32 1.442695, %v8046_v44 }
0x132c   : > { %v14976_v51 = vpop.eup %11767 }
0x132d   : > { %11775 = vpow2.f32 %v8075_v29  ;;  %8097 = vadd.xlane.f32.xlu0 %v14973_v40 }
0x132e   : > { %11777 = vpow2.f32 %v8077_v62 }
0x132f   : > { %v14978_v46 = vpop.eup %11769  ;;  %11779 = vpow2.f32 %v8079_v57 }
0x1330   : > { %8099 = vadd.xlane.f32.xlu1 %v14978_v46 }
0x1331   : > { %8101 = vadd.xlane.f32.xlu0 %v14976_v51 }
0x1333   : > { %v14982_v6 = vpop.eup %11771 }
0x1334   : > { %v14984_v27 = vpop.eup %11773  ;;  %8105 = vadd.xlane.f32.xlu1 %v14982_v6 }
0x1335   : > { %8103 = vadd.xlane.f32.xlu0 %v14984_v27 }
0x1337   : > { %v14988_v23 = vpop.eup %11775 }
0x1338   : > { %v14990_v25 = vpop.eup %11777 }
0x1339   : > { %8109 = vadd.xlane.f32.xlu1 %v14990_v25  ;;  %8107 = vadd.xlane.f32.xlu0 %v14988_v23  ;;  %v14994_v18 = vpop.eup %11779 }
0x133d   : > { %8111 = vadd.xlane.f32.xlu0 %v14994_v18 }
0x1374   : > { %v8086_v5 = vpop.xlane.xlu0 %8085 }
0x1378   : > { %v8082_v54 = vpop.xlane.xlu0 %8081 }
0x1379   : > { %11781 = vrcp.f32 %v8082_v54 }
0x137c   : > { %v8094_v48 = vpop.xlane.xlu1 %8093 }
0x137d   : > { %v8088_v42 = vpop.xlane.xlu0 %8087 }
0x1380   : > { %v8090_v20 = vpop.xlane.xlu1 %8089 }
0x1381   : > { %v8084_v37 = vpop.xlane.xlu0 %8083 }
0x1382   : > { %11783 = vrcp.f32 %v8084_v37 }
0x1383   : > { %11785 = vrcp.f32 %v8088_v42  ;;  %v11782_v0 = vpop.eup %11781 }
0x1384   : > { %11787 = vrcp.f32 %v8086_v5  ;;  %v8096_v60 = vpop.xlane.xlu1 %8095  ;;  %v8114_v11 = vmul.f32 %v11782_v0, %v14938_v47 }
0x1385   : > { %11789 = vrcp.f32 %v8090_v20  ;;  %v8092_v38 = vpop.xlane.xlu0 %8091 }
0x1386   : > { %11791 = vrcp.f32 %v8092_v38 }
0x1387   : > { %11793 = vrcp.f32 %v8096_v60 }
0x1388   : > { %v8174_v41 = vpop.permute.xlu1 %8173  ;;  %11795 = vrcp.f32 %v8094_v48 }
0x1389   : > { %v8172_v50 = vpop.permute.xlu0 %8171 }
0x138a   : > { %10468 = vmatprep.subr.bf16.mxu1 %v8172_v50 }
0x138b   : > { %10469 = vmatpush3.bf16.msra.mxu1 %v8172_v50 }
0x138c   : > { %v11784_v26 = vpop.eup %11783  ;;  %10470 = vmatprep.subr.bf16.mxu1 %v8174_v41  ;;  %v8176_v52 = vpop.permute.xlu1 %8175 }
0x138d   : > { %v11786_v59 = vpop.eup %11785  ;;  %v8116_v36 = vmul.f32 %v11784_v26, %v14949_v28 }
0x138e   : > { %v11788_v9 = vpop.eup %11787  ;;  %v8120_v34 = vmul.f32 %v11786_v59, %v14943_v19  ;;  %v11385_v19 = vld [vmem:[#allocation12 + $0x1f8] ss:$12 sps:$4 sm:$0xff]  }
0x138f   : > { %v11790_v7 = vpop.eup %11789  ;;  %10471 = vmatpush3.bf16.msra.mxu1 %v8174_v41  ;;  %v8145_v32 = vpack.c.bf16 %v8116_v36, %v8114_v11  ;;  %v8118_v58 = vmul.f32 %v11788_v9, %v14934_v33  ;;  %v11396_v41 = vld [vmem:[#allocation12 + $0x230] ss:$12 sps:$4 sm:$0xff]  }
0x1390   : > { %v11792_v24 = vpop.eup %11791  ;;  %10472 = vmatprep.subr.bf16.mxu1 %v8176_v52  ;;  %v8122_v47 = vmul.f32 %v11790_v7, %v14947_v53  ;;  %10496 = vmatprep.subr.bf16.mxu0 %v11396_v41 }
0x1391   : > { %10474 = vmatprep.mubr.bf16.mxu1 %v8145_v32  ;;  %v8124_v30 = vmul.f32 %v11792_v24, %v14955_v15  ;;  %v8146_v28 = vpack.c.bf16 %v8120_v34, %v8118_v58  ;;  %v11794_v2 = vpop.eup %11793  ;;  %v11391_v15 = vld [vmem:[#allocation12 + $0x214] ss:$12 sps:$4 sm:$0xff]   ;;  %10497 = vmatpush3.bf16.msra.mxu0 %v11396_v41 }
0x1392   : > { %v11796_v35 = vpop.eup %11795  ;;  %v8128_v4 = vmul.f32 %v11794_v2, %v14953_v22 }
0x1393   : > { %10473 = vmatpush3.bf16.msra.mxu1 %v8176_v52  ;;  %v8147_v13 = vpack.c.bf16 %v8124_v30, %v8122_v47  ;;  %v8126_v33 = vmul.f32 %v11796_v35, %v14941_v49  ;;  %v15807_v35 = vld [vmem:[#allocation34_spill] sm:$0xff] }
0x1394   : > { %8394 = vmatprep.subr.bf16.mxu1 %v11383_v17 }
0x1395   : > { %v8148_v53 = vpack.c.bf16 %v8128_v4, %v8126_v33  ;;  %v15808_v4 = vld [vmem:[#allocation33_spill] sm:$0xff]  ;;  %v15809_v33 = vld [vmem:[#allocation35_spill] sm:$0xff] }
0x1396   : > { %10475 = vmatmul.mubr.bf16.vlgmr.msra.gmra.mrb[216].mxu1 %v8146_v28 }
0x1397   : > { %10478 = vmatprep.mubr.bf16.mxu1 %v8147_v13  ;;  %8395 = vmatpush1.bf16.msra.mxu1 %v11381_v56  ;;  %v8652_v13 = vld [vmem:[%s15256_s8] sm:$0x7] }
0x1398   : > { %8396 = vmatprep.subr.bf16.mxu1 %v11387_v12 }
0x139b   : > { %8397 = vmatpush1.bf16.msra.mxu1 %v11385_v19  ;;  %v15041_v19 = vrot.slane %v8652_v13, %v15807_v35  ;;  %v11874_v35 = vld [vmem:[%s12420_s27 + $0x50] sm:$0xff] }
0x139c   : > { %8398 = vmatprep.subr.bf16.mxu1 %v11391_v15  ;;  %v15044_v15 = vrot.slane %v8652_v13, %v15808_v4 }
0x139e   : > { %10479 = vmatmul.mubr.bf16.gmra.mrb[220].mxu1 %v8148_v53 }
0x139f   : > { %8399 = vmatpush1.bf16.msra.mxu1 %v11389_v45  ;;  %v15047_v45 = vrot.slane %v8652_v13, %v15809_v33  ;;  %v11875_v33 = vld [vmem:[%s12420_s27 + $0xb8] sm:$0xff] }
0x13ba   : > { %v8098_v61 = vpop.xlane.xlu0 %8097 }
0x13bb   : > { %11797 = vrcp.f32 %v8098_v61 }
0x13bd   : > { %v8100_v43 = vpop.xlane.xlu1 %8099 }
0x13be   : > { %v8102_v31 = vpop.xlane.xlu0 %8101  ;;  %11799 = vrcp.f32 %v8100_v43 }
0x13bf   : > { %11801 = vrcp.f32 %v8102_v31 }
0x13c1   : > { %v8106_v3 = vpop.xlane.xlu1 %8105 }
0x13c2   : > { %v8104_v1 = vpop.xlane.xlu0 %8103 }
0x13c3   : > { %11803 = vrcp.f32 %v8104_v1 }
0x13c4   : > { %11805 = vrcp.f32 %v8106_v3 }
0x13c5   : > { %v11798_v63 = vpop.eup %11797 }
0x13c6   : > { %v8110_v22 = vpop.xlane.xlu1 %8109  ;;  %v8108_v14 = vpop.xlane.xlu0 %8107  ;;  %v8130_v44 = vmul.f32 %v11798_v63, %v14973_v40 }
0x13c7   : > { %11807 = vrcp.f32 %v8108_v14  ;;  %v11861_v14 = vld [vmem:[%s12420_s27] sm:$0xff] }
0x13c8   : > { %v11800_v49 = vpop.eup %11799  ;;  %11809 = vrcp.f32 %v8110_v22 }
0x13c9   : > { %v8132_v62 = vmul.f32 %v11800_v49, %v14978_v46  ;;  %v11802_v55 = vpop.eup %11801 }
0x13ca   : > { %v8112_v39 = vpop.xlane.xlu0 %8111  ;;  %v8134_v10 = vmul.f32 %v11802_v55, %v14976_v51  ;;  %v11393_v51 = vld [vmem:[#allocation12 + $0x228] ss:$12 sps:$4 sm:$0xff]  }
0x13cb   : > { %11811 = vrcp.f32 %v8112_v39  ;;  %v8149_v29 = vpack.c.bf16 %v8132_v62, %v8130_v44  ;;  %v11862_v55 = vld [vmem:[%s12420_s27 + $0x8] sm:$0xff] }
0x13cd   : > { %v11804_v57 = vpop.eup %11803  ;;  %10482 = vmatprep.mubr.bf16.mxu1 %v8149_v29 }
0x13ce   : > { %v8136_v16 = vmul.f32 %v11804_v57, %v14984_v27  ;;  %v11806_v8 = vpop.eup %11805  ;;  %v11395_v27 = vld [vmem:[#allocation12 + $0x22c] ss:$12 sps:$4 sm:$0xff]   ;;  %v11863_v57 = vld [vmem:[%s12420_s27 + $0x40] sm:$0xff] }
0x13cf   : > { %v8138_v42 = vmul.f32 %v11806_v8, %v14982_v6  ;;  %8400 = vmatprep.subr.bf16.mxu1 %v11395_v27 }
0x13d0   : > { %v8150_v5 = vpack.c.bf16 %v8136_v16, %v8134_v10  ;;  %8401 = vmatpush1.bf16.msra.mxu1 %v11393_v51  ;;  %v11868_v51 = vld [vmem:[%s12420_s27 + $0x28] sm:$0xff] }
0x13d1   : > { %v11808_v54 = vpop.eup %11807 }
0x13d2   : > { %v11810_v48 = vpop.eup %11809  ;;  %10483 = vmatmul.mubr.bf16.gmra.mrb[224].mxu1 %v8150_v5  ;;  %v8140_v40 = vmul.f32 %v11808_v54, %v14988_v23  ;;  %v11864_v54 = vld [vmem:[%s12420_s27 + $0x18] sm:$0xff] }
0x13d3   : > { %v8142_v37 = vmul.f32 %v11810_v48, %v14990_v25 }
0x13d4   : > { %v8151_v46 = vpack.c.bf16 %v8140_v40, %v8138_v42  ;;  %v11865_v42 = vld [vmem:[%s12420_s27 + $0x10] sm:$0xff] }
0x13d5   : > { %v11812_v20 = vpop.eup %11811 }
0x13d6   : > { %v8144_v60 = vmul.f32 %v11812_v20, %v14994_v18  ;;  %10486 = vmatprep.mubr.bf16.mxu1 %v8151_v46  ;;  %v11866_v46 = vld [vmem:[%s12420_s27 + $0x20] sm:$0xff] }
0x13d8   : > { %v8152_v38 = vpack.c.bf16 %v8144_v60, %v8142_v37  ;;  %v11867_v60 = vld [vmem:[%s12420_s27 + $0x58] sm:$0xff] }
0x13da   : > { %10487 = vmatmul.mubr.bf16.gmra.mrb[228].mxu1 %v8152_v38 }
0x13db   : > { %8426 = vmatprep.mubr.bf16.mxu1 %v15534_v21 }
0x1469   : > { %v10476_v6 = vpop.f32.mrb[216].mxu1 }
0x146a   : > { %v8219_v23 = vpop.f32.mrb[217].mxu1 }
0x146b   : > { %v10477_v50 = vpop.f32.mrb[218].mxu1 }
0x146c   : > { %v8283_v0 = vpack.c.bf16 %v10477_v50, %v10476_v6  ;;  %v8222_v26 = vpop.f32.mrb[219].mxu1 }
0x146d   : > { %v8282_v25 = vpack.c.bf16 %v8222_v26, %v8219_v23 }
0x146f   : > { %9367 = vmatmul.mubr.msk.bf16.vlgmr.msra.gmra.mrb[136].mxu1 %vm15792_vm12, %v8282_v25  ;;  %10498 = vmatprep.mubr.msk.bf16.mxu0 %vm15793_vm6, %v8282_v25 }
0x1470   : > { %10499 = vmatmul.mubr.msk.bf16.vlgmr.msra.gmra.mrb[168].mxu0 %vm15794_vm10, %v8283_v0  ;;  %8436 = vmatprep.mubr.bf16.mxu1 %v15534_v21 }
0x1471   : > { %v10480_v18 = vpop.f32.mrb[220].mxu1 }
0x1472   : > { %v8235_v59 = vpop.f32.mrb[221].mxu1 }
0x1473   : > { %v10481_v11 = vpop.f32.mrb[222].mxu1 }
0x1474   : > { %v8285_v36 = vpack.c.bf16 %v10481_v11, %v10480_v18  ;;  %v8238_v9 = vpop.f32.mrb[223].mxu1 }
0x1475   : > { %v8284_v7 = vpack.c.bf16 %v8238_v9, %v8235_v59  ;;  %v11869_v59 = vld [vmem:[%s12420_s27 + $0x30] sm:$0xff] }
0x1477   : > { %9368 = vmatmul.mubr.msk.bf16.gmra.mrb[140].mxu1 %vm15795_vm8, %v8283_v0  ;;  %10502 = vmatprep.mubr.msk.bf16.mxu0 %vm15796_vm15, %v8284_v7 }
0x1478   : > { %10503 = vmatmul.mubr.msk.bf16.gmra.mrb[172].mxu0 %vm15797_vm14, %v8285_v36  ;;  %8446 = vmatprep.mubr.bf16.mxu1 %v15534_v21 }
0x147f   : > { %9369 = vmatmul.mubr.msk.bf16.gmra.mrb[144].mxu1 %vm15798_vm13, %v8284_v7 }
0x1480   : > { %8456 = vmatprep.mubr.bf16.mxu1 %v15534_v21 }
0x1487   : > { %9370 = vmatmul.mubr.msk.bf16.gmra.mrb[148].mxu1 %vm15744_vm0, %v8285_v36 }
0x1488   : > { %8466 = vmatprep.mubr.bf16.mxu1 %v15534_v21 }
0x14a5   : > { %v10484_v52 = vpop.f32.mrb[224].mxu1 }
0x14a6   : > { %v8251_v32 = vpop.f32.mrb[225].mxu1 }
0x14a7   : > { %v10485_v24 = vpop.f32.mrb[226].mxu1 }
0x14a8   : > { %v8287_v34 = vpack.c.bf16 %v10485_v24, %v10484_v52  ;;  %v8254_v17 = vpop.f32.mrb[227].mxu1 }
0x14a9   : > { %v8286_v30 = vpack.c.bf16 %v8254_v17, %v8251_v32  ;;  %v11870_v32 = vld [vmem:[%s12420_s27 + $0x38] sm:$0xff] }
0x14ab   : > { %9371 = vmatmul.mubr.msk.bf16.gmra.mrb[152].mxu1 %vm15799_vm1, %v8286_v30  ;;  %10506 = vmatprep.mubr.msk.bf16.mxu0 %vm15800_vm2, %v8286_v30 }
0x14ac   : > { %10507 = vmatmul.mubr.msk.bf16.gmra.mrb[176].mxu0 %vm15801_vm3, %v8287_v34  ;;  %8476 = vmatprep.mubr.bf16.mxu1 %v15534_v21 }
0x14ad   : > { %v10488_v58 = vpop.f32.mrb[228].mxu1 }
0x14ae   : > { %v8267_v47 = vpop.f32.mrb[229].mxu1 }
0x14af   : > { %v10489_v56 = vpop.f32.mrb[230].mxu1 }
0x14b0   : > { %v8289_v28 = vpack.c.bf16 %v10489_v56, %v10488_v58  ;;  %v8270_v12 = vpop.f32.mrb[231].mxu1  ;;  %v11872_v56 = vld [vmem:[%s12420_s27 + $0x48] sm:$0xff] }
0x14b1   : > { %v8288_v2 = vpack.c.bf16 %v8270_v12, %v8267_v47  ;;  %v11873_v12 = vld [vmem:[%s12420_s27 + $0x70] sm:$0xff] }
0x14b3   : > { %9372 = vmatmul.mubr.msk.bf16.gmra.mrb[156].mxu1 %vm15802_vm4, %v8287_v34  ;;  %10510 = vmatprep.mubr.msk.bf16.mxu0 %vm15803_vm5, %v8288_v2  ;;  %v11871_v34 = vld [vmem:[%s12420_s27 + $0xa0] sm:$0xff] }
0x14b4   : > { %10511 = vmatmul.mubr.msk.bf16.gmra.mrb[180].mxu0 %vm15804_vm7, %v8289_v28  ;;  %8486 = vmatprep.mubr.bf16.mxu1 %v15534_v21 }
0x14bb   : > { %9373 = vmatmul.mubr.msk.bf16.gmra.mrb[160].mxu1 %vm15805_vm9, %v8288_v2 }
0x14bc   : > { %8496 = vmatprep.mubr.bf16.mxu1 %v15534_v21 }
0x14c3   : > { %9374 = vmatmul.mubr.msk.bf16.gmra.mrb[164].mxu1 %vm15806_vm11, %v8289_v28 }
0x1542   : > { %v8428_v53 = vpop.f32.mrb[136].mxu1 }
0x1543   : > { %v8669_v21 = vadd.f32 %v15041_v19, %v8428_v53  ;;  %v8430_v61 = vpop.f32.mrb[137].mxu1  ;;  %v10500_v43 = vpop.f32.mrb[168].mxu0 }
0x1544   : > { %v8670_v31 = vadd.f32 %v15044_v15, %v8430_v61  ;;  %v8677_v3 = vadd.f32 %v10500_v43, %v15047_v45  ;;  %v8432_v1 = vpop.f32.mrb[138].mxu1  ;;  %v8541_v22 = vpop.f32.mrb[169].mxu0 }
0x1545   : > { %v8717_v63 = vadd.f32 %v11861_v14, %v8669_v21  ;;  %v8672_v49 = vadd.f32 %v15041_v19, %v8432_v1  ;;  %v8671_v39 = vadd.f32 %v15047_v45, %v8541_v22  ;;  %v8434_v44 = vpop.f32.mrb[139].mxu1  ;;  %v10501_v62 = vpop.f32.mrb[170].mxu0  ;;  %v11876_v21 = vld [vmem:[%s12420_s27 + $0x88] sm:$0xff]  ;;  %v11877_v14 = vld [vmem:[%s12420_s27 + $0x60] sm:$0xff] }
0x1546   : > { %v8718_v29 = vadd.f32 %v11862_v55, %v8670_v31  ;;  %v8725_v10 = vadd.f32 %v11863_v57, %v8677_v3  ;;  %v8673_v16 = vadd.f32 %v15044_v15, %v8434_v44  ;;  %v8680_v8 = vadd.f32 %v10501_v62, %v15047_v45  ;;  %v8544_v5 = vpop.f32.mrb[171].mxu0  ;;  %v11878_v44 = vld [vmem:[%s12420_s27 + $0x68] sm:$0xff] }
0x1547   : > { %8765 = vst [vmem:[%s15061_s18] sm:$0xff] %v8717_v63  ;;  %v8720_v48 = vadd.f32 %v11864_v54, %v8672_v49  ;;  %v8719_v40 = vadd.f32 %v11865_v42, %v8671_v39  ;;  %v8674_v20 = vadd.f32 %v15047_v45, %v8544_v5 }
0x1548   : > { %8766 = vst [vmem:[%s15061_s18 + $0x8] sm:$0xff] %v8718_v29  ;;  %8773 = vst [vmem:[%s15061_s18 + $0x40] sm:$0xff] %v8725_v10  ;;  %v8721_v37 = vadd.f32 %v11866_v46, %v8673_v16  ;;  %v8728_v38 = vadd.f32 %v11867_v60, %v8680_v8  ;;  %v11879_v29 = vld [vmem:[%s12420_s27 + $0x78] sm:$0xff]  ;;  %v11880_v10 = vld [vmem:[%s12420_s27 + $0x80] sm:$0xff] }
0x1549   : > { %8768 = vst [vmem:[%s15061_s18 + $0x18] sm:$0xff] %v8720_v48  ;;  %8767 = vst [vmem:[%s15061_s18 + $0x10] sm:$0xff] %v8719_v40  ;;  %v8722_v27 = vadd.f32 %v11868_v51, %v8674_v20  ;;  %v11881_v40 = vld [vmem:[%s12420_s27 + $0x90] sm:$0xff]  ;;  %v11882_v60 = vld [vmem:[%s12420_s27 + $0x98] sm:$0xff] }
0x154a   : > { %8769 = vst [vmem:[%s15061_s18 + $0x20] sm:$0xff] %v8721_v37  ;;  %8776 = vst [vmem:[%s15061_s18 + $0x58] sm:$0xff] %v8728_v38  ;;  %v8438_v41 = vpop.f32.mrb[140].mxu1 }
0x154b   : > { %8770 = vst [vmem:[%s15061_s18 + $0x28] sm:$0xff] %v8722_v27  ;;  %v8675_v6 = vadd.f32 %v15041_v19, %v8438_v41  ;;  %v8440_v23 = vpop.f32.mrb[141].mxu1  ;;  %v10504_v50 = vpop.f32.mrb[172].mxu0  ;;  %v11883_v27 = vld [vmem:[%s12420_s27 + $0xa8] sm:$0xff] }
0x154c   : > { %v8676_v0 = vadd.f32 %v15044_v15, %v8440_v23  ;;  %v8689_v26 = vadd.f32 %v10504_v50, %v15047_v45  ;;  %v8442_v25 = vpop.f32.mrb[142].mxu1  ;;  %v8557_v18 = vpop.f32.mrb[173].mxu0 }
0x154d   : > { %v8723_v11 = vadd.f32 %v11869_v59, %v8675_v6  ;;  %v8678_v36 = vadd.f32 %v15041_v19, %v8442_v25  ;;  %v8683_v9 = vadd.f32 %v15047_v45, %v8557_v18  ;;  %v8444_v7 = vpop.f32.mrb[143].mxu1  ;;  %v10505_v52 = vpop.f32.mrb[174].mxu0  ;;  %v11884_v6 = vld [vmem:[%s12420_s27 + $0xb0] sm:$0xff] }
0x154e   : > { %v8724_v24 = vadd.f32 %v11870_v32, %v8676_v0  ;;  %v8737_v17 = vadd.f32 %v11871_v34, %v8689_v26  ;;  %v8679_v30 = vadd.f32 %v15044_v15, %v8444_v7  ;;  %v8692_v58 = vadd.f32 %v10505_v52, %v15047_v45  ;;  %v8560_v47 = vpop.f32.mrb[175].mxu0 }
0x154f   : > { %8771 = vst [vmem:[%s15061_s18 + $0x30] sm:$0xff] %v8723_v11  ;;  %v8726_v28 = vadd.f32 %v11872_v56, %v8678_v36  ;;  %v8731_v2 = vadd.f32 %v11873_v12, %v8683_v9  ;;  %v8686_v13 = vadd.f32 %v15047_v45, %v8560_v47  ;;  %v11885_v9 = vld [vmem:[%s12420_s27 + $0xc0] sm:$0xff] }
0x1550   : > { %8772 = vst [vmem:[%s15061_s18 + $0x38] sm:$0xff] %v8724_v24  ;;  %8785 = vst [vmem:[%s15061_s18 + $0xa0] sm:$0xff] %v8737_v17  ;;  %v8727_v4 = vadd.f32 %v11874_v35, %v8679_v30  ;;  %v8740_v53 = vadd.f32 %v11875_v33, %v8692_v58  ;;  %v11886_v17 = vld [vmem:[%s12420_s27 + $0xc8] sm:$0xff]  ;;  %v11887_v58 = vld [vmem:[%s12420_s27 + $0x100] sm:$0xff] }
0x1551   : > { %8774 = vst [vmem:[%s15061_s18 + $0x48] sm:$0xff] %v8726_v28  ;;  %8779 = vst [vmem:[%s15061_s18 + $0x70] sm:$0xff] %v8731_v2  ;;  %v8734_v61 = vadd.f32 %v11876_v21, %v8686_v13  ;;  %v11888_v2 = vld [vmem:[%s12420_s27 + $0xd8] sm:$0xff]  ;;  %v11889_v35 = vld [vmem:[%s12420_s27 + $0xd0] sm:$0xff] }
0x1552   : > { %8775 = vst [vmem:[%s15061_s18 + $0x50] sm:$0xff] %v8727_v4  ;;  %8788 = vst [vmem:[%s15061_s18 + $0xb8] sm:$0xff] %v8740_v53  ;;  %v8448_v43 = vpop.f32.mrb[144].mxu1  ;;  %v11890_v53 = vld [vmem:[%s12420_s27 + $0xe0] sm:$0xff] }
0x1553   : > { %8782 = vst [vmem:[%s15061_s18 + $0x88] sm:$0xff] %v8734_v61  ;;  %v8681_v31 = vadd.f32 %v15041_v19, %v8448_v43  ;;  %v8450_v3 = vpop.f32.mrb[145].mxu1  ;;  %v11891_v61 = vld [vmem:[%s12420_s27 + $0x118] sm:$0xff] }
0x1554   : > { %v8682_v1 = vadd.f32 %v15044_v15, %v8450_v3  ;;  %v8452_v22 = vpop.f32.mrb[146].mxu1 }
0x1555   : > { %v8729_v63 = vadd.f32 %v11877_v14, %v8681_v31  ;;  %v8684_v49 = vadd.f32 %v15041_v19, %v8452_v22  ;;  %v8454_v39 = vpop.f32.mrb[147].mxu1  ;;  %v11892_v31 = vld [vmem:[%s12420_s27 + $0xe8] sm:$0xff] }
0x1556   : > { %v8730_v62 = vadd.f32 %v11878_v44, %v8682_v1  ;;  %v8685_v55 = vadd.f32 %v15044_v15, %v8454_v39 }
0x1557   : > { %8777 = vst [vmem:[%s15061_s18 + $0x60] sm:$0xff] %v8729_v63  ;;  %v8732_v57 = vadd.f32 %v11879_v29, %v8684_v49 }
0x1558   : > { %8778 = vst [vmem:[%s15061_s18 + $0x68] sm:$0xff] %v8730_v62  ;;  %v8733_v16 = vadd.f32 %v11880_v10, %v8685_v55  ;;  %v11893_v55 = vld [vmem:[%s12420_s27 + $0xf0] sm:$0xff] }
0x1559   : > { %8780 = vst [vmem:[%s15061_s18 + $0x78] sm:$0xff] %v8732_v57 }
0x155a   : > { %8781 = vst [vmem:[%s15061_s18 + $0x80] sm:$0xff] %v8733_v16  ;;  %v8458_v8 = vpop.f32.mrb[148].mxu1 }
0x155b   : > { %v8687_v5 = vadd.f32 %v15041_v19, %v8458_v8  ;;  %v8460_v54 = vpop.f32.mrb[149].mxu1 }
0x155c   : > { %v8688_v48 = vadd.f32 %v15044_v15, %v8460_v54  ;;  %v8462_v42 = vpop.f32.mrb[150].mxu1 }
0x155d   : > { %v8735_v20 = vadd.f32 %v11881_v40, %v8687_v5  ;;  %v8690_v46 = vadd.f32 %v15041_v19, %v8462_v42  ;;  %v8464_v37 = vpop.f32.mrb[151].mxu1  ;;  %v11894_v5 = vld [vmem:[%s12420_s27 + $0xf8] sm:$0xff] }
0x155e   : > { %v8736_v38 = vadd.f32 %v11882_v60, %v8688_v48  ;;  %v8691_v51 = vadd.f32 %v15044_v15, %v8464_v37  ;;  %v11895_v48 = vld [vmem:[%s12420_s27 + $0x160] sm:$0xff]  ;;  %v11896_v37 = vld [vmem:[%s12420_s27 + $0x108] sm:$0xff] }
0x155f   : > { %8783 = vst [vmem:[%s15061_s18 + $0x90] sm:$0xff] %v8735_v20  ;;  %v8738_v41 = vadd.f32 %v11883_v27, %v8690_v46 }
0x1560   : > { %8784 = vst [vmem:[%s15061_s18 + $0x98] sm:$0xff] %v8736_v38  ;;  %v8739_v23 = vadd.f32 %v11884_v6, %v8691_v51  ;;  %v11897_v38 = vld [vmem:[%s12420_s27 + $0x130] sm:$0xff] }
0x1561   : > { %8786 = vst [vmem:[%s15061_s18 + $0xa8] sm:$0xff] %v8738_v41  ;;  %v11898_v41 = vld [vmem:[%s12420_s27 + $0x110] sm:$0xff] }
0x1562   : > { %8787 = vst [vmem:[%s15061_s18 + $0xb0] sm:$0xff] %v8739_v23  ;;  %v11899_v23 = vld [vmem:[%s12420_s27 + $0x178] sm:$0xff] }
0x157e   : > { %v8468_v50 = vpop.f32.mrb[152].mxu1 }
0x157f   : > { %v8693_v0 = vadd.f32 %v15041_v19, %v8468_v50  ;;  %v8470_v26 = vpop.f32.mrb[153].mxu1  ;;  %v10508_v25 = vpop.f32.mrb[176].mxu0 }
0x1580   : > { %v8694_v18 = vadd.f32 %v15044_v15, %v8470_v26  ;;  %v8701_v59 = vadd.f32 %v10508_v25, %v15047_v45  ;;  %v8472_v11 = vpop.f32.mrb[154].mxu1  ;;  %v8573_v36 = vpop.f32.mrb[177].mxu0 }
0x1581   : > { %v8741_v7 = vadd.f32 %v11885_v9, %v8693_v0  ;;  %v8696_v52 = vadd.f32 %v15041_v19, %v8472_v11  ;;  %v8695_v32 = vadd.f32 %v15047_v45, %v8573_v36  ;;  %v8474_v24 = vpop.f32.mrb[155].mxu1  ;;  %v10509_v34 = vpop.f32.mrb[178].mxu0  ;;  %v11900_v0 = vld [vmem:[%s12420_s27 + $0x148] sm:$0xff]  ;;  %v11901_v36 = vld [vmem:[%s12420_s27 + $0x120] sm:$0xff] }
0x1582   : > { %v8742_v30 = vadd.f32 %v11886_v17, %v8694_v18  ;;  %v8749_v47 = vadd.f32 %v11887_v58, %v8701_v59  ;;  %v8697_v56 = vadd.f32 %v15044_v15, %v8474_v24  ;;  %v8704_v28 = vadd.f32 %v10509_v34, %v15047_v45  ;;  %v8576_v12 = vpop.f32.mrb[179].mxu0  ;;  %v11903_v17 = vld [vmem:[%s12420_s27 + $0x138] sm:$0xff]  ;;  %v11904_v58 = vld [vmem:[%s12420_s27 + $0x140] sm:$0xff] }
0x1583   : > { %8789 = vst [vmem:[%s15061_s18 + $0xc0] sm:$0xff] %v8741_v7  ;;  %v8744_v13 = vadd.f32 %v11888_v2, %v8696_v52  ;;  %v8743_v4 = vadd.f32 %v11889_v35, %v8695_v32  ;;  %v8698_v33 = vadd.f32 %v15047_v45, %v8576_v12  ;;  %v11902_v32 = vld [vmem:[%s12420_s27 + $0x128] sm:$0xff]  ;;  %v11905_v35 = vld [vmem:[%s12420_s27 + $0x150] sm:$0xff] }
0x1584   : > { %8790 = vst [vmem:[%s15061_s18 + $0xc8] sm:$0xff] %v8742_v30  ;;  %8797 = vst [vmem:[%s15061_s18 + $0x100] sm:$0xff] %v8749_v47  ;;  %v8745_v21 = vadd.f32 %v11890_v53, %v8697_v56  ;;  %v8752_v43 = vadd.f32 %v11891_v61, %v8704_v28 }
0x1585   : > { %8792 = vst [vmem:[%s15061_s18 + $0xd8] sm:$0xff] %v8744_v13  ;;  %8791 = vst [vmem:[%s15061_s18 + $0xd0] sm:$0xff] %v8743_v4  ;;  %v8746_v3 = vadd.f32 %v11892_v31, %v8698_v33  ;;  %v11907_v31 = vld [vmem:[%s12420_s27 + $0x168] sm:$0xff] }
0x1586   : > { %8793 = vst [vmem:[%s15061_s18 + $0xe0] sm:$0xff] %v8745_v21  ;;  %8800 = vst [vmem:[%s15061_s18 + $0x118] sm:$0xff] %v8752_v43  ;;  %v8478_v1 = vpop.f32.mrb[156].mxu1  ;;  %v11906_v21 = vld [vmem:[%s12420_s27 + $0x158] sm:$0xff] }
0x1587   : > { %8794 = vst [vmem:[%s15061_s18 + $0xe8] sm:$0xff] %v8746_v3  ;;  %v8699_v22 = vadd.f32 %v15041_v19, %v8478_v1  ;;  %v8480_v14 = vpop.f32.mrb[157].mxu1  ;;  %v10512_v63 = vpop.f32.mrb[180].mxu0  ;;  %v11908_v1 = vld [vmem:[%s12420_s27 + $0x170] sm:$0xff] }
0x1588   : > { %v8700_v49 = vadd.f32 %v15044_v15, %v8480_v14  ;;  %v8713_v39 = vadd.f32 %v10512_v63, %v15047_v45  ;;  %v8482_v44 = vpop.f32.mrb[158].mxu1  ;;  %v8589_v62 = vpop.f32.mrb[181].mxu0 }
0x1589   : > { %v8747_v29 = vadd.f32 %v11893_v55, %v8699_v22  ;;  %v8702_v57 = vadd.f32 %v15041_v19, %v8482_v44  ;;  %v8707_v10 = vadd.f32 %v15047_v45, %v8589_v62  ;;  %v8484_v16 = vpop.f32.mrb[159].mxu1  ;;  %v10513_v8 = vpop.f32.mrb[182].mxu0 }
0x158a   : > { %v8748_v54 = vadd.f32 %v11894_v5, %v8700_v49  ;;  %v8761_v42 = vadd.f32 %v11895_v48, %v8713_v39  ;;  %v8703_v40 = vadd.f32 %v15044_v15, %v8484_v16  ;;  %v8716_v20 = vadd.f32 %v10513_v8, %v15047_v45  ;;  %v8592_v46 = vpop.f32.mrb[183].mxu0 }
0x158b   : > { %8795 = vst [vmem:[%s15061_s18 + $0xf0] sm:$0xff] %v8747_v29  ;;  %v8750_v60 = vadd.f32 %v11896_v37, %v8702_v57  ;;  %v8755_v51 = vadd.f32 %v11897_v38, %v8707_v10  ;;  %v8710_v27 = vadd.f32 %v15047_v45, %v8592_v46 }
0x158c   : > { %8796 = vst [vmem:[%s15061_s18 + $0xf8] sm:$0xff] %v8748_v54  ;;  %8809 = vst [vmem:[%s15061_s18 + $0x160] sm:$0xff] %v8761_v42  ;;  %v8751_v6 = vadd.f32 %v11898_v41, %v8703_v40  ;;  %v8764_v50 = vadd.f32 %v11899_v23, %v8716_v20 }
0x158d   : > { %8798 = vst [vmem:[%s15061_s18 + $0x108] sm:$0xff] %v8750_v60  ;;  %8803 = vst [vmem:[%s15061_s18 + $0x130] sm:$0xff] %v8755_v51  ;;  %v8758_v26 = vadd.f32 %v11900_v0, %v8710_v27 }
0x158e   : > { %8799 = vst [vmem:[%s15061_s18 + $0x110] sm:$0xff] %v8751_v6  ;;  %8812 = vst [vmem:[%s15061_s18 + $0x178] sm:$0xff] %v8764_v50  ;;  %v8488_v25 = vpop.f32.mrb[160].mxu1 }
0x158f   : > { %8806 = vst [vmem:[%s15061_s18 + $0x148] sm:$0xff] %v8758_v26  ;;  %v8705_v45 = vadd.f32 %v15041_v19, %v8488_v25  ;;  %v8490_v18 = vpop.f32.mrb[161].mxu1 }
0x1590   : > { %v8706_v59 = vadd.f32 %v15044_v15, %v8490_v18  ;;  %v8492_v11 = vpop.f32.mrb[162].mxu1 }
0x1591   : > { %v8753_v9 = vadd.f32 %v11901_v36, %v8705_v45  ;;  %v8708_v7 = vadd.f32 %v15041_v19, %v8492_v11  ;;  %v8494_v52 = vpop.f32.mrb[163].mxu1 }
0x1592   : > { %v8754_v24 = vadd.f32 %v11902_v32, %v8706_v59  ;;  %v8709_v34 = vadd.f32 %v15044_v15, %v8494_v52 }
0x1593   : > { %8801 = vst [vmem:[%s15061_s18 + $0x120] sm:$0xff] %v8753_v9  ;;  %v8756_v30 = vadd.f32 %v11903_v17, %v8708_v7 }
0x1594   : > { %8802 = vst [vmem:[%s15061_s18 + $0x128] sm:$0xff] %v8754_v24  ;;  %v8757_v47 = vadd.f32 %v11904_v58, %v8709_v34 }
0x1595   : > { %8804 = vst [vmem:[%s15061_s18 + $0x138] sm:$0xff] %v8756_v30 }
0x1596   : > { %8805 = vst [vmem:[%s15061_s18 + $0x140] sm:$0xff] %v8757_v47  ;;  %v8498_v56 = vpop.f32.mrb[164].mxu1 }
0x1597   : > { %v8711_v28 = vadd.f32 %v15041_v19, %v8498_v56  ;;  %v8500_v12 = vpop.f32.mrb[165].mxu1 }
0x1598   : > { %v8712_v2 = vadd.f32 %v15044_v15, %v8500_v12  ;;  %v8502_v13 = vpop.f32.mrb[166].mxu1 }
0x1599   : > { %v8759_v4 = vadd.f32 %v11905_v35, %v8711_v28  ;;  %v8714_v33 = vadd.f32 %v15041_v19, %v8502_v13  ;;  %v8504_v53 = vpop.f32.mrb[167].mxu1 }
0x159a   : > { %v8760_v61 = vadd.f32 %v11906_v21, %v8712_v2  ;;  %v8715_v43 = vadd.f32 %v15044_v15, %v8504_v53 }
0x159b   : > { %8807 = vst [vmem:[%s15061_s18 + $0x150] sm:$0xff] %v8759_v4  ;;  %v8762_v3 = vadd.f32 %v11907_v31, %v8714_v33 }
0x159c   : > { %8808 = vst [vmem:[%s15061_s18 + $0x158] sm:$0xff] %v8760_v61  ;;  %v8763_v22 = vadd.f32 %v11908_v1, %v8715_v43 }
0x159d   : > { %8810 = vst [vmem:[%s15061_s18 + $0x168] sm:$0xff] %v8762_v3 }
0x159e   : > { %8811 = vst [vmem:[%s15061_s18 + $0x170] sm:$0xff] %v8763_v22 }
0x159f   : > { %12064 = shalt.err (!%p12061_p13)
}
0x15a0   : > { %s12065_s27 = scalar_lea.hbm %s15198_s0, 6144  ;;  %s12069_s13 = scalar_lea.hbm %s15257_s9, 12288 }
0x15a1   : > { %p12066_p9 = scmp.ne.s32.totalorder %s15198_s0, %s12065_s27  ;;  %p12070_p4 = scmp.lt.u32.totalorder %s15198_s0, %s15257_s9 }
0x15a2   : > { %p12071_p8 = scmp.lt.u32.totalorder %s12069_s13, %s12065_s27  ;;  %p12073_p3 = scmp.lt.u32.totalorder %s12065_s27, %s15198_s0 }
0x15a3   : > { %p12067_p0 = pnand %p12066_p9, %p12362_p10 }
0x15a4   : > { %p12072_p6 = por %p12071_p8, %p12070_p4 }
0x15a5   : > { %p12068_p11 = pneg %p12067_p0 }
0x15a6   : > { %p12074_p5 = por %p12073_p3, %p12072_p6 }
0x15a8   : > { %p12075_p7 = pnand %p12074_p5, %p12068_p11 }
0x15aa   : > { %12078 = shalt.err (!%p12075_p7)
}
0x15ab   : > { %s12139_s12 = smov 384   ;;  %s12140_s15 = smov 24  }
0x15ac   : > { %10936 = dma.vmem_to_hbm [thread:$0]  (%p12362_p10), %s15202_s29, 6144, %s15198_s0, %s8814_s17, %s12139_s12, %s12139_s12, %s12140_s15  }
0x15ad PF: > { %s15810_s14 = sld [smem:[#allocation18_spill]]  ;;  %s15811_s16 = sld [smem:[#allocation19_spill]] }
0x15ae   : > { %p15813_p1 = scmp.ge.s32.totalorder %s12125_s11, 2 }
0x15b3   : > { %s8842_s24 = sand.u32 1, %s15810_s14   ;;  %p15812_p12 = scmp.ne.s32.totalorder %s15811_s16, 0 }
0x15b4   : > { %s8843_s20 = scalar_lea.sflag [#allocation6], %s8842_s24 }
0x15b5   : > { %p10956_p2 = pnand %p15813_p1, %p15812_p12 }
0x15b7   : > { %12108 = dma.done.wait (!%p10956_p2), %s8843_s20, 6144  }
0x15b8   : > { %12110 = vsyncadd (!%p10956_p2), %s8843_s20, 4294961152  ;;  %p25_p13 = scmp.ge.s32.totalorder %s12352_s28, 4   ;;  %s15814_s29 = smov %s12117_s30 }
0x15b9   : > { %s15815_s30 = smov %s12121_s10  ;;  %s15816_s10 = smov %s12368_s26 }
0x15ba   : > { %s15817_s11 = smov %s12352_s28  ;;  %27 = sbr.rel (!%p25_p13) target bundleno = 7 (0x7), region = 113 }
0x15c1   :  { %8848 = vsyncpa [#allocation5], 1 }
0x15c2   :  { %8850 = vsyncpa [#allocation5 + $0x1], 1 }
0x15c3   :  { %8851 = vsyncpa [#allocation8], 1 }
0x15c4   :  { %8852 = vsyncpa [#allocation11], 1 }
0x15c5   :  { %8853 = vsyncpa [#allocation6], 1 }
0x15c6   :  { %8855 = vsyncpa [#allocation6 + $0x1], 1 }

</bundles_post_ra>
